<compile_context>
chip_gen: v7x
topology: tpu7x:2x2x1
jax: 0.10.0
libtpu: 0.0.40
codegen_flags: <defaults>
</compile_context>

<pallas_src>
import functools
import re

import jax
import jax.numpy as jnp
from jax.experimental import pallas as pl
from jax.experimental.pallas import tpu as pltpu

HIDDEN = 128            # hidden_size in the PyTorch script
STATIC_FEATURES = 2     # static_features in the PyTorch script
NEG_INF = float("-inf")


def _round_up(n, m):
    return (n + m - 1) // m * m


def _tpu_generation():
    """(generation, tensorcores-per-device) from the runtime; defensive defaults."""
    try:
        kind = jax.devices()[0].device_kind.lower()
    except Exception:
        return 6, 1
    m = re.search(r"v(\d+)", kind)
    gen = int(m.group(1)) if m else 6
    return gen, (2 if gen >= 7 else 1)


def _argmax_last(x, lane_idx):
    """First-occurrence argmax along the last axis (iota passed in, not rebuilt)."""
    m = jnp.max(x, axis=-1, keepdims=True)
    cand = jnp.where(x == m, lane_idx, jnp.iinfo(jnp.int32).max)
    return jnp.min(cand, axis=-1)


def _gru_step_fused(inp, h, wg, bg):
    """PyTorch GRU step with one fused (2H, 4H) matmul (v6e/v7x: K=256 is one pass).

    wg columns: [r | z | gx_n (x path) | gh_n (h path)];
    bg = [bir+bhr | biz+bhz | bin | bhn]  (kept f32).
    """
    H = HIDDEN
    xh = jnp.concatenate([inp, h], axis=-1)                          # (Bt, 2H) f32
    g = jnp.dot(xh.astype(wg.dtype), wg,
                preferred_element_type=jnp.float32) + bg             # (Bt, 4H) f32
    r = jax.nn.sigmoid(g[:, 0:H])
    z = jax.nn.sigmoid(g[:, H:2 * H])
    n = jnp.tanh(g[:, 2 * H:3 * H] + r * g[:, 3 * H:4 * H])
    return (1.0 - z) * n + z * h


def _gru_step_split(inp, h, wih, whh, bih, bhh):
    """PyTorch GRU step with two K=128 matmuls (v5e: no 2-pass K, no zero blocks)."""
    H = HIDDEN
    gi = jnp.dot(inp.astype(wih.dtype), wih,
                 preferred_element_type=jnp.float32) + bih           # (Bt, 3H) f32
    gh = jnp.dot(h.astype(whh.dtype), whh,
                 preferred_element_type=jnp.float32) + bhh           # (Bt, 3H) f32
    r = jax.nn.sigmoid(gi[:, 0:H] + gh[:, 0:H])
    z = jax.nn.sigmoid(gi[:, H:2 * H] + gh[:, H:2 * H])
    n = jnp.tanh(gi[:, 2 * H:3 * H] + r * gh[:, 2 * H:3 * H])
    return (1.0 - z) * n + z * h


def _make_kernel(fuse_gates):
    def kernel(*refs):
        x_ref = refs[0]            # (S, Bt, 2) time-major coords
        out_ref = refs[-1]         # (Bt, W) packed: tours in [0,S), logp in [S,2S)
        p = [r[...] for r in refs[1:-1]]
        if fuse_gates:
            (we_e, be_e, wg_e, bg_e,
             we_d, be_d, wg_d, bg_d, wout, bout) = p
            enc_step = lambda i_, h_: _gru_step_fused(i_, h_, wg_e, bg_e)
            dec_step = lambda i_, h_: _gru_step_fused(i_, h_, wg_d, bg_d)
        else:
            (we_e, be_e, wih_e, whh_e, bih_e, bhh_e,
             we_d, be_d, wih_d, whh_d, bih_d, bhh_d, wout, bout) = p
            enc_step = lambda i_, h_: _gru_step_split(i_, h_, wih_e, whh_e, bih_e, bhh_e)
            dec_step = lambda i_, h_: _gru_step_split(i_, h_, wih_d, whh_d, bih_d, bhh_d)

        x = x_ref[...]                     # (S, Bt, 2) f32
        S, Bt, _ = x.shape
        H = HIDDEN
        W = out_ref.shape[-1]

        # ---------------- Encoder: Linear(2->H) + GRU, h0 = 0 --------------------
        # Embedding hoisted out of the recurrence; time-major so emb_all[t] is a
        # contiguous (Bt, H) view (no per-step cross-sublane gather).
        emb_all = (x[:, :, 0:1] * we_e[0:1, :][None]
                   + x[:, :, 1:2] * we_e[1:2, :][None]
                   + be_e[None])                                     # (S, Bt, H) f32
        h = jnp.zeros((Bt, H), jnp.float32)
        for t in range(S):       # trace-time unrolled; fine for small S
            h = enc_step(emb_all[t], h)
        # `h` is encoder_hidden; encoder_outputs are never consumed downstream.

        # ---------------- Decoder: greedy decoding (targets=None) ----------------
        lane_s = jax.lax.broadcasted_iota(jnp.int32, (Bt, S), 1)    # hoisted iotas
        lane_w = jax.lax.broadcasted_iota(jnp.int32, (Bt, W), 1)
        dec_in = jnp.ones((Bt, 1), jnp.float32)
        mask = jnp.zeros((Bt, S), jnp.float32)
        packed = jnp.zeros((Bt, W), jnp.float32)
        prev_chosen = None

        for i in range(S):
            # forward_step: Linear(1->H), ReLU, GRU step, Linear(H->S)
            emb = jnp.maximum(dec_in * we_d + be_d, 0.0)             # (Bt, H)
            h = dec_step(emb, h)
            logits = jnp.dot(h.astype(wout.dtype), wout,
                             preferred_element_type=jnp.float32) + bout  # (Bt, S)

            # torch takes topk(1) on decoder_output BEFORE apply_mask_to_logits
            # mutates it in place, so the next decoder input uses *unmasked* logits.
            next_in = _argmax_last(logits, lane_s).astype(jnp.float32)[:, None]

            # apply_mask_to_logits — torch mutates decoder_output in place, so the
            # masked logits are also what feeds log_softmax below.
            if i == 0:
                # step 0: logits[:, :] = -inf ; logits[:, :, 0] = 1 ; mask unchanged
                masked = jnp.where(lane_s == 0, jnp.float32(1.0), jnp.float32(NEG_INF))
            else:
                mask = jnp.where(lane_s == prev_chosen[:, None], 1.0, mask)
                masked = jnp.where(mask > 0.5, jnp.float32(NEG_INF), logits)

            chosen = _argmax_last(masked, lane_s)                    # (Bt,) int32

            m = jnp.max(masked, axis=-1, keepdims=True)
            lse = jnp.log(jnp.sum(jnp.exp(masked - m), axis=-1, keepdims=True)) + m
            log_probs = masked - lse                                 # (Bt, S)
            logp = jnp.sum(
                jnp.where(lane_s == chosen[:, None], log_probs, 0.0), axis=-1)

            # lane-dense packed writeback slab (no masked partial stores at S=8)
            packed = jnp.where(lane_w == i,
                               chosen.astype(jnp.float32)[:, None], packed)
            packed = jnp.where(lane_w == S + i, logp[:, None], packed)

            prev_chosen = chosen
            dec_in = next_in

        out_ref[...] = packed
    return kernel


def _fuse_gru(wih, whh, bih, bhh, matmul_dtype):
    """Fused (2H, 4H) GRU weight + (1, 4H) bias for _gru_step_fused."""
    H = HIDDEN
    zeros = jnp.zeros((H, H), jnp.float32)
    top = jnp.concatenate([wih[:, :2 * H], wih[:, 2 * H:], zeros], axis=1)  # (H, 4H)
    bot = jnp.concatenate([whh[:, :2 * H], zeros, whh[:, 2 * H:]], axis=1)  # (H, 4H)
    wg = jnp.concatenate([top, bot], axis=0).astype(matmul_dtype)           # (2H, 4H)
    bg = jnp.concatenate([bih[:, :2 * H] + bhh[:, :2 * H],
                          bih[:, 2 * H:], bhh[:, 2 * H:]], axis=1)          # (1, 4H) f32
    return wg, bg


@functools.partial(jax.jit, static_argnames=("matmul_dtype", "gen", "num_tc"))
def _forward(x, params, *, matmul_dtype, gen, num_tc):
    B, S, _ = x.shape

    # Per-generation batch tiling:
    #  - v5e/v6e (single TC): one tile holding the whole padded batch, up to the
    #    MXU height (128 on v5e, 256 on v6e+) — never split a sequential grid.
    #  - v7x (2 TCs): >= 2 tiles so the "parallel" batch axis shards across cores.
    cap = 128 if gen <= 5 else 256
    Bp8 = _round_up(B, 8)
    if num_tc >= 2:
        bt = min(cap, max(8, _round_up(pl.cdiv(B, num_tc), 8)))
    else:
        bt = min(cap, Bp8)
    Bp = _round_up(B, bt)
    if Bp != B:
        x = jnp.pad(x, ((0, Bp - B), (0, 0), (0, 0)))
    x_tm = jnp.transpose(x, (1, 0, 2))                 # (S, Bp, 2) time-major

    # MXU operands cast to matmul_dtype (bf16 default); biases/gate math stay f32.
    fuse_gates = gen >= 6   # K=256 fused layout is a single MXU pass only on v6e/v7x
    if fuse_gates:
        wg_e, bg_e = _fuse_gru(params["wih_e"], params["whh_e"],
                               params["bih_e"], params["bhh_e"], matmul_dtype)
        wg_d, bg_d = _fuse_gru(params["wih_d"], params["whh_d"],
                               params["bih_d"], params["bhh_d"], matmul_dtype)
        plist = [params["we_e"], params["be_e"], wg_e, bg_e,
                 params["we_d"], params["be_d"], wg_d, bg_d,
                 params["wout"].astype(matmul_dtype), params["bout"]]
    else:
        plist = [params["we_e"], params["be_e"],
                 params["wih_e"].astype(matmul_dtype),
                 params["whh_e"].astype(matmul_dtype),
                 params["bih_e"], params["bhh_e"],
                 params["we_d"], params["be_d"],
                 params["wih_d"].astype(matmul_dtype),
                 params["whh_d"].astype(matmul_dtype),
                 params["bih_d"], params["bhh_d"],
                 params["wout"].astype(matmul_dtype), params["bout"]]

    W = max(128, _round_up(2 * S, 128))                # lane-dense packed output width

    def weight_spec(arr):
        nd = arr.ndim
        return pl.BlockSpec(arr.shape, lambda b, nd=nd: (0,) * nd)

    in_specs = [pl.BlockSpec((S, bt, STATIC_FEATURES), lambda b: (0, b, 0))]
    in_specs += [weight_spec(a) for a in plist]

    # Rough resident working-set; only raise the scoped VMEM limit when a large
    # S x bt embedding would press on the default (matters on v7x's 64 MiB part).
    est = (sum(int(a.size) * a.dtype.itemsize for a in plist)
           + 4 * S * bt * HIDDEN
           + 2 * (4 * S * bt * STATIC_FEATURES + 4 * bt * W))
    vmem_limit = None
    if est > 24 * 1024 * 1024:
        vmem_limit = min(2 * est, (48 if gen >= 7 else 96) * 1024 * 1024)

    packed = pl.pallas_call(
        _make_kernel(fuse_gates),
        grid=(Bp // bt,),
        out_shape=jax.ShapeDtypeStruct((Bp, W), jnp.float32),
        in_specs=in_specs,
        out_specs=pl.BlockSpec((bt, W), lambda b: (b, 0)),
        compiler_params=pltpu.CompilerParams(
            dimension_semantics=("parallel",),
            vmem_limit_bytes=vmem_limit),
    )(x_tm, *plist)

    tours = packed[:B, :S][:, None, :]        # (B, 1, S) float (torch returns floats)
    tour_logp = packed[:B, S:2 * S]           # (B, S)
    return tours, tour_logp


def classic_seq2seq_tsp(x, params, matmul_dtype=jnp.bfloat16):
    """Greedy (targets=None) forward of ClassicSeq2SeqTSPModel."""
    gen, num_tc = _tpu_generation()
    return _forward(x, params, matmul_dtype=matmul_dtype, gen=gen, num_tc=num_tc)


def make_params(key, seq_len):
    """Deterministic synthetic parameters (PyTorch-style uniform(-1/sqrt(fan_in)))."""
    H = HIDDEN
    ks = jax.random.split(key, 14)

    def u(k, shape, fan_in):
        bound = 1.0 / (fan_in ** 0.5)
        return jax.random.uniform(k, shape, jnp.float32, -bound, bound)

    return {
        # Encoder
        "we_e": u(ks[0], (STATIC_FEATURES, H), STATIC_FEATURES),
        "be_e": u(ks[1], (1, H), STATIC_FEATURES),
        "wih_e": u(ks[2], (H, 3 * H), H),
        "whh_e": u(ks[3], (H, 3 * H), H),
        "bih_e": u(ks[4], (1, 3 * H), H),
        "bhh_e": u(ks[5], (1, 3 * H), H),
        # Decoder
        "we_d": u(ks[6], (1, H), 1),
        "be_d": u(ks[7], (1, H), 1),
        "wih_d": u(ks[8], (H, 3 * H), H),
        "whh_d": u(ks[9], (H, 3 * H), H),
        "bih_d": u(ks[10], (1, 3 * H), H),
        "bhh_d": u(ks[11], (1, 3 * H), H),
        "wout": u(ks[12], (H, seq_len), H),
        "bout": u(ks[13], (1, seq_len), H),
    }


if __name__ == "__main__":
    # B=8 fills a full vreg sublane group; S=8 city (x, y) coordinates.
    B, S = 8, 8
    key = jax.random.PRNGKey(0)
    kx, kp = jax.random.split(key)
    x = jax.random.uniform(kx, (B, S, STATIC_FEATURES), jnp.float32)
    params = make_params(kp, S)

    tours, tour_logp = classic_seq2seq_tsp(x, params)
    jax.block_until_ready((tours, tour_logp))

    assert tours.shape == (B, 1, S) and tour_logp.shape == (B, S)
    # each decoded tour must be a permutation of 0..S-1 (masking guarantees it)
    sorted_tours = jnp.sort(tours[:, 0, :], axis=-1)
    assert bool(jnp.all(sorted_tours == jnp.arange(S, dtype=jnp.float32)[None, :]))
    assert bool(jnp.all(jnp.isfinite(tour_logp)))

    print("KERNEL_OK")
</pallas_src>

<mosaic_0001>
module attributes {stable_mosaic.version = 11 : i64} {
  func.func @kernel(%arg0: i32, %arg1: memref<8x8x2xf32, #tpu.memory_space<vmem>>, %arg2: memref<2x128xf32, #tpu.memory_space<vmem>>, %arg3: memref<1x128xf32, #tpu.memory_space<vmem>>, %arg4: memref<256x512xbf16, #tpu.memory_space<vmem>>, %arg5: memref<1x512xf32, #tpu.memory_space<vmem>>, %arg6: memref<1x128xf32, #tpu.memory_space<vmem>>, %arg7: memref<1x128xf32, #tpu.memory_space<vmem>>, %arg8: memref<256x512xbf16, #tpu.memory_space<vmem>>, %arg9: memref<1x512xf32, #tpu.memory_space<vmem>>, %arg10: memref<128x8xbf16, #tpu.memory_space<vmem>>, %arg11: memref<1x8xf32, #tpu.memory_space<vmem>>, %arg12: memref<8x128xf32, #tpu.memory_space<vmem>>) attributes {dimension_semantics = [#tpu.dimension_semantics<parallel>], iteration_bounds = array<i64: 1>, scalar_prefetch = 0 : i64, scratch_operands = 0 : i64, tpu.core_type = #tpu.core_type<tc>, window_params = [{transform_indices = @transform_0, window_bounds = array<i64: 8, 8, 2>}, {pipeline_mode = #tpu.pipeline_mode<synchronous>, transform_indices = @transform_1, window_bounds = array<i64: 2, 128>}, {pipeline_mode = #tpu.pipeline_mode<synchronous>, transform_indices = @transform_2, window_bounds = array<i64: 1, 128>}, {pipeline_mode = #tpu.pipeline_mode<synchronous>, transform_indices = @transform_3, window_bounds = array<i64: 256, 512>}, {pipeline_mode = #tpu.pipeline_mode<synchronous>, transform_indices = @transform_4, window_bounds = array<i64: 1, 512>}, {pipeline_mode = #tpu.pipeline_mode<synchronous>, transform_indices = @transform_5, window_bounds = array<i64: 1, 128>}, {pipeline_mode = #tpu.pipeline_mode<synchronous>, transform_indices = @transform_6, window_bounds = array<i64: 1, 128>}, {pipeline_mode = #tpu.pipeline_mode<synchronous>, transform_indices = @transform_7, window_bounds = array<i64: 256, 512>}, {pipeline_mode = #tpu.pipeline_mode<synchronous>, transform_indices = @transform_8, window_bounds = array<i64: 1, 512>}, {pipeline_mode = #tpu.pipeline_mode<synchronous>, transform_indices = @transform_9, window_bounds = array<i64: 128, 8>}, {pipeline_mode = #tpu.pipeline_mode<synchronous>, transform_indices = @transform_10, window_bounds = array<i64: 1, 8>}, {transform_indices = @transform_11, window_bounds = array<i64: 8, 128>}]} {
    %c0 = arith.constant 0 : index
    %c0_0 = arith.constant 0 : index
    %0 = vector.load %arg2[%c0, %c0_0] : memref<2x128xf32, #tpu.memory_space<vmem>>, vector<2x128xf32>
    %c0_1 = arith.constant 0 : index
    %c0_2 = arith.constant 0 : index
    %1 = vector.load %arg3[%c0_1, %c0_2] : memref<1x128xf32, #tpu.memory_space<vmem>>, vector<1x128xf32>
    %c0_3 = arith.constant 0 : index
    %c0_4 = arith.constant 0 : index
    %2 = vector.load %arg4[%c0_3, %c0_4] : memref<256x512xbf16, #tpu.memory_space<vmem>>, vector<256x512xbf16>
    %c0_5 = arith.constant 0 : index
    %c0_6 = arith.constant 0 : index
    %3 = vector.load %arg5[%c0_5, %c0_6] : memref<1x512xf32, #tpu.memory_space<vmem>>, vector<1x512xf32>
    %c0_7 = arith.constant 0 : index
    %c0_8 = arith.constant 0 : index
    %4 = vector.load %arg6[%c0_7, %c0_8] : memref<1x128xf32, #tpu.memory_space<vmem>>, vector<1x128xf32>
    %c0_9 = arith.constant 0 : index
    %c0_10 = arith.constant 0 : index
    %5 = vector.load %arg7[%c0_9, %c0_10] : memref<1x128xf32, #tpu.memory_space<vmem>>, vector<1x128xf32>
    %c0_11 = arith.constant 0 : index
    %c0_12 = arith.constant 0 : index
    %6 = vector.load %arg8[%c0_11, %c0_12] : memref<256x512xbf16, #tpu.memory_space<vmem>>, vector<256x512xbf16>
    %c0_13 = arith.constant 0 : index
    %c0_14 = arith.constant 0 : index
    %7 = vector.load %arg9[%c0_13, %c0_14] : memref<1x512xf32, #tpu.memory_space<vmem>>, vector<1x512xf32>
    %c0_15 = arith.constant 0 : index
    %c0_16 = arith.constant 0 : index
    %8 = vector.load %arg10[%c0_15, %c0_16] : memref<128x8xbf16, #tpu.memory_space<vmem>>, vector<128x8xbf16>
    %c0_17 = arith.constant 0 : index
    %c0_18 = arith.constant 0 : index
    %9 = vector.load %arg11[%c0_17, %c0_18] : memref<1x8xf32, #tpu.memory_space<vmem>>, vector<1x8xf32>
    %c0_19 = arith.constant 0 : index
    %c0_20 = arith.constant 0 : index
    %c0_21 = arith.constant 0 : index
    %10 = vector.load %arg1[%c0_19, %c0_20, %c0_21] : memref<8x8x2xf32, #tpu.memory_space<vmem>>, vector<8x8x2xf32>
    %11 = vector.extract_strided_slice %10 {offsets = [0, 0, 0], sizes = [8, 8, 1], strides = [1, 1, 1]} : vector<8x8x2xf32> to vector<8x8x1xf32>
    %12 = vector.extract_strided_slice %0 {offsets = [0, 0], sizes = [1, 128], strides = [1, 1]} : vector<2x128xf32> to vector<1x128xf32>
    %13 = vector.shape_cast %12 : vector<1x128xf32> to vector<1x1x128xf32>
    %14 = vector.broadcast %11 : vector<8x8x1xf32> to vector<8x8x128xf32>
    %15 = vector.broadcast %13 : vector<1x1x128xf32> to vector<8x8x128xf32>
    %16 = arith.mulf %14, %15 : vector<8x8x128xf32>
    %17 = vector.extract_strided_slice %10 {offsets = [0, 0, 1], sizes = [8, 8, 1], strides = [1, 1, 1]} : vector<8x8x2xf32> to vector<8x8x1xf32>
    %18 = vector.extract_strided_slice %0 {offsets = [1, 0], sizes = [1, 128], strides = [1, 1]} : vector<2x128xf32> to vector<1x128xf32>
    %19 = vector.shape_cast %18 : vector<1x128xf32> to vector<1x1x128xf32>
    %20 = vector.broadcast %17 : vector<8x8x1xf32> to vector<8x8x128xf32>
    %21 = vector.broadcast %19 : vector<1x1x128xf32> to vector<8x8x128xf32>
    %22 = arith.mulf %20, %21 : vector<8x8x128xf32>
    %23 = arith.addf %16, %22 : vector<8x8x128xf32>
    %24 = vector.shape_cast %1 : vector<1x128xf32> to vector<1x1x128xf32>
    %25 = vector.broadcast %24 : vector<1x1x128xf32> to vector<8x8x128xf32>
    %26 = arith.addf %23, %25 : vector<8x8x128xf32>
    %cst = arith.constant 0.000000e+00 : f32
    %27 = vector.broadcast %cst : f32 to vector<8x128xf32>
    %28 = vector.extract_strided_slice %26 {offsets = [0, 0, 0], sizes = [1, 8, 128], strides = [1, 1, 1]} : vector<8x8x128xf32> to vector<1x8x128xf32>
    %29 = vector.shape_cast %28 : vector<1x8x128xf32> to vector<8x128xf32>
    %30 = tpu.concatenate %29, %27 in 1 : vector<8x128xf32>, vector<8x128xf32> -> vector<8x256xf32>
    %31 = arith.truncf %30 : vector<8x256xf32> to vector<8x256xbf16>
    %cst_22 = arith.constant dense<0.000000e+00> : vector<8x512xf32>
    %32 = tpu.matmul %31, %2, %cst_22 {dimension_numbers = #tpu.dot_dimension_numbers<[1], [0], [0], [1], [0, 0, 1, 1], [], []>} : vector<8x256xbf16>, vector<256x512xbf16>, vector<8x512xf32> -> vector<8x512xf32>
    %33 = vector.broadcast %3 : vector<1x512xf32> to vector<8x512xf32>
    %34 = arith.addf %32, %33 : vector<8x512xf32>
    %35 = vector.extract_strided_slice %34 {offsets = [0, 0], sizes = [8, 128], strides = [1, 1]} : vector<8x512xf32> to vector<8x128xf32>
    %36 = arith.negf %35 : vector<8x128xf32>
    %37 = math.exp %36 : vector<8x128xf32>
    %cst_23 = arith.constant 1.000000e+00 : f32
    %38 = vector.broadcast %cst_23 : f32 to vector<8x128xf32>
    %39 = arith.addf %38, %37 : vector<8x128xf32>
    %40 = arith.divf %38, %39 : vector<8x128xf32>
    %41 = vector.extract_strided_slice %34 {offsets = [0, 128], sizes = [8, 128], strides = [1, 1]} : vector<8x512xf32> to vector<8x128xf32>
    %42 = arith.negf %41 : vector<8x128xf32>
    %43 = math.exp %42 : vector<8x128xf32>
    %cst_24 = arith.constant 1.000000e+00 : f32
    %44 = vector.broadcast %cst_24 : f32 to vector<8x128xf32>
    %45 = arith.addf %44, %43 : vector<8x128xf32>
    %46 = arith.divf %44, %45 : vector<8x128xf32>
    %47 = vector.extract_strided_slice %34 {offsets = [0, 256], sizes = [8, 128], strides = [1, 1]} : vector<8x512xf32> to vector<8x128xf32>
    %48 = vector.extract_strided_slice %34 {offsets = [0, 384], sizes = [8, 128], strides = [1, 1]} : vector<8x512xf32> to vector<8x128xf32>
    %49 = arith.mulf %40, %48 : vector<8x128xf32>
    %50 = arith.addf %47, %49 : vector<8x128xf32>
    %51 = math.tanh %50 : vector<8x128xf32>
    %cst_25 = arith.constant 1.000000e+00 : f32
    %52 = vector.broadcast %cst_25 : f32 to vector<8x128xf32>
    %53 = arith.subf %52, %46 : vector<8x128xf32>
    %54 = arith.mulf %53, %51 : vector<8x128xf32>
    %55 = arith.mulf %46, %27 : vector<8x128xf32>
    %56 = arith.addf %54, %55 : vector<8x128xf32>
    %57 = vector.extract_strided_slice %26 {offsets = [1, 0, 0], sizes = [1, 8, 128], strides = [1, 1, 1]} : vector<8x8x128xf32> to vector<1x8x128xf32>
    %58 = vector.shape_cast %57 : vector<1x8x128xf32> to vector<8x128xf32>
    %59 = tpu.concatenate %58, %56 in 1 : vector<8x128xf32>, vector<8x128xf32> -> vector<8x256xf32>
    %60 = arith.truncf %59 : vector<8x256xf32> to vector<8x256xbf16>
    %cst_26 = arith.constant dense<0.000000e+00> : vector<8x512xf32>
    %61 = tpu.matmul %60, %2, %cst_26 {dimension_numbers = #tpu.dot_dimension_numbers<[1], [0], [0], [1], [0, 0, 1, 1], [], []>} : vector<8x256xbf16>, vector<256x512xbf16>, vector<8x512xf32> -> vector<8x512xf32>
    %62 = vector.broadcast %3 : vector<1x512xf32> to vector<8x512xf32>
    %63 = arith.addf %61, %62 : vector<8x512xf32>
    %64 = vector.extract_strided_slice %63 {offsets = [0, 0], sizes = [8, 128], strides = [1, 1]} : vector<8x512xf32> to vector<8x128xf32>
    %65 = arith.negf %64 : vector<8x128xf32>
    %66 = math.exp %65 : vector<8x128xf32>
    %cst_27 = arith.constant 1.000000e+00 : f32
    %67 = vector.broadcast %cst_27 : f32 to vector<8x128xf32>
    %68 = arith.addf %67, %66 : vector<8x128xf32>
    %69 = arith.divf %67, %68 : vector<8x128xf32>
    %70 = vector.extract_strided_slice %63 {offsets = [0, 128], sizes = [8, 128], strides = [1, 1]} : vector<8x512xf32> to vector<8x128xf32>
    %71 = arith.negf %70 : vector<8x128xf32>
    %72 = math.exp %71 : vector<8x128xf32>
    %cst_28 = arith.constant 1.000000e+00 : f32
    %73 = vector.broadcast %cst_28 : f32 to vector<8x128xf32>
    %74 = arith.addf %73, %72 : vector<8x128xf32>
    %75 = arith.divf %73, %74 : vector<8x128xf32>
    %76 = vector.extract_strided_slice %63 {offsets = [0, 256], sizes = [8, 128], strides = [1, 1]} : vector<8x512xf32> to vector<8x128xf32>
    %77 = vector.extract_strided_slice %63 {offsets = [0, 384], sizes = [8, 128], strides = [1, 1]} : vector<8x512xf32> to vector<8x128xf32>
    %78 = arith.mulf %69, %77 : vector<8x128xf32>
    %79 = arith.addf %76, %78 : vector<8x128xf32>
    %80 = math.tanh %79 : vector<8x128xf32>
    %cst_29 = arith.constant 1.000000e+00 : f32
    %81 = vector.broadcast %cst_29 : f32 to vector<8x128xf32>
    %82 = arith.subf %81, %75 : vector<8x128xf32>
    %83 = arith.mulf %82, %80 : vector<8x128xf32>
    %84 = arith.mulf %75, %56 : vector<8x128xf32>
    %85 = arith.addf %83, %84 : vector<8x128xf32>
    %86 = vector.extract_strided_slice %26 {offsets = [2, 0, 0], sizes = [1, 8, 128], strides = [1, 1, 1]} : vector<8x8x128xf32> to vector<1x8x128xf32>
    %87 = vector.shape_cast %86 : vector<1x8x128xf32> to vector<8x128xf32>
    %88 = tpu.concatenate %87, %85 in 1 : vector<8x128xf32>, vector<8x128xf32> -> vector<8x256xf32>
    %89 = arith.truncf %88 : vector<8x256xf32> to vector<8x256xbf16>
    %cst_30 = arith.constant dense<0.000000e+00> : vector<8x512xf32>
    %90 = tpu.matmul %89, %2, %cst_30 {dimension_numbers = #tpu.dot_dimension_numbers<[1], [0], [0], [1], [0, 0, 1, 1], [], []>} : vector<8x256xbf16>, vector<256x512xbf16>, vector<8x512xf32> -> vector<8x512xf32>
    %91 = vector.broadcast %3 : vector<1x512xf32> to vector<8x512xf32>
    %92 = arith.addf %90, %91 : vector<8x512xf32>
    %93 = vector.extract_strided_slice %92 {offsets = [0, 0], sizes = [8, 128], strides = [1, 1]} : vector<8x512xf32> to vector<8x128xf32>
    %94 = arith.negf %93 : vector<8x128xf32>
    %95 = math.exp %94 : vector<8x128xf32>
    %cst_31 = arith.constant 1.000000e+00 : f32
    %96 = vector.broadcast %cst_31 : f32 to vector<8x128xf32>
    %97 = arith.addf %96, %95 : vector<8x128xf32>
    %98 = arith.divf %96, %97 : vector<8x128xf32>
    %99 = vector.extract_strided_slice %92 {offsets = [0, 128], sizes = [8, 128], strides = [1, 1]} : vector<8x512xf32> to vector<8x128xf32>
    %100 = arith.negf %99 : vector<8x128xf32>
    %101 = math.exp %100 : vector<8x128xf32>
    %cst_32 = arith.constant 1.000000e+00 : f32
    %102 = vector.broadcast %cst_32 : f32 to vector<8x128xf32>
    %103 = arith.addf %102, %101 : vector<8x128xf32>
    %104 = arith.divf %102, %103 : vector<8x128xf32>
    %105 = vector.extract_strided_slice %92 {offsets = [0, 256], sizes = [8, 128], strides = [1, 1]} : vector<8x512xf32> to vector<8x128xf32>
    %106 = vector.extract_strided_slice %92 {offsets = [0, 384], sizes = [8, 128], strides = [1, 1]} : vector<8x512xf32> to vector<8x128xf32>
    %107 = arith.mulf %98, %106 : vector<8x128xf32>
    %108 = arith.addf %105, %107 : vector<8x128xf32>
    %109 = math.tanh %108 : vector<8x128xf32>
    %cst_33 = arith.constant 1.000000e+00 : f32
    %110 = vector.broadcast %cst_33 : f32 to vector<8x128xf32>
    %111 = arith.subf %110, %104 : vector<8x128xf32>
    %112 = arith.mulf %111, %109 : vector<8x128xf32>
    %113 = arith.mulf %104, %85 : vector<8x128xf32>
    %114 = arith.addf %112, %113 : vector<8x128xf32>
    %115 = vector.extract_strided_slice %26 {offsets = [3, 0, 0], sizes = [1, 8, 128], strides = [1, 1, 1]} : vector<8x8x128xf32> to vector<1x8x128xf32>
    %116 = vector.shape_cast %115 : vector<1x8x128xf32> to vector<8x128xf32>
    %117 = tpu.concatenate %116, %114 in 1 : vector<8x128xf32>, vector<8x128xf32> -> vector<8x256xf32>
    %118 = arith.truncf %117 : vector<8x256xf32> to vector<8x256xbf16>
    %cst_34 = arith.constant dense<0.000000e+00> : vector<8x512xf32>
    %119 = tpu.matmul %118, %2, %cst_34 {dimension_numbers = #tpu.dot_dimension_numbers<[1], [0], [0], [1], [0, 0, 1, 1], [], []>} : vector<8x256xbf16>, vector<256x512xbf16>, vector<8x512xf32> -> vector<8x512xf32>
    %120 = vector.broadcast %3 : vector<1x512xf32> to vector<8x512xf32>
    %121 = arith.addf %119, %120 : vector<8x512xf32>
    %122 = vector.extract_strided_slice %121 {offsets = [0, 0], sizes = [8, 128], strides = [1, 1]} : vector<8x512xf32> to vector<8x128xf32>
    %123 = arith.negf %122 : vector<8x128xf32>
    %124 = math.exp %123 : vector<8x128xf32>
    %cst_35 = arith.constant 1.000000e+00 : f32
    %125 = vector.broadcast %cst_35 : f32 to vector<8x128xf32>
    %126 = arith.addf %125, %124 : vector<8x128xf32>
    %127 = arith.divf %125, %126 : vector<8x128xf32>
    %128 = vector.extract_strided_slice %121 {offsets = [0, 128], sizes = [8, 128], strides = [1, 1]} : vector<8x512xf32> to vector<8x128xf32>
    %129 = arith.negf %128 : vector<8x128xf32>
    %130 = math.exp %129 : vector<8x128xf32>
    %cst_36 = arith.constant 1.000000e+00 : f32
    %131 = vector.broadcast %cst_36 : f32 to vector<8x128xf32>
    %132 = arith.addf %131, %130 : vector<8x128xf32>
    %133 = arith.divf %131, %132 : vector<8x128xf32>
    %134 = vector.extract_strided_slice %121 {offsets = [0, 256], sizes = [8, 128], strides = [1, 1]} : vector<8x512xf32> to vector<8x128xf32>
    %135 = vector.extract_strided_slice %121 {offsets = [0, 384], sizes = [8, 128], strides = [1, 1]} : vector<8x512xf32> to vector<8x128xf32>
    %136 = arith.mulf %127, %135 : vector<8x128xf32>
    %137 = arith.addf %134, %136 : vector<8x128xf32>
    %138 = math.tanh %137 : vector<8x128xf32>
    %cst_37 = arith.constant 1.000000e+00 : f32
    %139 = vector.broadcast %cst_37 : f32 to vector<8x128xf32>
    %140 = arith.subf %139, %133 : vector<8x128xf32>
    %141 = arith.mulf %140, %138 : vector<8x128xf32>
    %142 = arith.mulf %133, %114 : vector<8x128xf32>
    %143 = arith.addf %141, %142 : vector<8x128xf32>
    %144 = vector.extract_strided_slice %26 {offsets = [4, 0, 0], sizes = [1, 8, 128], strides = [1, 1, 1]} : vector<8x8x128xf32> to vector<1x8x128xf32>
    %145 = vector.shape_cast %144 : vector<1x8x128xf32> to vector<8x128xf32>
    %146 = tpu.concatenate %145, %143 in 1 : vector<8x128xf32>, vector<8x128xf32> -> vector<8x256xf32>
    %147 = arith.truncf %146 : vector<8x256xf32> to vector<8x256xbf16>
    %cst_38 = arith.constant dense<0.000000e+00> : vector<8x512xf32>
    %148 = tpu.matmul %147, %2, %cst_38 {dimension_numbers = #tpu.dot_dimension_numbers<[1], [0], [0], [1], [0, 0, 1, 1], [], []>} : vector<8x256xbf16>, vector<256x512xbf16>, vector<8x512xf32> -> vector<8x512xf32>
    %149 = vector.broadcast %3 : vector<1x512xf32> to vector<8x512xf32>
    %150 = arith.addf %148, %149 : vector<8x512xf32>
    %151 = vector.extract_strided_slice %150 {offsets = [0, 0], sizes = [8, 128], strides = [1, 1]} : vector<8x512xf32> to vector<8x128xf32>
    %152 = arith.negf %151 : vector<8x128xf32>
    %153 = math.exp %152 : vector<8x128xf32>
    %cst_39 = arith.constant 1.000000e+00 : f32
    %154 = vector.broadcast %cst_39 : f32 to vector<8x128xf32>
    %155 = arith.addf %154, %153 : vector<8x128xf32>
    %156 = arith.divf %154, %155 : vector<8x128xf32>
    %157 = vector.extract_strided_slice %150 {offsets = [0, 128], sizes = [8, 128], strides = [1, 1]} : vector<8x512xf32> to vector<8x128xf32>
    %158 = arith.negf %157 : vector<8x128xf32>
    %159 = math.exp %158 : vector<8x128xf32>
    %cst_40 = arith.constant 1.000000e+00 : f32
    %160 = vector.broadcast %cst_40 : f32 to vector<8x128xf32>
    %161 = arith.addf %160, %159 : vector<8x128xf32>
    %162 = arith.divf %160, %161 : vector<8x128xf32>
    %163 = vector.extract_strided_slice %150 {offsets = [0, 256], sizes = [8, 128], strides = [1, 1]} : vector<8x512xf32> to vector<8x128xf32>
    %164 = vector.extract_strided_slice %150 {offsets = [0, 384], sizes = [8, 128], strides = [1, 1]} : vector<8x512xf32> to vector<8x128xf32>
    %165 = arith.mulf %156, %164 : vector<8x128xf32>
    %166 = arith.addf %163, %165 : vector<8x128xf32>
    %167 = math.tanh %166 : vector<8x128xf32>
    %cst_41 = arith.constant 1.000000e+00 : f32
    %168 = vector.broadcast %cst_41 : f32 to vector<8x128xf32>
    %169 = arith.subf %168, %162 : vector<8x128xf32>
    %170 = arith.mulf %169, %167 : vector<8x128xf32>
    %171 = arith.mulf %162, %143 : vector<8x128xf32>
    %172 = arith.addf %170, %171 : vector<8x128xf32>
    %173 = vector.extract_strided_slice %26 {offsets = [5, 0, 0], sizes = [1, 8, 128], strides = [1, 1, 1]} : vector<8x8x128xf32> to vector<1x8x128xf32>
    %174 = vector.shape_cast %173 : vector<1x8x128xf32> to vector<8x128xf32>
    %175 = tpu.concatenate %174, %172 in 1 : vector<8x128xf32>, vector<8x128xf32> -> vector<8x256xf32>
    %176 = arith.truncf %175 : vector<8x256xf32> to vector<8x256xbf16>
    %cst_42 = arith.constant dense<0.000000e+00> : vector<8x512xf32>
    %177 = tpu.matmul %176, %2, %cst_42 {dimension_numbers = #tpu.dot_dimension_numbers<[1], [0], [0], [1], [0, 0, 1, 1], [], []>} : vector<8x256xbf16>, vector<256x512xbf16>, vector<8x512xf32> -> vector<8x512xf32>
    %178 = vector.broadcast %3 : vector<1x512xf32> to vector<8x512xf32>
    %179 = arith.addf %177, %178 : vector<8x512xf32>
    %180 = vector.extract_strided_slice %179 {offsets = [0, 0], sizes = [8, 128], strides = [1, 1]} : vector<8x512xf32> to vector<8x128xf32>
    %181 = arith.negf %180 : vector<8x128xf32>
    %182 = math.exp %181 : vector<8x128xf32>
    %cst_43 = arith.constant 1.000000e+00 : f32
    %183 = vector.broadcast %cst_43 : f32 to vector<8x128xf32>
    %184 = arith.addf %183, %182 : vector<8x128xf32>
    %185 = arith.divf %183, %184 : vector<8x128xf32>
    %186 = vector.extract_strided_slice %179 {offsets = [0, 128], sizes = [8, 128], strides = [1, 1]} : vector<8x512xf32> to vector<8x128xf32>
    %187 = arith.negf %186 : vector<8x128xf32>
    %188 = math.exp %187 : vector<8x128xf32>
    %cst_44 = arith.constant 1.000000e+00 : f32
    %189 = vector.broadcast %cst_44 : f32 to vector<8x128xf32>
    %190 = arith.addf %189, %188 : vector<8x128xf32>
    %191 = arith.divf %189, %190 : vector<8x128xf32>
    %192 = vector.extract_strided_slice %179 {offsets = [0, 256], sizes = [8, 128], strides = [1, 1]} : vector<8x512xf32> to vector<8x128xf32>
    %193 = vector.extract_strided_slice %179 {offsets = [0, 384], sizes = [8, 128], strides = [1, 1]} : vector<8x512xf32> to vector<8x128xf32>
    %194 = arith.mulf %185, %193 : vector<8x128xf32>
    %195 = arith.addf %192, %194 : vector<8x128xf32>
    %196 = math.tanh %195 : vector<8x128xf32>
    %cst_45 = arith.constant 1.000000e+00 : f32
    %197 = vector.broadcast %cst_45 : f32 to vector<8x128xf32>
    %198 = arith.subf %197, %191 : vector<8x128xf32>
    %199 = arith.mulf %198, %196 : vector<8x128xf32>
    %200 = arith.mulf %191, %172 : vector<8x128xf32>
    %201 = arith.addf %199, %200 : vector<8x128xf32>
    %202 = vector.extract_strided_slice %26 {offsets = [6, 0, 0], sizes = [1, 8, 128], strides = [1, 1, 1]} : vector<8x8x128xf32> to vector<1x8x128xf32>
    %203 = vector.shape_cast %202 : vector<1x8x128xf32> to vector<8x128xf32>
    %204 = tpu.concatenate %203, %201 in 1 : vector<8x128xf32>, vector<8x128xf32> -> vector<8x256xf32>
    %205 = arith.truncf %204 : vector<8x256xf32> to vector<8x256xbf16>
    %cst_46 = arith.constant dense<0.000000e+00> : vector<8x512xf32>
    %206 = tpu.matmul %205, %2, %cst_46 {dimension_numbers = #tpu.dot_dimension_numbers<[1], [0], [0], [1], [0, 0, 1, 1], [], []>} : vector<8x256xbf16>, vector<256x512xbf16>, vector<8x512xf32> -> vector<8x512xf32>
    %207 = vector.broadcast %3 : vector<1x512xf32> to vector<8x512xf32>
    %208 = arith.addf %206, %207 : vector<8x512xf32>
    %209 = vector.extract_strided_slice %208 {offsets = [0, 0], sizes = [8, 128], strides = [1, 1]} : vector<8x512xf32> to vector<8x128xf32>
    %210 = arith.negf %209 : vector<8x128xf32>
    %211 = math.exp %210 : vector<8x128xf32>
    %cst_47 = arith.constant 1.000000e+00 : f32
    %212 = vector.broadcast %cst_47 : f32 to vector<8x128xf32>
    %213 = arith.addf %212, %211 : vector<8x128xf32>
    %214 = arith.divf %212, %213 : vector<8x128xf32>
    %215 = vector.extract_strided_slice %208 {offsets = [0, 128], sizes = [8, 128], strides = [1, 1]} : vector<8x512xf32> to vector<8x128xf32>
    %216 = arith.negf %215 : vector<8x128xf32>
    %217 = math.exp %216 : vector<8x128xf32>
    %cst_48 = arith.constant 1.000000e+00 : f32
    %218 = vector.broadcast %cst_48 : f32 to vector<8x128xf32>
    %219 = arith.addf %218, %217 : vector<8x128xf32>
    %220 = arith.divf %218, %219 : vector<8x128xf32>
    %221 = vector.extract_strided_slice %208 {offsets = [0, 256], sizes = [8, 128], strides = [1, 1]} : vector<8x512xf32> to vector<8x128xf32>
    %222 = vector.extract_strided_slice %208 {offsets = [0, 384], sizes = [8, 128], strides = [1, 1]} : vector<8x512xf32> to vector<8x128xf32>
    %223 = arith.mulf %214, %222 : vector<8x128xf32>
    %224 = arith.addf %221, %223 : vector<8x128xf32>
    %225 = math.tanh %224 : vector<8x128xf32>
    %cst_49 = arith.constant 1.000000e+00 : f32
    %226 = vector.broadcast %cst_49 : f32 to vector<8x128xf32>
    %227 = arith.subf %226, %220 : vector<8x128xf32>
    %228 = arith.mulf %227, %225 : vector<8x128xf32>
    %229 = arith.mulf %220, %201 : vector<8x128xf32>
    %230 = arith.addf %228, %229 : vector<8x128xf32>
    %231 = vector.extract_strided_slice %26 {offsets = [7, 0, 0], sizes = [1, 8, 128], strides = [1, 1, 1]} : vector<8x8x128xf32> to vector<1x8x128xf32>
    %232 = vector.shape_cast %231 : vector<1x8x128xf32> to vector<8x128xf32>
    %233 = tpu.concatenate %232, %230 in 1 : vector<8x128xf32>, vector<8x128xf32> -> vector<8x256xf32>
    %234 = arith.truncf %233 : vector<8x256xf32> to vector<8x256xbf16>
    %cst_50 = arith.constant dense<0.000000e+00> : vector<8x512xf32>
    %235 = tpu.matmul %234, %2, %cst_50 {dimension_numbers = #tpu.dot_dimension_numbers<[1], [0], [0], [1], [0, 0, 1, 1], [], []>} : vector<8x256xbf16>, vector<256x512xbf16>, vector<8x512xf32> -> vector<8x512xf32>
    %236 = vector.broadcast %3 : vector<1x512xf32> to vector<8x512xf32>
    %237 = arith.addf %235, %236 : vector<8x512xf32>
    %238 = vector.extract_strided_slice %237 {offsets = [0, 0], sizes = [8, 128], strides = [1, 1]} : vector<8x512xf32> to vector<8x128xf32>
    %239 = arith.negf %238 : vector<8x128xf32>
    %240 = math.exp %239 : vector<8x128xf32>
    %cst_51 = arith.constant 1.000000e+00 : f32
    %241 = vector.broadcast %cst_51 : f32 to vector<8x128xf32>
    %242 = arith.addf %241, %240 : vector<8x128xf32>
    %243 = arith.divf %241, %242 : vector<8x128xf32>
    %244 = vector.extract_strided_slice %237 {offsets = [0, 128], sizes = [8, 128], strides = [1, 1]} : vector<8x512xf32> to vector<8x128xf32>
    %245 = arith.negf %244 : vector<8x128xf32>
    %246 = math.exp %245 : vector<8x128xf32>
    %cst_52 = arith.constant 1.000000e+00 : f32
    %247 = vector.broadcast %cst_52 : f32 to vector<8x128xf32>
    %248 = arith.addf %247, %246 : vector<8x128xf32>
    %249 = arith.divf %247, %248 : vector<8x128xf32>
    %250 = vector.extract_strided_slice %237 {offsets = [0, 256], sizes = [8, 128], strides = [1, 1]} : vector<8x512xf32> to vector<8x128xf32>
    %251 = vector.extract_strided_slice %237 {offsets = [0, 384], sizes = [8, 128], strides = [1, 1]} : vector<8x512xf32> to vector<8x128xf32>
    %252 = arith.mulf %243, %251 : vector<8x128xf32>
    %253 = arith.addf %250, %252 : vector<8x128xf32>
    %254 = math.tanh %253 : vector<8x128xf32>
    %cst_53 = arith.constant 1.000000e+00 : f32
    %255 = vector.broadcast %cst_53 : f32 to vector<8x128xf32>
    %256 = arith.subf %255, %249 : vector<8x128xf32>
    %257 = arith.mulf %256, %254 : vector<8x128xf32>
    %258 = arith.mulf %249, %230 : vector<8x128xf32>
    %259 = arith.addf %257, %258 : vector<8x128xf32>
    %260 = tpu.iota {dimensions = array<i32: 1>} : vector<8x8xi32>
    %261 = tpu.iota {dimensions = array<i32: 1>} : vector<8x128xi32>
    %cst_54 = arith.constant 1.000000e+00 : f32
    %262 = vector.broadcast %cst_54 : f32 to vector<8x1xf32>
    %cst_55 = arith.constant 0.000000e+00 : f32
    %263 = vector.broadcast %cst_55 : f32 to vector<8x8xf32>
    %cst_56 = arith.constant 0.000000e+00 : f32
    %264 = vector.broadcast %cst_56 : f32 to vector<8x128xf32>
    %265 = vector.broadcast %262 : vector<8x1xf32> to vector<8x128xf32>
    %266 = vector.broadcast %4 : vector<1x128xf32> to vector<8x128xf32>
    %267 = arith.mulf %265, %266 : vector<8x128xf32>
    %268 = vector.broadcast %5 : vector<1x128xf32> to vector<8x128xf32>
    %269 = arith.addf %267, %268 : vector<8x128xf32>
    %cst_57 = arith.constant 0.000000e+00 : f32
    %270 = vector.broadcast %cst_57 : f32 to vector<8x128xf32>
    %271 = arith.maximumf %269, %270 : vector<8x128xf32>
    %272 = tpu.concatenate %271, %259 in 1 : vector<8x128xf32>, vector<8x128xf32> -> vector<8x256xf32>
    %273 = arith.truncf %272 : vector<8x256xf32> to vector<8x256xbf16>
    %cst_58 = arith.constant dense<0.000000e+00> : vector<8x512xf32>
    %274 = tpu.matmul %273, %6, %cst_58 {dimension_numbers = #tpu.dot_dimension_numbers<[1], [0], [0], [1], [0, 0, 1, 1], [], []>} : vector<8x256xbf16>, vector<256x512xbf16>, vector<8x512xf32> -> vector<8x512xf32>
    %275 = vector.broadcast %7 : vector<1x512xf32> to vector<8x512xf32>
    %276 = arith.addf %274, %275 : vector<8x512xf32>
    %277 = vector.extract_strided_slice %276 {offsets = [0, 0], sizes = [8, 128], strides = [1, 1]} : vector<8x512xf32> to vector<8x128xf32>
    %278 = arith.negf %277 : vector<8x128xf32>
    %279 = math.exp %278 : vector<8x128xf32>
    %cst_59 = arith.constant 1.000000e+00 : f32
    %280 = vector.broadcast %cst_59 : f32 to vector<8x128xf32>
    %281 = arith.addf %280, %279 : vector<8x128xf32>
    %282 = arith.divf %280, %281 : vector<8x128xf32>
    %283 = vector.extract_strided_slice %276 {offsets = [0, 128], sizes = [8, 128], strides = [1, 1]} : vector<8x512xf32> to vector<8x128xf32>
    %284 = arith.negf %283 : vector<8x128xf32>
    %285 = math.exp %284 : vector<8x128xf32>
    %cst_60 = arith.constant 1.000000e+00 : f32
    %286 = vector.broadcast %cst_60 : f32 to vector<8x128xf32>
    %287 = arith.addf %286, %285 : vector<8x128xf32>
    %288 = arith.divf %286, %287 : vector<8x128xf32>
    %289 = vector.extract_strided_slice %276 {offsets = [0, 256], sizes = [8, 128], strides = [1, 1]} : vector<8x512xf32> to vector<8x128xf32>
    %290 = vector.extract_strided_slice %276 {offsets = [0, 384], sizes = [8, 128], strides = [1, 1]} : vector<8x512xf32> to vector<8x128xf32>
    %291 = arith.mulf %282, %290 : vector<8x128xf32>
    %292 = arith.addf %289, %291 : vector<8x128xf32>
    %293 = math.tanh %292 : vector<8x128xf32>
    %cst_61 = arith.constant 1.000000e+00 : f32
    %294 = vector.broadcast %cst_61 : f32 to vector<8x128xf32>
    %295 = arith.subf %294, %288 : vector<8x128xf32>
    %296 = arith.mulf %295, %293 : vector<8x128xf32>
    %297 = arith.mulf %288, %259 : vector<8x128xf32>
    %298 = arith.addf %296, %297 : vector<8x128xf32>
    %299 = arith.truncf %298 : vector<8x128xf32> to vector<8x128xbf16>
    %cst_62 = arith.constant dense<0.000000e+00> : vector<8x8xf32>
    %300 = tpu.matmul %299, %8, %cst_62 {dimension_numbers = #tpu.dot_dimension_numbers<[1], [0], [0], [1], [0, 0, 1, 1], [], []>} : vector<8x128xbf16>, vector<128x8xbf16>, vector<8x8xf32> -> vector<8x8xf32>
    %301 = vector.broadcast %9 : vector<1x8xf32> to vector<8x8xf32>
    %302 = arith.addf %300, %301 : vector<8x8xf32>
    %cst_63 = arith.constant dense<0xFF800000> : vector<8xf32>
    %303 = vector.multi_reduction <maximumf>, %302, %cst_63 [1] : vector<8x8xf32> to vector<8xf32>
    %304 = vector.shape_cast %303 : vector<8xf32> to vector<8x1xf32>
    %305 = vector.broadcast %304 : vector<8x1xf32> to vector<8x8xf32>
    %306 = arith.cmpf oeq, %302, %305 : vector<8x8xf32>
    %c2147483647_i32 = arith.constant 2147483647 : i32
    %307 = vector.broadcast %c2147483647_i32 : i32 to vector<8x8xi32>
    %308 = arith.select %306, %260, %307 : vector<8x8xi1>, vector<8x8xi32>
    %cst_64 = arith.constant dense<2147483647> : vector<8xi32>
    %309 = vector.multi_reduction <minsi>, %308, %cst_64 [1] : vector<8x8xi32> to vector<8xi32>
    %310 = arith.sitofp %309 : vector<8xi32> to vector<8xf32>
    %311 = vector.shape_cast %310 : vector<8xf32> to vector<8x1xf32>
    %c0_i32 = arith.constant 0 : i32
    %312 = vector.broadcast %c0_i32 : i32 to vector<8x8xi32>
    %313 = arith.cmpi eq, %260, %312 : vector<8x8xi32>
    %cst_65 = arith.constant 1.000000e+00 : f32
    %cst_66 = arith.constant 0xFF800000 : f32
    %314 = vector.broadcast %cst_65 : f32 to vector<8x8xf32>
    %315 = vector.broadcast %cst_66 : f32 to vector<8x8xf32>
    %316 = arith.select %313, %314, %315 : vector<8x8xi1>, vector<8x8xf32>
    %cst_67 = arith.constant dense<0xFF800000> : vector<8xf32>
    %317 = vector.multi_reduction <maximumf>, %316, %cst_67 [1] : vector<8x8xf32> to vector<8xf32>
    %318 = vector.shape_cast %317 : vector<8xf32> to vector<8x1xf32>
    %319 = vector.broadcast %318 : vector<8x1xf32> to vector<8x8xf32>
    %320 = arith.cmpf oeq, %316, %319 : vector<8x8xf32>
    %c2147483647_i32_68 = arith.constant 2147483647 : i32
    %321 = vector.broadcast %c2147483647_i32_68 : i32 to vector<8x8xi32>
    %322 = arith.select %320, %260, %321 : vector<8x8xi1>, vector<8x8xi32>
    %cst_69 = arith.constant dense<2147483647> : vector<8xi32>
    %323 = vector.multi_reduction <minsi>, %322, %cst_69 [1] : vector<8x8xi32> to vector<8xi32>
    %cst_70 = arith.constant dense<0xFF800000> : vector<8xf32>
    %324 = vector.multi_reduction <maximumf>, %316, %cst_70 [1] : vector<8x8xf32> to vector<8xf32>
    %325 = vector.shape_cast %324 : vector<8xf32> to vector<8x1xf32>
    %326 = vector.broadcast %325 : vector<8x1xf32> to vector<8x8xf32>
    %327 = arith.subf %316, %326 : vector<8x8xf32>
    %328 = math.exp %327 : vector<8x8xf32>
    %cst_71 = arith.constant dense<0.000000e+00> : vector<8xf32>
    %329 = vector.multi_reduction <add>, %328, %cst_71 [1] : vector<8x8xf32> to vector<8xf32>
    %330 = vector.shape_cast %329 : vector<8xf32> to vector<8x1xf32>
    %331 = math.log %330 : vector<8x1xf32>
    %332 = arith.addf %331, %325 : vector<8x1xf32>
    %333 = vector.broadcast %332 : vector<8x1xf32> to vector<8x8xf32>
    %334 = arith.subf %316, %333 : vector<8x8xf32>
    %335 = vector.shape_cast %323 : vector<8xi32> to vector<8x1xi32>
    %336 = vector.broadcast %335 : vector<8x1xi32> to vector<8x8xi32>
    %337 = arith.cmpi eq, %260, %336 : vector<8x8xi32>
    %cst_72 = arith.constant 0.000000e+00 : f32
    %338 = vector.broadcast %cst_72 : f32 to vector<8x8xf32>
    %339 = arith.select %337, %334, %338 : vector<8x8xi1>, vector<8x8xf32>
    %cst_73 = arith.constant dense<0.000000e+00> : vector<8xf32>
    %340 = vector.multi_reduction <add>, %339, %cst_73 [1] : vector<8x8xf32> to vector<8xf32>
    %c0_i32_74 = arith.constant 0 : i32
    %341 = vector.broadcast %c0_i32_74 : i32 to vector<8x128xi32>
    %342 = arith.cmpi eq, %261, %341 : vector<8x128xi32>
    %343 = arith.sitofp %323 : vector<8xi32> to vector<8xf32>
    %344 = vector.shape_cast %343 : vector<8xf32> to vector<8x1xf32>
    %345 = vector.shape_cast %344 : vector<8x1xf32> to vector<8x1xf32>
    %346 = vector.broadcast %345 : vector<8x1xf32> to vector<8x128xf32>
    %347 = arith.select %342, %346, %264 : vector<8x128xi1>, vector<8x128xf32>
    %c8_i32 = arith.constant 8 : i32
    %348 = vector.broadcast %c8_i32 : i32 to vector<8x128xi32>
    %349 = arith.cmpi eq, %261, %348 : vector<8x128xi32>
    %350 = vector.shape_cast %340 : vector<8xf32> to vector<8x1xf32>
    %351 = vector.shape_cast %350 : vector<8x1xf32> to vector<8x1xf32>
    %352 = vector.broadcast %351 : vector<8x1xf32> to vector<8x128xf32>
    %353 = arith.select %349, %352, %347 : vector<8x128xi1>, vector<8x128xf32>
    %354 = vector.broadcast %311 : vector<8x1xf32> to vector<8x128xf32>
    %355 = vector.broadcast %4 : vector<1x128xf32> to vector<8x128xf32>
    %356 = arith.mulf %354, %355 : vector<8x128xf32>
    %357 = vector.broadcast %5 : vector<1x128xf32> to vector<8x128xf32>
    %358 = arith.addf %356, %357 : vector<8x128xf32>
    %cst_75 = arith.constant 0.000000e+00 : f32
    %359 = vector.broadcast %cst_75 : f32 to vector<8x128xf32>
    %360 = arith.maximumf %358, %359 : vector<8x128xf32>
    %361 = tpu.concatenate %360, %298 in 1 : vector<8x128xf32>, vector<8x128xf32> -> vector<8x256xf32>
    %362 = arith.truncf %361 : vector<8x256xf32> to vector<8x256xbf16>
    %cst_76 = arith.constant dense<0.000000e+00> : vector<8x512xf32>
    %363 = tpu.matmul %362, %6, %cst_76 {dimension_numbers = #tpu.dot_dimension_numbers<[1], [0], [0], [1], [0, 0, 1, 1], [], []>} : vector<8x256xbf16>, vector<256x512xbf16>, vector<8x512xf32> -> vector<8x512xf32>
    %364 = vector.broadcast %7 : vector<1x512xf32> to vector<8x512xf32>
    %365 = arith.addf %363, %364 : vector<8x512xf32>
    %366 = vector.extract_strided_slice %365 {offsets = [0, 0], sizes = [8, 128], strides = [1, 1]} : vector<8x512xf32> to vector<8x128xf32>
    %367 = arith.negf %366 : vector<8x128xf32>
    %368 = math.exp %367 : vector<8x128xf32>
    %cst_77 = arith.constant 1.000000e+00 : f32
    %369 = vector.broadcast %cst_77 : f32 to vector<8x128xf32>
    %370 = arith.addf %369, %368 : vector<8x128xf32>
    %371 = arith.divf %369, %370 : vector<8x128xf32>
    %372 = vector.extract_strided_slice %365 {offsets = [0, 128], sizes = [8, 128], strides = [1, 1]} : vector<8x512xf32> to vector<8x128xf32>
    %373 = arith.negf %372 : vector<8x128xf32>
    %374 = math.exp %373 : vector<8x128xf32>
    %cst_78 = arith.constant 1.000000e+00 : f32
    %375 = vector.broadcast %cst_78 : f32 to vector<8x128xf32>
    %376 = arith.addf %375, %374 : vector<8x128xf32>
    %377 = arith.divf %375, %376 : vector<8x128xf32>
    %378 = vector.extract_strided_slice %365 {offsets = [0, 256], sizes = [8, 128], strides = [1, 1]} : vector<8x512xf32> to vector<8x128xf32>
    %379 = vector.extract_strided_slice %365 {offsets = [0, 384], sizes = [8, 128], strides = [1, 1]} : vector<8x512xf32> to vector<8x128xf32>
    %380 = arith.mulf %371, %379 : vector<8x128xf32>
    %381 = arith.addf %378, %380 : vector<8x128xf32>
    %382 = math.tanh %381 : vector<8x128xf32>
    %cst_79 = arith.constant 1.000000e+00 : f32
    %383 = vector.broadcast %cst_79 : f32 to vector<8x128xf32>
    %384 = arith.subf %383, %377 : vector<8x128xf32>
    %385 = arith.mulf %384, %382 : vector<8x128xf32>
    %386 = arith.mulf %377, %298 : vector<8x128xf32>
    %387 = arith.addf %385, %386 : vector<8x128xf32>
    %388 = arith.truncf %387 : vector<8x128xf32> to vector<8x128xbf16>
    %cst_80 = arith.constant dense<0.000000e+00> : vector<8x8xf32>
    %389 = tpu.matmul %388, %8, %cst_80 {dimension_numbers = #tpu.dot_dimension_numbers<[1], [0], [0], [1], [0, 0, 1, 1], [], []>} : vector<8x128xbf16>, vector<128x8xbf16>, vector<8x8xf32> -> vector<8x8xf32>
    %390 = vector.broadcast %9 : vector<1x8xf32> to vector<8x8xf32>
    %391 = arith.addf %389, %390 : vector<8x8xf32>
    %cst_81 = arith.constant dense<0xFF800000> : vector<8xf32>
    %392 = vector.multi_reduction <maximumf>, %391, %cst_81 [1] : vector<8x8xf32> to vector<8xf32>
    %393 = vector.shape_cast %392 : vector<8xf32> to vector<8x1xf32>
    %394 = vector.broadcast %393 : vector<8x1xf32> to vector<8x8xf32>
    %395 = arith.cmpf oeq, %391, %394 : vector<8x8xf32>
    %c2147483647_i32_82 = arith.constant 2147483647 : i32
    %396 = vector.broadcast %c2147483647_i32_82 : i32 to vector<8x8xi32>
    %397 = arith.select %395, %260, %396 : vector<8x8xi1>, vector<8x8xi32>
    %cst_83 = arith.constant dense<2147483647> : vector<8xi32>
    %398 = vector.multi_reduction <minsi>, %397, %cst_83 [1] : vector<8x8xi32> to vector<8xi32>
    %399 = arith.sitofp %398 : vector<8xi32> to vector<8xf32>
    %400 = vector.shape_cast %399 : vector<8xf32> to vector<8x1xf32>
    %401 = vector.shape_cast %323 : vector<8xi32> to vector<8x1xi32>
    %402 = vector.broadcast %401 : vector<8x1xi32> to vector<8x8xi32>
    %403 = arith.cmpi eq, %260, %402 : vector<8x8xi32>
    %cst_84 = arith.constant 1.000000e+00 : f32
    %404 = vector.broadcast %cst_84 : f32 to vector<8x8xf32>
    %405 = arith.select %403, %404, %263 : vector<8x8xi1>, vector<8x8xf32>
    %cst_85 = arith.constant 5.000000e-01 : f32
    %406 = vector.broadcast %cst_85 : f32 to vector<8x8xf32>
    %407 = arith.cmpf ogt, %405, %406 : vector<8x8xf32>
    %cst_86 = arith.constant 0xFF800000 : f32
    %408 = vector.broadcast %cst_86 : f32 to vector<8x8xf32>
    %409 = arith.select %407, %408, %391 : vector<8x8xi1>, vector<8x8xf32>
    %cst_87 = arith.constant dense<0xFF800000> : vector<8xf32>
    %410 = vector.multi_reduction <maximumf>, %409, %cst_87 [1] : vector<8x8xf32> to vector<8xf32>
    %411 = vector.shape_cast %410 : vector<8xf32> to vector<8x1xf32>
    %412 = vector.broadcast %411 : vector<8x1xf32> to vector<8x8xf32>
    %413 = arith.cmpf oeq, %409, %412 : vector<8x8xf32>
    %c2147483647_i32_88 = arith.constant 2147483647 : i32
    %414 = vector.broadcast %c2147483647_i32_88 : i32 to vector<8x8xi32>
    %415 = arith.select %413, %260, %414 : vector<8x8xi1>, vector<8x8xi32>
    %cst_89 = arith.constant dense<2147483647> : vector<8xi32>
    %416 = vector.multi_reduction <minsi>, %415, %cst_89 [1] : vector<8x8xi32> to vector<8xi32>
    %cst_90 = arith.constant dense<0xFF800000> : vector<8xf32>
    %417 = vector.multi_reduction <maximumf>, %409, %cst_90 [1] : vector<8x8xf32> to vector<8xf32>
    %418 = vector.shape_cast %417 : vector<8xf32> to vector<8x1xf32>
    %419 = vector.broadcast %418 : vector<8x1xf32> to vector<8x8xf32>
    %420 = arith.subf %409, %419 : vector<8x8xf32>
    %421 = math.exp %420 : vector<8x8xf32>
    %cst_91 = arith.constant dense<0.000000e+00> : vector<8xf32>
    %422 = vector.multi_reduction <add>, %421, %cst_91 [1] : vector<8x8xf32> to vector<8xf32>
    %423 = vector.shape_cast %422 : vector<8xf32> to vector<8x1xf32>
    %424 = math.log %423 : vector<8x1xf32>
    %425 = arith.addf %424, %418 : vector<8x1xf32>
    %426 = vector.broadcast %425 : vector<8x1xf32> to vector<8x8xf32>
    %427 = arith.subf %409, %426 : vector<8x8xf32>
    %428 = vector.shape_cast %416 : vector<8xi32> to vector<8x1xi32>
    %429 = vector.broadcast %428 : vector<8x1xi32> to vector<8x8xi32>
    %430 = arith.cmpi eq, %260, %429 : vector<8x8xi32>
    %cst_92 = arith.constant 0.000000e+00 : f32
    %431 = vector.broadcast %cst_92 : f32 to vector<8x8xf32>
    %432 = arith.select %430, %427, %431 : vector<8x8xi1>, vector<8x8xf32>
    %cst_93 = arith.constant dense<0.000000e+00> : vector<8xf32>
    %433 = vector.multi_reduction <add>, %432, %cst_93 [1] : vector<8x8xf32> to vector<8xf32>
    %c1_i32 = arith.constant 1 : i32
    %434 = vector.broadcast %c1_i32 : i32 to vector<8x128xi32>
    %435 = arith.cmpi eq, %261, %434 : vector<8x128xi32>
    %436 = arith.sitofp %416 : vector<8xi32> to vector<8xf32>
    %437 = vector.shape_cast %436 : vector<8xf32> to vector<8x1xf32>
    %438 = vector.shape_cast %437 : vector<8x1xf32> to vector<8x1xf32>
    %439 = vector.broadcast %438 : vector<8x1xf32> to vector<8x128xf32>
    %440 = arith.select %435, %439, %353 : vector<8x128xi1>, vector<8x128xf32>
    %c9_i32 = arith.constant 9 : i32
    %441 = vector.broadcast %c9_i32 : i32 to vector<8x128xi32>
    %442 = arith.cmpi eq, %261, %441 : vector<8x128xi32>
    %443 = vector.shape_cast %433 : vector<8xf32> to vector<8x1xf32>
    %444 = vector.shape_cast %443 : vector<8x1xf32> to vector<8x1xf32>
    %445 = vector.broadcast %444 : vector<8x1xf32> to vector<8x128xf32>
    %446 = arith.select %442, %445, %440 : vector<8x128xi1>, vector<8x128xf32>
    %447 = vector.broadcast %400 : vector<8x1xf32> to vector<8x128xf32>
    %448 = vector.broadcast %4 : vector<1x128xf32> to vector<8x128xf32>
    %449 = arith.mulf %447, %448 : vector<8x128xf32>
    %450 = vector.broadcast %5 : vector<1x128xf32> to vector<8x128xf32>
    %451 = arith.addf %449, %450 : vector<8x128xf32>
    %cst_94 = arith.constant 0.000000e+00 : f32
    %452 = vector.broadcast %cst_94 : f32 to vector<8x128xf32>
    %453 = arith.maximumf %451, %452 : vector<8x128xf32>
    %454 = tpu.concatenate %453, %387 in 1 : vector<8x128xf32>, vector<8x128xf32> -> vector<8x256xf32>
    %455 = arith.truncf %454 : vector<8x256xf32> to vector<8x256xbf16>
    %cst_95 = arith.constant dense<0.000000e+00> : vector<8x512xf32>
    %456 = tpu.matmul %455, %6, %cst_95 {dimension_numbers = #tpu.dot_dimension_numbers<[1], [0], [0], [1], [0, 0, 1, 1], [], []>} : vector<8x256xbf16>, vector<256x512xbf16>, vector<8x512xf32> -> vector<8x512xf32>
    %457 = vector.broadcast %7 : vector<1x512xf32> to vector<8x512xf32>
    %458 = arith.addf %456, %457 : vector<8x512xf32>
    %459 = vector.extract_strided_slice %458 {offsets = [0, 0], sizes = [8, 128], strides = [1, 1]} : vector<8x512xf32> to vector<8x128xf32>
    %460 = arith.negf %459 : vector<8x128xf32>
    %461 = math.exp %460 : vector<8x128xf32>
    %cst_96 = arith.constant 1.000000e+00 : f32
    %462 = vector.broadcast %cst_96 : f32 to vector<8x128xf32>
    %463 = arith.addf %462, %461 : vector<8x128xf32>
    %464 = arith.divf %462, %463 : vector<8x128xf32>
    %465 = vector.extract_strided_slice %458 {offsets = [0, 128], sizes = [8, 128], strides = [1, 1]} : vector<8x512xf32> to vector<8x128xf32>
    %466 = arith.negf %465 : vector<8x128xf32>
    %467 = math.exp %466 : vector<8x128xf32>
    %cst_97 = arith.constant 1.000000e+00 : f32
    %468 = vector.broadcast %cst_97 : f32 to vector<8x128xf32>
    %469 = arith.addf %468, %467 : vector<8x128xf32>
    %470 = arith.divf %468, %469 : vector<8x128xf32>
    %471 = vector.extract_strided_slice %458 {offsets = [0, 256], sizes = [8, 128], strides = [1, 1]} : vector<8x512xf32> to vector<8x128xf32>
    %472 = vector.extract_strided_slice %458 {offsets = [0, 384], sizes = [8, 128], strides = [1, 1]} : vector<8x512xf32> to vector<8x128xf32>
    %473 = arith.mulf %464, %472 : vector<8x128xf32>
    %474 = arith.addf %471, %473 : vector<8x128xf32>
    %475 = math.tanh %474 : vector<8x128xf32>
    %cst_98 = arith.constant 1.000000e+00 : f32
    %476 = vector.broadcast %cst_98 : f32 to vector<8x128xf32>
    %477 = arith.subf %476, %470 : vector<8x128xf32>
    %478 = arith.mulf %477, %475 : vector<8x128xf32>
    %479 = arith.mulf %470, %387 : vector<8x128xf32>
    %480 = arith.addf %478, %479 : vector<8x128xf32>
    %481 = arith.truncf %480 : vector<8x128xf32> to vector<8x128xbf16>
    %cst_99 = arith.constant dense<0.000000e+00> : vector<8x8xf32>
    %482 = tpu.matmul %481, %8, %cst_99 {dimension_numbers = #tpu.dot_dimension_numbers<[1], [0], [0], [1], [0, 0, 1, 1], [], []>} : vector<8x128xbf16>, vector<128x8xbf16>, vector<8x8xf32> -> vector<8x8xf32>
    %483 = vector.broadcast %9 : vector<1x8xf32> to vector<8x8xf32>
    %484 = arith.addf %482, %483 : vector<8x8xf32>
    %cst_100 = arith.constant dense<0xFF800000> : vector<8xf32>
    %485 = vector.multi_reduction <maximumf>, %484, %cst_100 [1] : vector<8x8xf32> to vector<8xf32>
    %486 = vector.shape_cast %485 : vector<8xf32> to vector<8x1xf32>
    %487 = vector.broadcast %486 : vector<8x1xf32> to vector<8x8xf32>
    %488 = arith.cmpf oeq, %484, %487 : vector<8x8xf32>
    %c2147483647_i32_101 = arith.constant 2147483647 : i32
    %489 = vector.broadcast %c2147483647_i32_101 : i32 to vector<8x8xi32>
    %490 = arith.select %488, %260, %489 : vector<8x8xi1>, vector<8x8xi32>
    %cst_102 = arith.constant dense<2147483647> : vector<8xi32>
    %491 = vector.multi_reduction <minsi>, %490, %cst_102 [1] : vector<8x8xi32> to vector<8xi32>
    %492 = arith.sitofp %491 : vector<8xi32> to vector<8xf32>
    %493 = vector.shape_cast %492 : vector<8xf32> to vector<8x1xf32>
    %494 = vector.shape_cast %416 : vector<8xi32> to vector<8x1xi32>
    %495 = vector.broadcast %494 : vector<8x1xi32> to vector<8x8xi32>
    %496 = arith.cmpi eq, %260, %495 : vector<8x8xi32>
    %cst_103 = arith.constant 1.000000e+00 : f32
    %497 = vector.broadcast %cst_103 : f32 to vector<8x8xf32>
    %498 = arith.select %496, %497, %405 : vector<8x8xi1>, vector<8x8xf32>
    %cst_104 = arith.constant 5.000000e-01 : f32
    %499 = vector.broadcast %cst_104 : f32 to vector<8x8xf32>
    %500 = arith.cmpf ogt, %498, %499 : vector<8x8xf32>
    %cst_105 = arith.constant 0xFF800000 : f32
    %501 = vector.broadcast %cst_105 : f32 to vector<8x8xf32>
    %502 = arith.select %500, %501, %484 : vector<8x8xi1>, vector<8x8xf32>
    %cst_106 = arith.constant dense<0xFF800000> : vector<8xf32>
    %503 = vector.multi_reduction <maximumf>, %502, %cst_106 [1] : vector<8x8xf32> to vector<8xf32>
    %504 = vector.shape_cast %503 : vector<8xf32> to vector<8x1xf32>
    %505 = vector.broadcast %504 : vector<8x1xf32> to vector<8x8xf32>
    %506 = arith.cmpf oeq, %502, %505 : vector<8x8xf32>
    %c2147483647_i32_107 = arith.constant 2147483647 : i32
    %507 = vector.broadcast %c2147483647_i32_107 : i32 to vector<8x8xi32>
    %508 = arith.select %506, %260, %507 : vector<8x8xi1>, vector<8x8xi32>
    %cst_108 = arith.constant dense<2147483647> : vector<8xi32>
    %509 = vector.multi_reduction <minsi>, %508, %cst_108 [1] : vector<8x8xi32> to vector<8xi32>
    %cst_109 = arith.constant dense<0xFF800000> : vector<8xf32>
    %510 = vector.multi_reduction <maximumf>, %502, %cst_109 [1] : vector<8x8xf32> to vector<8xf32>
    %511 = vector.shape_cast %510 : vector<8xf32> to vector<8x1xf32>
    %512 = vector.broadcast %511 : vector<8x1xf32> to vector<8x8xf32>
    %513 = arith.subf %502, %512 : vector<8x8xf32>
    %514 = math.exp %513 : vector<8x8xf32>
    %cst_110 = arith.constant dense<0.000000e+00> : vector<8xf32>
    %515 = vector.multi_reduction <add>, %514, %cst_110 [1] : vector<8x8xf32> to vector<8xf32>
    %516 = vector.shape_cast %515 : vector<8xf32> to vector<8x1xf32>
    %517 = math.log %516 : vector<8x1xf32>
    %518 = arith.addf %517, %511 : vector<8x1xf32>
    %519 = vector.broadcast %518 : vector<8x1xf32> to vector<8x8xf32>
    %520 = arith.subf %502, %519 : vector<8x8xf32>
    %521 = vector.shape_cast %509 : vector<8xi32> to vector<8x1xi32>
    %522 = vector.broadcast %521 : vector<8x1xi32> to vector<8x8xi32>
    %523 = arith.cmpi eq, %260, %522 : vector<8x8xi32>
    %cst_111 = arith.constant 0.000000e+00 : f32
    %524 = vector.broadcast %cst_111 : f32 to vector<8x8xf32>
    %525 = arith.select %523, %520, %524 : vector<8x8xi1>, vector<8x8xf32>
    %cst_112 = arith.constant dense<0.000000e+00> : vector<8xf32>
    %526 = vector.multi_reduction <add>, %525, %cst_112 [1] : vector<8x8xf32> to vector<8xf32>
    %c2_i32 = arith.constant 2 : i32
    %527 = vector.broadcast %c2_i32 : i32 to vector<8x128xi32>
    %528 = arith.cmpi eq, %261, %527 : vector<8x128xi32>
    %529 = arith.sitofp %509 : vector<8xi32> to vector<8xf32>
    %530 = vector.shape_cast %529 : vector<8xf32> to vector<8x1xf32>
    %531 = vector.shape_cast %530 : vector<8x1xf32> to vector<8x1xf32>
    %532 = vector.broadcast %531 : vector<8x1xf32> to vector<8x128xf32>
    %533 = arith.select %528, %532, %446 : vector<8x128xi1>, vector<8x128xf32>
    %c10_i32 = arith.constant 10 : i32
    %534 = vector.broadcast %c10_i32 : i32 to vector<8x128xi32>
    %535 = arith.cmpi eq, %261, %534 : vector<8x128xi32>
    %536 = vector.shape_cast %526 : vector<8xf32> to vector<8x1xf32>
    %537 = vector.shape_cast %536 : vector<8x1xf32> to vector<8x1xf32>
    %538 = vector.broadcast %537 : vector<8x1xf32> to vector<8x128xf32>
    %539 = arith.select %535, %538, %533 : vector<8x128xi1>, vector<8x128xf32>
    %540 = vector.broadcast %493 : vector<8x1xf32> to vector<8x128xf32>
    %541 = vector.broadcast %4 : vector<1x128xf32> to vector<8x128xf32>
    %542 = arith.mulf %540, %541 : vector<8x128xf32>
    %543 = vector.broadcast %5 : vector<1x128xf32> to vector<8x128xf32>
    %544 = arith.addf %542, %543 : vector<8x128xf32>
    %cst_113 = arith.constant 0.000000e+00 : f32
    %545 = vector.broadcast %cst_113 : f32 to vector<8x128xf32>
    %546 = arith.maximumf %544, %545 : vector<8x128xf32>
    %547 = tpu.concatenate %546, %480 in 1 : vector<8x128xf32>, vector<8x128xf32> -> vector<8x256xf32>
    %548 = arith.truncf %547 : vector<8x256xf32> to vector<8x256xbf16>
    %cst_114 = arith.constant dense<0.000000e+00> : vector<8x512xf32>
    %549 = tpu.matmul %548, %6, %cst_114 {dimension_numbers = #tpu.dot_dimension_numbers<[1], [0], [0], [1], [0, 0, 1, 1], [], []>} : vector<8x256xbf16>, vector<256x512xbf16>, vector<8x512xf32> -> vector<8x512xf32>
    %550 = vector.broadcast %7 : vector<1x512xf32> to vector<8x512xf32>
    %551 = arith.addf %549, %550 : vector<8x512xf32>
    %552 = vector.extract_strided_slice %551 {offsets = [0, 0], sizes = [8, 128], strides = [1, 1]} : vector<8x512xf32> to vector<8x128xf32>
    %553 = arith.negf %552 : vector<8x128xf32>
    %554 = math.exp %553 : vector<8x128xf32>
    %cst_115 = arith.constant 1.000000e+00 : f32
    %555 = vector.broadcast %cst_115 : f32 to vector<8x128xf32>
    %556 = arith.addf %555, %554 : vector<8x128xf32>
    %557 = arith.divf %555, %556 : vector<8x128xf32>
    %558 = vector.extract_strided_slice %551 {offsets = [0, 128], sizes = [8, 128], strides = [1, 1]} : vector<8x512xf32> to vector<8x128xf32>
    %559 = arith.negf %558 : vector<8x128xf32>
    %560 = math.exp %559 : vector<8x128xf32>
    %cst_116 = arith.constant 1.000000e+00 : f32
    %561 = vector.broadcast %cst_116 : f32 to vector<8x128xf32>
    %562 = arith.addf %561, %560 : vector<8x128xf32>
    %563 = arith.divf %561, %562 : vector<8x128xf32>
    %564 = vector.extract_strided_slice %551 {offsets = [0, 256], sizes = [8, 128], strides = [1, 1]} : vector<8x512xf32> to vector<8x128xf32>
    %565 = vector.extract_strided_slice %551 {offsets = [0, 384], sizes = [8, 128], strides = [1, 1]} : vector<8x512xf32> to vector<8x128xf32>
    %566 = arith.mulf %557, %565 : vector<8x128xf32>
    %567 = arith.addf %564, %566 : vector<8x128xf32>
    %568 = math.tanh %567 : vector<8x128xf32>
    %cst_117 = arith.constant 1.000000e+00 : f32
    %569 = vector.broadcast %cst_117 : f32 to vector<8x128xf32>
    %570 = arith.subf %569, %563 : vector<8x128xf32>
    %571 = arith.mulf %570, %568 : vector<8x128xf32>
    %572 = arith.mulf %563, %480 : vector<8x128xf32>
    %573 = arith.addf %571, %572 : vector<8x128xf32>
    %574 = arith.truncf %573 : vector<8x128xf32> to vector<8x128xbf16>
    %cst_118 = arith.constant dense<0.000000e+00> : vector<8x8xf32>
    %575 = tpu.matmul %574, %8, %cst_118 {dimension_numbers = #tpu.dot_dimension_numbers<[1], [0], [0], [1], [0, 0, 1, 1], [], []>} : vector<8x128xbf16>, vector<128x8xbf16>, vector<8x8xf32> -> vector<8x8xf32>
    %576 = vector.broadcast %9 : vector<1x8xf32> to vector<8x8xf32>
    %577 = arith.addf %575, %576 : vector<8x8xf32>
    %cst_119 = arith.constant dense<0xFF800000> : vector<8xf32>
    %578 = vector.multi_reduction <maximumf>, %577, %cst_119 [1] : vector<8x8xf32> to vector<8xf32>
    %579 = vector.shape_cast %578 : vector<8xf32> to vector<8x1xf32>
    %580 = vector.broadcast %579 : vector<8x1xf32> to vector<8x8xf32>
    %581 = arith.cmpf oeq, %577, %580 : vector<8x8xf32>
    %c2147483647_i32_120 = arith.constant 2147483647 : i32
    %582 = vector.broadcast %c2147483647_i32_120 : i32 to vector<8x8xi32>
    %583 = arith.select %581, %260, %582 : vector<8x8xi1>, vector<8x8xi32>
    %cst_121 = arith.constant dense<2147483647> : vector<8xi32>
    %584 = vector.multi_reduction <minsi>, %583, %cst_121 [1] : vector<8x8xi32> to vector<8xi32>
    %585 = arith.sitofp %584 : vector<8xi32> to vector<8xf32>
    %586 = vector.shape_cast %585 : vector<8xf32> to vector<8x1xf32>
    %587 = vector.shape_cast %509 : vector<8xi32> to vector<8x1xi32>
    %588 = vector.broadcast %587 : vector<8x1xi32> to vector<8x8xi32>
    %589 = arith.cmpi eq, %260, %588 : vector<8x8xi32>
    %cst_122 = arith.constant 1.000000e+00 : f32
    %590 = vector.broadcast %cst_122 : f32 to vector<8x8xf32>
    %591 = arith.select %589, %590, %498 : vector<8x8xi1>, vector<8x8xf32>
    %cst_123 = arith.constant 5.000000e-01 : f32
    %592 = vector.broadcast %cst_123 : f32 to vector<8x8xf32>
    %593 = arith.cmpf ogt, %591, %592 : vector<8x8xf32>
    %cst_124 = arith.constant 0xFF800000 : f32
    %594 = vector.broadcast %cst_124 : f32 to vector<8x8xf32>
    %595 = arith.select %593, %594, %577 : vector<8x8xi1>, vector<8x8xf32>
    %cst_125 = arith.constant dense<0xFF800000> : vector<8xf32>
    %596 = vector.multi_reduction <maximumf>, %595, %cst_125 [1] : vector<8x8xf32> to vector<8xf32>
    %597 = vector.shape_cast %596 : vector<8xf32> to vector<8x1xf32>
    %598 = vector.broadcast %597 : vector<8x1xf32> to vector<8x8xf32>
    %599 = arith.cmpf oeq, %595, %598 : vector<8x8xf32>
    %c2147483647_i32_126 = arith.constant 2147483647 : i32
    %600 = vector.broadcast %c2147483647_i32_126 : i32 to vector<8x8xi32>
    %601 = arith.select %599, %260, %600 : vector<8x8xi1>, vector<8x8xi32>
    %cst_127 = arith.constant dense<2147483647> : vector<8xi32>
    %602 = vector.multi_reduction <minsi>, %601, %cst_127 [1] : vector<8x8xi32> to vector<8xi32>
    %cst_128 = arith.constant dense<0xFF800000> : vector<8xf32>
    %603 = vector.multi_reduction <maximumf>, %595, %cst_128 [1] : vector<8x8xf32> to vector<8xf32>
    %604 = vector.shape_cast %603 : vector<8xf32> to vector<8x1xf32>
    %605 = vector.broadcast %604 : vector<8x1xf32> to vector<8x8xf32>
    %606 = arith.subf %595, %605 : vector<8x8xf32>
    %607 = math.exp %606 : vector<8x8xf32>
    %cst_129 = arith.constant dense<0.000000e+00> : vector<8xf32>
    %608 = vector.multi_reduction <add>, %607, %cst_129 [1] : vector<8x8xf32> to vector<8xf32>
    %609 = vector.shape_cast %608 : vector<8xf32> to vector<8x1xf32>
    %610 = math.log %609 : vector<8x1xf32>
    %611 = arith.addf %610, %604 : vector<8x1xf32>
    %612 = vector.broadcast %611 : vector<8x1xf32> to vector<8x8xf32>
    %613 = arith.subf %595, %612 : vector<8x8xf32>
    %614 = vector.shape_cast %602 : vector<8xi32> to vector<8x1xi32>
    %615 = vector.broadcast %614 : vector<8x1xi32> to vector<8x8xi32>
    %616 = arith.cmpi eq, %260, %615 : vector<8x8xi32>
    %cst_130 = arith.constant 0.000000e+00 : f32
    %617 = vector.broadcast %cst_130 : f32 to vector<8x8xf32>
    %618 = arith.select %616, %613, %617 : vector<8x8xi1>, vector<8x8xf32>
    %cst_131 = arith.constant dense<0.000000e+00> : vector<8xf32>
    %619 = vector.multi_reduction <add>, %618, %cst_131 [1] : vector<8x8xf32> to vector<8xf32>
    %c3_i32 = arith.constant 3 : i32
    %620 = vector.broadcast %c3_i32 : i32 to vector<8x128xi32>
    %621 = arith.cmpi eq, %261, %620 : vector<8x128xi32>
    %622 = arith.sitofp %602 : vector<8xi32> to vector<8xf32>
    %623 = vector.shape_cast %622 : vector<8xf32> to vector<8x1xf32>
    %624 = vector.shape_cast %623 : vector<8x1xf32> to vector<8x1xf32>
    %625 = vector.broadcast %624 : vector<8x1xf32> to vector<8x128xf32>
    %626 = arith.select %621, %625, %539 : vector<8x128xi1>, vector<8x128xf32>
    %c11_i32 = arith.constant 11 : i32
    %627 = vector.broadcast %c11_i32 : i32 to vector<8x128xi32>
    %628 = arith.cmpi eq, %261, %627 : vector<8x128xi32>
    %629 = vector.shape_cast %619 : vector<8xf32> to vector<8x1xf32>
    %630 = vector.shape_cast %629 : vector<8x1xf32> to vector<8x1xf32>
    %631 = vector.broadcast %630 : vector<8x1xf32> to vector<8x128xf32>
    %632 = arith.select %628, %631, %626 : vector<8x128xi1>, vector<8x128xf32>
    %633 = vector.broadcast %586 : vector<8x1xf32> to vector<8x128xf32>
    %634 = vector.broadcast %4 : vector<1x128xf32> to vector<8x128xf32>
    %635 = arith.mulf %633, %634 : vector<8x128xf32>
    %636 = vector.broadcast %5 : vector<1x128xf32> to vector<8x128xf32>
    %637 = arith.addf %635, %636 : vector<8x128xf32>
    %cst_132 = arith.constant 0.000000e+00 : f32
    %638 = vector.broadcast %cst_132 : f32 to vector<8x128xf32>
    %639 = arith.maximumf %637, %638 : vector<8x128xf32>
    %640 = tpu.concatenate %639, %573 in 1 : vector<8x128xf32>, vector<8x128xf32> -> vector<8x256xf32>
    %641 = arith.truncf %640 : vector<8x256xf32> to vector<8x256xbf16>
    %cst_133 = arith.constant dense<0.000000e+00> : vector<8x512xf32>
    %642 = tpu.matmul %641, %6, %cst_133 {dimension_numbers = #tpu.dot_dimension_numbers<[1], [0], [0], [1], [0, 0, 1, 1], [], []>} : vector<8x256xbf16>, vector<256x512xbf16>, vector<8x512xf32> -> vector<8x512xf32>
    %643 = vector.broadcast %7 : vector<1x512xf32> to vector<8x512xf32>
    %644 = arith.addf %642, %643 : vector<8x512xf32>
    %645 = vector.extract_strided_slice %644 {offsets = [0, 0], sizes = [8, 128], strides = [1, 1]} : vector<8x512xf32> to vector<8x128xf32>
    %646 = arith.negf %645 : vector<8x128xf32>
    %647 = math.exp %646 : vector<8x128xf32>
    %cst_134 = arith.constant 1.000000e+00 : f32
    %648 = vector.broadcast %cst_134 : f32 to vector<8x128xf32>
    %649 = arith.addf %648, %647 : vector<8x128xf32>
    %650 = arith.divf %648, %649 : vector<8x128xf32>
    %651 = vector.extract_strided_slice %644 {offsets = [0, 128], sizes = [8, 128], strides = [1, 1]} : vector<8x512xf32> to vector<8x128xf32>
    %652 = arith.negf %651 : vector<8x128xf32>
    %653 = math.exp %652 : vector<8x128xf32>
    %cst_135 = arith.constant 1.000000e+00 : f32
    %654 = vector.broadcast %cst_135 : f32 to vector<8x128xf32>
    %655 = arith.addf %654, %653 : vector<8x128xf32>
    %656 = arith.divf %654, %655 : vector<8x128xf32>
    %657 = vector.extract_strided_slice %644 {offsets = [0, 256], sizes = [8, 128], strides = [1, 1]} : vector<8x512xf32> to vector<8x128xf32>
    %658 = vector.extract_strided_slice %644 {offsets = [0, 384], sizes = [8, 128], strides = [1, 1]} : vector<8x512xf32> to vector<8x128xf32>
    %659 = arith.mulf %650, %658 : vector<8x128xf32>
    %660 = arith.addf %657, %659 : vector<8x128xf32>
    %661 = math.tanh %660 : vector<8x128xf32>
    %cst_136 = arith.constant 1.000000e+00 : f32
    %662 = vector.broadcast %cst_136 : f32 to vector<8x128xf32>
    %663 = arith.subf %662, %656 : vector<8x128xf32>
    %664 = arith.mulf %663, %661 : vector<8x128xf32>
    %665 = arith.mulf %656, %573 : vector<8x128xf32>
    %666 = arith.addf %664, %665 : vector<8x128xf32>
    %667 = arith.truncf %666 : vector<8x128xf32> to vector<8x128xbf16>
    %cst_137 = arith.constant dense<0.000000e+00> : vector<8x8xf32>
    %668 = tpu.matmul %667, %8, %cst_137 {dimension_numbers = #tpu.dot_dimension_numbers<[1], [0], [0], [1], [0, 0, 1, 1], [], []>} : vector<8x128xbf16>, vector<128x8xbf16>, vector<8x8xf32> -> vector<8x8xf32>
    %669 = vector.broadcast %9 : vector<1x8xf32> to vector<8x8xf32>
    %670 = arith.addf %668, %669 : vector<8x8xf32>
    %cst_138 = arith.constant dense<0xFF800000> : vector<8xf32>
    %671 = vector.multi_reduction <maximumf>, %670, %cst_138 [1] : vector<8x8xf32> to vector<8xf32>
    %672 = vector.shape_cast %671 : vector<8xf32> to vector<8x1xf32>
    %673 = vector.broadcast %672 : vector<8x1xf32> to vector<8x8xf32>
    %674 = arith.cmpf oeq, %670, %673 : vector<8x8xf32>
    %c2147483647_i32_139 = arith.constant 2147483647 : i32
    %675 = vector.broadcast %c2147483647_i32_139 : i32 to vector<8x8xi32>
    %676 = arith.select %674, %260, %675 : vector<8x8xi1>, vector<8x8xi32>
    %cst_140 = arith.constant dense<2147483647> : vector<8xi32>
    %677 = vector.multi_reduction <minsi>, %676, %cst_140 [1] : vector<8x8xi32> to vector<8xi32>
    %678 = arith.sitofp %677 : vector<8xi32> to vector<8xf32>
    %679 = vector.shape_cast %678 : vector<8xf32> to vector<8x1xf32>
    %680 = vector.shape_cast %602 : vector<8xi32> to vector<8x1xi32>
    %681 = vector.broadcast %680 : vector<8x1xi32> to vector<8x8xi32>
    %682 = arith.cmpi eq, %260, %681 : vector<8x8xi32>
    %cst_141 = arith.constant 1.000000e+00 : f32
    %683 = vector.broadcast %cst_141 : f32 to vector<8x8xf32>
    %684 = arith.select %682, %683, %591 : vector<8x8xi1>, vector<8x8xf32>
    %cst_142 = arith.constant 5.000000e-01 : f32
    %685 = vector.broadcast %cst_142 : f32 to vector<8x8xf32>
    %686 = arith.cmpf ogt, %684, %685 : vector<8x8xf32>
    %cst_143 = arith.constant 0xFF800000 : f32
    %687 = vector.broadcast %cst_143 : f32 to vector<8x8xf32>
    %688 = arith.select %686, %687, %670 : vector<8x8xi1>, vector<8x8xf32>
    %cst_144 = arith.constant dense<0xFF800000> : vector<8xf32>
    %689 = vector.multi_reduction <maximumf>, %688, %cst_144 [1] : vector<8x8xf32> to vector<8xf32>
    %690 = vector.shape_cast %689 : vector<8xf32> to vector<8x1xf32>
    %691 = vector.broadcast %690 : vector<8x1xf32> to vector<8x8xf32>
    %692 = arith.cmpf oeq, %688, %691 : vector<8x8xf32>
    %c2147483647_i32_145 = arith.constant 2147483647 : i32
    %693 = vector.broadcast %c2147483647_i32_145 : i32 to vector<8x8xi32>
    %694 = arith.select %692, %260, %693 : vector<8x8xi1>, vector<8x8xi32>
    %cst_146 = arith.constant dense<2147483647> : vector<8xi32>
    %695 = vector.multi_reduction <minsi>, %694, %cst_146 [1] : vector<8x8xi32> to vector<8xi32>
    %cst_147 = arith.constant dense<0xFF800000> : vector<8xf32>
    %696 = vector.multi_reduction <maximumf>, %688, %cst_147 [1] : vector<8x8xf32> to vector<8xf32>
    %697 = vector.shape_cast %696 : vector<8xf32> to vector<8x1xf32>
    %698 = vector.broadcast %697 : vector<8x1xf32> to vector<8x8xf32>
    %699 = arith.subf %688, %698 : vector<8x8xf32>
    %700 = math.exp %699 : vector<8x8xf32>
    %cst_148 = arith.constant dense<0.000000e+00> : vector<8xf32>
    %701 = vector.multi_reduction <add>, %700, %cst_148 [1] : vector<8x8xf32> to vector<8xf32>
    %702 = vector.shape_cast %701 : vector<8xf32> to vector<8x1xf32>
    %703 = math.log %702 : vector<8x1xf32>
    %704 = arith.addf %703, %697 : vector<8x1xf32>
    %705 = vector.broadcast %704 : vector<8x1xf32> to vector<8x8xf32>
    %706 = arith.subf %688, %705 : vector<8x8xf32>
    %707 = vector.shape_cast %695 : vector<8xi32> to vector<8x1xi32>
    %708 = vector.broadcast %707 : vector<8x1xi32> to vector<8x8xi32>
    %709 = arith.cmpi eq, %260, %708 : vector<8x8xi32>
    %cst_149 = arith.constant 0.000000e+00 : f32
    %710 = vector.broadcast %cst_149 : f32 to vector<8x8xf32>
    %711 = arith.select %709, %706, %710 : vector<8x8xi1>, vector<8x8xf32>
    %cst_150 = arith.constant dense<0.000000e+00> : vector<8xf32>
    %712 = vector.multi_reduction <add>, %711, %cst_150 [1] : vector<8x8xf32> to vector<8xf32>
    %c4_i32 = arith.constant 4 : i32
    %713 = vector.broadcast %c4_i32 : i32 to vector<8x128xi32>
    %714 = arith.cmpi eq, %261, %713 : vector<8x128xi32>
    %715 = arith.sitofp %695 : vector<8xi32> to vector<8xf32>
    %716 = vector.shape_cast %715 : vector<8xf32> to vector<8x1xf32>
    %717 = vector.shape_cast %716 : vector<8x1xf32> to vector<8x1xf32>
    %718 = vector.broadcast %717 : vector<8x1xf32> to vector<8x128xf32>
    %719 = arith.select %714, %718, %632 : vector<8x128xi1>, vector<8x128xf32>
    %c12_i32 = arith.constant 12 : i32
    %720 = vector.broadcast %c12_i32 : i32 to vector<8x128xi32>
    %721 = arith.cmpi eq, %261, %720 : vector<8x128xi32>
    %722 = vector.shape_cast %712 : vector<8xf32> to vector<8x1xf32>
    %723 = vector.shape_cast %722 : vector<8x1xf32> to vector<8x1xf32>
    %724 = vector.broadcast %723 : vector<8x1xf32> to vector<8x128xf32>
    %725 = arith.select %721, %724, %719 : vector<8x128xi1>, vector<8x128xf32>
    %726 = vector.broadcast %679 : vector<8x1xf32> to vector<8x128xf32>
    %727 = vector.broadcast %4 : vector<1x128xf32> to vector<8x128xf32>
    %728 = arith.mulf %726, %727 : vector<8x128xf32>
    %729 = vector.broadcast %5 : vector<1x128xf32> to vector<8x128xf32>
    %730 = arith.addf %728, %729 : vector<8x128xf32>
    %cst_151 = arith.constant 0.000000e+00 : f32
    %731 = vector.broadcast %cst_151 : f32 to vector<8x128xf32>
    %732 = arith.maximumf %730, %731 : vector<8x128xf32>
    %733 = tpu.concatenate %732, %666 in 1 : vector<8x128xf32>, vector<8x128xf32> -> vector<8x256xf32>
    %734 = arith.truncf %733 : vector<8x256xf32> to vector<8x256xbf16>
    %cst_152 = arith.constant dense<0.000000e+00> : vector<8x512xf32>
    %735 = tpu.matmul %734, %6, %cst_152 {dimension_numbers = #tpu.dot_dimension_numbers<[1], [0], [0], [1], [0, 0, 1, 1], [], []>} : vector<8x256xbf16>, vector<256x512xbf16>, vector<8x512xf32> -> vector<8x512xf32>
    %736 = vector.broadcast %7 : vector<1x512xf32> to vector<8x512xf32>
    %737 = arith.addf %735, %736 : vector<8x512xf32>
    %738 = vector.extract_strided_slice %737 {offsets = [0, 0], sizes = [8, 128], strides = [1, 1]} : vector<8x512xf32> to vector<8x128xf32>
    %739 = arith.negf %738 : vector<8x128xf32>
    %740 = math.exp %739 : vector<8x128xf32>
    %cst_153 = arith.constant 1.000000e+00 : f32
    %741 = vector.broadcast %cst_153 : f32 to vector<8x128xf32>
    %742 = arith.addf %741, %740 : vector<8x128xf32>
    %743 = arith.divf %741, %742 : vector<8x128xf32>
    %744 = vector.extract_strided_slice %737 {offsets = [0, 128], sizes = [8, 128], strides = [1, 1]} : vector<8x512xf32> to vector<8x128xf32>
    %745 = arith.negf %744 : vector<8x128xf32>
    %746 = math.exp %745 : vector<8x128xf32>
    %cst_154 = arith.constant 1.000000e+00 : f32
    %747 = vector.broadcast %cst_154 : f32 to vector<8x128xf32>
    %748 = arith.addf %747, %746 : vector<8x128xf32>
    %749 = arith.divf %747, %748 : vector<8x128xf32>
    %750 = vector.extract_strided_slice %737 {offsets = [0, 256], sizes = [8, 128], strides = [1, 1]} : vector<8x512xf32> to vector<8x128xf32>
    %751 = vector.extract_strided_slice %737 {offsets = [0, 384], sizes = [8, 128], strides = [1, 1]} : vector<8x512xf32> to vector<8x128xf32>
    %752 = arith.mulf %743, %751 : vector<8x128xf32>
    %753 = arith.addf %750, %752 : vector<8x128xf32>
    %754 = math.tanh %753 : vector<8x128xf32>
    %cst_155 = arith.constant 1.000000e+00 : f32
    %755 = vector.broadcast %cst_155 : f32 to vector<8x128xf32>
    %756 = arith.subf %755, %749 : vector<8x128xf32>
    %757 = arith.mulf %756, %754 : vector<8x128xf32>
    %758 = arith.mulf %749, %666 : vector<8x128xf32>
    %759 = arith.addf %757, %758 : vector<8x128xf32>
    %760 = arith.truncf %759 : vector<8x128xf32> to vector<8x128xbf16>
    %cst_156 = arith.constant dense<0.000000e+00> : vector<8x8xf32>
    %761 = tpu.matmul %760, %8, %cst_156 {dimension_numbers = #tpu.dot_dimension_numbers<[1], [0], [0], [1], [0, 0, 1, 1], [], []>} : vector<8x128xbf16>, vector<128x8xbf16>, vector<8x8xf32> -> vector<8x8xf32>
    %762 = vector.broadcast %9 : vector<1x8xf32> to vector<8x8xf32>
    %763 = arith.addf %761, %762 : vector<8x8xf32>
    %cst_157 = arith.constant dense<0xFF800000> : vector<8xf32>
    %764 = vector.multi_reduction <maximumf>, %763, %cst_157 [1] : vector<8x8xf32> to vector<8xf32>
    %765 = vector.shape_cast %764 : vector<8xf32> to vector<8x1xf32>
    %766 = vector.broadcast %765 : vector<8x1xf32> to vector<8x8xf32>
    %767 = arith.cmpf oeq, %763, %766 : vector<8x8xf32>
    %c2147483647_i32_158 = arith.constant 2147483647 : i32
    %768 = vector.broadcast %c2147483647_i32_158 : i32 to vector<8x8xi32>
    %769 = arith.select %767, %260, %768 : vector<8x8xi1>, vector<8x8xi32>
    %cst_159 = arith.constant dense<2147483647> : vector<8xi32>
    %770 = vector.multi_reduction <minsi>, %769, %cst_159 [1] : vector<8x8xi32> to vector<8xi32>
    %771 = arith.sitofp %770 : vector<8xi32> to vector<8xf32>
    %772 = vector.shape_cast %771 : vector<8xf32> to vector<8x1xf32>
    %773 = vector.shape_cast %695 : vector<8xi32> to vector<8x1xi32>
    %774 = vector.broadcast %773 : vector<8x1xi32> to vector<8x8xi32>
    %775 = arith.cmpi eq, %260, %774 : vector<8x8xi32>
    %cst_160 = arith.constant 1.000000e+00 : f32
    %776 = vector.broadcast %cst_160 : f32 to vector<8x8xf32>
    %777 = arith.select %775, %776, %684 : vector<8x8xi1>, vector<8x8xf32>
    %cst_161 = arith.constant 5.000000e-01 : f32
    %778 = vector.broadcast %cst_161 : f32 to vector<8x8xf32>
    %779 = arith.cmpf ogt, %777, %778 : vector<8x8xf32>
    %cst_162 = arith.constant 0xFF800000 : f32
    %780 = vector.broadcast %cst_162 : f32 to vector<8x8xf32>
    %781 = arith.select %779, %780, %763 : vector<8x8xi1>, vector<8x8xf32>
    %cst_163 = arith.constant dense<0xFF800000> : vector<8xf32>
    %782 = vector.multi_reduction <maximumf>, %781, %cst_163 [1] : vector<8x8xf32> to vector<8xf32>
    %783 = vector.shape_cast %782 : vector<8xf32> to vector<8x1xf32>
    %784 = vector.broadcast %783 : vector<8x1xf32> to vector<8x8xf32>
    %785 = arith.cmpf oeq, %781, %784 : vector<8x8xf32>
    %c2147483647_i32_164 = arith.constant 2147483647 : i32
    %786 = vector.broadcast %c2147483647_i32_164 : i32 to vector<8x8xi32>
    %787 = arith.select %785, %260, %786 : vector<8x8xi1>, vector<8x8xi32>
    %cst_165 = arith.constant dense<2147483647> : vector<8xi32>
    %788 = vector.multi_reduction <minsi>, %787, %cst_165 [1] : vector<8x8xi32> to vector<8xi32>
    %cst_166 = arith.constant dense<0xFF800000> : vector<8xf32>
    %789 = vector.multi_reduction <maximumf>, %781, %cst_166 [1] : vector<8x8xf32> to vector<8xf32>
    %790 = vector.shape_cast %789 : vector<8xf32> to vector<8x1xf32>
    %791 = vector.broadcast %790 : vector<8x1xf32> to vector<8x8xf32>
    %792 = arith.subf %781, %791 : vector<8x8xf32>
    %793 = math.exp %792 : vector<8x8xf32>
    %cst_167 = arith.constant dense<0.000000e+00> : vector<8xf32>
    %794 = vector.multi_reduction <add>, %793, %cst_167 [1] : vector<8x8xf32> to vector<8xf32>
    %795 = vector.shape_cast %794 : vector<8xf32> to vector<8x1xf32>
    %796 = math.log %795 : vector<8x1xf32>
    %797 = arith.addf %796, %790 : vector<8x1xf32>
    %798 = vector.broadcast %797 : vector<8x1xf32> to vector<8x8xf32>
    %799 = arith.subf %781, %798 : vector<8x8xf32>
    %800 = vector.shape_cast %788 : vector<8xi32> to vector<8x1xi32>
    %801 = vector.broadcast %800 : vector<8x1xi32> to vector<8x8xi32>
    %802 = arith.cmpi eq, %260, %801 : vector<8x8xi32>
    %cst_168 = arith.constant 0.000000e+00 : f32
    %803 = vector.broadcast %cst_168 : f32 to vector<8x8xf32>
    %804 = arith.select %802, %799, %803 : vector<8x8xi1>, vector<8x8xf32>
    %cst_169 = arith.constant dense<0.000000e+00> : vector<8xf32>
    %805 = vector.multi_reduction <add>, %804, %cst_169 [1] : vector<8x8xf32> to vector<8xf32>
    %c5_i32 = arith.constant 5 : i32
    %806 = vector.broadcast %c5_i32 : i32 to vector<8x128xi32>
    %807 = arith.cmpi eq, %261, %806 : vector<8x128xi32>
    %808 = arith.sitofp %788 : vector<8xi32> to vector<8xf32>
    %809 = vector.shape_cast %808 : vector<8xf32> to vector<8x1xf32>
    %810 = vector.shape_cast %809 : vector<8x1xf32> to vector<8x1xf32>
    %811 = vector.broadcast %810 : vector<8x1xf32> to vector<8x128xf32>
    %812 = arith.select %807, %811, %725 : vector<8x128xi1>, vector<8x128xf32>
    %c13_i32 = arith.constant 13 : i32
    %813 = vector.broadcast %c13_i32 : i32 to vector<8x128xi32>
    %814 = arith.cmpi eq, %261, %813 : vector<8x128xi32>
    %815 = vector.shape_cast %805 : vector<8xf32> to vector<8x1xf32>
    %816 = vector.shape_cast %815 : vector<8x1xf32> to vector<8x1xf32>
    %817 = vector.broadcast %816 : vector<8x1xf32> to vector<8x128xf32>
    %818 = arith.select %814, %817, %812 : vector<8x128xi1>, vector<8x128xf32>
    %819 = vector.broadcast %772 : vector<8x1xf32> to vector<8x128xf32>
    %820 = vector.broadcast %4 : vector<1x128xf32> to vector<8x128xf32>
    %821 = arith.mulf %819, %820 : vector<8x128xf32>
    %822 = vector.broadcast %5 : vector<1x128xf32> to vector<8x128xf32>
    %823 = arith.addf %821, %822 : vector<8x128xf32>
    %cst_170 = arith.constant 0.000000e+00 : f32
    %824 = vector.broadcast %cst_170 : f32 to vector<8x128xf32>
    %825 = arith.maximumf %823, %824 : vector<8x128xf32>
    %826 = tpu.concatenate %825, %759 in 1 : vector<8x128xf32>, vector<8x128xf32> -> vector<8x256xf32>
    %827 = arith.truncf %826 : vector<8x256xf32> to vector<8x256xbf16>
    %cst_171 = arith.constant dense<0.000000e+00> : vector<8x512xf32>
    %828 = tpu.matmul %827, %6, %cst_171 {dimension_numbers = #tpu.dot_dimension_numbers<[1], [0], [0], [1], [0, 0, 1, 1], [], []>} : vector<8x256xbf16>, vector<256x512xbf16>, vector<8x512xf32> -> vector<8x512xf32>
    %829 = vector.broadcast %7 : vector<1x512xf32> to vector<8x512xf32>
    %830 = arith.addf %828, %829 : vector<8x512xf32>
    %831 = vector.extract_strided_slice %830 {offsets = [0, 0], sizes = [8, 128], strides = [1, 1]} : vector<8x512xf32> to vector<8x128xf32>
    %832 = arith.negf %831 : vector<8x128xf32>
    %833 = math.exp %832 : vector<8x128xf32>
    %cst_172 = arith.constant 1.000000e+00 : f32
    %834 = vector.broadcast %cst_172 : f32 to vector<8x128xf32>
    %835 = arith.addf %834, %833 : vector<8x128xf32>
    %836 = arith.divf %834, %835 : vector<8x128xf32>
    %837 = vector.extract_strided_slice %830 {offsets = [0, 128], sizes = [8, 128], strides = [1, 1]} : vector<8x512xf32> to vector<8x128xf32>
    %838 = arith.negf %837 : vector<8x128xf32>
    %839 = math.exp %838 : vector<8x128xf32>
    %cst_173 = arith.constant 1.000000e+00 : f32
    %840 = vector.broadcast %cst_173 : f32 to vector<8x128xf32>
    %841 = arith.addf %840, %839 : vector<8x128xf32>
    %842 = arith.divf %840, %841 : vector<8x128xf32>
    %843 = vector.extract_strided_slice %830 {offsets = [0, 256], sizes = [8, 128], strides = [1, 1]} : vector<8x512xf32> to vector<8x128xf32>
    %844 = vector.extract_strided_slice %830 {offsets = [0, 384], sizes = [8, 128], strides = [1, 1]} : vector<8x512xf32> to vector<8x128xf32>
    %845 = arith.mulf %836, %844 : vector<8x128xf32>
    %846 = arith.addf %843, %845 : vector<8x128xf32>
    %847 = math.tanh %846 : vector<8x128xf32>
    %cst_174 = arith.constant 1.000000e+00 : f32
    %848 = vector.broadcast %cst_174 : f32 to vector<8x128xf32>
    %849 = arith.subf %848, %842 : vector<8x128xf32>
    %850 = arith.mulf %849, %847 : vector<8x128xf32>
    %851 = arith.mulf %842, %759 : vector<8x128xf32>
    %852 = arith.addf %850, %851 : vector<8x128xf32>
    %853 = arith.truncf %852 : vector<8x128xf32> to vector<8x128xbf16>
    %cst_175 = arith.constant dense<0.000000e+00> : vector<8x8xf32>
    %854 = tpu.matmul %853, %8, %cst_175 {dimension_numbers = #tpu.dot_dimension_numbers<[1], [0], [0], [1], [0, 0, 1, 1], [], []>} : vector<8x128xbf16>, vector<128x8xbf16>, vector<8x8xf32> -> vector<8x8xf32>
    %855 = vector.broadcast %9 : vector<1x8xf32> to vector<8x8xf32>
    %856 = arith.addf %854, %855 : vector<8x8xf32>
    %cst_176 = arith.constant dense<0xFF800000> : vector<8xf32>
    %857 = vector.multi_reduction <maximumf>, %856, %cst_176 [1] : vector<8x8xf32> to vector<8xf32>
    %858 = vector.shape_cast %857 : vector<8xf32> to vector<8x1xf32>
    %859 = vector.broadcast %858 : vector<8x1xf32> to vector<8x8xf32>
    %860 = arith.cmpf oeq, %856, %859 : vector<8x8xf32>
    %c2147483647_i32_177 = arith.constant 2147483647 : i32
    %861 = vector.broadcast %c2147483647_i32_177 : i32 to vector<8x8xi32>
    %862 = arith.select %860, %260, %861 : vector<8x8xi1>, vector<8x8xi32>
    %cst_178 = arith.constant dense<2147483647> : vector<8xi32>
    %863 = vector.multi_reduction <minsi>, %862, %cst_178 [1] : vector<8x8xi32> to vector<8xi32>
    %864 = arith.sitofp %863 : vector<8xi32> to vector<8xf32>
    %865 = vector.shape_cast %864 : vector<8xf32> to vector<8x1xf32>
    %866 = vector.shape_cast %788 : vector<8xi32> to vector<8x1xi32>
    %867 = vector.broadcast %866 : vector<8x1xi32> to vector<8x8xi32>
    %868 = arith.cmpi eq, %260, %867 : vector<8x8xi32>
    %cst_179 = arith.constant 1.000000e+00 : f32
    %869 = vector.broadcast %cst_179 : f32 to vector<8x8xf32>
    %870 = arith.select %868, %869, %777 : vector<8x8xi1>, vector<8x8xf32>
    %cst_180 = arith.constant 5.000000e-01 : f32
    %871 = vector.broadcast %cst_180 : f32 to vector<8x8xf32>
    %872 = arith.cmpf ogt, %870, %871 : vector<8x8xf32>
    %cst_181 = arith.constant 0xFF800000 : f32
    %873 = vector.broadcast %cst_181 : f32 to vector<8x8xf32>
    %874 = arith.select %872, %873, %856 : vector<8x8xi1>, vector<8x8xf32>
    %cst_182 = arith.constant dense<0xFF800000> : vector<8xf32>
    %875 = vector.multi_reduction <maximumf>, %874, %cst_182 [1] : vector<8x8xf32> to vector<8xf32>
    %876 = vector.shape_cast %875 : vector<8xf32> to vector<8x1xf32>
    %877 = vector.broadcast %876 : vector<8x1xf32> to vector<8x8xf32>
    %878 = arith.cmpf oeq, %874, %877 : vector<8x8xf32>
    %c2147483647_i32_183 = arith.constant 2147483647 : i32
    %879 = vector.broadcast %c2147483647_i32_183 : i32 to vector<8x8xi32>
    %880 = arith.select %878, %260, %879 : vector<8x8xi1>, vector<8x8xi32>
    %cst_184 = arith.constant dense<2147483647> : vector<8xi32>
    %881 = vector.multi_reduction <minsi>, %880, %cst_184 [1] : vector<8x8xi32> to vector<8xi32>
    %cst_185 = arith.constant dense<0xFF800000> : vector<8xf32>
    %882 = vector.multi_reduction <maximumf>, %874, %cst_185 [1] : vector<8x8xf32> to vector<8xf32>
    %883 = vector.shape_cast %882 : vector<8xf32> to vector<8x1xf32>
    %884 = vector.broadcast %883 : vector<8x1xf32> to vector<8x8xf32>
    %885 = arith.subf %874, %884 : vector<8x8xf32>
    %886 = math.exp %885 : vector<8x8xf32>
    %cst_186 = arith.constant dense<0.000000e+00> : vector<8xf32>
    %887 = vector.multi_reduction <add>, %886, %cst_186 [1] : vector<8x8xf32> to vector<8xf32>
    %888 = vector.shape_cast %887 : vector<8xf32> to vector<8x1xf32>
    %889 = math.log %888 : vector<8x1xf32>
    %890 = arith.addf %889, %883 : vector<8x1xf32>
    %891 = vector.broadcast %890 : vector<8x1xf32> to vector<8x8xf32>
    %892 = arith.subf %874, %891 : vector<8x8xf32>
    %893 = vector.shape_cast %881 : vector<8xi32> to vector<8x1xi32>
    %894 = vector.broadcast %893 : vector<8x1xi32> to vector<8x8xi32>
    %895 = arith.cmpi eq, %260, %894 : vector<8x8xi32>
    %cst_187 = arith.constant 0.000000e+00 : f32
    %896 = vector.broadcast %cst_187 : f32 to vector<8x8xf32>
    %897 = arith.select %895, %892, %896 : vector<8x8xi1>, vector<8x8xf32>
    %cst_188 = arith.constant dense<0.000000e+00> : vector<8xf32>
    %898 = vector.multi_reduction <add>, %897, %cst_188 [1] : vector<8x8xf32> to vector<8xf32>
    %c6_i32 = arith.constant 6 : i32
    %899 = vector.broadcast %c6_i32 : i32 to vector<8x128xi32>
    %900 = arith.cmpi eq, %261, %899 : vector<8x128xi32>
    %901 = arith.sitofp %881 : vector<8xi32> to vector<8xf32>
    %902 = vector.shape_cast %901 : vector<8xf32> to vector<8x1xf32>
    %903 = vector.shape_cast %902 : vector<8x1xf32> to vector<8x1xf32>
    %904 = vector.broadcast %903 : vector<8x1xf32> to vector<8x128xf32>
    %905 = arith.select %900, %904, %818 : vector<8x128xi1>, vector<8x128xf32>
    %c14_i32 = arith.constant 14 : i32
    %906 = vector.broadcast %c14_i32 : i32 to vector<8x128xi32>
    %907 = arith.cmpi eq, %261, %906 : vector<8x128xi32>
    %908 = vector.shape_cast %898 : vector<8xf32> to vector<8x1xf32>
    %909 = vector.shape_cast %908 : vector<8x1xf32> to vector<8x1xf32>
    %910 = vector.broadcast %909 : vector<8x1xf32> to vector<8x128xf32>
    %911 = arith.select %907, %910, %905 : vector<8x128xi1>, vector<8x128xf32>
    %912 = vector.broadcast %865 : vector<8x1xf32> to vector<8x128xf32>
    %913 = vector.broadcast %4 : vector<1x128xf32> to vector<8x128xf32>
    %914 = arith.mulf %912, %913 : vector<8x128xf32>
    %915 = vector.broadcast %5 : vector<1x128xf32> to vector<8x128xf32>
    %916 = arith.addf %914, %915 : vector<8x128xf32>
    %cst_189 = arith.constant 0.000000e+00 : f32
    %917 = vector.broadcast %cst_189 : f32 to vector<8x128xf32>
    %918 = arith.maximumf %916, %917 : vector<8x128xf32>
    %919 = tpu.concatenate %918, %852 in 1 : vector<8x128xf32>, vector<8x128xf32> -> vector<8x256xf32>
    %920 = arith.truncf %919 : vector<8x256xf32> to vector<8x256xbf16>
    %cst_190 = arith.constant dense<0.000000e+00> : vector<8x512xf32>
    %921 = tpu.matmul %920, %6, %cst_190 {dimension_numbers = #tpu.dot_dimension_numbers<[1], [0], [0], [1], [0, 0, 1, 1], [], []>} : vector<8x256xbf16>, vector<256x512xbf16>, vector<8x512xf32> -> vector<8x512xf32>
    %922 = vector.broadcast %7 : vector<1x512xf32> to vector<8x512xf32>
    %923 = arith.addf %921, %922 : vector<8x512xf32>
    %924 = vector.extract_strided_slice %923 {offsets = [0, 0], sizes = [8, 128], strides = [1, 1]} : vector<8x512xf32> to vector<8x128xf32>
    %925 = arith.negf %924 : vector<8x128xf32>
    %926 = math.exp %925 : vector<8x128xf32>
    %cst_191 = arith.constant 1.000000e+00 : f32
    %927 = vector.broadcast %cst_191 : f32 to vector<8x128xf32>
    %928 = arith.addf %927, %926 : vector<8x128xf32>
    %929 = arith.divf %927, %928 : vector<8x128xf32>
    %930 = vector.extract_strided_slice %923 {offsets = [0, 128], sizes = [8, 128], strides = [1, 1]} : vector<8x512xf32> to vector<8x128xf32>
    %931 = arith.negf %930 : vector<8x128xf32>
    %932 = math.exp %931 : vector<8x128xf32>
    %cst_192 = arith.constant 1.000000e+00 : f32
    %933 = vector.broadcast %cst_192 : f32 to vector<8x128xf32>
    %934 = arith.addf %933, %932 : vector<8x128xf32>
    %935 = arith.divf %933, %934 : vector<8x128xf32>
    %936 = vector.extract_strided_slice %923 {offsets = [0, 256], sizes = [8, 128], strides = [1, 1]} : vector<8x512xf32> to vector<8x128xf32>
    %937 = vector.extract_strided_slice %923 {offsets = [0, 384], sizes = [8, 128], strides = [1, 1]} : vector<8x512xf32> to vector<8x128xf32>
    %938 = arith.mulf %929, %937 : vector<8x128xf32>
    %939 = arith.addf %936, %938 : vector<8x128xf32>
    %940 = math.tanh %939 : vector<8x128xf32>
    %cst_193 = arith.constant 1.000000e+00 : f32
    %941 = vector.broadcast %cst_193 : f32 to vector<8x128xf32>
    %942 = arith.subf %941, %935 : vector<8x128xf32>
    %943 = arith.mulf %942, %940 : vector<8x128xf32>
    %944 = arith.mulf %935, %852 : vector<8x128xf32>
    %945 = arith.addf %943, %944 : vector<8x128xf32>
    %946 = arith.truncf %945 : vector<8x128xf32> to vector<8x128xbf16>
    %cst_194 = arith.constant dense<0.000000e+00> : vector<8x8xf32>
    %947 = tpu.matmul %946, %8, %cst_194 {dimension_numbers = #tpu.dot_dimension_numbers<[1], [0], [0], [1], [0, 0, 1, 1], [], []>} : vector<8x128xbf16>, vector<128x8xbf16>, vector<8x8xf32> -> vector<8x8xf32>
    %948 = vector.broadcast %9 : vector<1x8xf32> to vector<8x8xf32>
    %949 = arith.addf %947, %948 : vector<8x8xf32>
    %950 = vector.shape_cast %881 : vector<8xi32> to vector<8x1xi32>
    %951 = vector.broadcast %950 : vector<8x1xi32> to vector<8x8xi32>
    %952 = arith.cmpi eq, %260, %951 : vector<8x8xi32>
    %cst_195 = arith.constant 1.000000e+00 : f32
    %953 = vector.broadcast %cst_195 : f32 to vector<8x8xf32>
    %954 = arith.select %952, %953, %870 : vector<8x8xi1>, vector<8x8xf32>
    %cst_196 = arith.constant 5.000000e-01 : f32
    %955 = vector.broadcast %cst_196 : f32 to vector<8x8xf32>
    %956 = arith.cmpf ogt, %954, %955 : vector<8x8xf32>
    %cst_197 = arith.constant 0xFF800000 : f32
    %957 = vector.broadcast %cst_197 : f32 to vector<8x8xf32>
    %958 = arith.select %956, %957, %949 : vector<8x8xi1>, vector<8x8xf32>
    %cst_198 = arith.constant dense<0xFF800000> : vector<8xf32>
    %959 = vector.multi_reduction <maximumf>, %958, %cst_198 [1] : vector<8x8xf32> to vector<8xf32>
    %960 = vector.shape_cast %959 : vector<8xf32> to vector<8x1xf32>
    %961 = vector.broadcast %960 : vector<8x1xf32> to vector<8x8xf32>
    %962 = arith.cmpf oeq, %958, %961 : vector<8x8xf32>
    %c2147483647_i32_199 = arith.constant 2147483647 : i32
    %963 = vector.broadcast %c2147483647_i32_199 : i32 to vector<8x8xi32>
    %964 = arith.select %962, %260, %963 : vector<8x8xi1>, vector<8x8xi32>
    %cst_200 = arith.constant dense<2147483647> : vector<8xi32>
    %965 = vector.multi_reduction <minsi>, %964, %cst_200 [1] : vector<8x8xi32> to vector<8xi32>
    %cst_201 = arith.constant dense<0xFF800000> : vector<8xf32>
    %966 = vector.multi_reduction <maximumf>, %958, %cst_201 [1] : vector<8x8xf32> to vector<8xf32>
    %967 = vector.shape_cast %966 : vector<8xf32> to vector<8x1xf32>
    %968 = vector.broadcast %967 : vector<8x1xf32> to vector<8x8xf32>
    %969 = arith.subf %958, %968 : vector<8x8xf32>
    %970 = math.exp %969 : vector<8x8xf32>
    %cst_202 = arith.constant dense<0.000000e+00> : vector<8xf32>
    %971 = vector.multi_reduction <add>, %970, %cst_202 [1] : vector<8x8xf32> to vector<8xf32>
    %972 = vector.shape_cast %971 : vector<8xf32> to vector<8x1xf32>
    %973 = math.log %972 : vector<8x1xf32>
    %974 = arith.addf %973, %967 : vector<8x1xf32>
    %975 = vector.broadcast %974 : vector<8x1xf32> to vector<8x8xf32>
    %976 = arith.subf %958, %975 : vector<8x8xf32>
    %977 = vector.shape_cast %965 : vector<8xi32> to vector<8x1xi32>
    %978 = vector.broadcast %977 : vector<8x1xi32> to vector<8x8xi32>
    %979 = arith.cmpi eq, %260, %978 : vector<8x8xi32>
    %cst_203 = arith.constant 0.000000e+00 : f32
    %980 = vector.broadcast %cst_203 : f32 to vector<8x8xf32>
    %981 = arith.select %979, %976, %980 : vector<8x8xi1>, vector<8x8xf32>
    %cst_204 = arith.constant dense<0.000000e+00> : vector<8xf32>
    %982 = vector.multi_reduction <add>, %981, %cst_204 [1] : vector<8x8xf32> to vector<8xf32>
    %c7_i32 = arith.constant 7 : i32
    %983 = vector.broadcast %c7_i32 : i32 to vector<8x128xi32>
    %984 = arith.cmpi eq, %261, %983 : vector<8x128xi32>
    %985 = arith.sitofp %965 : vector<8xi32> to vector<8xf32>
    %986 = vector.shape_cast %985 : vector<8xf32> to vector<8x1xf32>
    %987 = vector.shape_cast %986 : vector<8x1xf32> to vector<8x1xf32>
    %988 = vector.broadcast %987 : vector<8x1xf32> to vector<8x128xf32>
    %989 = arith.select %984, %988, %911 : vector<8x128xi1>, vector<8x128xf32>
    %c15_i32 = arith.constant 15 : i32
    %990 = vector.broadcast %c15_i32 : i32 to vector<8x128xi32>
    %991 = arith.cmpi eq, %261, %990 : vector<8x128xi32>
    %992 = vector.shape_cast %982 : vector<8xf32> to vector<8x1xf32>
    %993 = vector.shape_cast %992 : vector<8x1xf32> to vector<8x1xf32>
    %994 = vector.broadcast %993 : vector<8x1xf32> to vector<8x128xf32>
    %995 = arith.select %991, %994, %989 : vector<8x128xi1>, vector<8x128xf32>
    %c0_205 = arith.constant 0 : index
    %c0_206 = arith.constant 0 : index
    %996 = vector.load %arg12[%c0_205, %c0_206] : memref<8x128xf32, #tpu.memory_space<vmem>>, vector<8x128xf32>
    tpu.vector_store %arg12[%c0_205, %c0_206], %995 {strides = array<i32>} : memref<8x128xf32, #tpu.memory_space<vmem>>, vector<8x128xf32>,
    return
  }
  func.func @transform_0(%arg0: i32) -> (i32, i32, i32) {
    %c0_i32 = arith.constant 0 : i32
    %c0_i32_0 = arith.constant 0 : i32
    %c0_i32_1 = arith.constant 0 : i32
    return %c0_i32, %arg0, %c0_i32_0 : i32, i32, i32
  }
  func.func @transform_1(%arg0: i32) -> (i32, i32) {
    %c0_i32 = arith.constant 0 : i32
    %c0_i32_0 = arith.constant 0 : i32
    %c0_i32_1 = arith.constant 0 : i32
    return %c0_i32, %c0_i32_0 : i32, i32
  }
  func.func @transform_2(%arg0: i32) -> (i32, i32) {
    %c0_i32 = arith.constant 0 : i32
    %c0_i32_0 = arith.constant 0 : i32
    %c0_i32_1 = arith.constant 0 : i32
    return %c0_i32, %c0_i32_0 : i32, i32
  }
  func.func @transform_3(%arg0: i32) -> (i32, i32) {
    %c0_i32 = arith.constant 0 : i32
    %c0_i32_0 = arith.constant 0 : i32
    %c0_i32_1 = arith.constant 0 : i32
    return %c0_i32, %c0_i32_0 : i32, i32
  }
  func.func @transform_4(%arg0: i32) -> (i32, i32) {
    %c0_i32 = arith.constant 0 : i32
    %c0_i32_0 = arith.constant 0 : i32
    %c0_i32_1 = arith.constant 0 : i32
    return %c0_i32, %c0_i32_0 : i32, i32
  }
  func.func @transform_5(%arg0: i32) -> (i32, i32) {
    %c0_i32 = arith.constant 0 : i32
    %c0_i32_0 = arith.constant 0 : i32
    %c0_i32_1 = arith.constant 0 : i32
    return %c0_i32, %c0_i32_0 : i32, i32
  }
  func.func @transform_6(%arg0: i32) -> (i32, i32) {
    %c0_i32 = arith.constant 0 : i32
    %c0_i32_0 = arith.constant 0 : i32
    %c0_i32_1 = arith.constant 0 : i32
    return %c0_i32, %c0_i32_0 : i32, i32
  }
  func.func @transform_7(%arg0: i32) -> (i32, i32) {
    %c0_i32 = arith.constant 0 : i32
    %c0_i32_0 = arith.constant 0 : i32
    %c0_i32_1 = arith.constant 0 : i32
    return %c0_i32, %c0_i32_0 : i32, i32
  }
  func.func @transform_8(%arg0: i32) -> (i32, i32) {
    %c0_i32 = arith.constant 0 : i32
    %c0_i32_0 = arith.constant 0 : i32
    %c0_i32_1 = arith.constant 0 : i32
    return %c0_i32, %c0_i32_0 : i32, i32
  }
  func.func @transform_9(%arg0: i32) -> (i32, i32) {
    %c0_i32 = arith.constant 0 : i32
    %c0_i32_0 = arith.constant 0 : i32
    %c0_i32_1 = arith.constant 0 : i32
    return %c0_i32, %c0_i32_0 : i32, i32
  }
  func.func @transform_10(%arg0: i32) -> (i32, i32) {
    %c0_i32 = arith.constant 0 : i32
    %c0_i32_0 = arith.constant 0 : i32
    %c0_i32_1 = arith.constant 0 : i32
    return %c0_i32, %c0_i32_0 : i32, i32
  }
  func.func @transform_11(%arg0: i32) -> (i32, i32) {
    %c0_i32 = arith.constant 0 : i32
    %c0_i32_0 = arith.constant 0 : i32
    return %arg0, %c0_i32 : i32, i32
  }
}

</mosaic_0001>

<bundles_post_ra>
// kernel: _forward.1
= control target key start
LH: loop header
LB: loop body
LE: loop exit
PB: predicated region body
PF: predicated region fallthrough
CT: control target
= control target key end

     0   :  { %v4545_v0 = vmov 0   ;;  %v4546_v6 = vmov 1   ;;  %v4547_v20 = vmov 0.0|0.0   ;;  %vm4549_vm0 = vmmov 0   ;;  %s7861_s0 = inlined_call_operand.vmem [shape: f32[8,8,2], index: 0, kind: input, shape index: {}]   ;;  %s7862_s3 = inlined_call_operand.vmem [shape: bf16[256,512], index: 3, kind: input, shape index: {}]   ;;  %s7863_s1 = inlined_call_operand.vmem [shape: f32[2,128], index: 1, kind: input, shape index: {}]   ;;  %s7864_s2 = inlined_call_operand.vmem [shape: f32[1,128], index: 2, kind: input, shape index: {}]   ;;  %s7865_s4 = inlined_call_operand.vmem [shape: f32[1,512], index: 4, kind: input, shape index: {}]   ;;  %s7866_s7 = inlined_call_operand.vmem [shape: bf16[256,512], index: 7, kind: input, shape index: {}]   ;;  %s7867_s5 = inlined_call_operand.vmem [shape: f32[1,128], index: 5, kind: input, shape index: {}]   ;;  %s7868_s6 = inlined_call_operand.vmem [shape: f32[1,128], index: 6, kind: input, shape index: {}]   ;;  %s7869_s9 = inlined_call_operand.vmem [shape: bf16[128,8], index: 9, kind: input, shape index: {}]   ;;  %s7870_s8 = inlined_call_operand.vmem [shape: f32[1,512], index: 8, kind: input, shape index: {}]   ;;  %s7871_s10 = inlined_call_operand.vmem [shape: f32[1,8], index: 10, kind: input, shape index: {}]   ;;  %s7872_s11 = inlined_call_operand.vmem [shape: f32[8,128], index: 11, kind: output, shape index: {}]  }
   0x1   :  { %3965 = vset.pattern.permute.xlu1 %v4545_v0  ;;  %3963 = vset.pattern.permute.xlu0 %v4545_v0  ;;  %v191_v1 = vld [vmem:[%s7861_s0 + $0x8] sm:$0xff]  ;;  %v190_v2 = vld [vmem:[%s7861_s0] sm:$0xff]  ;;  %v192_v7 = vld [vmem:[%s7861_s0 + $0x10] sm:$0xff]  ;;  %vm2036_vm1 = vcmask 64512  }
   0x2   :  { %205 = vperm.xlu1 %3965, %v191_v1   ;;  %200 = vperm.xlu0 %3963, %v190_v2   ;;  %v4620_v3 = vld [vmem:[%s7862_s3 + $0x4] ss:$16 sps:$4 sm:$0xff]   ;;  %v4625_v4 = vld [vmem:[%s7862_s3 + $0xc] ss:$16 sps:$4 sm:$0xff]   ;;  %v4630_v5 = vld [vmem:[%s7862_s3] ss:$16 sps:$4 sm:$0xff]  }
   0x3   :  { %8134 = vst [vmem:[#allocation2_spill] sm:$0xff] %v4620_v3  ;;  %8135 = vst [vmem:[#allocation3_spill] sm:$0xff] %v4625_v4  ;;  %v4638_v8 = vld [vmem:[%s7862_s3 + $0x8] ss:$16 sps:$4 sm:$0xff]   ;;  %v4643_v9 = vld [vmem:[%s7862_s3 + $0x24] ss:$16 sps:$4 sm:$0xff]   ;;  %659 = vmatprep.subr.bf16.mxu0 %v4620_v3  ;;  %700 = vmatprep.subr.bf16.mxu1 %v4625_v4 }
   0x4   :  { %v4650_v10 = vld [vmem:[%s7862_s3 + $0x2c] ss:$16 sps:$4 sm:$0xff]   ;;  %v4655_v11 = vld [vmem:[%s7862_s3 + $0x20] ss:$16 sps:$4 sm:$0xff]   ;;  %v4660_v12 = vld [vmem:[%s7862_s3 + $0x28] ss:$16 sps:$4 sm:$0xff]   ;;  %660 = vmatpush1.bf16.msra.mxu0 %v4630_v5  ;;  %701 = vmatpush1.bf16.msra.mxu1 %v4638_v8 }
   0x5   :  { %v4667_v13 = vld [vmem:[%s7862_s3 + $0x44] ss:$16 sps:$4 sm:$0xff]   ;;  %661 = vmatprep.subr.bf16.mxu0 %v4643_v9  ;;  %702 = vmatprep.subr.bf16.mxu1 %v4650_v10  ;;  %v4674_v14 = vld [vmem:[%s7862_s3 + $0x4c] ss:$16 sps:$4 sm:$0xff]   ;;  %v4682_v16 = vld [vmem:[%s7862_s3 + $0x40] ss:$16 sps:$4 sm:$0xff]  }
   0x6   :  { %3966 = vset.pattern.permute.xlu1 %v4546_v6  ;;  %3964 = vset.pattern.permute.xlu0 %v4546_v6  ;;  %v193_v15 = vld [vmem:[%s7861_s0 + $0x18] sm:$0xff]  ;;  %v4694_v18 = vld [vmem:[%s7862_s3 + $0x64] ss:$16 sps:$4 sm:$0xff]   ;;  %v4709_v22 = vld [vmem:[%s7862_s3 + $0x60] ss:$16 sps:$4 sm:$0xff]  }
   0x7   :  { %255 = vperm.xlu1 %3966, %v191_v1   ;;  %251 = vperm.xlu0 %3964, %v190_v2   ;;  %v4689_v17 = vld [vmem:[%s7862_s3 + $0x48] ss:$16 sps:$4 sm:$0xff]   ;;  %v4701_v19 = vld [vmem:[%s7862_s3 + $0x6c] ss:$16 sps:$4 sm:$0xff]   ;;  %v194_v21 = vld [vmem:[%s7861_s0 + $0x20] sm:$0xff] }
   0x8   :  { %662 = vmatpush1.bf16.msra.mxu0 %v4655_v11  ;;  %703 = vmatpush1.bf16.msra.mxu1 %v4660_v12  ;;  %v4714_v23 = vld [vmem:[%s7862_s3 + $0x68] ss:$16 sps:$4 sm:$0xff]   ;;  %v4721_v24 = vld [vmem:[%s7862_s3 + $0x84] ss:$16 sps:$4 sm:$0xff]   ;;  %v4728_v25 = vld [vmem:[%s7862_s3 + $0x8c] ss:$16 sps:$4 sm:$0xff]  }
   0x9   :  { %663 = vmatprep.subr.bf16.mxu0 %v4667_v13  ;;  %704 = vmatprep.subr.bf16.mxu1 %v4674_v14  ;;  %v195_v26 = vld [vmem:[%s7861_s0 + $0x28] sm:$0xff]  ;;  %v4736_v27 = vld [vmem:[%s7862_s3 + $0x80] ss:$16 sps:$4 sm:$0xff]   ;;  %v4748_v29 = vld [vmem:[%s7862_s3 + $0xa4] ss:$16 sps:$4 sm:$0xff]  }
   0xa   :  { %691 = vmatprep.mubr.bf16.mxu0 %v4547_v20  ;;  %732 = vmatprep.mubr.bf16.mxu1 %v4547_v20  ;;  %v4743_v28 = vld [vmem:[%s7862_s3 + $0x88] ss:$16 sps:$4 sm:$0xff]   ;;  %v4755_v30 = vld [vmem:[%s7862_s3 + $0xac] ss:$16 sps:$4 sm:$0xff]   ;;  %v196_v31 = vld [vmem:[%s7861_s0 + $0x30] sm:$0xff] }
   0xb   :  { %3967 = vset.pattern.permute.xlu1 %v4545_v0  ;;  %259 = vperm.xlu0 %3964, %v192_v7   ;;  %v4763_v32 = vld [vmem:[%s7862_s3 + $0xa0] ss:$16 sps:$4 sm:$0xff]   ;;  %v4768_v33 = vld [vmem:[%s7862_s3 + $0xa8] ss:$16 sps:$4 sm:$0xff]   ;;  %v4775_v34 = vld [vmem:[%s7862_s3 + $0xc4] ss:$16 sps:$4 sm:$0xff]  }
   0xc   :  { %210 = vperm.xlu1 %3967, %v192_v7   ;;  %664 = vmatpush1.bf16.msra.mxu0 %v4682_v16  ;;  %v4782_v35 = vld [vmem:[%s7862_s3 + $0xcc] ss:$16 sps:$4 sm:$0xff]   ;;  %v4790_v37 = vld [vmem:[%s7862_s3 + $0xc0] ss:$16 sps:$4 sm:$0xff]   ;;  %v4797_v38 = vld [vmem:[%s7862_s3 + $0xc8] ss:$16 sps:$4 sm:$0xff]  }
   0xd   :  { %705 = vmatpush1.bf16.msra.mxu1 %v4689_v17  ;;  %665 = vmatprep.subr.bf16.mxu0 %v4694_v18  ;;  %v197_v36 = vld [vmem:[%s7861_s0 + $0x38] sm:$0xff]  ;;  %v4802_v39 = vld [vmem:[%s7862_s3 + $0xe4] ss:$16 sps:$4 sm:$0xff]   ;;  %v4814_v41 = vld [vmem:[%s7862_s3 + $0xe0] ss:$16 sps:$4 sm:$0xff]  }
   0xe   :  { %706 = vmatprep.subr.bf16.mxu1 %v4701_v19  ;;  %v4809_v40 = vld [vmem:[%s7862_s3 + $0xec] ss:$16 sps:$4 sm:$0xff]   ;;  %v4819_v42 = vld [vmem:[%s7862_s3 + $0xe8] ss:$16 sps:$4 sm:$0xff]   ;;  %v4826_v43 = vld [vmem:[%s7862_s3 + $0x104] ss:$16 sps:$4 sm:$0xff]  }
   0xf   :  { %263 = vperm.xlu0 %3964, %v193_v15   ;;  %v4833_v44 = vld [vmem:[%s7862_s3 + $0x10c] ss:$16 sps:$4 sm:$0xff]   ;;  %v4840_v45 = vld [vmem:[%s7862_s3 + $0x100] ss:$16 sps:$4 sm:$0xff]   ;;  %v4845_v46 = vld [vmem:[%s7862_s3 + $0x108] ss:$16 sps:$4 sm:$0xff]  }
  0x10   :  { %215 = vperm.xlu1 %3967, %v193_v15   ;;  %666 = vmatpush1.bf16.msra.mxu0 %v4709_v22  ;;  %v4852_v47 = vld [vmem:[%s7862_s3 + $0x124] ss:$16 sps:$4 sm:$0xff]   ;;  %v4857_v48 = vld [vmem:[%s7862_s3 + $0x12c] ss:$16 sps:$4 sm:$0xff]   ;;  %v4862_v49 = vld [vmem:[%s7862_s3 + $0x120] ss:$16 sps:$4 sm:$0xff]  }
  0x11   :  { %707 = vmatpush1.bf16.msra.mxu1 %v4714_v23  ;;  %667 = vmatprep.subr.bf16.mxu0 %v4721_v24  ;;  %v4867_v50 = vld [vmem:[%s7862_s3 + $0x128] ss:$16 sps:$4 sm:$0xff]   ;;  %v4874_v51 = vld [vmem:[%s7862_s3 + $0x144] ss:$16 sps:$4 sm:$0xff]   ;;  %v4881_v52 = vld [vmem:[%s7862_s3 + $0x14c] ss:$16 sps:$4 sm:$0xff]  }
  0x12   :  { %708 = vmatprep.subr.bf16.mxu1 %v4728_v25  ;;  %v4886_v53 = vld [vmem:[%s7862_s3 + $0x140] ss:$16 sps:$4 sm:$0xff]   ;;  %v4893_v54 = vld [vmem:[%s7862_s3 + $0x148] ss:$16 sps:$4 sm:$0xff]   ;;  %v4900_v55 = vld [vmem:[%s7862_s3 + $0x164] ss:$16 sps:$4 sm:$0xff]  }
  0x13   :  { %267 = vperm.xlu0 %3964, %v194_v21   ;;  %8136 = vst [vmem:[#allocation4_spill] sm:$0xff] %v4900_v55  ;;  %v4905_v56 = vld [vmem:[%s7862_s3 + $0x16c] ss:$16 sps:$4 sm:$0xff]   ;;  %v4912_v57 = vld [vmem:[%s7862_s3 + $0x160] ss:$16 sps:$4 sm:$0xff]  }
  0x14   :  { %220 = vperm.xlu1 %3967, %v194_v21   ;;  %668 = vmatpush1.bf16.msra.mxu0 %v4736_v27  ;;  %8137 = vst [vmem:[#allocation5_spill] sm:$0xff] %v4905_v56  ;;  %8138 = vst [vmem:[#allocation6_spill] sm:$0xff] %v4912_v57  ;;  %v4917_v58 = vld [vmem:[%s7862_s3 + $0x168] ss:$16 sps:$4 sm:$0xff]   ;;  %v4924_v59 = vld [vmem:[%s7862_s3 + $0x184] ss:$16 sps:$4 sm:$0xff]  }
  0x15   :  { %709 = vmatpush1.bf16.msra.mxu1 %v4743_v28  ;;  %669 = vmatprep.subr.bf16.mxu0 %v4748_v29  ;;  %8139 = vst [vmem:[#allocation7_spill] sm:$0xff] %v4917_v58  ;;  %8140 = vst [vmem:[#allocation8_spill] sm:$0xff] %v4924_v59  ;;  %v4929_v60 = vld [vmem:[%s7862_s3 + $0x18c] ss:$16 sps:$4 sm:$0xff]   ;;  %v4936_v61 = vld [vmem:[%s7862_s3 + $0x180] ss:$16 sps:$4 sm:$0xff]  }
  0x16   :  { %710 = vmatprep.subr.bf16.mxu1 %v4755_v30  ;;  %8141 = vst [vmem:[#allocation9_spill] sm:$0xff] %v4929_v60  ;;  %8142 = vst [vmem:[#allocation10_spill] sm:$0xff] %v4936_v61  ;;  %v4941_v62 = vld [vmem:[%s7862_s3 + $0x188] ss:$16 sps:$4 sm:$0xff]   ;;  %v4948_v63 = vld [vmem:[%s7862_s3 + $0x1a4] ss:$16 sps:$4 sm:$0xff]  }
  0x17   :  { %271 = vperm.xlu0 %3964, %v195_v26   ;;  %8143 = vst [vmem:[#allocation11_spill] sm:$0xff] %v4941_v62  ;;  %8144 = vst [vmem:[#allocation12_spill] sm:$0xff] %v4948_v63  ;;  %v4953_v0 = vld [vmem:[%s7862_s3 + $0x1ac] ss:$16 sps:$4 sm:$0xff]   ;;  %v4960_v1 = vld [vmem:[%s7862_s3 + $0x1a0] ss:$16 sps:$4 sm:$0xff]  }
  0x18   :  { %225 = vperm.xlu1 %3967, %v195_v26   ;;  %670 = vmatpush1.bf16.msra.mxu0 %v4763_v32  ;;  %8145 = vst [vmem:[#allocation13_spill] sm:$0xff] %v4953_v0  ;;  %8146 = vst [vmem:[#allocation14_spill] sm:$0xff] %v4960_v1  ;;  %v4965_v2 = vld [vmem:[%s7862_s3 + $0x1a8] ss:$16 sps:$4 sm:$0xff]   ;;  %v4972_v6 = vld [vmem:[%s7862_s3 + $0x1c4] ss:$16 sps:$4 sm:$0xff]  }
  0x19   :  { %711 = vmatpush1.bf16.msra.mxu1 %v4768_v33  ;;  %671 = vmatprep.subr.bf16.mxu0 %v4775_v34  ;;  %8147 = vst [vmem:[#allocation15_spill] sm:$0xff] %v4965_v2  ;;  %8148 = vst [vmem:[#allocation16_spill] sm:$0xff] %v4972_v6  ;;  %v4977_v7 = vld [vmem:[%s7862_s3 + $0x1cc] ss:$16 sps:$4 sm:$0xff]   ;;  %v4984_v15 = vld [vmem:[%s7862_s3 + $0x1c0] ss:$16 sps:$4 sm:$0xff]  }
  0x1a   :  { %712 = vmatprep.subr.bf16.mxu1 %v4782_v35  ;;  %8149 = vst [vmem:[#allocation17_spill] sm:$0xff] %v4977_v7  ;;  %8150 = vst [vmem:[#allocation18_spill] sm:$0xff] %v4984_v15  ;;  %v4989_v20 = vld [vmem:[%s7862_s3 + $0x1c8] ss:$16 sps:$4 sm:$0xff]   ;;  %v4996_v21 = vld [vmem:[%s7862_s3 + $0x1e4] ss:$16 sps:$4 sm:$0xff]  }
  0x1b   :  { %275 = vperm.xlu0 %3964, %v196_v31   ;;  %8151 = vst [vmem:[#allocation19_spill] sm:$0xff] %v4989_v20  ;;  %8152 = vst [vmem:[#allocation20_spill] sm:$0xff] %v4996_v21  ;;  %v5001_v26 = vld [vmem:[%s7862_s3 + $0x1ec] ss:$16 sps:$4 sm:$0xff]  }
  0x1c   :  { %230 = vperm.xlu1 %3967, %v196_v31   ;;  %672 = vmatpush1.bf16.msra.mxu0 %v4790_v37  ;;  %8153 = vst [vmem:[#allocation21_spill] sm:$0xff] %v5001_v26  ;;  %v5008_v31 = vld [vmem:[%s7862_s3 + $0x1e0] ss:$16 sps:$4 sm:$0xff]  }
  0x1d   :  { %713 = vmatpush1.bf16.msra.mxu1 %v4797_v38  ;;  %673 = vmatprep.subr.bf16.mxu0 %v4802_v39  ;;  %8154 = vst [vmem:[#allocation22_spill] sm:$0xff] %v5008_v31 }
  0x1e   :  { %714 = vmatprep.subr.bf16.mxu1 %v4809_v40 }
  0x1f   :  { %279 = vperm.xlu0 %3964, %v197_v36  }
  0x20   :  { %235 = vperm.xlu1 %3967, %v197_v36   ;;  %674 = vmatpush1.bf16.msra.mxu0 %v4814_v41  ;;  %v5013_v36 = vld [vmem:[%s7862_s3 + $0x1e8] ss:$16 sps:$4 sm:$0xff]  }
  0x21   :  { %715 = vmatpush1.bf16.msra.mxu1 %v4819_v42  ;;  %675 = vmatprep.subr.bf16.mxu0 %v4826_v43  ;;  %8155 = vst [vmem:[#allocation23_spill] sm:$0xff] %v5013_v36 }
  0x22   :  { %716 = vmatprep.subr.bf16.mxu1 %v4833_v44 }
  0x24   :  { %676 = vmatpush1.bf16.msra.mxu0 %v4840_v45 }
  0x25   :  { %717 = vmatpush1.bf16.msra.mxu1 %v4845_v46  ;;  %677 = vmatprep.subr.bf16.mxu0 %v4852_v47 }
  0x26   :  { %718 = vmatprep.subr.bf16.mxu1 %v4857_v48 }
  0x28   :  { %678 = vmatpush1.bf16.msra.mxu0 %v4862_v49 }
  0x29   :  { %719 = vmatpush1.bf16.msra.mxu1 %v4867_v50  ;;  %679 = vmatprep.subr.bf16.mxu0 %v4874_v51 }
  0x2a   :  { %720 = vmatprep.subr.bf16.mxu1 %v4881_v52 }
  0x2c   :  { %680 = vmatpush1.bf16.msra.mxu0 %v4886_v53 }
  0x2d   :  { %721 = vmatpush1.bf16.msra.mxu1 %v4893_v54  ;;  %681 = vmatprep.subr.bf16.mxu0 %v4900_v55 }
  0x2e   :  { %722 = vmatprep.subr.bf16.mxu1 %v4905_v56 }
  0x30   :  { %682 = vmatpush1.bf16.msra.mxu0 %v4912_v57 }
  0x31   :  { %723 = vmatpush1.bf16.msra.mxu1 %v4917_v58  ;;  %683 = vmatprep.subr.bf16.mxu0 %v4924_v59 }
  0x32   :  { %724 = vmatprep.subr.bf16.mxu1 %v4929_v60 }
  0x34   :  { %684 = vmatpush1.bf16.msra.mxu0 %v4936_v61 }
  0x35   :  { %725 = vmatpush1.bf16.msra.mxu1 %v4941_v62  ;;  %685 = vmatprep.subr.bf16.mxu0 %v4948_v63  ;;  %v5042_v63 = vld [vmem:[%s7864_s2] ss:$0 sm:$0xff] }
  0x36   :  { %726 = vmatprep.subr.bf16.mxu1 %v4953_v0 }
  0x38   :  { %686 = vmatpush1.bf16.msra.mxu0 %v4960_v1 }
  0x39   :  { %727 = vmatpush1.bf16.msra.mxu1 %v4965_v2  ;;  %687 = vmatprep.subr.bf16.mxu0 %v4972_v6 }
  0x3a   :  { %728 = vmatprep.subr.bf16.mxu1 %v4977_v7 }
  0x3c   :  { %688 = vmatpush1.bf16.msra.mxu0 %v4984_v15 }
  0x3d   :  { %729 = vmatpush1.bf16.msra.mxu1 %v4989_v20  ;;  %689 = vmatprep.subr.bf16.mxu0 %v4996_v21  ;;  %v7891_v20 = vlaneseq }
  0x3e   :  { %730 = vmatprep.subr.bf16.mxu1 %v5001_v26 }
  0x3f   :  { %v5022_v15 = vshrl.u32 %v7891_v20, 7 }
  0x40   :  { %690 = vmatpush1.bf16.msra.mxu0 %v5008_v31  ;;  %v39_v31 = vld [vmem:[%s7863_s1] sm:$0x3] }
  0x41   :  { %731 = vmatpush1.bf16.msra.mxu1 %v5013_v36  ;;  %762 = vmatprep.subr.bf16.mxu0 %v4620_v3  ;;  %8156 = vst [vmem:[#allocation24_spill] sm:$0xff] %v5022_v15  ;;  %v5025_v7 = vsub.s32 0, %v5022_v15  ;;  %v5028_v6 = vsub.s32 1, %v5022_v15 }
  0x42   :  { %803 = vmatprep.subr.bf16.mxu1 %v4625_v4 }
  0x43   :  { %8157 = vst [vmem:[#allocation25_spill] sm:$0xff] %v5025_v7  ;;  %8158 = vst [vmem:[#allocation26_spill] sm:$0xff] %v5028_v6  ;;  %v5034_v3 = vrot.slane %v39_v31, %v5025_v7  ;;  %v285_v4 = vrot.slane %v39_v31, %v5028_v6 }
  0x81   :  { %v201_v26 = vpop.permute.xlu0 %200  ;;  %v206_v36 = vpop.permute.xlu1 %205 }
  0x82   :  { %v243_v20 = vmul.f32 %v5034_v3, %v206_v36  ;;  %v242_v1 = vmul.f32 %v5034_v3, %v201_v26 }
  0x86   :  { %v252_v21 = vpop.permute.xlu0 %251  ;;  %v256_v2 = vpop.permute.xlu1 %255 }
  0x87   :  { %v286_v0 = vmul.f32 %v285_v4, %v252_v21  ;;  %v287_v15 = vmul.f32 %v285_v4, %v256_v2 }
  0x89   :  { %v294_v62 = vadd.f32 %v286_v0, %v242_v1  ;;  %v295_v61 = vadd.f32 %v287_v15, %v243_v20 }
  0x8a   :  { %v260_v60 = vpop.permute.xlu0 %259 }
  0x8b   :  { %v5045_v7 = vadd.f32 %v5042_v63, %v295_v61  ;;  %v288_v31 = vmul.f32 %v285_v4, %v260_v60  ;;  %v211_v6 = vpop.permute.xlu1 %210  ;;  %v308_v36 = vadd.f32 %v5042_v63, %v294_v62 }
  0x8c   :  { %v244_v59 = vmul.f32 %v5034_v3, %v211_v6 }
  0x8d   :  { %v316_v26 = vpack.c.bf16 %v308_v36, %v308_v36 }
  0x8e   :  { %v296_v21 = vadd.f32 %v288_v31, %v244_v59  ;;  %v264_v2 = vpop.permute.xlu0 %263 }
  0x8f   :  { %v289_v58 = vmul.f32 %v285_v4, %v264_v2  ;;  %v216_v57 = vpop.permute.xlu1 %215  ;;  %692 = vmatmul.mubr.bf16.vlgmr.msra.gmra.mrb[0].mxu0 %v316_v26  ;;  %733 = vmatmul.mubr.bf16.vlgmr.msra.gmra.mrb[0].mxu1 %v316_v26 }
  0x90   :  { %v5050_v0 = vadd.f32 %v5042_v63, %v296_v21  ;;  %v245_v1 = vmul.f32 %v5034_v3, %v216_v57  ;;  %763 = vmatpush1.bf16.msra.mxu0 %v4630_v5  ;;  %804 = vmatpush1.bf16.msra.mxu1 %v4638_v8 }
  0x91   :  { %764 = vmatprep.subr.bf16.mxu0 %v4643_v9  ;;  %805 = vmatprep.subr.bf16.mxu1 %v4650_v10 }
  0x92   :  { %8159 = vst [vmem:[#allocation27_spill] sm:$0xff] %v5050_v0  ;;  %v297_v60 = vadd.f32 %v289_v58, %v245_v1  ;;  %v268_v59 = vpop.permute.xlu0 %267  ;;  %v8183_v0 = vld [vmem:[#allocation2_spill] sm:$0xff] }
  0x93   :  { %v290_v61 = vmul.f32 %v285_v4, %v268_v59  ;;  %v221_v62 = vpop.permute.xlu1 %220 }
  0x94   :  { %v5058_v6 = vadd.f32 %v5042_v63, %v297_v60  ;;  %v246_v15 = vmul.f32 %v5034_v3, %v221_v62  ;;  %765 = vmatpush1.bf16.msra.mxu0 %v4655_v11  ;;  %806 = vmatpush1.bf16.msra.mxu1 %v4660_v12 }
  0x95   :  { %766 = vmatprep.subr.bf16.mxu0 %v4667_v13  ;;  %807 = vmatprep.subr.bf16.mxu1 %v4674_v14 }
  0x96   :  { %8160 = vst [vmem:[#allocation28_spill] sm:$0xff] %v5058_v6  ;;  %v298_v57 = vadd.f32 %v290_v61, %v246_v15  ;;  %v272_v20 = vpop.permute.xlu0 %271  ;;  %v8182_v6 = vld [vmem:[#allocation23_spill] sm:$0xff] }
  0x97   :  { %v291_v31 = vmul.f32 %v285_v4, %v272_v20  ;;  %v226_v58 = vpop.permute.xlu1 %225 }
  0x98   :  { %v5066_v36 = vadd.f32 %v5042_v63, %v298_v57  ;;  %v247_v26 = vmul.f32 %v5034_v3, %v226_v58  ;;  %767 = vmatpush1.bf16.msra.mxu0 %v4682_v16  ;;  %808 = vmatpush1.bf16.msra.mxu1 %v4689_v17 }
  0x99   :  { %768 = vmatprep.subr.bf16.mxu0 %v4694_v18  ;;  %809 = vmatprep.subr.bf16.mxu1 %v4701_v19 }
  0x9a   :  { %8161 = vst [vmem:[#allocation29_spill] sm:$0xff] %v5066_v36  ;;  %v299_v21 = vadd.f32 %v291_v31, %v247_v26  ;;  %v276_v2 = vpop.permute.xlu0 %275  ;;  %v8181_v36 = vld [vmem:[#allocation22_spill] sm:$0xff] }
  0x9b   :  { %v292_v1 = vmul.f32 %v285_v4, %v276_v2  ;;  %v231_v60 = vpop.permute.xlu1 %230  ;;  %v8168_v2 = vld [vmem:[#allocation9_spill] sm:$0xff] }
  0x9c   :  { %v5074_v59 = vadd.f32 %v5042_v63, %v299_v21  ;;  %v248_v61 = vmul.f32 %v5034_v3, %v231_v60  ;;  %769 = vmatpush1.bf16.msra.mxu0 %v4709_v22  ;;  %810 = vmatpush1.bf16.msra.mxu1 %v4714_v23  ;;  %v8170_v60 = vld [vmem:[#allocation11_spill] sm:$0xff] }
  0x9d   :  { %770 = vmatprep.subr.bf16.mxu0 %v4721_v24  ;;  %811 = vmatprep.subr.bf16.mxu1 %v4728_v25 }
  0x9e   :  { %8162 = vst [vmem:[#allocation30_spill] sm:$0xff] %v5074_v59  ;;  %v300_v62 = vadd.f32 %v292_v1, %v248_v61  ;;  %v280_v15 = vpop.permute.xlu0 %279  ;;  %v8169_v1 = vld [vmem:[#allocation10_spill] sm:$0xff]  ;;  %v8171_v61 = vld [vmem:[#allocation12_spill] sm:$0xff]  ;;  %v8180_v59 = vld [vmem:[#allocation21_spill] sm:$0xff] }
  0x9f   :  { %v293_v57 = vmul.f32 %v285_v4, %v280_v15  ;;  %v236_v20 = vpop.permute.xlu1 %235  ;;  %v8166_v4 = vld [vmem:[#allocation7_spill] sm:$0xff]  ;;  %v8173_v15 = vld [vmem:[#allocation14_spill] sm:$0xff] }
  0xa0   :  { %v5082_v31 = vadd.f32 %v5042_v63, %v300_v62  ;;  %v249_v58 = vmul.f32 %v5034_v3, %v236_v20  ;;  %771 = vmatpush1.bf16.msra.mxu0 %v4736_v27  ;;  %812 = vmatpush1.bf16.msra.mxu1 %v4743_v28  ;;  %v8165_v3 = vld [vmem:[#allocation6_spill] sm:$0xff]  ;;  %v8172_v62 = vld [vmem:[#allocation13_spill] sm:$0xff]  ;;  %v8175_v20 = vld [vmem:[#allocation16_spill] sm:$0xff] }
  0xa1   :  { %772 = vmatprep.subr.bf16.mxu0 %v4748_v29  ;;  %813 = vmatprep.subr.bf16.mxu1 %v4755_v30 }
  0xa2   :  { %8163 = vst [vmem:[#allocation31_spill] sm:$0xff] %v5082_v31  ;;  %v301_v26 = vadd.f32 %v293_v57, %v249_v58  ;;  %v8174_v57 = vld [vmem:[#allocation15_spill] sm:$0xff]  ;;  %v8176_v58 = vld [vmem:[#allocation17_spill] sm:$0xff]  ;;  %v8179_v31 = vld [vmem:[#allocation20_spill] sm:$0xff] }
  0xa4   :  { %v5090_v21 = vadd.f32 %v5042_v63, %v301_v26  ;;  %773 = vmatpush1.bf16.msra.mxu0 %v4763_v32  ;;  %814 = vmatpush1.bf16.msra.mxu1 %v4768_v33  ;;  %v8167_v63 = vld [vmem:[#allocation8_spill] sm:$0xff]  ;;  %v8177_v26 = vld [vmem:[#allocation18_spill] sm:$0xff] }
  0xa5   :  { %774 = vmatprep.subr.bf16.mxu0 %v4775_v34  ;;  %815 = vmatprep.subr.bf16.mxu1 %v4782_v35 }
  0xa6   :  { %8164 = vst [vmem:[#allocation32_spill] sm:$0xff] %v5090_v21  ;;  %v8178_v21 = vld [vmem:[#allocation19_spill] sm:$0xff] }
  0xa8   :  { %775 = vmatpush1.bf16.msra.mxu0 %v4790_v37  ;;  %816 = vmatpush1.bf16.msra.mxu1 %v4797_v38 }
  0xa9   :  { %776 = vmatprep.subr.bf16.mxu0 %v4802_v39  ;;  %817 = vmatprep.subr.bf16.mxu1 %v4809_v40 }
  0xac   :  { %777 = vmatpush1.bf16.msra.mxu0 %v4814_v41  ;;  %818 = vmatpush1.bf16.msra.mxu1 %v4819_v42 }
  0xad   :  { %778 = vmatprep.subr.bf16.mxu0 %v4826_v43  ;;  %819 = vmatprep.subr.bf16.mxu1 %v4833_v44 }
  0xb0   :  { %779 = vmatpush1.bf16.msra.mxu0 %v4840_v45  ;;  %820 = vmatpush1.bf16.msra.mxu1 %v4845_v46 }
  0xb1   :  { %780 = vmatprep.subr.bf16.mxu0 %v4852_v47  ;;  %821 = vmatprep.subr.bf16.mxu1 %v4857_v48 }
  0xb4   :  { %781 = vmatpush1.bf16.msra.mxu0 %v4862_v49  ;;  %822 = vmatpush1.bf16.msra.mxu1 %v4867_v50 }
  0xb5   :  { %782 = vmatprep.subr.bf16.mxu0 %v4874_v51  ;;  %823 = vmatprep.subr.bf16.mxu1 %v4881_v52 }
  0xb8   :  { %783 = vmatpush1.bf16.msra.mxu0 %v4886_v53  ;;  %824 = vmatpush1.bf16.msra.mxu1 %v4893_v54 }
  0xb9   :  { %784 = vmatprep.subr.bf16.mxu0 %v4900_v55  ;;  %825 = vmatprep.subr.bf16.mxu1 %v4905_v56 }
  0xbc   :  { %785 = vmatpush1.bf16.msra.mxu0 %v8165_v3  ;;  %826 = vmatpush1.bf16.msra.mxu1 %v8166_v4  ;;  %v8189_v3 = vld [vmem:[#allocation24_spill] sm:$0xff] }
  0xbd   :  { %786 = vmatprep.subr.bf16.mxu0 %v8167_v63  ;;  %827 = vmatprep.subr.bf16.mxu1 %v8168_v2  ;;  %v7927_v56 = vsub.s32 2, %v8189_v3 }
  0xc0   :  { %787 = vmatpush1.bf16.msra.mxu0 %v8169_v1  ;;  %828 = vmatpush1.bf16.msra.mxu1 %v8170_v60 }
  0xc1   :  { %788 = vmatprep.subr.bf16.mxu0 %v8171_v61  ;;  %829 = vmatprep.subr.bf16.mxu1 %v8172_v62 }
  0xc4   :  { %789 = vmatpush1.bf16.msra.mxu0 %v8173_v15  ;;  %830 = vmatpush1.bf16.msra.mxu1 %v8174_v57  ;;  %v8184_v15 = vld [vmem:[#allocation3_spill] sm:$0xff] }
  0xc5   :  { %790 = vmatprep.subr.bf16.mxu0 %v8175_v20  ;;  %831 = vmatprep.subr.bf16.mxu1 %v8176_v58  ;;  %v105_v58 = vld [vmem:[%s7865_s4] sm:$0xf]  ;;  %v8185_v20 = vld [vmem:[#allocation25_spill] sm:$0xff] }
  0xc8   :  { %791 = vmatpush1.bf16.msra.mxu0 %v8177_v26  ;;  %832 = vmatpush1.bf16.msra.mxu1 %v8178_v21  ;;  %v5140_v26 = vrot.slane %v105_v58, %v8185_v20 }
  0xc9   :  { %792 = vmatprep.subr.bf16.mxu0 %v8179_v31  ;;  %833 = vmatprep.subr.bf16.mxu1 %v8180_v59  ;;  %v8187_v31 = vld [vmem:[#allocation26_spill] sm:$0xff] }
  0xca   :  { %8186 = vst [vmem:[#allocation33_spill] sm:$0xff] %v5140_v26  ;;  %v5143_v62 = vrot.slane %v105_v58, %v8187_v31  ;;  %v7924_v31 = vsub.s32 3, %v8189_v3  ;;  %v8207_v3 = vld [vmem:[#allocation22_spill] sm:$0xff] }
  0xcc   :  { %793 = vmatpush1.bf16.msra.mxu0 %v8181_v36  ;;  %834 = vmatpush1.bf16.msra.mxu1 %v8182_v6  ;;  %8188 = vst [vmem:[#allocation34_spill] sm:$0xff] %v5143_v62 }
  0xcd   :  { %865 = vmatprep.subr.bf16.mxu0 %v8183_v0  ;;  %906 = vmatprep.subr.bf16.mxu1 %v8184_v15 }
 0x162   :  { %v693_v21 = vpop.f32.mrb[0].mxu0  ;;  %v734_v57 = vpop.f32.mrb[0].mxu1 }
 0x163   :  { %v694_v36 = vadd.f32 %v693_v21, %v5140_v26  ;;  %v695_v59 = vpop.f32.mrb[1].mxu0  ;;  %v736_v6 = vpop.f32.mrb[1].mxu1 }
 0x164   :  { %v697_v61 = vpop.f32.mrb[2].mxu0  ;;  %v738_v0 = vpop.f32.mrb[2].mxu1  ;;  %v696_v2 = vadd.f32 %v695_v59, %v5143_v62 }
 0x165   :  { %v3618_v60 = vmul.f32 -1.442695, %v694_v36  ;;  %v698_v15 = vpop.f32.mrb[3].mxu0  ;;  %v739_v1 = vpop.f32.mrb[3].mxu1  ;;  %v5151_v61 = vrot.slane %v105_v58, %v7924_v31  ;;  %v5155_v0 = vrot.slane %v105_v58, %v7927_v56  ;;  %v8206_v56 = vld [vmem:[#allocation21_spill] sm:$0xff] }
 0x166   :  { %v3619_v63 = vmul.f32 -1.442695, %v696_v2 }
 0x167   :  { %4168 = vpow2.f32 %v3618_v60  ;;  %v737_v59 = vadd.f32 %v736_v6, %v5151_v61  ;;  %v735_v2 = vadd.f32 %v734_v57, %v5155_v0  ;;  %v760_v6 = vpack.c.bf16 %v5045_v7, %v5045_v7  ;;  %v8190_v7 = vld [vmem:[#allocation5_spill] sm:$0xff]  ;;  %v8193_v57 = vld [vmem:[#allocation8_spill] sm:$0xff] }
 0x168   :  { %4170 = vpow2.f32 %v3619_v63 }
 0x171   :  { %v4169_v20 = vpop.eup %4168 }
 0x172   :  { %v744_v4 = vadd.f32 1.0, %v4169_v20  ;;  %v4171_v21 = vpop.eup %4170 }
 0x173   :  { %v750_v36 = vadd.f32 1.0, %v4171_v21  ;;  %v8194_v21 = vld [vmem:[#allocation9_spill] sm:$0xff] }
 0x174   :  { %4172 = vrcp.f32 %v744_v4 }
 0x175   :  { %4174 = vrcp.f32 %v750_v36  ;;  %v8195_v36 = vld [vmem:[#allocation10_spill] sm:$0xff] }
 0x17e   :  { %v4173_v63 = vpop.eup %4172 }
 0x17f   :  { %v753_v4 = vmul.f32 %v4173_v63, %v737_v59  ;;  %v4175_v60 = vpop.eup %4174  ;;  %v8196_v59 = vld [vmem:[#allocation11_spill] sm:$0xff]  ;;  %v8197_v63 = vld [vmem:[#allocation12_spill] sm:$0xff] }
 0x180   :  { %v756_v15 = vsub.f32 1.0, %v4175_v60  ;;  %v758_v31 = vmul.f32 0.0, %v4175_v60  ;;  %v8201_v60 = vld [vmem:[#allocation16_spill] sm:$0xff] }
 0x181   :  { %v754_v1 = vadd.f32 %v753_v4, %v735_v2  ;;  %v8198_v2 = vld [vmem:[#allocation13_spill] sm:$0xff]  ;;  %v8199_v4 = vld [vmem:[#allocation14_spill] sm:$0xff] }
 0x183   :  { %4176 = vtanh.f32 %v754_v1  ;;  %v8200_v1 = vld [vmem:[#allocation15_spill] sm:$0xff] }
 0x18d   :  { %v4177_v20 = vpop.eup %4176 }
 0x18e   :  { %v757_v62 = vmul.f32 %v4177_v20, %v756_v15  ;;  %v8202_v15 = vld [vmem:[#allocation17_spill] sm:$0xff]  ;;  %v8203_v20 = vld [vmem:[#allocation18_spill] sm:$0xff] }
 0x190   :  { %v5159_v26 = vadd.f32 %v758_v31, %v757_v62  ;;  %v8191_v31 = vld [vmem:[#allocation6_spill] sm:$0xff]  ;;  %v8192_v62 = vld [vmem:[#allocation7_spill] sm:$0xff] }
 0x192   :  { %v761_v58 = vpack.c.bf16 %v5159_v26, %v5159_v26 }
 0x194   :  { %794 = vmatprep.mubr.bf16.mxu0 %v761_v58  ;;  %835 = vmatprep.mubr.bf16.mxu1 %v761_v58  ;;  %v8204_v58 = vld [vmem:[#allocation19_spill] sm:$0xff] }
 0x195   :  { %795 = vmatmul.mubr.bf16.vlgmr.msra.gmra.mrb[4].mxu0 %v760_v6  ;;  %836 = vmatmul.mubr.bf16.vlgmr.msra.gmra.mrb[4].mxu1 %v760_v6  ;;  %v8205_v6 = vld [vmem:[#allocation20_spill] sm:$0xff] }
 0x196   :  { %866 = vmatpush1.bf16.msra.mxu0 %v4630_v5  ;;  %907 = vmatpush1.bf16.msra.mxu1 %v4638_v8 }
 0x197   :  { %867 = vmatprep.subr.bf16.mxu0 %v4643_v9  ;;  %908 = vmatprep.subr.bf16.mxu1 %v4650_v10 }
 0x19a   :  { %868 = vmatpush1.bf16.msra.mxu0 %v4655_v11  ;;  %909 = vmatpush1.bf16.msra.mxu1 %v4660_v12 }
 0x19b   :  { %869 = vmatprep.subr.bf16.mxu0 %v4667_v13  ;;  %910 = vmatprep.subr.bf16.mxu1 %v4674_v14 }
 0x19e   :  { %870 = vmatpush1.bf16.msra.mxu0 %v4682_v16  ;;  %911 = vmatpush1.bf16.msra.mxu1 %v4689_v17 }
 0x19f   :  { %871 = vmatprep.subr.bf16.mxu0 %v4694_v18  ;;  %912 = vmatprep.subr.bf16.mxu1 %v4701_v19 }
 0x1a2   :  { %872 = vmatpush1.bf16.msra.mxu0 %v4709_v22  ;;  %913 = vmatpush1.bf16.msra.mxu1 %v4714_v23 }
 0x1a3   :  { %873 = vmatprep.subr.bf16.mxu0 %v4721_v24  ;;  %914 = vmatprep.subr.bf16.mxu1 %v4728_v25 }
 0x1a6   :  { %874 = vmatpush1.bf16.msra.mxu0 %v4736_v27  ;;  %915 = vmatpush1.bf16.msra.mxu1 %v4743_v28 }
 0x1a7   :  { %875 = vmatprep.subr.bf16.mxu0 %v4748_v29  ;;  %916 = vmatprep.subr.bf16.mxu1 %v4755_v30 }
 0x1aa   :  { %876 = vmatpush1.bf16.msra.mxu0 %v4763_v32  ;;  %917 = vmatpush1.bf16.msra.mxu1 %v4768_v33 }
 0x1ab   :  { %877 = vmatprep.subr.bf16.mxu0 %v4775_v34  ;;  %918 = vmatprep.subr.bf16.mxu1 %v4782_v35 }
 0x1ae   :  { %878 = vmatpush1.bf16.msra.mxu0 %v4790_v37  ;;  %919 = vmatpush1.bf16.msra.mxu1 %v4797_v38 }
 0x1af   :  { %879 = vmatprep.subr.bf16.mxu0 %v4802_v39  ;;  %920 = vmatprep.subr.bf16.mxu1 %v4809_v40 }
 0x1b2   :  { %880 = vmatpush1.bf16.msra.mxu0 %v4814_v41  ;;  %921 = vmatpush1.bf16.msra.mxu1 %v4819_v42 }
 0x1b3   :  { %881 = vmatprep.subr.bf16.mxu0 %v4826_v43  ;;  %922 = vmatprep.subr.bf16.mxu1 %v4833_v44 }
 0x1b6   :  { %882 = vmatpush1.bf16.msra.mxu0 %v4840_v45  ;;  %923 = vmatpush1.bf16.msra.mxu1 %v4845_v46 }
 0x1b7   :  { %883 = vmatprep.subr.bf16.mxu0 %v4852_v47  ;;  %924 = vmatprep.subr.bf16.mxu1 %v4857_v48 }
 0x1ba   :  { %884 = vmatpush1.bf16.msra.mxu0 %v4862_v49  ;;  %925 = vmatpush1.bf16.msra.mxu1 %v4867_v50 }
 0x1bb   :  { %885 = vmatprep.subr.bf16.mxu0 %v4874_v51  ;;  %926 = vmatprep.subr.bf16.mxu1 %v4881_v52 }
 0x1be   :  { %886 = vmatpush1.bf16.msra.mxu0 %v4886_v53  ;;  %927 = vmatpush1.bf16.msra.mxu1 %v4893_v54 }
 0x1bf   :  { %887 = vmatprep.subr.bf16.mxu0 %v4900_v55  ;;  %928 = vmatprep.subr.bf16.mxu1 %v8190_v7 }
 0x1c2   :  { %888 = vmatpush1.bf16.msra.mxu0 %v8191_v31  ;;  %929 = vmatpush1.bf16.msra.mxu1 %v8192_v62 }
 0x1c3   :  { %889 = vmatprep.subr.bf16.mxu0 %v8193_v57  ;;  %930 = vmatprep.subr.bf16.mxu1 %v8194_v21 }
 0x1c6   :  { %890 = vmatpush1.bf16.msra.mxu0 %v8195_v36  ;;  %931 = vmatpush1.bf16.msra.mxu1 %v8196_v59  ;;  %v8211_v59 = vld [vmem:[#allocation33_spill] sm:$0xff] }
 0x1c7   :  { %891 = vmatprep.subr.bf16.mxu0 %v8197_v63  ;;  %932 = vmatprep.subr.bf16.mxu1 %v8198_v2  ;;  %v8208_v63 = vld [vmem:[#allocation23_spill] sm:$0xff]  ;;  %v8209_v2 = vld [vmem:[#allocation2_spill] sm:$0xff] }
 0x1ca   :  { %892 = vmatpush1.bf16.msra.mxu0 %v8199_v4  ;;  %933 = vmatpush1.bf16.msra.mxu1 %v8200_v1  ;;  %v8210_v4 = vld [vmem:[#allocation3_spill] sm:$0xff] }
 0x1cb   :  { %893 = vmatprep.subr.bf16.mxu0 %v8201_v60  ;;  %934 = vmatprep.subr.bf16.mxu1 %v8202_v15 }
 0x1ce   :  { %894 = vmatpush1.bf16.msra.mxu0 %v8203_v20  ;;  %935 = vmatpush1.bf16.msra.mxu1 %v8204_v58 }
 0x1cf   :  { %895 = vmatprep.subr.bf16.mxu0 %v8205_v6  ;;  %936 = vmatprep.subr.bf16.mxu1 %v8206_v56  ;;  %v8212_v56 = vld [vmem:[#allocation34_spill] sm:$0xff] }
 0x1d2   :  { %896 = vmatpush1.bf16.msra.mxu0 %v8207_v3  ;;  %937 = vmatpush1.bf16.msra.mxu1 %v8208_v63 }
 0x1d3   :  { %968 = vmatprep.subr.bf16.mxu0 %v8209_v2  ;;  %1009 = vmatprep.subr.bf16.mxu1 %v8210_v4 }
 0x268   :  { %v796_v1 = vpop.f32.mrb[4].mxu0  ;;  %v837_v60 = vpop.f32.mrb[4].mxu1 }
 0x269   :  { %v797_v15 = vadd.f32 %v796_v1, %v8211_v59  ;;  %v798_v36 = vpop.f32.mrb[5].mxu0  ;;  %v839_v20 = vpop.f32.mrb[5].mxu1  ;;  %v838_v59 = vadd.f32 %v837_v60, %v5155_v0 }
 0x26a   :  { %v800_v21 = vpop.f32.mrb[6].mxu0  ;;  %v841_v58 = vpop.f32.mrb[6].mxu1  ;;  %v799_v31 = vadd.f32 %v798_v36, %v8212_v56  ;;  %v840_v55 = vadd.f32 %v839_v20, %v5151_v61 }
 0x26b   :  { %v3620_v57 = vmul.f32 -1.442695, %v797_v15  ;;  %v801_v6 = vpop.f32.mrb[7].mxu0  ;;  %v842_v62 = vpop.f32.mrb[7].mxu1 }
 0x26c   :  { %v3621_v3 = vmul.f32 -1.442695, %v799_v31  ;;  %v8213_v6 = vld [vmem:[#allocation27_spill] sm:$0xff] }
 0x26d   :  { %4178 = vpow2.f32 %v3620_v57  ;;  %v863_v20 = vpack.c.bf16 %v8213_v6, %v8213_v6 }
 0x26e   :  { %4180 = vpow2.f32 %v3621_v3 }
 0x277   :  { %v4179_v63 = vpop.eup %4178 }
 0x278   :  { %v847_v2 = vadd.f32 1.0, %v4179_v63  ;;  %v4181_v4 = vpop.eup %4180 }
 0x279   :  { %v853_v7 = vadd.f32 1.0, %v4181_v4 }
 0x27a   :  { %4182 = vrcp.f32 %v847_v2 }
 0x27b   :  { %4184 = vrcp.f32 %v853_v7 }
 0x284   :  { %v4183_v1 = vpop.eup %4182 }
 0x285   :  { %v856_v21 = vmul.f32 %v4183_v1, %v840_v55  ;;  %v4185_v62 = vpop.eup %4184  ;;  %v8236_v55 = vld [vmem:[#allocation33_spill] sm:$0xff] }
 0x286   :  { %v859_v58 = vsub.f32 1.0, %v4185_v62  ;;  %v861_v3 = vmul.f32 %v4185_v62, %v5159_v26 }
 0x287   :  { %v857_v15 = vadd.f32 %v856_v21, %v838_v59 }
 0x289   :  { %4186 = vtanh.f32 %v857_v15 }
 0x293   :  { %v4187_v36 = vpop.eup %4186 }
 0x294   :  { %v860_v57 = vmul.f32 %v4187_v36, %v859_v58 }
 0x296   :  { %v5234_v31 = vadd.f32 %v861_v3, %v860_v57 }
 0x298   :  { %v864_v63 = vpack.c.bf16 %v5234_v31, %v5234_v31 }
 0x29a   :  { %897 = vmatprep.mubr.bf16.mxu0 %v864_v63  ;;  %938 = vmatprep.mubr.bf16.mxu1 %v864_v63 }
 0x29b   :  { %898 = vmatmul.mubr.bf16.vlgmr.msra.gmra.mrb[8].mxu0 %v863_v20  ;;  %939 = vmatmul.mubr.bf16.vlgmr.msra.gmra.mrb[8].mxu1 %v863_v20 }
 0x29c   :  { %969 = vmatpush1.bf16.msra.mxu0 %v4630_v5  ;;  %1010 = vmatpush1.bf16.msra.mxu1 %v4638_v8  ;;  %v8214_v5 = vld [vmem:[#allocation4_spill] sm:$0xff]  ;;  %v8215_v8 = vld [vmem:[#allocation5_spill] sm:$0xff] }
 0x29d   :  { %970 = vmatprep.subr.bf16.mxu0 %v4643_v9  ;;  %1011 = vmatprep.subr.bf16.mxu1 %v4650_v10  ;;  %v8216_v9 = vld [vmem:[#allocation6_spill] sm:$0xff]  ;;  %v8217_v10 = vld [vmem:[#allocation7_spill] sm:$0xff] }
 0x2a0   :  { %971 = vmatpush1.bf16.msra.mxu0 %v4655_v11  ;;  %1012 = vmatpush1.bf16.msra.mxu1 %v4660_v12  ;;  %v8218_v11 = vld [vmem:[#allocation8_spill] sm:$0xff]  ;;  %v8219_v12 = vld [vmem:[#allocation9_spill] sm:$0xff] }
 0x2a1   :  { %972 = vmatprep.subr.bf16.mxu0 %v4667_v13  ;;  %1013 = vmatprep.subr.bf16.mxu1 %v4674_v14  ;;  %v8220_v13 = vld [vmem:[#allocation10_spill] sm:$0xff]  ;;  %v8221_v14 = vld [vmem:[#allocation11_spill] sm:$0xff] }
 0x2a4   :  { %973 = vmatpush1.bf16.msra.mxu0 %v4682_v16  ;;  %1014 = vmatpush1.bf16.msra.mxu1 %v4689_v17  ;;  %v8222_v16 = vld [vmem:[#allocation12_spill] sm:$0xff]  ;;  %v8223_v17 = vld [vmem:[#allocation13_spill] sm:$0xff] }
 0x2a5   :  { %974 = vmatprep.subr.bf16.mxu0 %v4694_v18  ;;  %1015 = vmatprep.subr.bf16.mxu1 %v4701_v19  ;;  %v8224_v18 = vld [vmem:[#allocation14_spill] sm:$0xff]  ;;  %v8225_v19 = vld [vmem:[#allocation15_spill] sm:$0xff] }
 0x2a8   :  { %975 = vmatpush1.bf16.msra.mxu0 %v4709_v22  ;;  %1016 = vmatpush1.bf16.msra.mxu1 %v4714_v23  ;;  %v8226_v22 = vld [vmem:[#allocation16_spill] sm:$0xff]  ;;  %v8227_v23 = vld [vmem:[#allocation17_spill] sm:$0xff] }
 0x2a9   :  { %976 = vmatprep.subr.bf16.mxu0 %v4721_v24  ;;  %1017 = vmatprep.subr.bf16.mxu1 %v4728_v25  ;;  %v8228_v24 = vld [vmem:[#allocation18_spill] sm:$0xff]  ;;  %v8229_v25 = vld [vmem:[#allocation19_spill] sm:$0xff] }
 0x2ac   :  { %977 = vmatpush1.bf16.msra.mxu0 %v4736_v27  ;;  %1018 = vmatpush1.bf16.msra.mxu1 %v4743_v28  ;;  %v8230_v27 = vld [vmem:[#allocation20_spill] sm:$0xff]  ;;  %v8231_v28 = vld [vmem:[#allocation21_spill] sm:$0xff] }
 0x2ad   :  { %978 = vmatprep.subr.bf16.mxu0 %v4748_v29  ;;  %1019 = vmatprep.subr.bf16.mxu1 %v4755_v30  ;;  %v8232_v29 = vld [vmem:[#allocation22_spill] sm:$0xff]  ;;  %v8233_v30 = vld [vmem:[#allocation23_spill] sm:$0xff] }
 0x2b0   :  { %979 = vmatpush1.bf16.msra.mxu0 %v4763_v32  ;;  %1020 = vmatpush1.bf16.msra.mxu1 %v4768_v33  ;;  %v5305_v32 = vld [vmem:[%s7862_s3 + $0x4] ss:$16 sps:$4 sm:$0xff]   ;;  %v5311_v33 = vld [vmem:[%s7862_s3 + $0xc] ss:$16 sps:$4 sm:$0xff]  }
 0x2b1   :  { %980 = vmatprep.subr.bf16.mxu0 %v4775_v34  ;;  %1021 = vmatprep.subr.bf16.mxu1 %v4782_v35  ;;  %8234 = vst [vmem:[#allocation2_spill] sm:$0xff] %v5305_v32  ;;  %8235 = vst [vmem:[#allocation3_spill] sm:$0xff] %v5311_v33 }
 0x2b4   :  { %981 = vmatpush1.bf16.msra.mxu0 %v4790_v37  ;;  %1022 = vmatpush1.bf16.msra.mxu1 %v4797_v38 }
 0x2b5   :  { %982 = vmatprep.subr.bf16.mxu0 %v4802_v39  ;;  %1023 = vmatprep.subr.bf16.mxu1 %v4809_v40 }
 0x2b8   :  { %983 = vmatpush1.bf16.msra.mxu0 %v4814_v41  ;;  %1024 = vmatpush1.bf16.msra.mxu1 %v4819_v42 }
 0x2b9   :  { %984 = vmatprep.subr.bf16.mxu0 %v4826_v43  ;;  %1025 = vmatprep.subr.bf16.mxu1 %v4833_v44 }
 0x2bc   :  { %985 = vmatpush1.bf16.msra.mxu0 %v4840_v45  ;;  %1026 = vmatpush1.bf16.msra.mxu1 %v4845_v46 }
 0x2bd   :  { %986 = vmatprep.subr.bf16.mxu0 %v4852_v47  ;;  %1027 = vmatprep.subr.bf16.mxu1 %v4857_v48 }
 0x2c0   :  { %987 = vmatpush1.bf16.msra.mxu0 %v4862_v49  ;;  %1028 = vmatpush1.bf16.msra.mxu1 %v4867_v50 }
 0x2c1   :  { %988 = vmatprep.subr.bf16.mxu0 %v4874_v51  ;;  %1029 = vmatprep.subr.bf16.mxu1 %v4881_v52 }
 0x2c4   :  { %989 = vmatpush1.bf16.msra.mxu0 %v4886_v53  ;;  %1030 = vmatpush1.bf16.msra.mxu1 %v4893_v54 }
 0x2c5   :  { %990 = vmatprep.subr.bf16.mxu0 %v8214_v5  ;;  %1031 = vmatprep.subr.bf16.mxu1 %v8215_v8 }
 0x2c8   :  { %991 = vmatpush1.bf16.msra.mxu0 %v8216_v9  ;;  %1032 = vmatpush1.bf16.msra.mxu1 %v8217_v10 }
 0x2c9   :  { %992 = vmatprep.subr.bf16.mxu0 %v8218_v11  ;;  %1033 = vmatprep.subr.bf16.mxu1 %v8219_v12 }
 0x2cc   :  { %993 = vmatpush1.bf16.msra.mxu0 %v8220_v13  ;;  %1034 = vmatpush1.bf16.msra.mxu1 %v8221_v14 }
 0x2cd   :  { %994 = vmatprep.subr.bf16.mxu0 %v8222_v16  ;;  %1035 = vmatprep.subr.bf16.mxu1 %v8223_v17 }
 0x2d0   :  { %995 = vmatpush1.bf16.msra.mxu0 %v8224_v18  ;;  %1036 = vmatpush1.bf16.msra.mxu1 %v8225_v19 }
 0x2d1   :  { %996 = vmatprep.subr.bf16.mxu0 %v8226_v22  ;;  %1037 = vmatprep.subr.bf16.mxu1 %v8227_v23 }
 0x2d4   :  { %997 = vmatpush1.bf16.msra.mxu0 %v8228_v24  ;;  %1038 = vmatpush1.bf16.msra.mxu1 %v8229_v25 }
 0x2d5   :  { %998 = vmatprep.subr.bf16.mxu0 %v8230_v27  ;;  %1039 = vmatprep.subr.bf16.mxu1 %v8231_v28 }
 0x2d8   :  { %999 = vmatpush1.bf16.msra.mxu0 %v8232_v29  ;;  %1040 = vmatpush1.bf16.msra.mxu1 %v8233_v30 }
 0x2d9   :  { %1071 = vmatprep.subr.bf16.mxu0 %v5305_v32  ;;  %1112 = vmatprep.subr.bf16.mxu1 %v5311_v33 }
 0x36e   :  { %v899_v34 = vpop.f32.mrb[8].mxu0  ;;  %v940_v35 = vpop.f32.mrb[8].mxu1 }
 0x36f   :  { %v900_v26 = vadd.f32 %v899_v34, %v8236_v55  ;;  %v901_v7 = vpop.f32.mrb[9].mxu0  ;;  %v942_v59 = vpop.f32.mrb[9].mxu1  ;;  %v941_v20 = vadd.f32 %v940_v35, %v5155_v0  ;;  %v5328_v35 = vld [vmem:[%s7862_s3] ss:$16 sps:$4 sm:$0xff]  }
 0x370   :  { %v903_v60 = vpop.f32.mrb[10].mxu0  ;;  %v944_v2 = vpop.f32.mrb[10].mxu1  ;;  %v902_v15 = vadd.f32 %v901_v7, %v8212_v56  ;;  %v943_v63 = vadd.f32 %v942_v59, %v5151_v61 }
 0x371   :  { %v3622_v4 = vmul.f32 -1.442695, %v900_v26  ;;  %v904_v1 = vpop.f32.mrb[11].mxu0  ;;  %v945_v21 = vpop.f32.mrb[11].mxu1 }
 0x372   :  { %v3623_v62 = vmul.f32 -1.442695, %v902_v15 }
 0x373   :  { %4188 = vpow2.f32 %v3622_v4 }
 0x374   :  { %4190 = vpow2.f32 %v3623_v62  ;;  %v8237_v62 = vld [vmem:[#allocation28_spill] sm:$0xff] }
 0x375   :  { %v966_v59 = vpack.c.bf16 %v8237_v62, %v8237_v62  ;;  %v5430_v62 = vld [vmem:[%s7862_s3 + $0x88] ss:$16 sps:$4 sm:$0xff]  }
 0x376   :  { %8240 = vst [vmem:[#allocation4_spill] sm:$0xff] %v5430_v62 }
 0x37d   :  { %v4189_v58 = vpop.eup %4188 }
 0x37e   :  { %v950_v36 = vadd.f32 1.0, %v4189_v58  ;;  %v4191_v57 = vpop.eup %4190  ;;  %v5340_v58 = vld [vmem:[%s7862_s3 + $0x24] ss:$16 sps:$4 sm:$0xff]  }
 0x37f   :  { %v956_v3 = vadd.f32 1.0, %v4191_v57  ;;  %v5352_v57 = vld [vmem:[%s7862_s3 + $0x20] ss:$16 sps:$4 sm:$0xff]  }
 0x380   :  { %4192 = vrcp.f32 %v950_v36  ;;  %v5346_v36 = vld [vmem:[%s7862_s3 + $0x2c] ss:$16 sps:$4 sm:$0xff]  }
 0x381   :  { %4194 = vrcp.f32 %v956_v3  ;;  %v5358_v3 = vld [vmem:[%s7862_s3 + $0x28] ss:$16 sps:$4 sm:$0xff]  }
 0x38a   :  { %v4193_v6 = vpop.eup %4192 }
 0x38b   :  { %v959_v34 = vmul.f32 %v4193_v6, %v943_v63  ;;  %v4195_v60 = vpop.eup %4194  ;;  %v5364_v63 = vld [vmem:[%s7862_s3 + $0x44] ss:$16 sps:$4 sm:$0xff]   ;;  %v5370_v6 = vld [vmem:[%s7862_s3 + $0x4c] ss:$16 sps:$4 sm:$0xff]  }
 0x38c   :  { %v962_v2 = vsub.f32 1.0, %v4195_v60  ;;  %v964_v1 = vmul.f32 %v4195_v60, %v5234_v31  ;;  %v5334_v31 = vld [vmem:[%s7862_s3 + $0x8] ss:$16 sps:$4 sm:$0xff]   ;;  %v5394_v60 = vld [vmem:[%s7862_s3 + $0x6c] ss:$16 sps:$4 sm:$0xff]  }
 0x38d   :  { %v960_v26 = vadd.f32 %v959_v34, %v941_v20  ;;  %v5376_v20 = vld [vmem:[%s7862_s3 + $0x40] ss:$16 sps:$4 sm:$0xff]   ;;  %v5382_v34 = vld [vmem:[%s7862_s3 + $0x48] ss:$16 sps:$4 sm:$0xff]  }
 0x38f   :  { %4196 = vtanh.f32 %v960_v26  ;;  %v5388_v26 = vld [vmem:[%s7862_s3 + $0x64] ss:$16 sps:$4 sm:$0xff]  }
 0x399   :  { %v4197_v7 = vpop.eup %4196 }
 0x39a   :  { %v963_v4 = vmul.f32 %v4197_v7, %v962_v2  ;;  %v5400_v2 = vld [vmem:[%s7862_s3 + $0x60] ss:$16 sps:$4 sm:$0xff]   ;;  %v5406_v7 = vld [vmem:[%s7862_s3 + $0x68] ss:$16 sps:$4 sm:$0xff]  }
 0x39c   :  { %v5319_v21 = vadd.f32 %v964_v1, %v963_v4  ;;  %v5412_v4 = vld [vmem:[%s7862_s3 + $0x84] ss:$16 sps:$4 sm:$0xff]   ;;  %v5418_v1 = vld [vmem:[%s7862_s3 + $0x8c] ss:$16 sps:$4 sm:$0xff]  }
 0x39d   :  { %8238 = vst [vmem:[#allocation34_spill] sm:$0xff] %v5418_v1 }
 0x39e   :  { %v967_v15 = vpack.c.bf16 %v5319_v21, %v5319_v21 }
 0x3a0   :  { %1000 = vmatprep.mubr.bf16.mxu0 %v967_v15  ;;  %1041 = vmatprep.mubr.bf16.mxu1 %v967_v15  ;;  %v5424_v15 = vld [vmem:[%s7862_s3 + $0x80] ss:$16 sps:$4 sm:$0xff]  }
 0x3a1   :  { %1001 = vmatmul.mubr.bf16.vlgmr.msra.gmra.mrb[12].mxu0 %v966_v59  ;;  %1042 = vmatmul.mubr.bf16.vlgmr.msra.gmra.mrb[12].mxu1 %v966_v59  ;;  %8239 = vst [vmem:[#allocation27_spill] sm:$0xff] %v5424_v15  ;;  %v5436_v59 = vld [vmem:[%s7862_s3 + $0xa4] ss:$16 sps:$4 sm:$0xff]  }
 0x3a2   :  { %1072 = vmatpush1.bf16.msra.mxu0 %v5328_v35  ;;  %1113 = vmatpush1.bf16.msra.mxu1 %v5334_v31  ;;  %8241 = vst [vmem:[#allocation5_spill] sm:$0xff] %v5436_v59 }
 0x3a3   :  { %1073 = vmatprep.subr.bf16.mxu0 %v5340_v58  ;;  %1114 = vmatprep.subr.bf16.mxu1 %v5346_v36 }
 0x3a6   :  { %1074 = vmatpush1.bf16.msra.mxu0 %v5352_v57  ;;  %1115 = vmatpush1.bf16.msra.mxu1 %v5358_v3 }
 0x3a7   :  { %1075 = vmatprep.subr.bf16.mxu0 %v5364_v63  ;;  %1116 = vmatprep.subr.bf16.mxu1 %v5370_v6 }
 0x3aa   :  { %1076 = vmatpush1.bf16.msra.mxu0 %v5376_v20  ;;  %1117 = vmatpush1.bf16.msra.mxu1 %v5382_v34 }
 0x3ab   :  { %1077 = vmatprep.subr.bf16.mxu0 %v5388_v26  ;;  %1118 = vmatprep.subr.bf16.mxu1 %v5394_v60 }
 0x3ae   :  { %1078 = vmatpush1.bf16.msra.mxu0 %v5400_v2  ;;  %1119 = vmatpush1.bf16.msra.mxu1 %v5406_v7 }
 0x3af   :  { %1079 = vmatprep.subr.bf16.mxu0 %v5412_v4  ;;  %1120 = vmatprep.subr.bf16.mxu1 %v5418_v1  ;;  %v5442_v1 = vld [vmem:[%s7862_s3 + $0xac] ss:$16 sps:$4 sm:$0xff]  }
 0x3b0   :  { %8242 = vst [vmem:[#allocation6_spill] sm:$0xff] %v5442_v1 }
 0x3b2   :  { %1080 = vmatpush1.bf16.msra.mxu0 %v5424_v15  ;;  %1121 = vmatpush1.bf16.msra.mxu1 %v5430_v62  ;;  %v5448_v15 = vld [vmem:[%s7862_s3 + $0xa0] ss:$16 sps:$4 sm:$0xff]   ;;  %v5454_v62 = vld [vmem:[%s7862_s3 + $0xa8] ss:$16 sps:$4 sm:$0xff]  }
 0x3b3   :  { %1081 = vmatprep.subr.bf16.mxu0 %v5436_v59  ;;  %1122 = vmatprep.subr.bf16.mxu1 %v5442_v1  ;;  %v5460_v59 = vld [vmem:[%s7862_s3 + $0xc4] ss:$16 sps:$4 sm:$0xff]   ;;  %v5466_v1 = vld [vmem:[%s7862_s3 + $0xcc] ss:$16 sps:$4 sm:$0xff]  }
 0x3b6   :  { %1082 = vmatpush1.bf16.msra.mxu0 %v5448_v15  ;;  %1123 = vmatpush1.bf16.msra.mxu1 %v5454_v62 }
 0x3b7   :  { %1083 = vmatprep.subr.bf16.mxu0 %v5460_v59  ;;  %1124 = vmatprep.subr.bf16.mxu1 %v5466_v1 }
 0x3ba   :  { %1084 = vmatpush1.bf16.msra.mxu0 %v4790_v37  ;;  %1125 = vmatpush1.bf16.msra.mxu1 %v4797_v38 }
 0x3bb   :  { %1085 = vmatprep.subr.bf16.mxu0 %v4802_v39  ;;  %1126 = vmatprep.subr.bf16.mxu1 %v4809_v40 }
 0x3be   :  { %1086 = vmatpush1.bf16.msra.mxu0 %v4814_v41  ;;  %1127 = vmatpush1.bf16.msra.mxu1 %v4819_v42 }
 0x3bf   :  { %1087 = vmatprep.subr.bf16.mxu0 %v4826_v43  ;;  %1128 = vmatprep.subr.bf16.mxu1 %v4833_v44 }
 0x3c2   :  { %1088 = vmatpush1.bf16.msra.mxu0 %v4840_v45  ;;  %1129 = vmatpush1.bf16.msra.mxu1 %v4845_v46 }
 0x3c3   :  { %1089 = vmatprep.subr.bf16.mxu0 %v4852_v47  ;;  %1130 = vmatprep.subr.bf16.mxu1 %v4857_v48 }
 0x3c6   :  { %1090 = vmatpush1.bf16.msra.mxu0 %v4862_v49  ;;  %1131 = vmatpush1.bf16.msra.mxu1 %v4867_v50 }
 0x3c7   :  { %1091 = vmatprep.subr.bf16.mxu0 %v4874_v51  ;;  %1132 = vmatprep.subr.bf16.mxu1 %v4881_v52 }
 0x3ca   :  { %1092 = vmatpush1.bf16.msra.mxu0 %v4886_v53  ;;  %1133 = vmatpush1.bf16.msra.mxu1 %v4893_v54 }
 0x3cb   :  { %1093 = vmatprep.subr.bf16.mxu0 %v8214_v5  ;;  %1134 = vmatprep.subr.bf16.mxu1 %v8215_v8 }
 0x3ce   :  { %1094 = vmatpush1.bf16.msra.mxu0 %v8216_v9  ;;  %1135 = vmatpush1.bf16.msra.mxu1 %v8217_v10 }
 0x3cf   :  { %1095 = vmatprep.subr.bf16.mxu0 %v8218_v11  ;;  %1136 = vmatprep.subr.bf16.mxu1 %v8219_v12 }
 0x3d2   :  { %1096 = vmatpush1.bf16.msra.mxu0 %v8220_v13  ;;  %1137 = vmatpush1.bf16.msra.mxu1 %v8221_v14 }
 0x3d3   :  { %1097 = vmatprep.subr.bf16.mxu0 %v8222_v16  ;;  %1138 = vmatprep.subr.bf16.mxu1 %v8223_v17 }
 0x3d6   :  { %1098 = vmatpush1.bf16.msra.mxu0 %v8224_v18  ;;  %1139 = vmatpush1.bf16.msra.mxu1 %v8225_v19  ;;  %v8243_v18 = vld [vmem:[#allocation29_spill] sm:$0xff] }
 0x3d7   :  { %1099 = vmatprep.subr.bf16.mxu0 %v8226_v22  ;;  %1140 = vmatprep.subr.bf16.mxu1 %v8227_v23  ;;  %v1069_v19 = vpack.c.bf16 %v8243_v18, %v8243_v18  ;;  %v8244_v22 = vld [vmem:[#allocation34_spill] sm:$0xff]  ;;  %v8245_v23 = vld [vmem:[#allocation27_spill] sm:$0xff] }
 0x3d8   :  { %v5733_v18 = vld [vmem:[%s7862_s3 + $0x1cc] ss:$16 sps:$4 sm:$0xff]  }
 0x3d9   :  { %8262 = vst [vmem:[#allocation20_spill] sm:$0xff] %v5733_v18 }
 0x3da   :  { %1100 = vmatpush1.bf16.msra.mxu0 %v8228_v24  ;;  %1141 = vmatpush1.bf16.msra.mxu1 %v8229_v25  ;;  %v8246_v24 = vld [vmem:[#allocation4_spill] sm:$0xff]  ;;  %v8247_v25 = vld [vmem:[#allocation5_spill] sm:$0xff] }
 0x3db   :  { %1101 = vmatprep.subr.bf16.mxu0 %v8230_v27  ;;  %1142 = vmatprep.subr.bf16.mxu1 %v8231_v28  ;;  %v8248_v27 = vld [vmem:[#allocation6_spill] sm:$0xff] }
 0x3dc   :  { %v5547_v28 = vld [vmem:[%s7862_s3 + $0xc0] ss:$16 sps:$4 sm:$0xff]  }
 0x3de   :  { %1102 = vmatpush1.bf16.msra.mxu0 %v8232_v29  ;;  %1143 = vmatpush1.bf16.msra.mxu1 %v8233_v30  ;;  %v5553_v29 = vld [vmem:[%s7862_s3 + $0xc8] ss:$16 sps:$4 sm:$0xff]   ;;  %v5559_v30 = vld [vmem:[%s7862_s3 + $0xe4] ss:$16 sps:$4 sm:$0xff]  }
 0x3df   :  { %1174 = vmatprep.subr.bf16.mxu0 %v5305_v32  ;;  %1215 = vmatprep.subr.bf16.mxu1 %v5311_v33 }
 0x474   :  { %v1002_v37 = vpop.f32.mrb[12].mxu0  ;;  %v1043_v38 = vpop.f32.mrb[12].mxu1 }
 0x475   :  { %v1003_v39 = vadd.f32 %v1002_v37, %v8236_v55  ;;  %v1004_v40 = vpop.f32.mrb[13].mxu0  ;;  %v1045_v41 = vpop.f32.mrb[13].mxu1  ;;  %v1044_v5 = vadd.f32 %v1043_v38, %v5155_v0  ;;  %v5571_v37 = vld [vmem:[%s7862_s3 + $0xe0] ss:$16 sps:$4 sm:$0xff]   ;;  %v5577_v38 = vld [vmem:[%s7862_s3 + $0xe8] ss:$16 sps:$4 sm:$0xff]  }
 0x476   :  { %v1006_v42 = vpop.f32.mrb[14].mxu0  ;;  %v1047_v43 = vpop.f32.mrb[14].mxu1  ;;  %v1005_v47 = vadd.f32 %v1004_v40, %v8212_v56  ;;  %v1046_v53 = vadd.f32 %v1045_v41, %v5151_v61  ;;  %v5589_v40 = vld [vmem:[%s7862_s3 + $0x10c] ss:$16 sps:$4 sm:$0xff]   ;;  %v5595_v41 = vld [vmem:[%s7862_s3 + $0x100] ss:$16 sps:$4 sm:$0xff]  }
 0x477   :  { %v3624_v44 = vmul.f32 -1.442695, %v1003_v39  ;;  %v1007_v45 = vpop.f32.mrb[15].mxu0  ;;  %v1048_v46 = vpop.f32.mrb[15].mxu1  ;;  %v5583_v39 = vld [vmem:[%s7862_s3 + $0x104] ss:$16 sps:$4 sm:$0xff]  }
 0x478   :  { %v3625_v48 = vmul.f32 -1.442695, %v1005_v47  ;;  %v5601_v42 = vld [vmem:[%s7862_s3 + $0x108] ss:$16 sps:$4 sm:$0xff]   ;;  %v5607_v43 = vld [vmem:[%s7862_s3 + $0x124] ss:$16 sps:$4 sm:$0xff]  }
 0x479   :  { %4198 = vpow2.f32 %v3624_v44  ;;  %v5613_v44 = vld [vmem:[%s7862_s3 + $0x12c] ss:$16 sps:$4 sm:$0xff]   ;;  %v5619_v45 = vld [vmem:[%s7862_s3 + $0x120] ss:$16 sps:$4 sm:$0xff]   ;;  %v5625_v46 = vld [vmem:[%s7862_s3 + $0x128] ss:$16 sps:$4 sm:$0xff]  }
 0x47a   :  { %4200 = vpow2.f32 %v3625_v48  ;;  %v5631_v47 = vld [vmem:[%s7862_s3 + $0x144] ss:$16 sps:$4 sm:$0xff]   ;;  %v5637_v48 = vld [vmem:[%s7862_s3 + $0x14c] ss:$16 sps:$4 sm:$0xff]  }
 0x483   :  { %v4199_v49 = vpop.eup %4198 }
 0x484   :  { %v1053_v50 = vadd.f32 1.0, %v4199_v49  ;;  %v4201_v51 = vpop.eup %4200  ;;  %v5643_v49 = vld [vmem:[%s7862_s3 + $0x140] ss:$16 sps:$4 sm:$0xff]  }
 0x485   :  { %v1059_v52 = vadd.f32 1.0, %v4201_v51  ;;  %v5655_v51 = vld [vmem:[%s7862_s3 + $0x164] ss:$16 sps:$4 sm:$0xff]  }
 0x486   :  { %4202 = vrcp.f32 %v1053_v50  ;;  %v5649_v50 = vld [vmem:[%s7862_s3 + $0x148] ss:$16 sps:$4 sm:$0xff]   ;;  %8249 = vst [vmem:[#allocation7_spill] sm:$0xff] %v5655_v51 }
 0x487   :  { %4204 = vrcp.f32 %v1059_v52  ;;  %v5661_v52 = vld [vmem:[%s7862_s3 + $0x16c] ss:$16 sps:$4 sm:$0xff]  }
 0x488   :  { %8250 = vst [vmem:[#allocation8_spill] sm:$0xff] %v5661_v52 }
 0x490   :  { %v4203_v54 = vpop.eup %4202 }
 0x491   :  { %v1062_v8 = vmul.f32 %v4203_v54, %v1046_v53  ;;  %v4205_v10 = vpop.eup %4204  ;;  %v5667_v53 = vld [vmem:[%s7862_s3 + $0x160] ss:$16 sps:$4 sm:$0xff]   ;;  %v5673_v54 = vld [vmem:[%s7862_s3 + $0x168] ss:$16 sps:$4 sm:$0xff]  }
 0x492   :  { %v1065_v11 = vsub.f32 1.0, %v4205_v10  ;;  %v1067_v14 = vmul.f32 %v4205_v10, %v5319_v21  ;;  %v5565_v21 = vld [vmem:[%s7862_s3 + $0xec] ss:$16 sps:$4 sm:$0xff]   ;;  %8251 = vst [vmem:[#allocation9_spill] sm:$0xff] %v5667_v53  ;;  %8252 = vst [vmem:[#allocation10_spill] sm:$0xff] %v5673_v54 }
 0x493   :  { %v1063_v9 = vadd.f32 %v1062_v8, %v1044_v5  ;;  %v5679_v5 = vld [vmem:[%s7862_s3 + $0x184] ss:$16 sps:$4 sm:$0xff]   ;;  %v5685_v8 = vld [vmem:[%s7862_s3 + $0x18c] ss:$16 sps:$4 sm:$0xff]   ;;  %v5697_v10 = vld [vmem:[%s7862_s3 + $0x188] ss:$16 sps:$4 sm:$0xff]  }
 0x494   :  { %8253 = vst [vmem:[#allocation11_spill] sm:$0xff] %v5679_v5  ;;  %8254 = vst [vmem:[#allocation12_spill] sm:$0xff] %v5685_v8 }
 0x495   :  { %4206 = vtanh.f32 %v1063_v9  ;;  %v5691_v9 = vld [vmem:[%s7862_s3 + $0x180] ss:$16 sps:$4 sm:$0xff]   ;;  %8256 = vst [vmem:[#allocation14_spill] sm:$0xff] %v5697_v10 }
 0x496   :  { %8255 = vst [vmem:[#allocation13_spill] sm:$0xff] %v5691_v9 }
 0x49f   :  { %v4207_v12 = vpop.eup %4206 }
 0x4a0   :  { %v1066_v13 = vmul.f32 %v4207_v12, %v1065_v11  ;;  %v5703_v11 = vld [vmem:[%s7862_s3 + $0x1a4] ss:$16 sps:$4 sm:$0xff]   ;;  %v5709_v12 = vld [vmem:[%s7862_s3 + $0x1ac] ss:$16 sps:$4 sm:$0xff]  }
 0x4a1   :  { %8257 = vst [vmem:[#allocation15_spill] sm:$0xff] %v5703_v11  ;;  %8258 = vst [vmem:[#allocation16_spill] sm:$0xff] %v5709_v12 }
 0x4a2   :  { %v5514_v16 = vadd.f32 %v1067_v14, %v1066_v13  ;;  %v5715_v13 = vld [vmem:[%s7862_s3 + $0x1a0] ss:$16 sps:$4 sm:$0xff]   ;;  %v5721_v14 = vld [vmem:[%s7862_s3 + $0x1a8] ss:$16 sps:$4 sm:$0xff]  }
 0x4a3   :  { %8259 = vst [vmem:[#allocation17_spill] sm:$0xff] %v5715_v13  ;;  %8260 = vst [vmem:[#allocation18_spill] sm:$0xff] %v5721_v14 }
 0x4a4   :  { %v1070_v17 = vpack.c.bf16 %v5514_v16, %v5514_v16 }
 0x4a6   :  { %1103 = vmatprep.mubr.bf16.mxu0 %v1070_v17  ;;  %1144 = vmatprep.mubr.bf16.mxu1 %v1070_v17  ;;  %v5727_v17 = vld [vmem:[%s7862_s3 + $0x1c4] ss:$16 sps:$4 sm:$0xff]  }
 0x4a7   :  { %1104 = vmatmul.mubr.bf16.vlgmr.msra.gmra.mrb[16].mxu0 %v1069_v19  ;;  %1145 = vmatmul.mubr.bf16.vlgmr.msra.gmra.mrb[16].mxu1 %v1069_v19  ;;  %8261 = vst [vmem:[#allocation19_spill] sm:$0xff] %v5727_v17  ;;  %v5739_v19 = vld [vmem:[%s7862_s3 + $0x1c0] ss:$16 sps:$4 sm:$0xff]  }
 0x4a8   :  { %1175 = vmatpush1.bf16.msra.mxu0 %v5328_v35  ;;  %1216 = vmatpush1.bf16.msra.mxu1 %v5334_v31  ;;  %8263 = vst [vmem:[#allocation21_spill] sm:$0xff] %v5739_v19 }
 0x4a9   :  { %1176 = vmatprep.subr.bf16.mxu0 %v5340_v58  ;;  %1217 = vmatprep.subr.bf16.mxu1 %v5346_v36 }
 0x4ac   :  { %1177 = vmatpush1.bf16.msra.mxu0 %v5352_v57  ;;  %1218 = vmatpush1.bf16.msra.mxu1 %v5358_v3 }
 0x4ad   :  { %1178 = vmatprep.subr.bf16.mxu0 %v5364_v63  ;;  %1219 = vmatprep.subr.bf16.mxu1 %v5370_v6 }
 0x4b0   :  { %1179 = vmatpush1.bf16.msra.mxu0 %v5376_v20  ;;  %1220 = vmatpush1.bf16.msra.mxu1 %v5382_v34 }
 0x4b1   :  { %1180 = vmatprep.subr.bf16.mxu0 %v5388_v26  ;;  %1221 = vmatprep.subr.bf16.mxu1 %v5394_v60 }
 0x4b4   :  { %1181 = vmatpush1.bf16.msra.mxu0 %v5400_v2  ;;  %1222 = vmatpush1.bf16.msra.mxu1 %v5406_v7 }
 0x4b5   :  { %1182 = vmatprep.subr.bf16.mxu0 %v5412_v4  ;;  %1223 = vmatprep.subr.bf16.mxu1 %v8244_v22 }
 0x4b8   :  { %1183 = vmatpush1.bf16.msra.mxu0 %v8245_v23  ;;  %1224 = vmatpush1.bf16.msra.mxu1 %v8246_v24 }
 0x4b9   :  { %1184 = vmatprep.subr.bf16.mxu0 %v8247_v25  ;;  %1225 = vmatprep.subr.bf16.mxu1 %v8248_v27 }
 0x4bc   :  { %1185 = vmatpush1.bf16.msra.mxu0 %v5448_v15  ;;  %1226 = vmatpush1.bf16.msra.mxu1 %v5454_v62 }
 0x4bd   :  { %1186 = vmatprep.subr.bf16.mxu0 %v5460_v59  ;;  %1227 = vmatprep.subr.bf16.mxu1 %v5466_v1 }
 0x4c0   :  { %1187 = vmatpush1.bf16.msra.mxu0 %v5547_v28  ;;  %1228 = vmatpush1.bf16.msra.mxu1 %v5553_v29 }
 0x4c1   :  { %1188 = vmatprep.subr.bf16.mxu0 %v5559_v30  ;;  %1229 = vmatprep.subr.bf16.mxu1 %v5565_v21 }
 0x4c4   :  { %1189 = vmatpush1.bf16.msra.mxu0 %v5571_v37  ;;  %1230 = vmatpush1.bf16.msra.mxu1 %v5577_v38 }
 0x4c5   :  { %1190 = vmatprep.subr.bf16.mxu0 %v5583_v39  ;;  %1231 = vmatprep.subr.bf16.mxu1 %v5589_v40 }
 0x4c8   :  { %1191 = vmatpush1.bf16.msra.mxu0 %v5595_v41  ;;  %1232 = vmatpush1.bf16.msra.mxu1 %v5601_v42 }
 0x4c9   :  { %1192 = vmatprep.subr.bf16.mxu0 %v5607_v43  ;;  %1233 = vmatprep.subr.bf16.mxu1 %v5613_v44 }
 0x4cc   :  { %1193 = vmatpush1.bf16.msra.mxu0 %v5619_v45  ;;  %1234 = vmatpush1.bf16.msra.mxu1 %v5625_v46 }
 0x4cd   :  { %1194 = vmatprep.subr.bf16.mxu0 %v5631_v47  ;;  %1235 = vmatprep.subr.bf16.mxu1 %v5637_v48 }
 0x4d0   :  { %1195 = vmatpush1.bf16.msra.mxu0 %v5643_v49  ;;  %1236 = vmatpush1.bf16.msra.mxu1 %v5649_v50 }
 0x4d1   :  { %1196 = vmatprep.subr.bf16.mxu0 %v5655_v51  ;;  %1237 = vmatprep.subr.bf16.mxu1 %v5661_v52 }
 0x4d4   :  { %1197 = vmatpush1.bf16.msra.mxu0 %v5667_v53  ;;  %1238 = vmatpush1.bf16.msra.mxu1 %v5673_v54 }
 0x4d5   :  { %1198 = vmatprep.subr.bf16.mxu0 %v5679_v5  ;;  %1239 = vmatprep.subr.bf16.mxu1 %v5685_v8 }
 0x4d8   :  { %1199 = vmatpush1.bf16.msra.mxu0 %v5691_v9  ;;  %1240 = vmatpush1.bf16.msra.mxu1 %v5697_v10 }
 0x4d9   :  { %1200 = vmatprep.subr.bf16.mxu0 %v5703_v11  ;;  %1241 = vmatprep.subr.bf16.mxu1 %v5709_v12 }
 0x4dc   :  { %1201 = vmatpush1.bf16.msra.mxu0 %v5715_v13  ;;  %1242 = vmatpush1.bf16.msra.mxu1 %v5721_v14  ;;  %v5745_v14 = vld [vmem:[%s7862_s3 + $0x1c8] ss:$16 sps:$4 sm:$0xff]  }
 0x4dd   :  { %1202 = vmatprep.subr.bf16.mxu0 %v5727_v17  ;;  %1243 = vmatprep.subr.bf16.mxu1 %v5733_v18  ;;  %8264 = vst [vmem:[#allocation22_spill] sm:$0xff] %v5745_v14  ;;  %v5751_v17 = vld [vmem:[%s7862_s3 + $0x1e4] ss:$16 sps:$4 sm:$0xff]   ;;  %v5757_v18 = vld [vmem:[%s7862_s3 + $0x1ec] ss:$16 sps:$4 sm:$0xff]  }
 0x4de   :  { %8265 = vst [vmem:[#allocation23_spill] sm:$0xff] %v5751_v17  ;;  %8266 = vst [vmem:[#allocation28_spill] sm:$0xff] %v5757_v18 }
 0x4e0   :  { %1203 = vmatpush1.bf16.msra.mxu0 %v5739_v19  ;;  %1244 = vmatpush1.bf16.msra.mxu1 %v5745_v14  ;;  %v5763_v19 = vld [vmem:[%s7862_s3 + $0x1e0] ss:$16 sps:$4 sm:$0xff]   ;;  %v5769_v14 = vld [vmem:[%s7862_s3 + $0x1e8] ss:$16 sps:$4 sm:$0xff]  }
 0x4e1   :  { %1204 = vmatprep.subr.bf16.mxu0 %v5751_v17  ;;  %1245 = vmatprep.subr.bf16.mxu1 %v5757_v18  ;;  %8267 = vst [vmem:[#allocation29_spill] sm:$0xff] %v5763_v19  ;;  %8268 = vst [vmem:[#allocation34_spill] sm:$0xff] %v5769_v14 }
 0x4e4   :  { %1205 = vmatpush1.bf16.msra.mxu0 %v5763_v19  ;;  %1246 = vmatpush1.bf16.msra.mxu1 %v5769_v14 }
 0x4e5   :  { %1277 = vmatprep.subr.bf16.mxu0 %v5305_v32  ;;  %1318 = vmatprep.subr.bf16.mxu1 %v5311_v33 }
 0x57a   :  { %v1105_v17 = vpop.f32.mrb[16].mxu0  ;;  %v1146_v18 = vpop.f32.mrb[16].mxu1 }
 0x57b   :  { %v1106_v13 = vadd.f32 %v1105_v17, %v8236_v55  ;;  %v1107_v12 = vpop.f32.mrb[17].mxu0  ;;  %v1148_v11 = vpop.f32.mrb[17].mxu1  ;;  %v1147_v55 = vadd.f32 %v1146_v18, %v5155_v0  ;;  %v8275_v18 = vld [vmem:[#allocation12_spill] sm:$0xff] }
 0x57c   :  { %v1109_v10 = vpop.f32.mrb[18].mxu0  ;;  %v1150_v9 = vpop.f32.mrb[18].mxu1  ;;  %v1108_v54 = vadd.f32 %v1107_v12, %v8212_v56  ;;  %v1149_v51 = vadd.f32 %v1148_v11, %v5151_v61 }
 0x57d   :  { %v3626_v19 = vmul.f32 -1.442695, %v1106_v13  ;;  %v1110_v8 = vpop.f32.mrb[19].mxu0  ;;  %v1151_v5 = vpop.f32.mrb[19].mxu1 }
 0x57e   :  { %v3627_v53 = vmul.f32 -1.442695, %v1108_v54 }
 0x57f   :  { %4208 = vpow2.f32 %v3626_v19  ;;  %v8276_v19 = vld [vmem:[#allocation13_spill] sm:$0xff] }
 0x580   :  { %4210 = vpow2.f32 %v3627_v53 }
 0x589   :  { %v4209_v14 = vpop.eup %4208 }
 0x58a   :  { %v1156_v32 = vadd.f32 1.0, %v4209_v14  ;;  %v4211_v33 = vpop.eup %4210  ;;  %v8274_v14 = vld [vmem:[#allocation11_spill] sm:$0xff] }
 0x58b   :  { %v1162_v52 = vadd.f32 1.0, %v4211_v33  ;;  %v8269_v33 = vld [vmem:[#allocation30_spill] sm:$0xff] }
 0x58c   :  { %4212 = vrcp.f32 %v1156_v32  ;;  %v1172_v11 = vpack.c.bf16 %v8269_v33, %v8269_v33  ;;  %v8286_v33 = vld [vmem:[#allocation23_spill] sm:$0xff] }
 0x58d   :  { %4214 = vrcp.f32 %v1162_v52  ;;  %v8273_v52 = vld [vmem:[#allocation10_spill] sm:$0xff] }
 0x596   :  { %v4213_v17 = vpop.eup %4212 }
 0x597   :  { %v1165_v9 = vmul.f32 %v4213_v17, %v1149_v51  ;;  %v4215_v5 = vpop.eup %4214  ;;  %v8272_v51 = vld [vmem:[#allocation9_spill] sm:$0xff]  ;;  %v8277_v17 = vld [vmem:[#allocation14_spill] sm:$0xff] }
 0x598   :  { %v1168_v8 = vsub.f32 1.0, %v4215_v5  ;;  %v1170_v53 = vmul.f32 %v4215_v5, %v5514_v16  ;;  %v8271_v16 = vld [vmem:[#allocation8_spill] sm:$0xff]  ;;  %v8280_v5 = vld [vmem:[#allocation17_spill] sm:$0xff] }
 0x599   :  { %v1166_v10 = vadd.f32 %v1165_v9, %v1147_v55  ;;  %v8270_v55 = vld [vmem:[#allocation7_spill] sm:$0xff] }
 0x59a   :  { %v8278_v9 = vld [vmem:[#allocation15_spill] sm:$0xff] }
 0x59b   :  { %4216 = vtanh.f32 %v1166_v10  ;;  %v8279_v10 = vld [vmem:[#allocation16_spill] sm:$0xff] }
 0x5a5   :  { %v4217_v12 = vpop.eup %4216 }
 0x5a6   :  { %v1169_v13 = vmul.f32 %v4217_v12, %v1168_v8  ;;  %v8281_v8 = vld [vmem:[#allocation18_spill] sm:$0xff]  ;;  %v8282_v12 = vld [vmem:[#allocation19_spill] sm:$0xff] }
 0x5a8   :  { %v5779_v54 = vadd.f32 %v1170_v53, %v1169_v13  ;;  %v8283_v13 = vld [vmem:[#allocation20_spill] sm:$0xff]  ;;  %v8284_v53 = vld [vmem:[#allocation21_spill] sm:$0xff] }
 0x5aa   :  { %v1173_v32 = vpack.c.bf16 %v5779_v54, %v5779_v54 }
 0x5ac   :  { %1206 = vmatprep.mubr.bf16.mxu0 %v1173_v32  ;;  %1247 = vmatprep.mubr.bf16.mxu1 %v1173_v32  ;;  %v8285_v32 = vld [vmem:[#allocation22_spill] sm:$0xff] }
 0x5ad   :  { %1207 = vmatmul.mubr.bf16.vlgmr.msra.gmra.mrb[20].mxu0 %v1172_v11  ;;  %1248 = vmatmul.mubr.bf16.vlgmr.msra.gmra.mrb[20].mxu1 %v1172_v11  ;;  %v8287_v11 = vld [vmem:[#allocation28_spill] sm:$0xff] }
 0x5ae   :  { %1278 = vmatpush1.bf16.msra.mxu0 %v5328_v35  ;;  %1319 = vmatpush1.bf16.msra.mxu1 %v5334_v31 }
 0x5af   :  { %1279 = vmatprep.subr.bf16.mxu0 %v5340_v58  ;;  %1320 = vmatprep.subr.bf16.mxu1 %v5346_v36 }
 0x5b2   :  { %1280 = vmatpush1.bf16.msra.mxu0 %v5352_v57  ;;  %1321 = vmatpush1.bf16.msra.mxu1 %v5358_v3 }
 0x5b3   :  { %1281 = vmatprep.subr.bf16.mxu0 %v5364_v63  ;;  %1322 = vmatprep.subr.bf16.mxu1 %v5370_v6 }
 0x5b6   :  { %1282 = vmatpush1.bf16.msra.mxu0 %v5376_v20  ;;  %1323 = vmatpush1.bf16.msra.mxu1 %v5382_v34 }
 0x5b7   :  { %1283 = vmatprep.subr.bf16.mxu0 %v5388_v26  ;;  %1324 = vmatprep.subr.bf16.mxu1 %v5394_v60 }
 0x5ba   :  { %1284 = vmatpush1.bf16.msra.mxu0 %v5400_v2  ;;  %1325 = vmatpush1.bf16.msra.mxu1 %v5406_v7 }
 0x5bb   :  { %1285 = vmatprep.subr.bf16.mxu0 %v5412_v4  ;;  %1326 = vmatprep.subr.bf16.mxu1 %v8244_v22 }
 0x5be   :  { %1286 = vmatpush1.bf16.msra.mxu0 %v8245_v23  ;;  %1327 = vmatpush1.bf16.msra.mxu1 %v8246_v24 }
 0x5bf   :  { %1287 = vmatprep.subr.bf16.mxu0 %v8247_v25  ;;  %1328 = vmatprep.subr.bf16.mxu1 %v8248_v27 }
 0x5c2   :  { %1288 = vmatpush1.bf16.msra.mxu0 %v5448_v15  ;;  %1329 = vmatpush1.bf16.msra.mxu1 %v5454_v62 }
 0x5c3   :  { %1289 = vmatprep.subr.bf16.mxu0 %v5460_v59  ;;  %1330 = vmatprep.subr.bf16.mxu1 %v5466_v1 }
 0x5c6   :  { %1290 = vmatpush1.bf16.msra.mxu0 %v5547_v28  ;;  %1331 = vmatpush1.bf16.msra.mxu1 %v5553_v29 }
 0x5c7   :  { %1291 = vmatprep.subr.bf16.mxu0 %v5559_v30  ;;  %1332 = vmatprep.subr.bf16.mxu1 %v5565_v21 }
 0x5ca   :  { %1292 = vmatpush1.bf16.msra.mxu0 %v5571_v37  ;;  %1333 = vmatpush1.bf16.msra.mxu1 %v5577_v38 }
 0x5cb   :  { %1293 = vmatprep.subr.bf16.mxu0 %v5583_v39  ;;  %1334 = vmatprep.subr.bf16.mxu1 %v5589_v40 }
 0x5ce   :  { %1294 = vmatpush1.bf16.msra.mxu0 %v5595_v41  ;;  %1335 = vmatpush1.bf16.msra.mxu1 %v5601_v42 }
 0x5cf   :  { %1295 = vmatprep.subr.bf16.mxu0 %v5607_v43  ;;  %1336 = vmatprep.subr.bf16.mxu1 %v5613_v44 }
 0x5d2   :  { %1296 = vmatpush1.bf16.msra.mxu0 %v5619_v45  ;;  %1337 = vmatpush1.bf16.msra.mxu1 %v5625_v46 }
 0x5d3   :  { %1297 = vmatprep.subr.bf16.mxu0 %v5631_v47  ;;  %1338 = vmatprep.subr.bf16.mxu1 %v5637_v48 }
 0x5d6   :  { %1298 = vmatpush1.bf16.msra.mxu0 %v5643_v49  ;;  %1339 = vmatpush1.bf16.msra.mxu1 %v5649_v50 }
 0x5d7   :  { %1299 = vmatprep.subr.bf16.mxu0 %v8270_v55  ;;  %1340 = vmatprep.subr.bf16.mxu1 %v8271_v16 }
 0x5da   :  { %1300 = vmatpush1.bf16.msra.mxu0 %v8272_v51  ;;  %1341 = vmatpush1.bf16.msra.mxu1 %v8273_v52 }
 0x5db   :  { %1301 = vmatprep.subr.bf16.mxu0 %v8274_v14  ;;  %1342 = vmatprep.subr.bf16.mxu1 %v8275_v18 }
 0x5de   :  { %1302 = vmatpush1.bf16.msra.mxu0 %v8276_v19  ;;  %1343 = vmatpush1.bf16.msra.mxu1 %v8277_v17  ;;  %v8288_v17 = vld [vmem:[#allocation29_spill] sm:$0xff] }
 0x5df   :  { %1303 = vmatprep.subr.bf16.mxu0 %v8278_v9  ;;  %1344 = vmatprep.subr.bf16.mxu1 %v8279_v10  ;;  %v8289_v9 = vld [vmem:[#allocation34_spill] sm:$0xff]  ;;  %v8292_v19 = vld [vmem:[#allocation33_spill] sm:$0xff] }
 0x5e0   :  { %v8290_v10 = vld [vmem:[#allocation2_spill] sm:$0xff] }
 0x5e2   :  { %1304 = vmatpush1.bf16.msra.mxu0 %v8280_v5  ;;  %1345 = vmatpush1.bf16.msra.mxu1 %v8281_v8  ;;  %v8291_v5 = vld [vmem:[#allocation3_spill] sm:$0xff] }
 0x5e3   :  { %1305 = vmatprep.subr.bf16.mxu0 %v8282_v12  ;;  %1346 = vmatprep.subr.bf16.mxu1 %v8283_v13 }
 0x5e6   :  { %1306 = vmatpush1.bf16.msra.mxu0 %v8284_v53  ;;  %1347 = vmatpush1.bf16.msra.mxu1 %v8285_v32 }
 0x5e7   :  { %1307 = vmatprep.subr.bf16.mxu0 %v8286_v33  ;;  %1348 = vmatprep.subr.bf16.mxu1 %v8287_v11 }
 0x5ea   :  { %1308 = vmatpush1.bf16.msra.mxu0 %v8288_v17  ;;  %1349 = vmatpush1.bf16.msra.mxu1 %v8289_v9 }
 0x5eb   :  { %1380 = vmatprep.subr.bf16.mxu0 %v8290_v10  ;;  %1421 = vmatprep.subr.bf16.mxu1 %v8291_v5 }
 0x680   :  { %v1208_v8 = vpop.f32.mrb[20].mxu0  ;;  %v1249_v12 = vpop.f32.mrb[20].mxu1 }
 0x681   :  { %v1209_v13 = vadd.f32 %v1208_v8, %v8292_v19  ;;  %v1210_v18 = vpop.f32.mrb[21].mxu0  ;;  %v1251_v53 = vpop.f32.mrb[21].mxu1  ;;  %v1250_v19 = vadd.f32 %v1249_v12, %v5155_v0 }
 0x682   :  { %v1212_v14 = vpop.f32.mrb[22].mxu0  ;;  %v1253_v32 = vpop.f32.mrb[22].mxu1  ;;  %v1211_v11 = vadd.f32 %v1210_v18, %v8212_v56  ;;  %v1252_v55 = vadd.f32 %v1251_v53, %v5151_v61 }
 0x683   :  { %v3628_v52 = vmul.f32 -1.442695, %v1209_v13  ;;  %v1213_v33 = vpop.f32.mrb[23].mxu0  ;;  %v1254_v51 = vpop.f32.mrb[23].mxu1 }
 0x684   :  { %v3629_v17 = vmul.f32 -1.442695, %v1211_v11  ;;  %v8293_v11 = vld [vmem:[#allocation31_spill] sm:$0xff] }
 0x685   :  { %4218 = vpow2.f32 %v3628_v52  ;;  %v1275_v53 = vpack.c.bf16 %v8293_v11, %v8293_v11  ;;  %v5984_v11 = vld [vmem:[%s7866_s7 + $0x84] ss:$16 sps:$4 sm:$0xff]  }
 0x686   :  { %4220 = vpow2.f32 %v3629_v17 }
 0x68f   :  { %v4219_v9 = vpop.eup %4218 }
 0x690   :  { %v1259_v10 = vadd.f32 1.0, %v4219_v9  ;;  %v4221_v5 = vpop.eup %4220 }
 0x691   :  { %v1265_v16 = vadd.f32 1.0, %v4221_v5 }
 0x692   :  { %4222 = vrcp.f32 %v1259_v10 }
 0x693   :  { %4224 = vrcp.f32 %v1265_v16 }
 0x69c   :  { %v4223_v8 = vpop.eup %4222 }
 0x69d   :  { %v1268_v14 = vmul.f32 %v4223_v8, %v1252_v55  ;;  %v4225_v51 = vpop.eup %4224 }
 0x69e   :  { %v1271_v32 = vsub.f32 1.0, %v4225_v51  ;;  %v1273_v17 = vmul.f32 %v4225_v51, %v5779_v54 }
 0x69f   :  { %v1269_v13 = vadd.f32 %v1268_v14, %v1250_v19  ;;  %v5940_v14 = vld [vmem:[%s7866_s7] ss:$16 sps:$4 sm:$0xff]  }
 0x6a1   :  { %4226 = vtanh.f32 %v1269_v13  ;;  %v8316_v13 = vld [vmem:[#allocation32_spill] sm:$0xff] }
 0x6a2   :  { %v1378_v51 = vpack.c.bf16 %v8316_v13, %v8316_v13  ;;  %v6277_v13 = vld [vmem:[%s7866_s7 + $0x188] ss:$16 sps:$4 sm:$0xff]  }
 0x6ab   :  { %v4227_v18 = vpop.eup %4226 }
 0x6ac   :  { %v1272_v52 = vmul.f32 %v4227_v18, %v1271_v32  ;;  %v5947_v32 = vld [vmem:[%s7866_s7 + $0x24] ss:$16 sps:$4 sm:$0xff]   ;;  %v5953_v18 = vld [vmem:[%s7866_s7 + $0x20] ss:$16 sps:$4 sm:$0xff]  }
 0x6ae   :  { %v5854_v33 = vadd.f32 %v1273_v17, %v1272_v52  ;;  %v5959_v52 = vld [vmem:[%s7866_s7 + $0x44] ss:$16 sps:$4 sm:$0xff]   ;;  %v5965_v17 = vld [vmem:[%s7866_s7 + $0x40] ss:$16 sps:$4 sm:$0xff]  }
 0x6b0   :  { %v1276_v9 = vpack.c.bf16 %v5854_v33, %v5854_v33 }
 0x6b2   :  { %1309 = vmatprep.mubr.bf16.mxu0 %v1276_v9  ;;  %1350 = vmatprep.mubr.bf16.mxu1 %v1276_v9  ;;  %v5978_v9 = vld [vmem:[%s7866_s7 + $0x60] ss:$16 sps:$4 sm:$0xff]  }
 0x6b3   :  { %1310 = vmatmul.mubr.bf16.vlgmr.msra.gmra.mrb[24].mxu0 %v1275_v53  ;;  %1351 = vmatmul.mubr.bf16.vlgmr.msra.gmra.mrb[24].mxu1 %v1275_v53  ;;  %v5989_v53 = vld [vmem:[%s7866_s7 + $0x80] ss:$16 sps:$4 sm:$0xff]  }
 0x6b4   :  { %1381 = vmatpush1.bf16.msra.mxu0 %v5328_v35  ;;  %1422 = vmatpush1.bf16.msra.mxu1 %v5334_v31  ;;  %v8294_v35 = vld [vmem:[#allocation7_spill] sm:$0xff]  ;;  %v8295_v31 = vld [vmem:[#allocation8_spill] sm:$0xff] }
 0x6b5   :  { %1382 = vmatprep.subr.bf16.mxu0 %v5340_v58  ;;  %1423 = vmatprep.subr.bf16.mxu1 %v5346_v36  ;;  %v8296_v58 = vld [vmem:[#allocation9_spill] sm:$0xff]  ;;  %v8297_v36 = vld [vmem:[#allocation10_spill] sm:$0xff] }
 0x6b8   :  { %1383 = vmatpush1.bf16.msra.mxu0 %v5352_v57  ;;  %1424 = vmatpush1.bf16.msra.mxu1 %v5358_v3  ;;  %v8298_v57 = vld [vmem:[#allocation11_spill] sm:$0xff]  ;;  %v8299_v3 = vld [vmem:[#allocation12_spill] sm:$0xff] }
 0x6b9   :  { %1384 = vmatprep.subr.bf16.mxu0 %v5364_v63  ;;  %1425 = vmatprep.subr.bf16.mxu1 %v5370_v6  ;;  %v8300_v63 = vld [vmem:[#allocation13_spill] sm:$0xff]  ;;  %v8301_v6 = vld [vmem:[#allocation14_spill] sm:$0xff] }
 0x6bc   :  { %1385 = vmatpush1.bf16.msra.mxu0 %v5376_v20  ;;  %1426 = vmatpush1.bf16.msra.mxu1 %v5382_v34  ;;  %v8302_v20 = vld [vmem:[#allocation15_spill] sm:$0xff]  ;;  %v8303_v34 = vld [vmem:[#allocation16_spill] sm:$0xff] }
 0x6bd   :  { %1386 = vmatprep.subr.bf16.mxu0 %v5388_v26  ;;  %1427 = vmatprep.subr.bf16.mxu1 %v5394_v60  ;;  %v8304_v26 = vld [vmem:[#allocation17_spill] sm:$0xff]  ;;  %v8305_v60 = vld [vmem:[#allocation18_spill] sm:$0xff] }
 0x6c0   :  { %1387 = vmatpush1.bf16.msra.mxu0 %v5400_v2  ;;  %1428 = vmatpush1.bf16.msra.mxu1 %v5406_v7  ;;  %v8306_v2 = vld [vmem:[#allocation19_spill] sm:$0xff]  ;;  %v8307_v7 = vld [vmem:[#allocation20_spill] sm:$0xff] }
 0x6c1   :  { %1388 = vmatprep.subr.bf16.mxu0 %v5412_v4  ;;  %1429 = vmatprep.subr.bf16.mxu1 %v8244_v22  ;;  %v8308_v4 = vld [vmem:[#allocation21_spill] sm:$0xff]  ;;  %v8313_v22 = vld [vmem:[#allocation34_spill] sm:$0xff] }
 0x6c4   :  { %1389 = vmatpush1.bf16.msra.mxu0 %v8245_v23  ;;  %1430 = vmatpush1.bf16.msra.mxu1 %v8246_v24  ;;  %v5925_v23 = vld [vmem:[%s7866_s7 + $0x4] ss:$16 sps:$4 sm:$0xff]  }
 0x6c5   :  { %1390 = vmatprep.subr.bf16.mxu0 %v8247_v25  ;;  %1431 = vmatprep.subr.bf16.mxu1 %v8248_v27  ;;  %8314 = vst [vmem:[#allocation27_spill] sm:$0xff] %v5925_v23  ;;  %v8315_v27 = vld [vmem:[#allocation33_spill] sm:$0xff] }
 0x6c8   :  { %1391 = vmatpush1.bf16.msra.mxu0 %v5448_v15  ;;  %1432 = vmatpush1.bf16.msra.mxu1 %v5454_v62  ;;  %v8310_v15 = vld [vmem:[#allocation23_spill] sm:$0xff]  ;;  %v8311_v62 = vld [vmem:[#allocation28_spill] sm:$0xff] }
 0x6c9   :  { %1392 = vmatprep.subr.bf16.mxu0 %v5460_v59  ;;  %1433 = vmatprep.subr.bf16.mxu1 %v5466_v1  ;;  %v8309_v1 = vld [vmem:[#allocation22_spill] sm:$0xff]  ;;  %v8312_v59 = vld [vmem:[#allocation29_spill] sm:$0xff]  ;;  %8340 = vst [vmem:[#allocation23_spill] sm:$0xff] %v6277_v13 }
 0x6cc   :  { %1393 = vmatpush1.bf16.msra.mxu0 %v5547_v28  ;;  %1434 = vmatpush1.bf16.msra.mxu1 %v5553_v29 }
 0x6cd   :  { %1394 = vmatprep.subr.bf16.mxu0 %v5559_v30  ;;  %1435 = vmatprep.subr.bf16.mxu1 %v5565_v21 }
 0x6d0   :  { %1395 = vmatpush1.bf16.msra.mxu0 %v5571_v37  ;;  %1436 = vmatpush1.bf16.msra.mxu1 %v5577_v38 }
 0x6d1   :  { %1396 = vmatprep.subr.bf16.mxu0 %v5583_v39  ;;  %1437 = vmatprep.subr.bf16.mxu1 %v5589_v40 }
 0x6d4   :  { %1397 = vmatpush1.bf16.msra.mxu0 %v5595_v41  ;;  %1438 = vmatpush1.bf16.msra.mxu1 %v5601_v42 }
 0x6d5   :  { %1398 = vmatprep.subr.bf16.mxu0 %v5607_v43  ;;  %1439 = vmatprep.subr.bf16.mxu1 %v5613_v44 }
 0x6d8   :  { %1399 = vmatpush1.bf16.msra.mxu0 %v5619_v45  ;;  %1440 = vmatpush1.bf16.msra.mxu1 %v5625_v46 }
 0x6d9   :  { %1400 = vmatprep.subr.bf16.mxu0 %v5631_v47  ;;  %1441 = vmatprep.subr.bf16.mxu1 %v5637_v48 }
 0x6dc   :  { %1401 = vmatpush1.bf16.msra.mxu0 %v5643_v49  ;;  %1442 = vmatpush1.bf16.msra.mxu1 %v5649_v50 }
 0x6dd   :  { %1402 = vmatprep.subr.bf16.mxu0 %v8294_v35  ;;  %1443 = vmatprep.subr.bf16.mxu1 %v8295_v31  ;;  %v5996_v35 = vld [vmem:[%s7866_s7 + $0xa4] ss:$16 sps:$4 sm:$0xff]   ;;  %v6001_v31 = vld [vmem:[%s7866_s7 + $0xa0] ss:$16 sps:$4 sm:$0xff]  }
 0x6e0   :  { %1403 = vmatpush1.bf16.msra.mxu0 %v8296_v58  ;;  %1444 = vmatpush1.bf16.msra.mxu1 %v8297_v36  ;;  %v6007_v58 = vld [vmem:[%s7866_s7 + $0xc] ss:$16 sps:$4 sm:$0xff]   ;;  %v6013_v36 = vld [vmem:[%s7866_s7 + $0x8] ss:$16 sps:$4 sm:$0xff]  }
 0x6e1   :  { %1404 = vmatprep.subr.bf16.mxu0 %v8298_v57  ;;  %1445 = vmatprep.subr.bf16.mxu1 %v8299_v3  ;;  %v6019_v57 = vld [vmem:[%s7866_s7 + $0xc4] ss:$16 sps:$4 sm:$0xff]   ;;  %v6025_v3 = vld [vmem:[%s7866_s7 + $0xc0] ss:$16 sps:$4 sm:$0xff]  }
 0x6e4   :  { %1405 = vmatpush1.bf16.msra.mxu0 %v8300_v63  ;;  %1446 = vmatpush1.bf16.msra.mxu1 %v8301_v6  ;;  %v6031_v63 = vld [vmem:[%s7866_s7 + $0x2c] ss:$16 sps:$4 sm:$0xff]   ;;  %v6037_v6 = vld [vmem:[%s7866_s7 + $0x28] ss:$16 sps:$4 sm:$0xff]  }
 0x6e5   :  { %1406 = vmatprep.subr.bf16.mxu0 %v8302_v20  ;;  %1447 = vmatprep.subr.bf16.mxu1 %v8303_v34  ;;  %v6043_v20 = vld [vmem:[%s7866_s7 + $0xe4] ss:$16 sps:$4 sm:$0xff]   ;;  %v6049_v34 = vld [vmem:[%s7866_s7 + $0xe0] ss:$16 sps:$4 sm:$0xff]  }
 0x6e8   :  { %1407 = vmatpush1.bf16.msra.mxu0 %v8304_v26  ;;  %1448 = vmatpush1.bf16.msra.mxu1 %v8305_v60  ;;  %v6055_v26 = vld [vmem:[%s7866_s7 + $0x4c] ss:$16 sps:$4 sm:$0xff]   ;;  %v6061_v60 = vld [vmem:[%s7866_s7 + $0x48] ss:$16 sps:$4 sm:$0xff]  }
 0x6e9   :  { %1408 = vmatprep.subr.bf16.mxu0 %v8306_v2  ;;  %1449 = vmatprep.subr.bf16.mxu1 %v8307_v7  ;;  %v6067_v2 = vld [vmem:[%s7866_s7 + $0x104] ss:$16 sps:$4 sm:$0xff]   ;;  %v6073_v7 = vld [vmem:[%s7866_s7 + $0x100] ss:$16 sps:$4 sm:$0xff]  }
 0x6ec   :  { %1409 = vmatpush1.bf16.msra.mxu0 %v8308_v4  ;;  %1450 = vmatpush1.bf16.msra.mxu1 %v8309_v1  ;;  %v6079_v4 = vld [vmem:[%s7866_s7 + $0x6c] ss:$16 sps:$4 sm:$0xff]   ;;  %v6085_v1 = vld [vmem:[%s7866_s7 + $0x68] ss:$16 sps:$4 sm:$0xff]  }
 0x6ed   :  { %1410 = vmatprep.subr.bf16.mxu0 %v8310_v15  ;;  %1451 = vmatprep.subr.bf16.mxu1 %v8311_v62  ;;  %v6091_v15 = vld [vmem:[%s7866_s7 + $0x124] ss:$16 sps:$4 sm:$0xff]   ;;  %v6097_v62 = vld [vmem:[%s7866_s7 + $0x120] ss:$16 sps:$4 sm:$0xff]  }
 0x6f0   :  { %1411 = vmatpush1.bf16.msra.mxu0 %v8312_v59  ;;  %1452 = vmatpush1.bf16.msra.mxu1 %v8313_v22  ;;  %v6103_v59 = vld [vmem:[%s7866_s7 + $0x8c] ss:$16 sps:$4 sm:$0xff]   ;;  %v6109_v22 = vld [vmem:[%s7866_s7 + $0x88] ss:$16 sps:$4 sm:$0xff]  }
 0x6f1   :  { %1840 = vmatprep.subr.bf16.mxu0 %v5925_v23  ;;  %1881 = vmatprep.subr.bf16.mxu1 %v6007_v58 }
 0x786   :  { %v1311_v24 = vpop.f32.mrb[24].mxu0  ;;  %v1352_v25 = vpop.f32.mrb[24].mxu1 }
 0x787   :  { %v1312_v28 = vadd.f32 %v1311_v24, %v8315_v27  ;;  %v1313_v29 = vpop.f32.mrb[25].mxu0  ;;  %v1354_v30 = vpop.f32.mrb[25].mxu1  ;;  %v1353_v49 = vadd.f32 %v1352_v25, %v5155_v0  ;;  %v6115_v24 = vld [vmem:[%s7866_s7 + $0x144] ss:$16 sps:$4 sm:$0xff]   ;;  %v6121_v25 = vld [vmem:[%s7866_s7 + $0x140] ss:$16 sps:$4 sm:$0xff]  }
 0x788   :  { %v1315_v21 = vpop.f32.mrb[26].mxu0  ;;  %v1356_v37 = vpop.f32.mrb[26].mxu1  ;;  %v1314_v41 = vadd.f32 %v1313_v29, %v8212_v56  ;;  %v1355_v47 = vadd.f32 %v1354_v30, %v5151_v61  ;;  %v6133_v29 = vld [vmem:[%s7866_s7 + $0xa8] ss:$16 sps:$4 sm:$0xff]   ;;  %v6139_v30 = vld [vmem:[%s7866_s7 + $0x164] ss:$16 sps:$4 sm:$0xff]  }
 0x789   :  { %v3630_v38 = vmul.f32 -1.442695, %v1312_v28  ;;  %v1316_v39 = vpop.f32.mrb[27].mxu0  ;;  %v1357_v40 = vpop.f32.mrb[27].mxu1  ;;  %v6127_v28 = vld [vmem:[%s7866_s7 + $0xac] ss:$16 sps:$4 sm:$0xff]  }
 0x78a   :  { %v3631_v42 = vmul.f32 -1.442695, %v1314_v41  ;;  %8317 = vst [vmem:[#allocation4_spill] sm:$0xff] %v6133_v29  ;;  %v6145_v21 = vld [vmem:[%s7866_s7 + $0x160] ss:$16 sps:$4 sm:$0xff]  }
 0x78b   :  { %4228 = vpow2.f32 %v3630_v38  ;;  %8318 = vst [vmem:[#allocation5_spill] sm:$0xff] %v6145_v21  ;;  %v6151_v37 = vld [vmem:[%s7866_s7 + $0xcc] ss:$16 sps:$4 sm:$0xff]   ;;  %v6157_v38 = vld [vmem:[%s7866_s7 + $0xc8] ss:$16 sps:$4 sm:$0xff]  }
 0x78c   :  { %4230 = vpow2.f32 %v3631_v42  ;;  %8319 = vst [vmem:[#allocation6_spill] sm:$0xff] %v6151_v37  ;;  %8320 = vst [vmem:[#allocation30_spill] sm:$0xff] %v6157_v38  ;;  %v6163_v39 = vld [vmem:[%s7866_s7 + $0x184] ss:$16 sps:$4 sm:$0xff]   ;;  %v6168_v40 = vld [vmem:[%s7866_s7 + $0x180] ss:$16 sps:$4 sm:$0xff]  }
 0x78d   :  { %8321 = vst [vmem:[#allocation2_spill] sm:$0xff] %v6163_v39  ;;  %8322 = vst [vmem:[#allocation3_spill] sm:$0xff] %v6168_v40  ;;  %v6173_v41 = vld [vmem:[%s7866_s7 + $0xec] ss:$16 sps:$4 sm:$0xff]   ;;  %v6179_v42 = vld [vmem:[%s7866_s7 + $0xe8] ss:$16 sps:$4 sm:$0xff]  }
 0x78e   :  { %8323 = vst [vmem:[#allocation31_spill] sm:$0xff] %v6173_v41  ;;  %8324 = vst [vmem:[#allocation7_spill] sm:$0xff] %v6179_v42 }
 0x795   :  { %v4229_v43 = vpop.eup %4228 }
 0x796   :  { %v1362_v44 = vadd.f32 1.0, %v4229_v43  ;;  %v4231_v45 = vpop.eup %4230  ;;  %v6184_v43 = vld [vmem:[%s7866_s7 + $0x1a4] ss:$16 sps:$4 sm:$0xff]  }
 0x797   :  { %v1368_v46 = vadd.f32 1.0, %v4231_v45  ;;  %8325 = vst [vmem:[#allocation8_spill] sm:$0xff] %v6184_v43  ;;  %v6197_v45 = vld [vmem:[%s7866_s7 + $0x1a0] ss:$16 sps:$4 sm:$0xff]  }
 0x798   :  { %4232 = vrcp.f32 %v1362_v44  ;;  %v6191_v44 = vld [vmem:[%s7866_s7 + $0x10c] ss:$16 sps:$4 sm:$0xff]   ;;  %8327 = vst [vmem:[#allocation10_spill] sm:$0xff] %v6197_v45 }
 0x799   :  { %4234 = vrcp.f32 %v1368_v46  ;;  %8326 = vst [vmem:[#allocation9_spill] sm:$0xff] %v6191_v44  ;;  %v6203_v46 = vld [vmem:[%s7866_s7 + $0x1c4] ss:$16 sps:$4 sm:$0xff]  }
 0x79a   :  { %8328 = vst [vmem:[#allocation11_spill] sm:$0xff] %v6203_v46 }
 0x7a2   :  { %v4233_v48 = vpop.eup %4232 }
 0x7a3   :  { %v1371_v50 = vmul.f32 %v4233_v48, %v1355_v47  ;;  %v4235_v55 = vpop.eup %4234  ;;  %v6209_v47 = vld [vmem:[%s7866_s7 + $0x108] ss:$16 sps:$4 sm:$0xff]   ;;  %v6215_v48 = vld [vmem:[%s7866_s7 + $0x12c] ss:$16 sps:$4 sm:$0xff]  }
 0x7a4   :  { %v1374_v16 = vsub.f32 1.0, %v4235_v55  ;;  %v1376_v10 = vmul.f32 %v4235_v55, %v5854_v33  ;;  %v5971_v33 = vld [vmem:[%s7866_s7 + $0x64] ss:$16 sps:$4 sm:$0xff]   ;;  %8329 = vst [vmem:[#allocation12_spill] sm:$0xff] %v6209_v47  ;;  %8330 = vst [vmem:[#allocation13_spill] sm:$0xff] %v6215_v48 }
 0x7a5   :  { %v1372_v54 = vadd.f32 %v1371_v50, %v1353_v49  ;;  %v6221_v49 = vld [vmem:[%s7866_s7 + $0x1c0] ss:$16 sps:$4 sm:$0xff]   ;;  %v6227_v50 = vld [vmem:[%s7866_s7 + $0x1e4] ss:$16 sps:$4 sm:$0xff]   ;;  %v6239_v55 = vld [vmem:[%s7866_s7 + $0x14c] ss:$16 sps:$4 sm:$0xff]  }
 0x7a6   :  { %8331 = vst [vmem:[#allocation14_spill] sm:$0xff] %v6221_v49  ;;  %8332 = vst [vmem:[#allocation15_spill] sm:$0xff] %v6227_v50 }
 0x7a7   :  { %4236 = vtanh.f32 %v1372_v54  ;;  %v6233_v54 = vld [vmem:[%s7866_s7 + $0x128] ss:$16 sps:$4 sm:$0xff]   ;;  %8334 = vst [vmem:[#allocation17_spill] sm:$0xff] %v6239_v55 }
 0x7a8   :  { %8333 = vst [vmem:[#allocation16_spill] sm:$0xff] %v6233_v54 }
 0x7b1   :  { %v4237_v19 = vpop.eup %4236 }
 0x7b2   :  { %v1375_v12 = vmul.f32 %v4237_v19, %v1374_v16  ;;  %v6245_v16 = vld [vmem:[%s7866_s7 + $0x1e0] ss:$16 sps:$4 sm:$0xff]   ;;  %v6254_v19 = vld [vmem:[%s7866_s7 + $0x148] ss:$16 sps:$4 sm:$0xff]  }
 0x7b3   :  { %8335 = vst [vmem:[#allocation18_spill] sm:$0xff] %v6245_v16  ;;  %8336 = vst [vmem:[#allocation19_spill] sm:$0xff] %v6254_v19 }
 0x7b4   :  { %v5933_v5 = vadd.f32 %v1376_v10, %v1375_v12  ;;  %v6260_v12 = vld [vmem:[%s7866_s7 + $0x16c] ss:$16 sps:$4 sm:$0xff]   ;;  %v6265_v10 = vld [vmem:[%s7866_s7 + $0x168] ss:$16 sps:$4 sm:$0xff]  }
 0x7b5   :  { %8337 = vst [vmem:[#allocation20_spill] sm:$0xff] %v6260_v12  ;;  %8338 = vst [vmem:[#allocation21_spill] sm:$0xff] %v6265_v10 }
 0x7b6   :  { %v1379_v8 = vpack.c.bf16 %v5933_v5, %v5933_v5 }
 0x7b8   :  { %1412 = vmatprep.mubr.bf16.mxu0 %v1379_v8  ;;  %1453 = vmatprep.mubr.bf16.mxu1 %v1379_v8  ;;  %v6270_v8 = vld [vmem:[%s7866_s7 + $0x18c] ss:$16 sps:$4 sm:$0xff]  }
 0x7b9   :  { %1413 = vmatmul.mubr.bf16.vlgmr.msra.gmra.mrb[28].mxu0 %v1378_v51  ;;  %1454 = vmatmul.mubr.bf16.vlgmr.msra.gmra.mrb[28].mxu1 %v1378_v51  ;;  %8339 = vst [vmem:[#allocation22_spill] sm:$0xff] %v6270_v8  ;;  %v6283_v51 = vld [vmem:[%s7866_s7 + $0x1ac] ss:$16 sps:$4 sm:$0xff]  }
 0x7ba   :  { %1841 = vmatpush1.bf16.msra.mxu0 %v5940_v14  ;;  %1882 = vmatpush1.bf16.msra.mxu1 %v6013_v36  ;;  %8341 = vst [vmem:[#allocation28_spill] sm:$0xff] %v6283_v51 }
 0x7bb   :  { %1842 = vmatprep.subr.bf16.mxu0 %v5947_v32  ;;  %1883 = vmatprep.subr.bf16.mxu1 %v6031_v63 }
 0x7be   :  { %1843 = vmatpush1.bf16.msra.mxu0 %v5953_v18  ;;  %1884 = vmatpush1.bf16.msra.mxu1 %v6037_v6 }
 0x7bf   :  { %1844 = vmatprep.subr.bf16.mxu0 %v5959_v52  ;;  %1885 = vmatprep.subr.bf16.mxu1 %v6055_v26 }
 0x7c2   :  { %1845 = vmatpush1.bf16.msra.mxu0 %v5965_v17  ;;  %1886 = vmatpush1.bf16.msra.mxu1 %v6061_v60 }
 0x7c3   :  { %1846 = vmatprep.subr.bf16.mxu0 %v5971_v33  ;;  %1887 = vmatprep.subr.bf16.mxu1 %v6079_v4 }
 0x7c6   :  { %1847 = vmatpush1.bf16.msra.mxu0 %v5978_v9  ;;  %1888 = vmatpush1.bf16.msra.mxu1 %v6085_v1 }
 0x7c7   :  { %1848 = vmatprep.subr.bf16.mxu0 %v5984_v11  ;;  %1889 = vmatprep.subr.bf16.mxu1 %v6103_v59 }
 0x7ca   :  { %1849 = vmatpush1.bf16.msra.mxu0 %v5989_v53  ;;  %1890 = vmatpush1.bf16.msra.mxu1 %v6109_v22 }
 0x7cb   :  { %1850 = vmatprep.subr.bf16.mxu0 %v5996_v35  ;;  %1891 = vmatprep.subr.bf16.mxu1 %v6127_v28 }
 0x7ce   :  { %1851 = vmatpush1.bf16.msra.mxu0 %v6001_v31  ;;  %1892 = vmatpush1.bf16.msra.mxu1 %v6133_v29 }
 0x7cf   :  { %1852 = vmatprep.subr.bf16.mxu0 %v6019_v57  ;;  %1893 = vmatprep.subr.bf16.mxu1 %v6151_v37 }
 0x7d2   :  { %1853 = vmatpush1.bf16.msra.mxu0 %v6025_v3  ;;  %1894 = vmatpush1.bf16.msra.mxu1 %v6157_v38 }
 0x7d3   :  { %1854 = vmatprep.subr.bf16.mxu0 %v6043_v20  ;;  %1895 = vmatprep.subr.bf16.mxu1 %v6173_v41 }
 0x7d6   :  { %1855 = vmatpush1.bf16.msra.mxu0 %v6049_v34  ;;  %1896 = vmatpush1.bf16.msra.mxu1 %v6179_v42 }
 0x7d7   :  { %1856 = vmatprep.subr.bf16.mxu0 %v6067_v2  ;;  %1897 = vmatprep.subr.bf16.mxu1 %v6191_v44 }
 0x7da   :  { %1857 = vmatpush1.bf16.msra.mxu0 %v6073_v7  ;;  %1898 = vmatpush1.bf16.msra.mxu1 %v6209_v47 }
 0x7db   :  { %1858 = vmatprep.subr.bf16.mxu0 %v6091_v15  ;;  %1899 = vmatprep.subr.bf16.mxu1 %v6215_v48 }
 0x7de   :  { %1859 = vmatpush1.bf16.msra.mxu0 %v6097_v62  ;;  %1900 = vmatpush1.bf16.msra.mxu1 %v6233_v54 }
 0x7df   :  { %1860 = vmatprep.subr.bf16.mxu0 %v6115_v24  ;;  %1901 = vmatprep.subr.bf16.mxu1 %v6239_v55 }
 0x7e2   :  { %1861 = vmatpush1.bf16.msra.mxu0 %v6121_v25  ;;  %1902 = vmatpush1.bf16.msra.mxu1 %v6254_v19 }
 0x7e3   :  { %1862 = vmatprep.subr.bf16.mxu0 %v6139_v30  ;;  %1903 = vmatprep.subr.bf16.mxu1 %v6260_v12  ;;  %v6289_v12 = vld [vmem:[%s7866_s7 + $0x1a8] ss:$16 sps:$4 sm:$0xff]  }
 0x7e4   :  { %8342 = vst [vmem:[#allocation29_spill] sm:$0xff] %v6289_v12 }
 0x7e6   :  { %1863 = vmatpush1.bf16.msra.mxu0 %v6145_v21  ;;  %1904 = vmatpush1.bf16.msra.mxu1 %v6265_v10  ;;  %v6295_v10 = vld [vmem:[%s7866_s7 + $0x1cc] ss:$16 sps:$4 sm:$0xff]  }
 0x7e7   :  { %1864 = vmatprep.subr.bf16.mxu0 %v6163_v39  ;;  %1905 = vmatprep.subr.bf16.mxu1 %v6270_v8  ;;  %8343 = vst [vmem:[#allocation34_spill] sm:$0xff] %v6295_v10  ;;  %v6301_v8 = vld [vmem:[%s7866_s7 + $0x1c8] ss:$16 sps:$4 sm:$0xff]  }
 0x7e8   :  { %8344 = vst [vmem:[#allocation33_spill] sm:$0xff] %v6301_v8 }
 0x7ea   :  { %1865 = vmatpush1.bf16.msra.mxu0 %v6168_v40  ;;  %1906 = vmatpush1.bf16.msra.mxu1 %v6277_v13  ;;  %v6307_v13 = vld [vmem:[%s7866_s7 + $0x1ec] ss:$16 sps:$4 sm:$0xff]  }
 0x7eb   :  { %1866 = vmatprep.subr.bf16.mxu0 %v6184_v43  ;;  %1907 = vmatprep.subr.bf16.mxu1 %v6283_v51  ;;  %8345 = vst [vmem:[#allocation32_spill] sm:$0xff] %v6307_v13  ;;  %v6313_v51 = vld [vmem:[%s7866_s7 + $0x1e8] ss:$16 sps:$4 sm:$0xff]  }
 0x7ec   :  { %8346 = vst [vmem:[#allocation35_spill] sm:$0xff] %v6313_v51 }
 0x7ee   :  { %1867 = vmatpush1.bf16.msra.mxu0 %v6197_v45  ;;  %1908 = vmatpush1.bf16.msra.mxu1 %v6289_v12 }
 0x7ef   :  { %1868 = vmatprep.subr.bf16.mxu0 %v6203_v46  ;;  %1909 = vmatprep.subr.bf16.mxu1 %v6295_v10 }
 0x7f2   :  { %1869 = vmatpush1.bf16.msra.mxu0 %v6221_v49  ;;  %1910 = vmatpush1.bf16.msra.mxu1 %v6301_v8 }
 0x7f3   :  { %1870 = vmatprep.subr.bf16.mxu0 %v6227_v50  ;;  %1911 = vmatprep.subr.bf16.mxu1 %v6307_v13 }
 0x7f6   :  { %1871 = vmatpush1.bf16.msra.mxu0 %v6245_v16  ;;  %1912 = vmatpush1.bf16.msra.mxu1 %v6313_v51 }
 0x7f7   :  { %2103 = vmatprep.subr.bf16.mxu1 %v5925_v23 }
 0x88c   :  { %v1414_v12 = vpop.f32.mrb[28].mxu0  ;;  %v1455_v10 = vpop.f32.mrb[28].mxu1 }
 0x88d   :  { %v1415_v19 = vadd.f32 %v1414_v12, %v8315_v27  ;;  %v1416_v55 = vpop.f32.mrb[29].mxu0  ;;  %v1457_v54 = vpop.f32.mrb[29].mxu1  ;;  %v1456_v12 = vadd.f32 %v1455_v10, %v5155_v0  ;;  %v6382_v10 = vld [vmem:[%s7869_s9 + $0x8] sm:$0xff]  }
 0x88e   :  { %v1418_v48 = vpop.f32.mrb[30].mxu0  ;;  %v1459_v47 = vpop.f32.mrb[30].mxu1  ;;  %v1417_v41 = vadd.f32 %v1416_v55, %v8212_v56  ;;  %v1458_v29 = vadd.f32 %v1457_v54, %v5151_v61  ;;  %v6325_v56 = vld [vmem:[%s7867_s5] ss:$0 sm:$0xff] }
 0x88f   :  { %v3632_v8 = vmul.f32 -1.442695, %v1415_v19  ;;  %v1419_v44 = vpop.f32.mrb[31].mxu0  ;;  %v1460_v42 = vpop.f32.mrb[31].mxu1  ;;  %v8027_v19 = vmov 0.0  }
 0x890   :  { %v3633_v38 = vmul.f32 -1.442695, %v1417_v41  ;;  %3797 = vmatprep.subr.bf16.mxu0 %v8027_v19 }
 0x891   :  { %4238 = vpow2.f32 %v3632_v8  ;;  %v6389_v8 = vld [vmem:[%s7869_s9 + $0x10] sm:$0xff]  }
 0x892   :  { %4240 = vpow2.f32 %v3633_v38  ;;  %v6330_v38 = vld [vmem:[%s7868_s6] ss:$0 sm:$0xff] }
 0x893   :  { %v1495_v61 = vadd.f32 %v6330_v38, %v6325_v56 }
 0x89b   :  { %v4239_v13 = vpop.eup %4238 }
 0x89c   :  { %v1465_v51 = vadd.f32 1.0, %v4239_v13  ;;  %v4241_v23 = vpop.eup %4240  ;;  %v6396_v13 = vld [vmem:[%s7869_s9 + $0x18] sm:$0xff]  }
 0x89d   :  { %v1471_v37 = vadd.f32 1.0, %v4241_v23 }
 0x89e   :  { %4242 = vrcp.f32 %v1465_v51  ;;  %v6403_v51 = vld [vmem:[%s7869_s9 + $0x20] sm:$0xff]  }
 0x89f   :  { %4244 = vrcp.f32 %v1471_v37  ;;  %v1496_v37 = vmax.f32 %v1495_v61, 0.0 }
 0x8a1   :  { %v1497_v54 = vpack.c.bf16 %v1496_v37, %v1496_v37 }
 0x8a8   :  { %v4243_v27 = vpop.eup %4242 }
 0x8a9   :  { %v1474_v47 = vmul.f32 %v4243_v27, %v1458_v29  ;;  %v4245_v23 = vpop.eup %4244  ;;  %v6411_v27 = vld [vmem:[%s7869_s9 + $0x28] sm:$0xff]  }
 0x8aa   :  { %v1477_v41 = vsub.f32 1.0, %v4245_v23  ;;  %v1479_v42 = vmul.f32 %v4245_v23, %v5933_v5  ;;  %v6373_v5 = vld [vmem:[%s7869_s9] sm:$0xff]   ;;  %v8347_v23 = vld [vmem:[#allocation25_spill] sm:$0xff] }
 0x8ab   :  { %v1475_v48 = vadd.f32 %v1474_v47, %v1456_v12  ;;  %v6418_v12 = vld [vmem:[%s7869_s9 + $0x30] sm:$0xff]   ;;  %v6425_v47 = vld [vmem:[%s7869_s9 + $0x38] sm:$0xff]  }
 0x8ad   :  { %4246 = vtanh.f32 %v1475_v48  ;;  %v172_v48 = vld [vmem:[%s7870_s8] sm:$0xf] }
 0x8ae   :  { %v6434_v61 = vrot.slane %v172_v48, %v8347_v23 }
 0x8b0   :  { %8348 = vst [vmem:[#allocation25_spill] sm:$0xff] %v6434_v61 }
 0x8b7   :  { %v4247_v0 = vpop.eup %4246 }
 0x8b8   :  { %v1478_v29 = vmul.f32 %v4247_v0, %v1477_v41  ;;  %v8349_v0 = vld [vmem:[#allocation26_spill] sm:$0xff] }
 0x8b9   :  { %v6437_v37 = vrot.slane %v172_v48, %v8349_v0  ;;  %v8350_v0 = vld [vmem:[#allocation24_spill] sm:$0xff] }
 0x8ba   :  { %v6335_v44 = vadd.f32 %v1479_v42, %v1478_v29 }
 0x8bc   :  { %v1498_v55 = vpack.c.bf16 %v6335_v44, %v6335_v44 }
 0x8be   :  { %1872 = vmatprep.mubr.bf16.mxu0 %v1498_v55  ;;  %1913 = vmatprep.mubr.bf16.mxu1 %v1498_v55 }
 0x8bf   :  { %1873 = vmatmul.mubr.bf16.vlgmr.msra.gmra.mrb[32].mxu0 %v1497_v54  ;;  %1914 = vmatmul.mubr.bf16.vlgmr.msra.gmra.mrb[32].mxu1 %v1497_v54 }
 0x8c0   :  { %2104 = vmatpush1.bf16.msra.mxu1 %v5940_v14  ;;  %3798 = vmatpush3.bf16.msra.mxu0 %v6373_v5 }
 0x8c1   :  { %2105 = vmatprep.subr.bf16.mxu1 %v5947_v32  ;;  %3799 = vmatprep.subr.bf16.mxu0 %v8027_v19 }
 0x8c2   :  { %3813 = vmatprep.mubr.msk.bf16.mxu0 %vm4549_vm0, %v8027_v19 }
 0x8c4   :  { %2106 = vmatpush1.bf16.msra.mxu1 %v5953_v18  ;;  %3800 = vmatpush3.bf16.msra.mxu0 %v6382_v10 }
 0x8c5   :  { %2107 = vmatprep.subr.bf16.mxu1 %v5959_v52  ;;  %3801 = vmatprep.subr.bf16.mxu0 %v8027_v19 }
 0x8c8   :  { %2108 = vmatpush1.bf16.msra.mxu1 %v5965_v17  ;;  %3802 = vmatpush3.bf16.msra.mxu0 %v6389_v8 }
 0x8c9   :  { %2109 = vmatprep.subr.bf16.mxu1 %v5971_v33  ;;  %3803 = vmatprep.subr.bf16.mxu0 %v8027_v19 }
 0x8cc   :  { %2110 = vmatpush1.bf16.msra.mxu1 %v5978_v9  ;;  %3804 = vmatpush3.bf16.msra.mxu0 %v6396_v13 }
 0x8cd   :  { %2111 = vmatprep.subr.bf16.mxu1 %v5984_v11  ;;  %3805 = vmatprep.subr.bf16.mxu0 %v8027_v19 }
 0x8d0   :  { %2112 = vmatpush1.bf16.msra.mxu1 %v5989_v53  ;;  %3806 = vmatpush3.bf16.msra.mxu0 %v6403_v51 }
 0x8d1   :  { %2113 = vmatprep.subr.bf16.mxu1 %v5996_v35  ;;  %3807 = vmatprep.subr.bf16.mxu0 %v8027_v19 }
 0x8d4   :  { %2114 = vmatpush1.bf16.msra.mxu1 %v6001_v31  ;;  %3808 = vmatpush3.bf16.msra.mxu0 %v6411_v27 }
 0x8d5   :  { %2115 = vmatprep.subr.bf16.mxu1 %v6019_v57  ;;  %3809 = vmatprep.subr.bf16.mxu0 %v8027_v19 }
 0x8d8   :  { %2116 = vmatpush1.bf16.msra.mxu1 %v6025_v3  ;;  %3810 = vmatpush3.bf16.msra.mxu0 %v6418_v12 }
 0x8d9   :  { %2117 = vmatprep.subr.bf16.mxu1 %v6043_v20  ;;  %3811 = vmatprep.subr.bf16.mxu0 %v8027_v19 }
 0x8dc   :  { %2118 = vmatpush1.bf16.msra.mxu1 %v6049_v34  ;;  %3812 = vmatpush3.bf16.msra.mxu0 %v6425_v47 }
 0x8dd   :  { %2119 = vmatprep.subr.bf16.mxu1 %v6067_v2  ;;  %2144 = vmatprep.subr.bf16.mxu0 %v6007_v58 }
 0x8e0   :  { %2120 = vmatpush1.bf16.msra.mxu1 %v6073_v7 }
 0x8e1   :  { %2121 = vmatprep.subr.bf16.mxu1 %v6091_v15 }
 0x8e4   :  { %2122 = vmatpush1.bf16.msra.mxu1 %v6097_v62 }
 0x8e5   :  { %2123 = vmatprep.subr.bf16.mxu1 %v6115_v24 }
 0x8e8   :  { %2124 = vmatpush1.bf16.msra.mxu1 %v6121_v25 }
 0x8e9   :  { %2125 = vmatprep.subr.bf16.mxu1 %v6139_v30 }
 0x8ec   :  { %2126 = vmatpush1.bf16.msra.mxu1 %v6145_v21 }
 0x8ed   :  { %2127 = vmatprep.subr.bf16.mxu1 %v6163_v39  ;;  %v8351_v39 = vsub.s32 3, %v8350_v0 }
 0x8ef   :  { %v6443_v21 = vrot.slane %v172_v48, %v8351_v39 }
 0x8f0   :  { %2128 = vmatpush1.bf16.msra.mxu1 %v6168_v40 }
 0x8f1   :  { %2129 = vmatprep.subr.bf16.mxu1 %v6184_v43 }
 0x8f4   :  { %2130 = vmatpush1.bf16.msra.mxu1 %v6197_v45 }
 0x8f5   :  { %2131 = vmatprep.subr.bf16.mxu1 %v6203_v46 }
 0x8f8   :  { %2132 = vmatpush1.bf16.msra.mxu1 %v6221_v49 }
 0x8f9   :  { %2133 = vmatprep.subr.bf16.mxu1 %v6227_v50 }
 0x8fc   :  { %2134 = vmatpush1.bf16.msra.mxu1 %v6245_v16 }
 0x8fd   :  { %3817 = vmatprep.subr.bf16.mxu1 %v8027_v19 }
 0x992   :  { %v1874_v41 = vpop.f32.mrb[32].mxu0  ;;  %v1915_v29 = vpop.f32.mrb[32].mxu1 }
 0x993   :  { %v1875_v42 = vadd.f32 %v1874_v41, %v6434_v61  ;;  %v1876_v54 = vpop.f32.mrb[33].mxu0  ;;  %v1917_v55 = vpop.f32.mrb[33].mxu1 }
 0x994   :  { %v1878_v19 = vpop.f32.mrb[34].mxu0  ;;  %v1919_v16 = vpop.f32.mrb[34].mxu1  ;;  %v1877_v45 = vadd.f32 %v1876_v54, %v6437_v37 }
 0x995   :  { %v3700_v50 = vmul.f32 -1.442695, %v1875_v42  ;;  %v1879_v49 = vpop.f32.mrb[35].mxu0  ;;  %v1920_v46 = vpop.f32.mrb[35].mxu1  ;;  %v8352_v19 = vsub.s32 2, %v8350_v0  ;;  %v8357_v0 = vld [vmem:[#allocation7_spill] sm:$0xff] }
 0x996   :  { %v3701_v43 = vmul.f32 -1.442695, %v1877_v45  ;;  %v1918_v46 = vadd.f32 %v1917_v55, %v6443_v21  ;;  %v8356_v55 = vld [vmem:[#allocation31_spill] sm:$0xff] }
 0x997   :  { %4248 = vpow2.f32 %v3700_v50  ;;  %v6447_v16 = vrot.slane %v172_v48, %v8352_v19  ;;  %v8358_v19 = vld [vmem:[#allocation9_spill] sm:$0xff] }
 0x998   :  { %4250 = vpow2.f32 %v3701_v43 }
 0x999   :  { %v1916_v45 = vadd.f32 %v1915_v29, %v6447_v16  ;;  %v8355_v29 = vld [vmem:[#allocation30_spill] sm:$0xff] }
 0x9a1   :  { %v4249_v23 = vpop.eup %4248 }
 0x9a2   :  { %v1925_v40 = vadd.f32 1.0, %v4249_v23  ;;  %v4251_v41 = vpop.eup %4250 }
 0x9a3   :  { %v1931_v61 = vadd.f32 1.0, %v4251_v41 }
 0x9a4   :  { %4252 = vrcp.f32 %v1925_v40 }
 0x9a5   :  { %4254 = vrcp.f32 %v1931_v61  ;;  %v8354_v61 = vld [vmem:[#allocation6_spill] sm:$0xff] }
 0x9ae   :  { %v4253_v49 = vpop.eup %4252 }
 0x9af   :  { %v1934_v43 = vmul.f32 %v4253_v49, %v1918_v46  ;;  %v4255_v40 = vpop.eup %4254  ;;  %v8359_v46 = vld [vmem:[#allocation12_spill] sm:$0xff]  ;;  %v8360_v49 = vld [vmem:[#allocation13_spill] sm:$0xff] }
 0x9b0   :  { %v1937_v42 = vsub.f32 1.0, %v4255_v40  ;;  %v1939_v23 = vmul.f32 %v4255_v40, %v6335_v44  ;;  %v8353_v44 = vld [vmem:[#allocation4_spill] sm:$0xff] }
 0x9b1   :  { %v1935_v50 = vadd.f32 %v1934_v43, %v1916_v45  ;;  %v8361_v45 = vld [vmem:[#allocation16_spill] sm:$0xff]  ;;  %v8362_v43 = vld [vmem:[#allocation17_spill] sm:$0xff] }
 0x9b2   :  { %v8364_v40 = vld [vmem:[#allocation20_spill] sm:$0xff] }
 0x9b3   :  { %4256 = vtanh.f32 %v1935_v50  ;;  %v8363_v50 = vld [vmem:[#allocation19_spill] sm:$0xff] }
 0x9bd   :  { %v4257_v54 = vpop.eup %4256 }
 0x9be   :  { %v1938_v39 = vmul.f32 %v4257_v54, %v1937_v42  ;;  %v8365_v42 = vld [vmem:[#allocation21_spill] sm:$0xff]  ;;  %v8366_v54 = vld [vmem:[#allocation22_spill] sm:$0xff] }
 0x9c0   :  { %v6452_v41 = vadd.f32 %v1939_v23, %v1938_v39  ;;  %v8367_v39 = vld [vmem:[#allocation23_spill] sm:$0xff]  ;;  %v8368_v23 = vld [vmem:[#allocation28_spill] sm:$0xff] }
 0x9c2   :  { %v1941_v48 = vpack.c.bf16 %v6452_v41, %v6452_v41 }
 0x9c4   :  { %3814 = vmatmul.mubr.bf16.vlgmr.msra.gmra.mrb[36].mxu0 %v1941_v48  ;;  %2135 = vmatprep.mubr.bf16.mxu1 %v1941_v48 }
 0x9c5   :  { %2176 = vmatprep.mubr.bf16.mxu0 %v1941_v48  ;;  %2145 = vmatpush1.bf16.msra.mxu0 %v6013_v36  ;;  %v8369_v48 = vld [vmem:[#allocation29_spill] sm:$0xff] }
 0x9c6   :  { %2146 = vmatprep.subr.bf16.mxu0 %v6031_v63 }
 0x9c9   :  { %2147 = vmatpush1.bf16.msra.mxu0 %v6037_v6 }
 0x9ca   :  { %2148 = vmatprep.subr.bf16.mxu0 %v6055_v26 }
 0x9cd   :  { %2149 = vmatpush1.bf16.msra.mxu0 %v6061_v60 }
 0x9ce   :  { %2150 = vmatprep.subr.bf16.mxu0 %v6079_v4 }
 0x9d1   :  { %2151 = vmatpush1.bf16.msra.mxu0 %v6085_v1 }
 0x9d2   :  { %2152 = vmatprep.subr.bf16.mxu0 %v6103_v59 }
 0x9d5   :  { %2153 = vmatpush1.bf16.msra.mxu0 %v6109_v22 }
 0x9d6   :  { %2154 = vmatprep.subr.bf16.mxu0 %v6127_v28 }
 0x9d9   :  { %2155 = vmatpush1.bf16.msra.mxu0 %v8353_v44 }
 0x9da   :  { %2156 = vmatprep.subr.bf16.mxu0 %v8354_v61 }
 0x9dd   :  { %2157 = vmatpush1.bf16.msra.mxu0 %v8355_v29 }
 0x9de   :  { %2158 = vmatprep.subr.bf16.mxu0 %v8356_v55 }
 0x9e1   :  { %2159 = vmatpush1.bf16.msra.mxu0 %v8357_v0 }
 0x9e2   :  { %2160 = vmatprep.subr.bf16.mxu0 %v8358_v19 }
 0x9e5   :  { %2161 = vmatpush1.bf16.msra.mxu0 %v8359_v46  ;;  %v8370_v46 = vld [vmem:[#allocation34_spill] sm:$0xff] }
 0x9e6   :  { %2162 = vmatprep.subr.bf16.mxu0 %v8360_v49  ;;  %v8371_v49 = vld [vmem:[#allocation33_spill] sm:$0xff] }
 0x9e9   :  { %2163 = vmatpush1.bf16.msra.mxu0 %v8361_v45  ;;  %v8372_v45 = vld [vmem:[#allocation32_spill] sm:$0xff] }
 0x9ea   :  { %2164 = vmatprep.subr.bf16.mxu0 %v8362_v43  ;;  %v8373_v43 = vld [vmem:[#allocation35_spill] sm:$0xff] }
 0x9ed   :  { %2165 = vmatpush1.bf16.msra.mxu0 %v8363_v50  ;;  %v8374_v50 = vld [vmem:[#allocation27_spill] sm:$0xff] }
 0x9ee   :  { %2166 = vmatprep.subr.bf16.mxu0 %v8364_v40 }
 0x9f1   :  { %2167 = vmatpush1.bf16.msra.mxu0 %v8365_v42 }
 0x9f2   :  { %2168 = vmatprep.subr.bf16.mxu0 %v8366_v54  ;;  %v6491_v54 = vld [vmem:[%s7871_s10] ss:$0 sm:$0xff] }
 0x9f3   :  { %8375 = vst [vmem:[#allocation26_spill] sm:$0xff] %v6491_v54 }
 0x9f5   :  { %2169 = vmatpush1.bf16.msra.mxu0 %v8367_v39 }
 0x9f6   :  { %2170 = vmatprep.subr.bf16.mxu0 %v8368_v23 }
 0x9f9   :  { %2171 = vmatpush1.bf16.msra.mxu0 %v8369_v48 }
 0x9fa   :  { %2172 = vmatprep.subr.bf16.mxu0 %v8370_v46 }
 0x9fd   :  { %2173 = vmatpush1.bf16.msra.mxu0 %v8371_v49 }
 0x9fe   :  { %2174 = vmatprep.subr.bf16.mxu0 %v8372_v45  ;;  %v8376_v45 = vlaneseq }
 0xa00   :  { %v6496_v40 = vand.u32 127, %v8376_v45 }
 0xa01   :  { %2175 = vmatpush1.bf16.msra.mxu0 %v8373_v43 }
 0xa02   :  { %2313 = vmatprep.subr.bf16.mxu0 %v8374_v50  ;;  %8377 = vst [vmem:[#allocation24_spill] sm:$0xff] %v6496_v40 }
 0xa97   :  { %v2030_v39 = vpop.f32.mrb[36].mxu0 }
 0xa98   :  { %v2031_v23 = vadd.f32 %v6491_v54, %v2030_v39  ;;  %v3815_v48 = vpop.f32.mrb[37].mxu0 }
 0xa99   :  { %v2033_v42 = vpop.f32.mrb[38].mxu0 }
 0xa9a   :  { %v3816_v46 = vpop.f32.mrb[39].mxu0  ;;  %v2037_v49 = vsel %vm2036_vm1, %v2031_v23, -inf }
 0xa9b   :  { %2038 = vmax.xlane.f32.xlu1 %v2037_v49 }
 0xb28   :  { %v2039_v43 = vpop.xlane.xlu1 %2038 }
 0xb29   :  { %vm2040_vm2 = vcmp.eq.f32.partialorder %v2031_v23, %v2039_v43 }
 0xb2a   :  { %v2041_v50 = vsel %vm2040_vm2, %v6496_v40, 2147483647 }
 0xb2b   :  { %v2042_v19 = vsel %vm2036_vm1, %v2041_v50, 2147483647 }
 0xb2c   :  { %v2044_v0 = vshra.s32 %v2042_v19, 16  ;;  %v2043_v29 = vand.u32 65535, %v2042_v19  ;;  %v8386_v19 = vld [vmem:[#allocation15_spill] sm:$0xff] }
 0xb2e   :  { %v2046_v55 = vcvt.s32.f32 %v2044_v0  ;;  %v2045_v48 = vcvt.s32.f32 %v2043_v29  ;;  %v8378_v29 = vmov 0.0   ;;  %v8385_v0 = vld [vmem:[#allocation14_spill] sm:$0xff] }
 0xb30   :  { %2047 = vmin.xlane.f32.xlu0 %v2046_v55 }
 0xbbd   :  { %v2048_v39 = vpop.xlane.xlu0 %2047 }
 0xbbe   :  { %vm2049_vm3 = vcmp.eq.f32.partialorder %v2046_v55, %v2048_v39  ;;  %v2054_v42 = vcvt.f32.s32 %v2048_v39  ;;  %v8384_v55 = vld [vmem:[#allocation11_spill] sm:$0xff] }
 0xbbf   :  { %v2050_v46 = vsel %vm2049_vm3, %v2045_v48, inf  ;;  %v8388_v48 = vld [vmem:[#allocation25_spill] sm:$0xff] }
 0xbc0   :  { %2051 = vmin.xlane.f32.xlu0 %v2050_v46  ;;  %v2055_v54 = vshll.u32 %v2054_v42, 16 }
 0xc4d   :  { %v2052_v49 = vpop.xlane.xlu0 %2051 }
 0xc4e   :  { %v2053_v45 = vcvt.f32.s32 %v2052_v49 }
 0xc50   :  { %v2056_v61 = vadd.s32 %v2055_v54, %v2053_v45 }
 0xc52   :  { %v2057_v44 = vcvt.s32.f32 %v2056_v61  ;;  %v8383_v61 = vld [vmem:[#allocation10_spill] sm:$0xff] }
 0xc54   :  { %v2099_v43 = vmul.f32 %v6325_v56, %v2057_v44  ;;  %v8382_v44 = vld [vmem:[#allocation8_spill] sm:$0xff] }
 0xc56   :  { %v2100_v23 = vadd.f32 %v6330_v38, %v2099_v43 }
 0xc58   :  { %v2101_v50 = vmax.f32 %v2100_v23, 0.0 }
 0xc5a   :  { %v2102_v40 = vpack.c.bf16 %v2101_v50, %v2101_v50 }
 0xc5c   :  { %2136 = vmatmul.mubr.bf16.vlgmr.msra.gmra.mrb[36].mxu1 %v2102_v40  ;;  %2177 = vmatmul.mubr.bf16.vlgmr.msra.gmra.mrb[40].mxu0 %v2102_v40  ;;  %v8387_v40 = vld [vmem:[#allocation18_spill] sm:$0xff] }
 0xc5d   :  { %3818 = vmatpush3.bf16.msra.mxu1 %v6373_v5  ;;  %3833 = vmatprep.mubr.msk.bf16.mxu1 %vm4549_vm0, %v8378_v29 }
 0xc5e   :  { %3819 = vmatprep.subr.bf16.mxu1 %v8378_v29  ;;  %2314 = vmatpush1.bf16.msra.mxu0 %v5940_v14  ;;  %v8379_v14 = vld [vmem:[#allocation5_spill] sm:$0xff] }
 0xc5f   :  { %2315 = vmatprep.subr.bf16.mxu0 %v5947_v32  ;;  %v8380_v32 = vld [vmem:[#allocation2_spill] sm:$0xff] }
 0xc61   :  { %3820 = vmatpush3.bf16.msra.mxu1 %v6382_v10 }
 0xc62   :  { %3821 = vmatprep.subr.bf16.mxu1 %v8378_v29  ;;  %2316 = vmatpush1.bf16.msra.mxu0 %v5953_v18 }
 0xc63   :  { %2317 = vmatprep.subr.bf16.mxu0 %v5959_v52 }
 0xc65   :  { %3822 = vmatpush3.bf16.msra.mxu1 %v6389_v8 }
 0xc66   :  { %3823 = vmatprep.subr.bf16.mxu1 %v8378_v29  ;;  %2318 = vmatpush1.bf16.msra.mxu0 %v5965_v17 }
 0xc67   :  { %2319 = vmatprep.subr.bf16.mxu0 %v5971_v33 }
 0xc69   :  { %3824 = vmatpush3.bf16.msra.mxu1 %v6396_v13 }
 0xc6a   :  { %3825 = vmatprep.subr.bf16.mxu1 %v8378_v29  ;;  %2320 = vmatpush1.bf16.msra.mxu0 %v5978_v9 }
 0xc6b   :  { %2321 = vmatprep.subr.bf16.mxu0 %v5984_v11 }
 0xc6d   :  { %3826 = vmatpush3.bf16.msra.mxu1 %v6403_v51 }
 0xc6e   :  { %3827 = vmatprep.subr.bf16.mxu1 %v8378_v29  ;;  %2322 = vmatpush1.bf16.msra.mxu0 %v5989_v53 }
 0xc6f   :  { %2323 = vmatprep.subr.bf16.mxu0 %v5996_v35 }
 0xc71   :  { %3828 = vmatpush3.bf16.msra.mxu1 %v6411_v27 }
 0xc72   :  { %3829 = vmatprep.subr.bf16.mxu1 %v8378_v29  ;;  %2324 = vmatpush1.bf16.msra.mxu0 %v6001_v31 }
 0xc73   :  { %2325 = vmatprep.subr.bf16.mxu0 %v6019_v57 }
 0xc75   :  { %3830 = vmatpush3.bf16.msra.mxu1 %v6418_v12 }
 0xc76   :  { %3831 = vmatprep.subr.bf16.mxu1 %v8378_v29  ;;  %2326 = vmatpush1.bf16.msra.mxu0 %v6025_v3 }
 0xc77   :  { %2327 = vmatprep.subr.bf16.mxu0 %v6043_v20 }
 0xc79   :  { %3832 = vmatpush3.bf16.msra.mxu1 %v6425_v47 }
 0xc7a   :  { %2354 = vmatprep.subr.bf16.mxu1 %v6007_v58  ;;  %2328 = vmatpush1.bf16.msra.mxu0 %v6049_v34  ;;  %v8381_v58 = vld [vmem:[#allocation3_spill] sm:$0xff] }
 0xc7b   :  { %2329 = vmatprep.subr.bf16.mxu0 %v6067_v2 }
 0xc7e   :  { %2330 = vmatpush1.bf16.msra.mxu0 %v6073_v7 }
 0xc7f   :  { %2331 = vmatprep.subr.bf16.mxu0 %v6091_v15 }
 0xc82   :  { %2332 = vmatpush1.bf16.msra.mxu0 %v6097_v62 }
 0xc83   :  { %2333 = vmatprep.subr.bf16.mxu0 %v6115_v24 }
 0xc86   :  { %2334 = vmatpush1.bf16.msra.mxu0 %v6121_v25 }
 0xc87   :  { %2335 = vmatprep.subr.bf16.mxu0 %v6139_v30 }
 0xc8a   :  { %2336 = vmatpush1.bf16.msra.mxu0 %v8379_v14 }
 0xc8b   :  { %2337 = vmatprep.subr.bf16.mxu0 %v8380_v32 }
 0xc8e   :  { %2338 = vmatpush1.bf16.msra.mxu0 %v8381_v58 }
 0xc8f   :  { %2339 = vmatprep.subr.bf16.mxu0 %v8382_v44 }
 0xc92   :  { %2340 = vmatpush1.bf16.msra.mxu0 %v8383_v61 }
 0xc93   :  { %2341 = vmatprep.subr.bf16.mxu0 %v8384_v55 }
 0xc96   :  { %2342 = vmatpush1.bf16.msra.mxu0 %v8385_v0 }
 0xc97   :  { %2343 = vmatprep.subr.bf16.mxu0 %v8386_v19 }
 0xc9a   :  { %2344 = vmatpush1.bf16.msra.mxu0 %v8387_v40 }
 0xc9b   :  { %3837 = vmatprep.subr.bf16.mxu0 %v8378_v29 }
 0xd2f   :  { %v2137_v54 = vpop.f32.mrb[36].mxu1  ;;  %v2178_v39 = vpop.f32.mrb[40].mxu0 }
 0xd30   :  { %v2138_v46 = vadd.f32 %v2137_v54, %v8388_v48  ;;  %v2139_v42 = vpop.f32.mrb[37].mxu1  ;;  %v2180_v49 = vpop.f32.mrb[41].mxu0  ;;  %v2179_v48 = vadd.f32 %v2178_v39, %v6447_v16  ;;  %v8404_v39 = vld [vmem:[#allocation28_spill] sm:$0xff] }
 0xd31   :  { %v2141_v45 = vpop.f32.mrb[38].mxu1  ;;  %v2182_v43 = vpop.f32.mrb[42].mxu0  ;;  %v2140_v55 = vadd.f32 %v2139_v42, %v6437_v37  ;;  %v2181_v32 = vadd.f32 %v2180_v49, %v6443_v21  ;;  %v8406_v49 = vld [vmem:[#allocation34_spill] sm:$0xff] }
 0xd32   :  { %v3711_v23 = vmul.f32 -1.442695, %v2138_v46  ;;  %v2142_v50 = vpop.f32.mrb[39].mxu1  ;;  %v2183_v61 = vpop.f32.mrb[43].mxu0 }
 0xd33   :  { %v3712_v0 = vmul.f32 -1.442695, %v2140_v55  ;;  %v8407_v50 = vld [vmem:[#allocation33_spill] sm:$0xff] }
 0xd34   :  { %4258 = vpow2.f32 %v3711_v23 }
 0xd35   :  { %4260 = vpow2.f32 %v3712_v0 }
 0xd3e   :  { %v4259_v19 = vpop.eup %4258 }
 0xd3f   :  { %v2188_v40 = vadd.f32 1.0, %v4259_v19  ;;  %v4261_v44 = vpop.eup %4260  ;;  %v8402_v19 = vld [vmem:[#allocation22_spill] sm:$0xff] }
 0xd40   :  { %v2194_v58 = vadd.f32 1.0, %v4261_v44 }
 0xd41   :  { %4262 = vrcp.f32 %v2188_v40  ;;  %v8403_v40 = vld [vmem:[#allocation23_spill] sm:$0xff] }
 0xd42   :  { %4264 = vrcp.f32 %v2194_v58  ;;  %v8401_v58 = vld [vmem:[#allocation21_spill] sm:$0xff] }
 0xd4b   :  { %v4263_v54 = vpop.eup %4262 }
 0xd4c   :  { %v2197_v45 = vmul.f32 %v4263_v54, %v2181_v32  ;;  %v4265_v61 = vpop.eup %4264  ;;  %v8400_v32 = vld [vmem:[#allocation20_spill] sm:$0xff] }
 0xd4d   :  { %v2200_v43 = vsub.f32 1.0, %v4265_v61  ;;  %v2202_v55 = vmul.f32 %v4265_v61, %v6452_v41  ;;  %v8389_v41 = vld [vmem:[#allocation4_spill] sm:$0xff] }
 0xd4e   :  { %v2198_v46 = vadd.f32 %v2197_v45, %v2179_v48  ;;  %v8405_v48 = vld [vmem:[#allocation29_spill] sm:$0xff]  ;;  %v8408_v54 = vld [vmem:[#allocation32_spill] sm:$0xff]  ;;  %v8409_v45 = vld [vmem:[#allocation35_spill] sm:$0xff] }
 0xd50   :  { %4266 = vtanh.f32 %v2198_v46  ;;  %v6595_v46 = vld [vmem:[%s7866_s7 + $0x4] ss:$16 sps:$4 sm:$0xff]  }
 0xd51   :  { %8410 = vst [vmem:[#allocation27_spill] sm:$0xff] %v6595_v46 }
 0xd5a   :  { %v4267_v42 = vpop.eup %4266 }
 0xd5b   :  { %v2201_v23 = vmul.f32 %v4267_v42, %v2200_v43  ;;  %v8411_v43 = vld [vmem:[#allocation26_spill] sm:$0xff] }
 0xd5d   :  { %v6557_v0 = vadd.f32 %v2202_v55, %v2201_v23 }
 0xd5f   :  { %v2204_v44 = vpack.c.bf16 %v6557_v0, %v6557_v0 }
 0xd61   :  { %3834 = vmatmul.mubr.bf16.vlgmr.msra.gmra.mrb[40].mxu1 %v2204_v44  ;;  %2345 = vmatprep.mubr.bf16.mxu0 %v2204_v44 }
 0xd62   :  { %2386 = vmatprep.mubr.bf16.mxu1 %v2204_v44  ;;  %2355 = vmatpush1.bf16.msra.mxu1 %v6013_v36  ;;  %v8390_v36 = vld [vmem:[#allocation6_spill] sm:$0xff] }
 0xd63   :  { %2356 = vmatprep.subr.bf16.mxu1 %v6031_v63  ;;  %v8391_v63 = vld [vmem:[#allocation30_spill] sm:$0xff] }
 0xd66   :  { %2357 = vmatpush1.bf16.msra.mxu1 %v6037_v6  ;;  %v8392_v6 = vld [vmem:[#allocation31_spill] sm:$0xff] }
 0xd67   :  { %2358 = vmatprep.subr.bf16.mxu1 %v6055_v26  ;;  %v8393_v26 = vld [vmem:[#allocation7_spill] sm:$0xff] }
 0xd6a   :  { %2359 = vmatpush1.bf16.msra.mxu1 %v6061_v60  ;;  %v8394_v60 = vld [vmem:[#allocation9_spill] sm:$0xff] }
 0xd6b   :  { %2360 = vmatprep.subr.bf16.mxu1 %v6079_v4  ;;  %v8395_v4 = vld [vmem:[#allocation12_spill] sm:$0xff] }
 0xd6e   :  { %2361 = vmatpush1.bf16.msra.mxu1 %v6085_v1  ;;  %v8396_v1 = vld [vmem:[#allocation13_spill] sm:$0xff] }
 0xd6f   :  { %2362 = vmatprep.subr.bf16.mxu1 %v6103_v59  ;;  %v8397_v59 = vld [vmem:[#allocation16_spill] sm:$0xff] }
 0xd72   :  { %2363 = vmatpush1.bf16.msra.mxu1 %v6109_v22  ;;  %v8398_v22 = vld [vmem:[#allocation17_spill] sm:$0xff] }
 0xd73   :  { %2364 = vmatprep.subr.bf16.mxu1 %v6127_v28  ;;  %v8399_v28 = vld [vmem:[#allocation19_spill] sm:$0xff] }
 0xd76   :  { %2365 = vmatpush1.bf16.msra.mxu1 %v8389_v41 }
 0xd77   :  { %2366 = vmatprep.subr.bf16.mxu1 %v8390_v36 }
 0xd7a   :  { %2367 = vmatpush1.bf16.msra.mxu1 %v8391_v63  ;;  %v8413_v63 = vld [vmem:[#allocation24_spill] sm:$0xff] }
 0xd7b   :  { %2368 = vmatprep.subr.bf16.mxu1 %v8392_v6 }
 0xd7e   :  { %2369 = vmatpush1.bf16.msra.mxu1 %v8393_v26 }
 0xd7f   :  { %2370 = vmatprep.subr.bf16.mxu1 %v8394_v60 }
 0xd82   :  { %2371 = vmatpush1.bf16.msra.mxu1 %v8395_v4 }
 0xd83   :  { %2372 = vmatprep.subr.bf16.mxu1 %v8396_v1 }
 0xd86   :  { %2373 = vmatpush1.bf16.msra.mxu1 %v8397_v59 }
 0xd87   :  { %2374 = vmatprep.subr.bf16.mxu1 %v8398_v22 }
 0xd8a   :  { %2375 = vmatpush1.bf16.msra.mxu1 %v8399_v28 }
 0xd8b   :  { %2376 = vmatprep.subr.bf16.mxu1 %v8400_v32 }
 0xd8e   :  { %2377 = vmatpush1.bf16.msra.mxu1 %v8401_v58 }
 0xd8f   :  { %2378 = vmatprep.subr.bf16.mxu1 %v8402_v19 }
 0xd92   :  { %2379 = vmatpush1.bf16.msra.mxu1 %v8403_v40 }
 0xd93   :  { %2380 = vmatprep.subr.bf16.mxu1 %v8404_v39 }
 0xd96   :  { %2381 = vmatpush1.bf16.msra.mxu1 %v8405_v48 }
 0xd97   :  { %2382 = vmatprep.subr.bf16.mxu1 %v8406_v49 }
 0xd9a   :  { %2383 = vmatpush1.bf16.msra.mxu1 %v8407_v50 }
 0xd9b   :  { %2384 = vmatprep.subr.bf16.mxu1 %v8408_v54 }
 0xd9e   :  { %2385 = vmatpush1.bf16.msra.mxu1 %v8409_v45 }
 0xd9f   :  { %2523 = vmatprep.subr.bf16.mxu1 %v6595_v46 }
 0xe34   :  { %v2239_v61 = vpop.f32.mrb[40].mxu1 }
 0xe35   :  { %v6599_v42 = vadd.f32 %v8411_v43, %v2239_v61  ;;  %v3835_v23 = vpop.f32.mrb[41].mxu1 }
 0xe36   :  { %v2242_v55 = vpop.f32.mrb[42].mxu1 }
 0xe37   :  { %8412 = vst [vmem:[#allocation5_spill] sm:$0xff] %v6599_v42  ;;  %v3836_v44 = vpop.f32.mrb[43].mxu1  ;;  %v2245_v41 = vsel %vm2036_vm1, %v6599_v42, -inf }
 0xe38   :  { %2246 = vmax.xlane.f32.xlu1 %v2245_v41 }
 0xec5   :  { %v2247_v36 = vpop.xlane.xlu1 %2246 }
 0xec6   :  { %vm2248_vm4 = vcmp.eq.f32.partialorder %v6599_v42, %v2247_v36 }
 0xec7   :  { %v2249_v6 = vsel %vm2248_vm4, %v8413_v63, 2147483647 }
 0xec8   :  { %v2250_v26 = vsel %vm2036_vm1, %v2249_v6, 2147483647 }
 0xec9   :  { %v2252_v60 = vshra.s32 %v2250_v26, 16  ;;  %v2251_v1 = vand.u32 65535, %v2250_v26  ;;  %v6615_v26 = vld [vmem:[%s7866_s7] ss:$16 sps:$4 sm:$0xff]  }
 0xecb   :  { %v2254_v4 = vcvt.s32.f32 %v2252_v60  ;;  %v2253_v22 = vcvt.s32.f32 %v2251_v1 }
 0xecd   :  { %2255 = vmin.xlane.f32.xlu0 %v2254_v4 }
 0xf5a   :  { %v2256_v59 = vpop.xlane.xlu0 %2255 }
 0xf5b   :  { %vm2257_vm5 = vcmp.eq.f32.partialorder %v2254_v4, %v2256_v59  ;;  %v2262_v23 = vcvt.f32.s32 %v2256_v59 }
 0xf5c   :  { %v2258_v61 = vsel %vm2257_vm5, %v2253_v22, inf }
 0xf5d   :  { %2259 = vmin.xlane.f32.xlu1 %v2258_v61  ;;  %v2263_v44 = vshll.u32 %v2262_v23, 16 }
 0xfea   :  { %v2260_v55 = vpop.xlane.xlu1 %2259 }
 0xfeb   :  { %v2261_v41 = vcvt.f32.s32 %v2260_v55 }
 0xfed   :  { %v2264_v43 = vadd.s32 %v2263_v44, %v2261_v41 }
 0xfef   :  { %v2265_v46 = vcvt.s32.f32 %v2264_v43 }
 0xff1   :  { %v2309_v36 = vmul.f32 %v6325_v56, %v2265_v46  ;;  %v6621_v46 = vld [vmem:[%s7866_s7 + $0x24] ss:$16 sps:$4 sm:$0xff]  }
 0xff3   :  { %v2310_v42 = vadd.f32 %v6330_v38, %v2309_v36 }
 0xff5   :  { %v2311_v6 = vmax.f32 %v2310_v42, 0.0 }
 0xff7   :  { %v2312_v63 = vpack.c.bf16 %v2311_v6, %v2311_v6 }
 0xff9   :  { %2346 = vmatmul.mubr.bf16.vlgmr.msra.gmra.mrb[44].mxu0 %v2312_v63  ;;  %2387 = vmatmul.mubr.bf16.vlgmr.msra.gmra.mrb[44].mxu1 %v2312_v63 }
 0xffa   :  { %3838 = vmatpush3.bf16.msra.mxu0 %v6373_v5  ;;  %3853 = vmatprep.mubr.msk.bf16.mxu0 %vm4549_vm0, %v8378_v29 }
 0xffb   :  { %3839 = vmatprep.subr.bf16.mxu0 %v8378_v29  ;;  %2524 = vmatpush1.bf16.msra.mxu1 %v6615_v26 }
 0xffc   :  { %2525 = vmatprep.subr.bf16.mxu1 %v6621_v46 }
 0xffe   :  { %3840 = vmatpush3.bf16.msra.mxu0 %v6382_v10 }
 0xfff   :  { %3841 = vmatprep.subr.bf16.mxu0 %v8378_v29  ;;  %2526 = vmatpush1.bf16.msra.mxu1 %v5953_v18  ;;  %v6652_v18 = vld [vmem:[%s7866_s7 + $0xc] ss:$16 sps:$4 sm:$0xff]  }
0x1000   :  { %2527 = vmatprep.subr.bf16.mxu1 %v5959_v52  ;;  %8414 = vst [vmem:[#allocation4_spill] sm:$0xff] %v6652_v18  ;;  %v8415_v52 = vld [vmem:[#allocation2_spill] sm:$0xff] }
0x1002   :  { %3842 = vmatpush3.bf16.msra.mxu0 %v6389_v8 }
0x1003   :  { %3843 = vmatprep.subr.bf16.mxu0 %v8378_v29  ;;  %2528 = vmatpush1.bf16.msra.mxu1 %v5965_v17  ;;  %v8416_v17 = vld [vmem:[#allocation3_spill] sm:$0xff] }
0x1004   :  { %2529 = vmatprep.subr.bf16.mxu1 %v5971_v33  ;;  %v8417_v33 = vld [vmem:[#allocation8_spill] sm:$0xff] }
0x1006   :  { %3844 = vmatpush3.bf16.msra.mxu0 %v6396_v13 }
0x1007   :  { %3845 = vmatprep.subr.bf16.mxu0 %v8378_v29  ;;  %2530 = vmatpush1.bf16.msra.mxu1 %v5978_v9  ;;  %v8418_v9 = vld [vmem:[#allocation10_spill] sm:$0xff] }
0x1008   :  { %2531 = vmatprep.subr.bf16.mxu1 %v5984_v11  ;;  %v8419_v11 = vld [vmem:[#allocation11_spill] sm:$0xff] }
0x100a   :  { %3846 = vmatpush3.bf16.msra.mxu0 %v6403_v51 }
0x100b   :  { %3847 = vmatprep.subr.bf16.mxu0 %v8378_v29  ;;  %2532 = vmatpush1.bf16.msra.mxu1 %v5989_v53  ;;  %v8420_v53 = vld [vmem:[#allocation14_spill] sm:$0xff] }
0x100c   :  { %2533 = vmatprep.subr.bf16.mxu1 %v5996_v35  ;;  %v8421_v35 = vld [vmem:[#allocation15_spill] sm:$0xff] }
0x100e   :  { %3848 = vmatpush3.bf16.msra.mxu0 %v6411_v27 }
0x100f   :  { %3849 = vmatprep.subr.bf16.mxu0 %v8378_v29  ;;  %2534 = vmatpush1.bf16.msra.mxu1 %v6001_v31  ;;  %v8422_v31 = vld [vmem:[#allocation18_spill] sm:$0xff] }
0x1010   :  { %2535 = vmatprep.subr.bf16.mxu1 %v6019_v57 }
0x1012   :  { %3850 = vmatpush3.bf16.msra.mxu0 %v6418_v12 }
0x1013   :  { %3851 = vmatprep.subr.bf16.mxu0 %v8378_v29  ;;  %2536 = vmatpush1.bf16.msra.mxu1 %v6025_v3 }
0x1014   :  { %2537 = vmatprep.subr.bf16.mxu1 %v6043_v20  ;;  %v8423_v20 = vld [vmem:[#allocation25_spill] sm:$0xff] }
0x1016   :  { %3852 = vmatpush3.bf16.msra.mxu0 %v6425_v47 }
0x1017   :  { %2564 = vmatprep.subr.bf16.mxu0 %v6652_v18  ;;  %2538 = vmatpush1.bf16.msra.mxu1 %v6049_v34 }
0x1018   :  { %2539 = vmatprep.subr.bf16.mxu1 %v6067_v2 }
0x101b   :  { %2540 = vmatpush1.bf16.msra.mxu1 %v6073_v7 }
0x101c   :  { %2541 = vmatprep.subr.bf16.mxu1 %v6091_v15 }
0x101f   :  { %2542 = vmatpush1.bf16.msra.mxu1 %v6097_v62 }
0x1020   :  { %2543 = vmatprep.subr.bf16.mxu1 %v6115_v24 }
0x1023   :  { %2544 = vmatpush1.bf16.msra.mxu1 %v6121_v25 }
0x1024   :  { %2545 = vmatprep.subr.bf16.mxu1 %v6139_v30 }
0x1027   :  { %2546 = vmatpush1.bf16.msra.mxu1 %v8379_v14 }
0x1028   :  { %2547 = vmatprep.subr.bf16.mxu1 %v8415_v52 }
0x102b   :  { %2548 = vmatpush1.bf16.msra.mxu1 %v8416_v17 }
0x102c   :  { %2549 = vmatprep.subr.bf16.mxu1 %v8417_v33  ;;  %v6685_v33 = vld [vmem:[%s7866_s7 + $0x8] ss:$16 sps:$4 sm:$0xff]  }
0x102f   :  { %2550 = vmatpush1.bf16.msra.mxu1 %v8418_v9  ;;  %v6691_v9 = vld [vmem:[%s7866_s7 + $0x2c] ss:$16 sps:$4 sm:$0xff]  }
0x1030   :  { %2551 = vmatprep.subr.bf16.mxu1 %v8419_v11  ;;  %v6703_v11 = vld [vmem:[%s7866_s7 + $0x4c] ss:$16 sps:$4 sm:$0xff]  }
0x1033   :  { %2552 = vmatpush1.bf16.msra.mxu1 %v8420_v53  ;;  %v6709_v53 = vld [vmem:[%s7866_s7 + $0x48] ss:$16 sps:$4 sm:$0xff]  }
0x1034   :  { %2553 = vmatprep.subr.bf16.mxu1 %v8421_v35  ;;  %v6715_v35 = vld [vmem:[%s7866_s7 + $0x6c] ss:$16 sps:$4 sm:$0xff]  }
0x1037   :  { %2554 = vmatpush1.bf16.msra.mxu1 %v8422_v31  ;;  %v6721_v31 = vld [vmem:[%s7866_s7 + $0x68] ss:$16 sps:$4 sm:$0xff]  }
0x1038   :  { %3857 = vmatprep.subr.bf16.mxu1 %v8378_v29 }
0x10cc   :  { %v2347_v57 = vpop.f32.mrb[44].mxu0  ;;  %v2388_v3 = vpop.f32.mrb[44].mxu1 }
0x10cd   :  { %v2348_v34 = vadd.f32 %v2347_v57, %v8423_v20  ;;  %v2349_v2 = vpop.f32.mrb[45].mxu0  ;;  %v2390_v7 = vpop.f32.mrb[45].mxu1  ;;  %v2389_v22 = vadd.f32 %v2388_v3, %v6447_v16  ;;  %v6727_v57 = vld [vmem:[%s7866_s7 + $0x8c] ss:$16 sps:$4 sm:$0xff]   ;;  %v6733_v3 = vld [vmem:[%s7866_s7 + $0x88] ss:$16 sps:$4 sm:$0xff]  }
0x10ce   :  { %v2351_v15 = vpop.f32.mrb[46].mxu0  ;;  %v2392_v62 = vpop.f32.mrb[46].mxu1  ;;  %v2350_v14 = vadd.f32 %v2349_v2, %v6437_v37  ;;  %v2391_v1 = vadd.f32 %v2390_v7, %v6443_v21  ;;  %v6745_v2 = vld [vmem:[%s7866_s7 + $0xa8] ss:$16 sps:$4 sm:$0xff]   ;;  %v6751_v7 = vld [vmem:[%s7866_s7 + $0xcc] ss:$16 sps:$4 sm:$0xff]  }
0x10cf   :  { %v3713_v24 = vmul.f32 -1.442695, %v2348_v34  ;;  %v2352_v25 = vpop.f32.mrb[47].mxu0  ;;  %v2393_v30 = vpop.f32.mrb[47].mxu1  ;;  %v6739_v34 = vld [vmem:[%s7866_s7 + $0xac] ss:$16 sps:$4 sm:$0xff]  }
0x10d0   :  { %v3714_v43 = vmul.f32 -1.442695, %v2350_v14  ;;  %v6757_v15 = vld [vmem:[%s7866_s7 + $0xc8] ss:$16 sps:$4 sm:$0xff]   ;;  %v6763_v62 = vld [vmem:[%s7866_s7 + $0xec] ss:$16 sps:$4 sm:$0xff]  }
0x10d1   :  { %4268 = vpow2.f32 %v3713_v24  ;;  %v6769_v24 = vld [vmem:[%s7866_s7 + $0xe8] ss:$16 sps:$4 sm:$0xff]   ;;  %v6775_v25 = vld [vmem:[%s7866_s7 + $0x10c] ss:$16 sps:$4 sm:$0xff]  }
0x10d2   :  { %4270 = vpow2.f32 %v3714_v43  ;;  %v6781_v30 = vld [vmem:[%s7866_s7 + $0x108] ss:$16 sps:$4 sm:$0xff]   ;;  %v6787_v14 = vld [vmem:[%s7866_s7 + $0x12c] ss:$16 sps:$4 sm:$0xff]  }
0x10d3   :  { %v6793_v43 = vld [vmem:[%s7866_s7 + $0x128] ss:$16 sps:$4 sm:$0xff]  }
0x10db   :  { %v4269_v42 = vpop.eup %4268 }
0x10dc   :  { %v2398_v63 = vadd.f32 1.0, %v4269_v42  ;;  %v4271_v60 = vpop.eup %4270  ;;  %v6799_v42 = vld [vmem:[%s7866_s7 + $0x14c] ss:$16 sps:$4 sm:$0xff]  }
0x10dd   :  { %v2404_v4 = vadd.f32 1.0, %v4271_v60 }
0x10de   :  { %4272 = vrcp.f32 %v2398_v63 }
0x10df   :  { %4274 = vrcp.f32 %v2404_v4 }
0x10e8   :  { %v4273_v59 = vpop.eup %4272 }
0x10e9   :  { %v2407_v61 = vmul.f32 %v4273_v59, %v2391_v1  ;;  %v4275_v55 = vpop.eup %4274 }
0x10ea   :  { %v2410_v44 = vsub.f32 1.0, %v4275_v55  ;;  %v2412_v6 = vmul.f32 %v4275_v55, %v6557_v0  ;;  %v6697_v0 = vld [vmem:[%s7866_s7 + $0x28] ss:$16 sps:$4 sm:$0xff]  }
0x10eb   :  { %v2408_v23 = vadd.f32 %v2407_v61, %v2389_v22 }
0x10ed   :  { %4276 = vtanh.f32 %v2408_v23 }
0x10f7   :  { %v4277_v41 = vpop.eup %4276 }
0x10f8   :  { %v2411_v36 = vmul.f32 %v4277_v41, %v2410_v44 }
0x10fa   :  { %v6678_v52 = vadd.f32 %v2412_v6, %v2411_v36 }
0x10fc   :  { %v2414_v17 = vpack.c.bf16 %v6678_v52, %v6678_v52 }
0x10fe   :  { %3854 = vmatmul.mubr.bf16.vlgmr.msra.gmra.mrb[48].mxu0 %v2414_v17  ;;  %2555 = vmatprep.mubr.bf16.mxu1 %v2414_v17 }
0x10ff   :  { %2596 = vmatprep.mubr.bf16.mxu0 %v2414_v17  ;;  %2565 = vmatpush1.bf16.msra.mxu0 %v6685_v33 }
0x1100   :  { %2566 = vmatprep.subr.bf16.mxu0 %v6691_v9 }
0x1103   :  { %2567 = vmatpush1.bf16.msra.mxu0 %v6697_v0 }
0x1104   :  { %2568 = vmatprep.subr.bf16.mxu0 %v6703_v11 }
0x1107   :  { %2569 = vmatpush1.bf16.msra.mxu0 %v6709_v53 }
0x1108   :  { %2570 = vmatprep.subr.bf16.mxu0 %v6715_v35 }
0x110b   :  { %2571 = vmatpush1.bf16.msra.mxu0 %v6721_v31 }
0x110c   :  { %2572 = vmatprep.subr.bf16.mxu0 %v6727_v57 }
0x110f   :  { %2573 = vmatpush1.bf16.msra.mxu0 %v6733_v3 }
0x1110   :  { %2574 = vmatprep.subr.bf16.mxu0 %v6739_v34 }
0x1113   :  { %2575 = vmatpush1.bf16.msra.mxu0 %v6745_v2 }
0x1114   :  { %2576 = vmatprep.subr.bf16.mxu0 %v6751_v7 }
0x1117   :  { %2577 = vmatpush1.bf16.msra.mxu0 %v6757_v15 }
0x1118   :  { %2578 = vmatprep.subr.bf16.mxu0 %v6763_v62 }
0x111b   :  { %2579 = vmatpush1.bf16.msra.mxu0 %v6769_v24 }
0x111c   :  { %2580 = vmatprep.subr.bf16.mxu0 %v6775_v25 }
0x111f   :  { %2581 = vmatpush1.bf16.msra.mxu0 %v6781_v30 }
0x1120   :  { %2582 = vmatprep.subr.bf16.mxu0 %v6787_v14 }
0x1123   :  { %2583 = vmatpush1.bf16.msra.mxu0 %v6793_v43 }
0x1124   :  { %2584 = vmatprep.subr.bf16.mxu0 %v6799_v42 }
0x1127   :  { %2585 = vmatpush1.bf16.msra.mxu0 %v8399_v28  ;;  %v8424_v28 = vld [vmem:[#allocation27_spill] sm:$0xff] }
0x1128   :  { %2586 = vmatprep.subr.bf16.mxu0 %v8400_v32 }
0x112b   :  { %2587 = vmatpush1.bf16.msra.mxu0 %v8401_v58  ;;  %v8425_v58 = vld [vmem:[#allocation26_spill] sm:$0xff] }
0x112c   :  { %2588 = vmatprep.subr.bf16.mxu0 %v8402_v19 }
0x112f   :  { %2589 = vmatpush1.bf16.msra.mxu0 %v8403_v40 }
0x1130   :  { %2590 = vmatprep.subr.bf16.mxu0 %v8404_v39 }
0x1133   :  { %2591 = vmatpush1.bf16.msra.mxu0 %v8405_v48 }
0x1134   :  { %2592 = vmatprep.subr.bf16.mxu0 %v8406_v49  ;;  %v8427_v49 = vld [vmem:[#allocation24_spill] sm:$0xff] }
0x1135   :  { %vm2058_vm11 = vcmp.eq.s32.totalorder %v8427_v49, 0 }
0x1137   :  { %2593 = vmatpush1.bf16.msra.mxu0 %v8407_v50 }
0x1138   :  { %2594 = vmatprep.subr.bf16.mxu0 %v8408_v54 }
0x113b   :  { %2595 = vmatpush1.bf16.msra.mxu0 %v8409_v45 }
0x113c   :  { %2733 = vmatprep.subr.bf16.mxu0 %v8424_v28 }
0x11d1   :  { %v2449_v32 = vpop.f32.mrb[48].mxu0 }
0x11d2   :  { %v6815_v63 = vadd.f32 %v8425_v58, %v2449_v32  ;;  %v3855_v19 = vpop.f32.mrb[49].mxu0 }
0x11d3   :  { %v2452_v40 = vpop.f32.mrb[50].mxu0 }
0x11d4   :  { %8426 = vst [vmem:[#allocation6_spill] sm:$0xff] %v6815_v63  ;;  %v3856_v60 = vpop.f32.mrb[51].mxu0  ;;  %v2455_v39 = vsel %vm2036_vm1, %v6815_v63, -inf }
0x11d5   :  { %2456 = vmax.xlane.f32.xlu0 %v2455_v39  ;;  %v6869_v60 = vld [vmem:[%s7866_s7 + $0x84] ss:$16 sps:$4 sm:$0xff]  }
0x11d6   :  { %v6883_v39 = vld [vmem:[%s7866_s7 + $0xa4] ss:$16 sps:$4 sm:$0xff]  }
0x11d7   :  { %8428 = vst [vmem:[#allocation30_spill] sm:$0xff] %v6883_v39 }
0x1262   :  { %v2457_v48 = vpop.xlane.xlu0 %2456 }
0x1263   :  { %vm2458_vm6 = vcmp.eq.f32.partialorder %v6815_v63, %v2457_v48  ;;  %v6897_v48 = vld [vmem:[%s7866_s7 + $0xc4] ss:$16 sps:$4 sm:$0xff]  }
0x1264   :  { %v2459_v50 = vsel %vm2458_vm6, %v8427_v49, 2147483647  ;;  %8430 = vst [vmem:[#allocation7_spill] sm:$0xff] %v6897_v48 }
0x1265   :  { %v2460_v54 = vsel %vm2036_vm1, %v2459_v50, 2147483647  ;;  %v6911_v50 = vld [vmem:[%s7866_s7 + $0xe4] ss:$16 sps:$4 sm:$0xff]  }
0x1266   :  { %v2462_v45 = vshra.s32 %v2460_v54, 16  ;;  %v2461_v1 = vand.u32 65535, %v2460_v54  ;;  %8432 = vst [vmem:[#allocation12_spill] sm:$0xff] %v6911_v50  ;;  %v6925_v54 = vld [vmem:[%s7866_s7 + $0x104] ss:$16 sps:$4 sm:$0xff]  }
0x1267   :  { %8434 = vst [vmem:[#allocation16_spill] sm:$0xff] %v6925_v54 }
0x1268   :  { %v2464_v4 = vcvt.s32.f32 %v2462_v45  ;;  %v2463_v22 = vcvt.s32.f32 %v2461_v1  ;;  %v6937_v45 = vld [vmem:[%s7866_s7 + $0x124] ss:$16 sps:$4 sm:$0xff]  }
0x1269   :  { %8436 = vst [vmem:[#allocation19_spill] sm:$0xff] %v6937_v45  ;;  %v6949_v1 = vld [vmem:[%s7866_s7 + $0x144] ss:$16 sps:$4 sm:$0xff]  }
0x126a   :  { %2465 = vmin.xlane.f32.xlu1 %v2464_v4  ;;  %8438 = vst [vmem:[#allocation21_spill] sm:$0xff] %v6949_v1 }
0x12f7   :  { %v2466_v59 = vpop.xlane.xlu1 %2465 }
0x12f8   :  { %vm2467_vm7 = vcmp.eq.f32.partialorder %v2464_v4, %v2466_v59  ;;  %v2472_v23 = vcvt.f32.s32 %v2466_v59  ;;  %v6943_v4 = vld [vmem:[%s7866_s7 + $0x120] ss:$16 sps:$4 sm:$0xff]  }
0x12f9   :  { %v2468_v61 = vsel %vm2467_vm7, %v2463_v22, inf  ;;  %8437 = vst [vmem:[#allocation20_spill] sm:$0xff] %v6943_v4  ;;  %v6955_v59 = vld [vmem:[%s7866_s7 + $0x140] ss:$16 sps:$4 sm:$0xff]   ;;  %v6961_v22 = vld [vmem:[%s7866_s7 + $0x164] ss:$16 sps:$4 sm:$0xff]  }
0x12fa   :  { %2469 = vmin.xlane.f32.xlu0 %v2468_v61  ;;  %v2473_v44 = vshll.u32 %v2472_v23, 16  ;;  %8439 = vst [vmem:[#allocation22_spill] sm:$0xff] %v6955_v59  ;;  %8440 = vst [vmem:[#allocation23_spill] sm:$0xff] %v6961_v22  ;;  %v6967_v61 = vld [vmem:[%s7866_s7 + $0x160] ss:$16 sps:$4 sm:$0xff]  }
0x12fb   :  { %8441 = vst [vmem:[#allocation28_spill] sm:$0xff] %v6967_v61  ;;  %v6973_v23 = vld [vmem:[%s7866_s7 + $0x184] ss:$16 sps:$4 sm:$0xff]  }
0x12fc   :  { %8442 = vst [vmem:[#allocation29_spill] sm:$0xff] %v6973_v23 }
0x1387   :  { %v2470_v55 = vpop.xlane.xlu0 %2469 }
0x1388   :  { %v2471_v41 = vcvt.f32.s32 %v2470_v55  ;;  %v6979_v55 = vld [vmem:[%s7866_s7 + $0x180] ss:$16 sps:$4 sm:$0xff]  }
0x1389   :  { %8443 = vst [vmem:[#allocation34_spill] sm:$0xff] %v6979_v55 }
0x138a   :  { %v2474_v36 = vadd.s32 %v2473_v44, %v2471_v41  ;;  %v6985_v44 = vld [vmem:[%s7866_s7 + $0x1a4] ss:$16 sps:$4 sm:$0xff]   ;;  %v6991_v41 = vld [vmem:[%s7866_s7 + $0x1a0] ss:$16 sps:$4 sm:$0xff]  }
0x138b   :  { %8444 = vst [vmem:[#allocation33_spill] sm:$0xff] %v6985_v44  ;;  %8445 = vst [vmem:[#allocation32_spill] sm:$0xff] %v6991_v41 }
0x138c   :  { %v2475_v6 = vcvt.s32.f32 %v2474_v36  ;;  %v6997_v36 = vld [vmem:[%s7866_s7 + $0x1c4] ss:$16 sps:$4 sm:$0xff]  }
0x138d   :  { %8446 = vst [vmem:[#allocation35_spill] sm:$0xff] %v6997_v36 }
0x138e   :  { %v2519_v17 = vmul.f32 %v6325_v56, %v2475_v6  ;;  %v6835_v56 = vld [vmem:[%s7866_s7 + $0x20] ss:$16 sps:$4 sm:$0xff]  }
0x138f   :  { %v7003_v6 = vld [vmem:[%s7866_s7 + $0x1c0] ss:$16 sps:$4 sm:$0xff]  }
0x1390   :  { %v2520_v32 = vadd.f32 %v6330_v38, %v2519_v17  ;;  %v6841_v38 = vld [vmem:[%s7866_s7 + $0x44] ss:$16 sps:$4 sm:$0xff]   ;;  %8447 = vst [vmem:[#allocation2_spill] sm:$0xff] %v7003_v6 }
0x1391   :  { %v7009_v17 = vld [vmem:[%s7866_s7 + $0x1e4] ss:$16 sps:$4 sm:$0xff]  }
0x1392   :  { %v2521_v19 = vmax.f32 %v2520_v32, 0.0  ;;  %8448 = vst [vmem:[#allocation3_spill] sm:$0xff] %v7009_v17  ;;  %v7015_v32 = vld [vmem:[%s7866_s7 + $0x1e0] ss:$16 sps:$4 sm:$0xff]  }
0x1393   :  { %8449 = vst [vmem:[#allocation8_spill] sm:$0xff] %v7015_v32 }
0x1394   :  { %v2522_v40 = vpack.c.bf16 %v2521_v19, %v2521_v19 }
0x1396   :  { %2556 = vmatmul.mubr.bf16.vlgmr.msra.gmra.mrb[48].mxu1 %v2522_v40  ;;  %2597 = vmatmul.mubr.bf16.vlgmr.msra.gmra.mrb[52].mxu0 %v2522_v40 }
0x1397   :  { %3858 = vmatpush3.bf16.msra.mxu1 %v6373_v5  ;;  %3873 = vmatprep.mubr.msk.bf16.mxu1 %vm4549_vm0, %v8378_v29  ;;  %v6849_v5 = vld [vmem:[%s7866_s7 + $0x40] ss:$16 sps:$4 sm:$0xff]  }
0x1398   :  { %3859 = vmatprep.subr.bf16.mxu1 %v8378_v29  ;;  %2734 = vmatpush1.bf16.msra.mxu0 %v6615_v26 }
0x1399   :  { %2735 = vmatprep.subr.bf16.mxu0 %v6621_v46 }
0x139b   :  { %3860 = vmatpush3.bf16.msra.mxu1 %v6382_v10  ;;  %v6855_v10 = vld [vmem:[%s7866_s7 + $0x64] ss:$16 sps:$4 sm:$0xff]  }
0x139c   :  { %3861 = vmatprep.subr.bf16.mxu1 %v8378_v29  ;;  %2736 = vmatpush1.bf16.msra.mxu0 %v6835_v56 }
0x139d   :  { %2737 = vmatprep.subr.bf16.mxu0 %v6841_v38 }
0x139f   :  { %3862 = vmatpush3.bf16.msra.mxu1 %v6389_v8  ;;  %v6863_v8 = vld [vmem:[%s7866_s7 + $0x60] ss:$16 sps:$4 sm:$0xff]  }
0x13a0   :  { %3863 = vmatprep.subr.bf16.mxu1 %v8378_v29  ;;  %2738 = vmatpush1.bf16.msra.mxu0 %v6849_v5 }
0x13a1   :  { %2739 = vmatprep.subr.bf16.mxu0 %v6855_v10 }
0x13a3   :  { %3864 = vmatpush3.bf16.msra.mxu1 %v6396_v13  ;;  %v6877_v13 = vld [vmem:[%s7866_s7 + $0x80] ss:$16 sps:$4 sm:$0xff]  }
0x13a4   :  { %3865 = vmatprep.subr.bf16.mxu1 %v8378_v29  ;;  %2740 = vmatpush1.bf16.msra.mxu0 %v6863_v8 }
0x13a5   :  { %2741 = vmatprep.subr.bf16.mxu0 %v6869_v60 }
0x13a7   :  { %3866 = vmatpush3.bf16.msra.mxu1 %v6403_v51  ;;  %v6891_v51 = vld [vmem:[%s7866_s7 + $0xa0] ss:$16 sps:$4 sm:$0xff]  }
0x13a8   :  { %3867 = vmatprep.subr.bf16.mxu1 %v8378_v29  ;;  %2742 = vmatpush1.bf16.msra.mxu0 %v6877_v13  ;;  %8429 = vst [vmem:[#allocation31_spill] sm:$0xff] %v6891_v51 }
0x13a9   :  { %2743 = vmatprep.subr.bf16.mxu0 %v6883_v39 }
0x13ab   :  { %3868 = vmatpush3.bf16.msra.mxu1 %v6411_v27  ;;  %v6905_v27 = vld [vmem:[%s7866_s7 + $0xc0] ss:$16 sps:$4 sm:$0xff]  }
0x13ac   :  { %3869 = vmatprep.subr.bf16.mxu1 %v8378_v29  ;;  %2744 = vmatpush1.bf16.msra.mxu0 %v6891_v51  ;;  %8431 = vst [vmem:[#allocation9_spill] sm:$0xff] %v6905_v27 }
0x13ad   :  { %2745 = vmatprep.subr.bf16.mxu0 %v6897_v48 }
0x13af   :  { %3870 = vmatpush3.bf16.msra.mxu1 %v6418_v12  ;;  %v6919_v12 = vld [vmem:[%s7866_s7 + $0xe0] ss:$16 sps:$4 sm:$0xff]  }
0x13b0   :  { %3871 = vmatprep.subr.bf16.mxu1 %v8378_v29  ;;  %2746 = vmatpush1.bf16.msra.mxu0 %v6905_v27  ;;  %8433 = vst [vmem:[#allocation13_spill] sm:$0xff] %v6919_v12 }
0x13b1   :  { %2747 = vmatprep.subr.bf16.mxu0 %v6911_v50 }
0x13b3   :  { %3872 = vmatpush3.bf16.msra.mxu1 %v6425_v47  ;;  %v6931_v47 = vld [vmem:[%s7866_s7 + $0x100] ss:$16 sps:$4 sm:$0xff]  }
0x13b4   :  { %2774 = vmatprep.subr.bf16.mxu1 %v6652_v18  ;;  %2748 = vmatpush1.bf16.msra.mxu0 %v6919_v12  ;;  %8435 = vst [vmem:[#allocation17_spill] sm:$0xff] %v6931_v47 }
0x13b5   :  { %2749 = vmatprep.subr.bf16.mxu0 %v6925_v54 }
0x13b8   :  { %2750 = vmatpush1.bf16.msra.mxu0 %v6931_v47 }
0x13b9   :  { %2751 = vmatprep.subr.bf16.mxu0 %v6937_v45 }
0x13bc   :  { %2752 = vmatpush1.bf16.msra.mxu0 %v6943_v4 }
0x13bd   :  { %2753 = vmatprep.subr.bf16.mxu0 %v6949_v1 }
0x13c0   :  { %2754 = vmatpush1.bf16.msra.mxu0 %v6955_v59 }
0x13c1   :  { %2755 = vmatprep.subr.bf16.mxu0 %v6961_v22 }
0x13c4   :  { %2756 = vmatpush1.bf16.msra.mxu0 %v6967_v61 }
0x13c5   :  { %2757 = vmatprep.subr.bf16.mxu0 %v6973_v23 }
0x13c8   :  { %2758 = vmatpush1.bf16.msra.mxu0 %v6979_v55 }
0x13c9   :  { %2759 = vmatprep.subr.bf16.mxu0 %v6985_v44 }
0x13cc   :  { %2760 = vmatpush1.bf16.msra.mxu0 %v6991_v41 }
0x13cd   :  { %2761 = vmatprep.subr.bf16.mxu0 %v6997_v36 }
0x13d0   :  { %2762 = vmatpush1.bf16.msra.mxu0 %v7003_v6 }
0x13d1   :  { %2763 = vmatprep.subr.bf16.mxu0 %v7009_v17 }
0x13d4   :  { %2764 = vmatpush1.bf16.msra.mxu0 %v7015_v32 }
0x13d5   :  { %3877 = vmatprep.subr.bf16.mxu0 %v8378_v29 }
0x1469   :  { %v2557_v19 = vpop.f32.mrb[48].mxu1  ;;  %v2598_v40 = vpop.f32.mrb[52].mxu0 }
0x146a   :  { %v2558_v63 = vadd.f32 %v2557_v19, %v8423_v20  ;;  %v2559_v6 = vpop.f32.mrb[49].mxu1  ;;  %v2600_v36 = vpop.f32.mrb[53].mxu0  ;;  %v2599_v20 = vadd.f32 %v2598_v40, %v6447_v16  ;;  %v7099_v40 = vld [vmem:[%s7866_s7 + $0x1c8] ss:$16 sps:$4 sm:$0xff]  }
0x146b   :  { %v2561_v41 = vpop.f32.mrb[50].mxu1  ;;  %v2602_v44 = vpop.f32.mrb[54].mxu0  ;;  %v2560_v61 = vadd.f32 %v2559_v6, %v6437_v37  ;;  %v2601_v45 = vadd.f32 %v2600_v36, %v6443_v21  ;;  %v7081_v36 = vld [vmem:[%s7866_s7 + $0x1ac] ss:$16 sps:$4 sm:$0xff]   ;;  %8454 = vst [vmem:[#allocation18_spill] sm:$0xff] %v7099_v40 }
0x146c   :  { %v3715_v55 = vmul.f32 -1.442695, %v2558_v63  ;;  %v2562_v23 = vpop.f32.mrb[51].mxu1  ;;  %v2603_v17 = vpop.f32.mrb[55].mxu0  ;;  %8451 = vst [vmem:[#allocation11_spill] sm:$0xff] %v7081_v36 }
0x146d   :  { %v3716_v22 = vmul.f32 -1.442695, %v2560_v61  ;;  %v7087_v17 = vld [vmem:[%s7866_s7 + $0x1a8] ss:$16 sps:$4 sm:$0xff]  }
0x146e   :  { %4278 = vpow2.f32 %v3715_v55  ;;  %8452 = vst [vmem:[#allocation14_spill] sm:$0xff] %v7087_v17 }
0x146f   :  { %4280 = vpow2.f32 %v3716_v22 }
0x1478   :  { %v4279_v59 = vpop.eup %4278 }
0x1479   :  { %v2608_v32 = vadd.f32 1.0, %v4279_v59  ;;  %v4281_v1 = vpop.eup %4280  ;;  %v7075_v59 = vld [vmem:[%s7866_s7 + $0x188] ss:$16 sps:$4 sm:$0xff]  }
0x147a   :  { %v2614_v4 = vadd.f32 1.0, %v4281_v1  ;;  %8450 = vst [vmem:[#allocation10_spill] sm:$0xff] %v7075_v59 }
0x147b   :  { %4282 = vrcp.f32 %v2608_v32  ;;  %v7093_v32 = vld [vmem:[%s7866_s7 + $0x1cc] ss:$16 sps:$4 sm:$0xff]  }
0x147c   :  { %4284 = vrcp.f32 %v2614_v4  ;;  %v7069_v4 = vld [vmem:[%s7866_s7 + $0x18c] ss:$16 sps:$4 sm:$0xff]   ;;  %8453 = vst [vmem:[#allocation15_spill] sm:$0xff] %v7093_v32 }
0x1485   :  { %v4283_v19 = vpop.eup %4282 }
0x1486   :  { %v2617_v44 = vmul.f32 %v4283_v19, %v2601_v45  ;;  %v4285_v23 = vpop.eup %4284  ;;  %v7063_v45 = vld [vmem:[%s7866_s7 + $0x168] ss:$16 sps:$4 sm:$0xff]   ;;  %v7105_v19 = vld [vmem:[%s7866_s7 + $0x1ec] ss:$16 sps:$4 sm:$0xff]  }
0x1487   :  { %v2620_v41 = vsub.f32 1.0, %v4285_v23  ;;  %v2622_v22 = vmul.f32 %v4285_v23, %v6678_v52  ;;  %v7057_v52 = vld [vmem:[%s7866_s7 + $0x16c] ss:$16 sps:$4 sm:$0xff]   ;;  %8455 = vst [vmem:[#allocation26_spill] sm:$0xff] %v7105_v19 }
0x1488   :  { %v2618_v63 = vadd.f32 %v2617_v44, %v2599_v20  ;;  %v7051_v20 = vld [vmem:[%s7866_s7 + $0x148] ss:$16 sps:$4 sm:$0xff]  }
0x1489   :  { %v7111_v44 = vld [vmem:[%s7866_s7 + $0x1e8] ss:$16 sps:$4 sm:$0xff]  }
0x148a   :  { %4286 = vtanh.f32 %v2618_v63  ;;  %8456 = vst [vmem:[#allocation24_spill] sm:$0xff] %v7111_v44 }
0x1494   :  { %v4287_v6 = vpop.eup %4286 }
0x1495   :  { %v2621_v55 = vmul.f32 %v4287_v6, %v2620_v41 }
0x1497   :  { %v7024_v61 = vadd.f32 %v2622_v22, %v2621_v55 }
0x1499   :  { %v2624_v1 = vpack.c.bf16 %v7024_v61, %v7024_v61 }
0x149b   :  { %3874 = vmatmul.mubr.bf16.vlgmr.msra.gmra.mrb[52].mxu1 %v2624_v1  ;;  %2765 = vmatprep.mubr.bf16.mxu0 %v2624_v1 }
0x149c   :  { %2806 = vmatprep.mubr.bf16.mxu1 %v2624_v1  ;;  %2775 = vmatpush1.bf16.msra.mxu1 %v6685_v33 }
0x149d   :  { %2776 = vmatprep.subr.bf16.mxu1 %v6691_v9 }
0x14a0   :  { %2777 = vmatpush1.bf16.msra.mxu1 %v6697_v0 }
0x14a1   :  { %2778 = vmatprep.subr.bf16.mxu1 %v6703_v11 }
0x14a4   :  { %2779 = vmatpush1.bf16.msra.mxu1 %v6709_v53 }
0x14a5   :  { %2780 = vmatprep.subr.bf16.mxu1 %v6715_v35 }
0x14a8   :  { %2781 = vmatpush1.bf16.msra.mxu1 %v6721_v31 }
0x14a9   :  { %2782 = vmatprep.subr.bf16.mxu1 %v6727_v57 }
0x14ac   :  { %2783 = vmatpush1.bf16.msra.mxu1 %v6733_v3 }
0x14ad   :  { %2784 = vmatprep.subr.bf16.mxu1 %v6739_v34 }
0x14b0   :  { %2785 = vmatpush1.bf16.msra.mxu1 %v6745_v2 }
0x14b1   :  { %2786 = vmatprep.subr.bf16.mxu1 %v6751_v7 }
0x14b4   :  { %2787 = vmatpush1.bf16.msra.mxu1 %v6757_v15 }
0x14b5   :  { %2788 = vmatprep.subr.bf16.mxu1 %v6763_v62 }
0x14b8   :  { %2789 = vmatpush1.bf16.msra.mxu1 %v6769_v24 }
0x14b9   :  { %2790 = vmatprep.subr.bf16.mxu1 %v6775_v25 }
0x14bc   :  { %2791 = vmatpush1.bf16.msra.mxu1 %v6781_v30 }
0x14bd   :  { %2792 = vmatprep.subr.bf16.mxu1 %v6787_v14 }
0x14c0   :  { %2793 = vmatpush1.bf16.msra.mxu1 %v6793_v43 }
0x14c1   :  { %2794 = vmatprep.subr.bf16.mxu1 %v6799_v42 }
0x14c4   :  { %2795 = vmatpush1.bf16.msra.mxu1 %v7051_v20 }
0x14c5   :  { %2796 = vmatprep.subr.bf16.mxu1 %v7057_v52 }
0x14c8   :  { %2797 = vmatpush1.bf16.msra.mxu1 %v7063_v45 }
0x14c9   :  { %2798 = vmatprep.subr.bf16.mxu1 %v7069_v4 }
0x14cc   :  { %2799 = vmatpush1.bf16.msra.mxu1 %v7075_v59 }
0x14cd   :  { %2800 = vmatprep.subr.bf16.mxu1 %v7081_v36 }
0x14d0   :  { %2801 = vmatpush1.bf16.msra.mxu1 %v7087_v17 }
0x14d1   :  { %2802 = vmatprep.subr.bf16.mxu1 %v7093_v32 }
0x14d4   :  { %2803 = vmatpush1.bf16.msra.mxu1 %v7099_v40 }
0x14d5   :  { %2804 = vmatprep.subr.bf16.mxu1 %v7105_v19 }
0x14d8   :  { %2805 = vmatpush1.bf16.msra.mxu1 %v7111_v44 }
0x14d9   :  { %2943 = vmatprep.subr.bf16.mxu1 %v8424_v28 }
0x156e   :  { %v2659_v63 = vpop.f32.mrb[52].mxu1 }
0x156f   :  { %v7116_v23 = vadd.f32 %v8425_v58, %v2659_v63  ;;  %v3875_v41 = vpop.f32.mrb[53].mxu1 }
0x1570   :  { %v2662_v6 = vpop.f32.mrb[54].mxu1 }
0x1571   :  { %8457 = vst [vmem:[#allocation36_spill] sm:$0xff] %v7116_v23  ;;  %v3876_v55 = vpop.f32.mrb[55].mxu1  ;;  %v2665_v22 = vsel %vm2036_vm1, %v7116_v23, -inf }
0x1572   :  { %2666 = vmax.xlane.f32.xlu1 %v2665_v22 }
0x15ff   :  { %v2667_v1 = vpop.xlane.xlu1 %2666 }
0x1600   :  { %vm2668_vm8 = vcmp.eq.f32.partialorder %v7116_v23, %v2667_v1  ;;  %v7126_v1 = vld [vmem:[%s7867_s5] ss:$0 sm:$0xff]  ;;  %v8466_v23 = vld [vmem:[#allocation28_spill] sm:$0xff] }
0x1601   :  { %v2669_v19 = vsel %vm2668_vm8, %v8427_v49, 2147483647 }
0x1602   :  { %v2670_v44 = vsel %vm2036_vm1, %v2669_v19, 2147483647 }
0x1603   :  { %v2672_v40 = vshra.s32 %v2670_v44, 16  ;;  %v2671_v32 = vand.u32 65535, %v2670_v44 }
0x1605   :  { %v2674_v28 = vcvt.s32.f32 %v2672_v40  ;;  %v2673_v63 = vcvt.s32.f32 %v2671_v32  ;;  %v7132_v32 = vld [vmem:[%s7868_s6] ss:$0 sm:$0xff] }
0x1607   :  { %2675 = vmin.xlane.f32.xlu0 %v2674_v28 }
0x1694   :  { %v2676_v58 = vpop.xlane.xlu0 %2675 }
0x1695   :  { %vm2677_vm9 = vcmp.eq.f32.partialorder %v2674_v28, %v2676_v58  ;;  %v2682_v6 = vcvt.f32.s32 %v2676_v58  ;;  %v7167_v58 = vld [vmem:[%s7869_s9 + $0x18] sm:$0xff]  }
0x1696   :  { %v2678_v41 = vsel %vm2677_vm9, %v2673_v63, inf  ;;  %v7176_v63 = vld [vmem:[%s7869_s9 + $0x20] sm:$0xff]  }
0x1697   :  { %2679 = vmin.xlane.f32.xlu1 %v2678_v41  ;;  %v2683_v17 = vshll.u32 %v2682_v6, 16  ;;  %v7185_v41 = vld [vmem:[%s7869_s9 + $0x28] sm:$0xff]   ;;  %v7194_v6 = vld [vmem:[%s7869_s9 + $0x30] sm:$0xff]  }
0x1698   :  { %8458 = vst [vmem:[#allocation37_spill] sm:$0xff] %v7185_v41  ;;  %8459 = vst [vmem:[#allocation38_spill] sm:$0xff] %v7194_v6 }
0x1724   :  { %v2680_v55 = vpop.xlane.xlu1 %2679 }
0x1725   :  { %v2681_v22 = vcvt.f32.s32 %v2680_v55  ;;  %v7203_v55 = vld [vmem:[%s7869_s9 + $0x38] sm:$0xff]  }
0x1726   :  { %8460 = vst [vmem:[#allocation39_spill] sm:$0xff] %v7203_v55 }
0x1727   :  { %v2684_v36 = vadd.s32 %v2683_v17, %v2681_v22  ;;  %v7158_v17 = vld [vmem:[%s7869_s9 + $0x10] sm:$0xff]   ;;  %v8461_v22 = vld [vmem:[#allocation19_spill] sm:$0xff] }
0x1729   :  { %v2685_v59 = vcvt.s32.f32 %v2684_v36  ;;  %v7138_v36 = vld [vmem:[%s7869_s9] sm:$0xff]  }
0x172b   :  { %v2729_v40 = vmul.f32 %v7126_v1, %v2685_v59  ;;  %v7149_v59 = vld [vmem:[%s7869_s9 + $0x8] sm:$0xff]  }
0x172d   :  { %v2730_v28 = vadd.f32 %v7132_v32, %v2729_v40  ;;  %v8462_v40 = vld [vmem:[#allocation20_spill] sm:$0xff] }
0x172f   :  { %v2731_v19 = vmax.f32 %v2730_v28, 0.0  ;;  %v8463_v28 = vld [vmem:[#allocation21_spill] sm:$0xff] }
0x1731   :  { %v2732_v44 = vpack.c.bf16 %v2731_v19, %v2731_v19  ;;  %v8464_v19 = vld [vmem:[#allocation22_spill] sm:$0xff] }
0x1733   :  { %2766 = vmatmul.mubr.bf16.vlgmr.msra.gmra.mrb[56].mxu0 %v2732_v44  ;;  %2807 = vmatmul.mubr.bf16.vlgmr.msra.gmra.mrb[56].mxu1 %v2732_v44  ;;  %v8465_v44 = vld [vmem:[#allocation23_spill] sm:$0xff] }
0x1734   :  { %3878 = vmatpush3.bf16.msra.mxu0 %v7138_v36  ;;  %3893 = vmatprep.mubr.msk.bf16.mxu0 %vm4549_vm0, %v8378_v29 }
0x1735   :  { %3879 = vmatprep.subr.bf16.mxu0 %v8378_v29  ;;  %2944 = vmatpush1.bf16.msra.mxu1 %v6615_v26 }
0x1736   :  { %2945 = vmatprep.subr.bf16.mxu1 %v6621_v46 }
0x1738   :  { %3880 = vmatpush3.bf16.msra.mxu0 %v7149_v59 }
0x1739   :  { %3881 = vmatprep.subr.bf16.mxu0 %v8378_v29  ;;  %2946 = vmatpush1.bf16.msra.mxu1 %v6835_v56 }
0x173a   :  { %2947 = vmatprep.subr.bf16.mxu1 %v6841_v38 }
0x173c   :  { %3882 = vmatpush3.bf16.msra.mxu0 %v7158_v17 }
0x173d   :  { %3883 = vmatprep.subr.bf16.mxu0 %v8378_v29  ;;  %2948 = vmatpush1.bf16.msra.mxu1 %v6849_v5 }
0x173e   :  { %2949 = vmatprep.subr.bf16.mxu1 %v6855_v10 }
0x1740   :  { %3884 = vmatpush3.bf16.msra.mxu0 %v7167_v58 }
0x1741   :  { %3885 = vmatprep.subr.bf16.mxu0 %v8378_v29  ;;  %2950 = vmatpush1.bf16.msra.mxu1 %v6863_v8 }
0x1742   :  { %2951 = vmatprep.subr.bf16.mxu1 %v6869_v60 }
0x1744   :  { %3886 = vmatpush3.bf16.msra.mxu0 %v7176_v63 }
0x1745   :  { %3887 = vmatprep.subr.bf16.mxu0 %v8378_v29  ;;  %2952 = vmatpush1.bf16.msra.mxu1 %v6877_v13 }
0x1746   :  { %2953 = vmatprep.subr.bf16.mxu1 %v6883_v39 }
0x1748   :  { %3888 = vmatpush3.bf16.msra.mxu0 %v7185_v41 }
0x1749   :  { %3889 = vmatprep.subr.bf16.mxu0 %v8378_v29  ;;  %2954 = vmatpush1.bf16.msra.mxu1 %v6891_v51 }
0x174a   :  { %2955 = vmatprep.subr.bf16.mxu1 %v6897_v48 }
0x174c   :  { %3890 = vmatpush3.bf16.msra.mxu0 %v7194_v6 }
0x174d   :  { %3891 = vmatprep.subr.bf16.mxu0 %v8378_v29  ;;  %2956 = vmatpush1.bf16.msra.mxu1 %v6905_v27 }
0x174e   :  { %2957 = vmatprep.subr.bf16.mxu1 %v6911_v50 }
0x1750   :  { %3892 = vmatpush3.bf16.msra.mxu0 %v7203_v55  ;;  %v8467_v55 = vld [vmem:[#allocation29_spill] sm:$0xff] }
0x1751   :  { %2984 = vmatprep.subr.bf16.mxu0 %v6652_v18  ;;  %2958 = vmatpush1.bf16.msra.mxu1 %v6919_v12  ;;  %v8468_v18 = vld [vmem:[#allocation34_spill] sm:$0xff]  ;;  %v8469_v12 = vld [vmem:[#allocation33_spill] sm:$0xff] }
0x1752   :  { %2959 = vmatprep.subr.bf16.mxu1 %v6925_v54  ;;  %v8470_v54 = vld [vmem:[#allocation32_spill] sm:$0xff] }
0x1755   :  { %2960 = vmatpush1.bf16.msra.mxu1 %v6931_v47  ;;  %v8471_v47 = vld [vmem:[#allocation35_spill] sm:$0xff] }
0x1756   :  { %2961 = vmatprep.subr.bf16.mxu1 %v8461_v22  ;;  %v8472_v22 = vld [vmem:[#allocation2_spill] sm:$0xff] }
0x1759   :  { %2962 = vmatpush1.bf16.msra.mxu1 %v8462_v40  ;;  %v8473_v40 = vld [vmem:[#allocation3_spill] sm:$0xff] }
0x175a   :  { %2963 = vmatprep.subr.bf16.mxu1 %v8463_v28  ;;  %v8474_v28 = vld [vmem:[#allocation8_spill] sm:$0xff] }
0x175d   :  { %2964 = vmatpush1.bf16.msra.mxu1 %v8464_v19  ;;  %v8475_v19 = vld [vmem:[#allocation25_spill] sm:$0xff] }
0x175e   :  { %2965 = vmatprep.subr.bf16.mxu1 %v8465_v44 }
0x1761   :  { %2966 = vmatpush1.bf16.msra.mxu1 %v8466_v23 }
0x1762   :  { %2967 = vmatprep.subr.bf16.mxu1 %v8467_v55 }
0x1765   :  { %2968 = vmatpush1.bf16.msra.mxu1 %v8468_v18 }
0x1766   :  { %2969 = vmatprep.subr.bf16.mxu1 %v8469_v12 }
0x1769   :  { %2970 = vmatpush1.bf16.msra.mxu1 %v8470_v54 }
0x176a   :  { %2971 = vmatprep.subr.bf16.mxu1 %v8471_v47 }
0x176d   :  { %2972 = vmatpush1.bf16.msra.mxu1 %v8472_v22 }
0x176e   :  { %2973 = vmatprep.subr.bf16.mxu1 %v8473_v40 }
0x1771   :  { %2974 = vmatpush1.bf16.msra.mxu1 %v8474_v28 }
0x1772   :  { %3897 = vmatprep.subr.bf16.mxu1 %v8378_v29 }
0x1806   :  { %v2767_v44 = vpop.f32.mrb[56].mxu0  ;;  %v2808_v23 = vpop.f32.mrb[56].mxu1 }
0x1807   :  { %v2768_v55 = vadd.f32 %v2767_v44, %v8475_v19  ;;  %v2769_v50 = vpop.f32.mrb[57].mxu0  ;;  %v2810_v18 = vpop.f32.mrb[57].mxu1  ;;  %v2809_v19 = vadd.f32 %v2808_v23, %v6447_v16  ;;  %v8479_v23 = vld [vmem:[#allocation15_spill] sm:$0xff] }
0x1808   :  { %v2771_v27 = vpop.f32.mrb[58].mxu0  ;;  %v2812_v12 = vpop.f32.mrb[58].mxu1  ;;  %v2770_v47 = vadd.f32 %v2769_v50, %v6437_v37  ;;  %v2811_v39 = vadd.f32 %v2810_v18, %v6443_v21  ;;  %v8476_v18 = vld [vmem:[#allocation10_spill] sm:$0xff] }
0x1809   :  { %v3717_v6 = vmul.f32 -1.442695, %v2768_v55  ;;  %v2772_v54 = vpop.f32.mrb[59].mxu0  ;;  %v2813_v48 = vpop.f32.mrb[59].mxu1 }
0x180a   :  { %v3718_v22 = vmul.f32 -1.442695, %v2770_v47 }
0x180b   :  { %4288 = vpow2.f32 %v3717_v6 }
0x180c   :  { %4290 = vpow2.f32 %v3718_v22  ;;  %v8481_v22 = vld [vmem:[#allocation26_spill] sm:$0xff] }
0x1815   :  { %v4289_v40 = vpop.eup %4288 }
0x1816   :  { %v2818_v28 = vadd.f32 1.0, %v4289_v40  ;;  %v4291_v51 = vpop.eup %4290  ;;  %v8482_v40 = vld [vmem:[#allocation24_spill] sm:$0xff] }
0x1817   :  { %v2824_v41 = vadd.f32 1.0, %v4291_v51 }
0x1818   :  { %4292 = vrcp.f32 %v2818_v28  ;;  %v8483_v28 = vld [vmem:[#allocation27_spill] sm:$0xff] }
0x1819   :  { %4294 = vrcp.f32 %v2824_v41  ;;  %v8480_v41 = vld [vmem:[#allocation18_spill] sm:$0xff] }
0x1822   :  { %v4293_v44 = vpop.eup %4292 }
0x1823   :  { %v2827_v27 = vmul.f32 %v4293_v44, %v2811_v39  ;;  %v4295_v48 = vpop.eup %4294  ;;  %v8477_v39 = vld [vmem:[#allocation11_spill] sm:$0xff]  ;;  %v7269_v44 = vld [vmem:[%s7871_s10] ss:$0 sm:$0xff] }
0x1824   :  { %v2830_v54 = vsub.f32 1.0, %v4295_v48  ;;  %v2832_v47 = vmul.f32 %v4295_v48, %v7024_v61  ;;  %v8478_v61 = vld [vmem:[#allocation14_spill] sm:$0xff]  ;;  %8484 = vst [vmem:[#allocation27_spill] sm:$0xff] %v7269_v44 }
0x1825   :  { %v2828_v12 = vadd.f32 %v2827_v27, %v2809_v19 }
0x1827   :  { %4296 = vtanh.f32 %v2828_v12 }
0x1831   :  { %v4297_v50 = vpop.eup %4296 }
0x1832   :  { %v2831_v6 = vmul.f32 %v4297_v50, %v2830_v54 }
0x1834   :  { %v7230_v55 = vadd.f32 %v2832_v47, %v2831_v6 }
0x1836   :  { %v2834_v51 = vpack.c.bf16 %v7230_v55, %v7230_v55 }
0x1838   :  { %3894 = vmatmul.mubr.bf16.vlgmr.msra.gmra.mrb[60].mxu0 %v2834_v51  ;;  %2975 = vmatprep.mubr.bf16.mxu1 %v2834_v51 }
0x1839   :  { %3016 = vmatprep.mubr.bf16.mxu0 %v2834_v51  ;;  %2985 = vmatpush1.bf16.msra.mxu0 %v6685_v33 }
0x183a   :  { %2986 = vmatprep.subr.bf16.mxu0 %v6691_v9 }
0x183d   :  { %2987 = vmatpush1.bf16.msra.mxu0 %v6697_v0 }
0x183e   :  { %2988 = vmatprep.subr.bf16.mxu0 %v6703_v11 }
0x1841   :  { %2989 = vmatpush1.bf16.msra.mxu0 %v6709_v53 }
0x1842   :  { %2990 = vmatprep.subr.bf16.mxu0 %v6715_v35 }
0x1845   :  { %2991 = vmatpush1.bf16.msra.mxu0 %v6721_v31 }
0x1846   :  { %2992 = vmatprep.subr.bf16.mxu0 %v6727_v57 }
0x1849   :  { %2993 = vmatpush1.bf16.msra.mxu0 %v6733_v3 }
0x184a   :  { %2994 = vmatprep.subr.bf16.mxu0 %v6739_v34 }
0x184d   :  { %2995 = vmatpush1.bf16.msra.mxu0 %v6745_v2 }
0x184e   :  { %2996 = vmatprep.subr.bf16.mxu0 %v6751_v7 }
0x1851   :  { %2997 = vmatpush1.bf16.msra.mxu0 %v6757_v15 }
0x1852   :  { %2998 = vmatprep.subr.bf16.mxu0 %v6763_v62 }
0x1855   :  { %2999 = vmatpush1.bf16.msra.mxu0 %v6769_v24 }
0x1856   :  { %3000 = vmatprep.subr.bf16.mxu0 %v6775_v25 }
0x1859   :  { %3001 = vmatpush1.bf16.msra.mxu0 %v6781_v30 }
0x185a   :  { %3002 = vmatprep.subr.bf16.mxu0 %v6787_v14 }
0x185d   :  { %3003 = vmatpush1.bf16.msra.mxu0 %v6793_v43 }
0x185e   :  { %3004 = vmatprep.subr.bf16.mxu0 %v6799_v42 }
0x1861   :  { %3005 = vmatpush1.bf16.msra.mxu0 %v7051_v20 }
0x1862   :  { %3006 = vmatprep.subr.bf16.mxu0 %v7057_v52 }
0x1865   :  { %3007 = vmatpush1.bf16.msra.mxu0 %v7063_v45 }
0x1866   :  { %3008 = vmatprep.subr.bf16.mxu0 %v7069_v4 }
0x1869   :  { %3009 = vmatpush1.bf16.msra.mxu0 %v8476_v18 }
0x186a   :  { %3010 = vmatprep.subr.bf16.mxu0 %v8477_v39 }
0x186d   :  { %3011 = vmatpush1.bf16.msra.mxu0 %v8478_v61 }
0x186e   :  { %3012 = vmatprep.subr.bf16.mxu0 %v8479_v23 }
0x1871   :  { %3013 = vmatpush1.bf16.msra.mxu0 %v8480_v41 }
0x1872   :  { %3014 = vmatprep.subr.bf16.mxu0 %v8481_v22 }
0x1875   :  { %3015 = vmatpush1.bf16.msra.mxu0 %v8482_v40 }
0x1876   :  { %3153 = vmatprep.subr.bf16.mxu0 %v8483_v28 }
0x190b   :  { %v2869_v19 = vpop.f32.mrb[60].mxu0 }
0x190c   :  { %v7272_v27 = vadd.f32 %v7269_v44, %v2869_v19  ;;  %v3895_v12 = vpop.f32.mrb[61].mxu0  ;;  %v4550_v19 = vmov -inf  }
0x190d   :  { %v2872_v48 = vpop.f32.mrb[62].mxu0  ;;  %v7282_v12 = vsel %vm2058_vm11, 1.0, %v4550_v19 }
0x190e   :  { %8485 = vst [vmem:[#allocation40_spill] sm:$0xff] %v7272_v27  ;;  %v3896_v54 = vpop.f32.mrb[63].mxu0  ;;  %v2875_v50 = vsel %vm2036_vm1, %v7272_v27, -inf  ;;  %8486 = vst [vmem:[#allocation41_spill] sm:$0xff] %v7282_v12  ;;  %v2060_v48 = vsel %vm2036_vm1, %v7282_v12, -inf }
0x190f   :  { %2876 = vmax.xlane.f32.xlu0 %v2875_v50 }
0x199c   :  { %v2877_v6 = vpop.xlane.xlu0 %2876 }
0x199d   :  { %vm2878_vm10 = vcmp.eq.f32.partialorder %v7272_v27, %v2877_v6 }
0x199e   :  { %v2879_v47 = vsel %vm2878_vm10, %v8427_v49, 2147483647 }
0x199f   :  { %v2880_v51 = vsel %vm2036_vm1, %v2879_v47, 2147483647 }
0x19a0   :  { %v2882_v28 = vshra.s32 %v2880_v51, 16  ;;  %v2881_v54 = vand.u32 65535, %v2880_v51 }
0x19a2   :  { %v2884_v40 = vcvt.s32.f32 %v2882_v28  ;;  %v2883_v6 = vcvt.s32.f32 %v2881_v54 }
0x19a4   :  { %2885 = vmin.xlane.f32.xlu1 %v2884_v40 }
0x19a8   :  { %2061 = vmax.xlane.f32.xlu1 %v2060_v48 }
0x1a31   :  { %v2886_v50 = vpop.xlane.xlu1 %2885 }
0x1a32   :  { %vm2887_vm12 = vcmp.eq.f32.partialorder %v2884_v40, %v2886_v50  ;;  %v2892_v41 = vcvt.f32.s32 %v2886_v50  ;;  %v8497_v50 = vld [vmem:[#allocation13_spill] sm:$0xff] }
0x1a33   :  { %v2888_v27 = vsel %vm2887_vm12, %v2883_v6, inf }
0x1a34   :  { %2889 = vmin.xlane.f32.xlu0 %v2888_v27  ;;  %v2893_v51 = vshll.u32 %v2892_v41, 16  ;;  %v8494_v41 = vld [vmem:[#allocation12_spill] sm:$0xff] }
0x1a35   :  { %v7286_v47 = vpop.xlane.xlu1 %2061 }
0x1a36   :  { %8487 = vst [vmem:[#allocation42_spill] sm:$0xff] %v7286_v47  ;;  %vm2063_vm13 = vcmp.eq.f32.partialorder %v7282_v12, %v7286_v47 }
0x1a37   :  { %v2064_v28 = vsel %vm2063_vm13, %v8427_v49, 2147483647 }
0x1a38   :  { %v2065_v19 = vsel %vm2036_vm1, %v2064_v28, 2147483647 }
0x1a39   :  { %v2067_v44 = vshra.s32 %v2065_v19, 16  ;;  %v2066_v40 = vand.u32 65535, %v2065_v19  ;;  %v8499_v19 = vld [vmem:[#allocation17_spill] sm:$0xff] }
0x1a3b   :  { %v2069_v22 = vcvt.s32.f32 %v2067_v44  ;;  %v2068_v61 = vcvt.s32.f32 %v2066_v40  ;;  %v8496_v44 = vld [vmem:[#allocation4_spill] sm:$0xff]  ;;  %v8503_v40 = vld [vmem:[#allocation22_spill] sm:$0xff] }
0x1a3d   :  { %2070 = vmin.xlane.f32.xlu0 %v2069_v22 }
0x1ac1   :  { %v2890_v48 = vpop.xlane.xlu0 %2889 }
0x1ac2   :  { %v2891_v23 = vcvt.f32.s32 %v2890_v48  ;;  %v8500_v48 = vld [vmem:[#allocation19_spill] sm:$0xff] }
0x1ac4   :  { %v2894_v54 = vadd.s32 %v2893_v51, %v2891_v23  ;;  %v8493_v23 = vld [vmem:[#allocation9_spill] sm:$0xff]  ;;  %v8501_v51 = vld [vmem:[#allocation20_spill] sm:$0xff] }
0x1ac6   :  { %v2895_v6 = vcvt.s32.f32 %v2894_v54  ;;  %v8502_v54 = vld [vmem:[#allocation21_spill] sm:$0xff] }
0x1ac8   :  { %v2939_v27 = vmul.f32 %v7126_v1, %v2895_v6  ;;  %v8504_v6 = vld [vmem:[#allocation23_spill] sm:$0xff] }
0x1aca   :  { %v2940_v39 = vadd.f32 %v7132_v32, %v2939_v27  ;;  %v2071_v12 = vpop.xlane.xlu0 %2070  ;;  %v8505_v27 = vld [vmem:[#allocation28_spill] sm:$0xff] }
0x1acb   :  { %vm2072_vm14 = vcmp.eq.f32.partialorder %v2069_v22, %v2071_v12  ;;  %v8495_v22 = vld [vmem:[#allocation39_spill] sm:$0xff] }
0x1acc   :  { %v2941_v47 = vmax.f32 %v2940_v39, 0.0  ;;  %v2073_v18 = vsel %vm2072_vm14, %v2068_v61, inf  ;;  %v8491_v39 = vld [vmem:[#allocation7_spill] sm:$0xff]  ;;  %v8492_v61 = vld [vmem:[#allocation38_spill] sm:$0xff] }
0x1acd   :  { %2074 = vmin.xlane.f32.xlu1 %v2073_v18  ;;  %v8490_v18 = vld [vmem:[#allocation31_spill] sm:$0xff] }
0x1ace   :  { %v2942_v28 = vpack.c.bf16 %v2941_v47, %v2941_v47  ;;  %v8498_v47 = vld [vmem:[#allocation16_spill] sm:$0xff] }
0x1ad0   :  { %2976 = vmatmul.mubr.bf16.vlgmr.msra.gmra.mrb[60].mxu1 %v2942_v28  ;;  %3017 = vmatmul.mubr.bf16.vlgmr.msra.gmra.mrb[64].mxu0 %v2942_v28  ;;  %v8506_v28 = vld [vmem:[#allocation29_spill] sm:$0xff] }
0x1ad1   :  { %3898 = vmatpush3.bf16.msra.mxu1 %v7138_v36  ;;  %3913 = vmatprep.mubr.msk.bf16.mxu1 %vm4549_vm0, %v8378_v29 }
0x1ad2   :  { %3899 = vmatprep.subr.bf16.mxu1 %v8378_v29  ;;  %3154 = vmatpush1.bf16.msra.mxu0 %v6615_v26  ;;  %v8488_v26 = vld [vmem:[#allocation30_spill] sm:$0xff] }
0x1ad3   :  { %3155 = vmatprep.subr.bf16.mxu0 %v6621_v46  ;;  %v8489_v46 = vld [vmem:[#allocation37_spill] sm:$0xff] }
0x1ad5   :  { %3900 = vmatpush3.bf16.msra.mxu1 %v7149_v59 }
0x1ad6   :  { %3901 = vmatprep.subr.bf16.mxu1 %v8378_v29  ;;  %3156 = vmatpush1.bf16.msra.mxu0 %v6835_v56 }
0x1ad7   :  { %3157 = vmatprep.subr.bf16.mxu0 %v6841_v38 }
0x1ad9   :  { %3902 = vmatpush3.bf16.msra.mxu1 %v7158_v17 }
0x1ada   :  { %3903 = vmatprep.subr.bf16.mxu1 %v8378_v29  ;;  %3158 = vmatpush1.bf16.msra.mxu0 %v6849_v5 }
0x1adb   :  { %3159 = vmatprep.subr.bf16.mxu0 %v6855_v10 }
0x1add   :  { %3904 = vmatpush3.bf16.msra.mxu1 %v7167_v58 }
0x1ade   :  { %3905 = vmatprep.subr.bf16.mxu1 %v8378_v29  ;;  %3160 = vmatpush1.bf16.msra.mxu0 %v6863_v8 }
0x1adf   :  { %3161 = vmatprep.subr.bf16.mxu0 %v6869_v60 }
0x1ae1   :  { %3906 = vmatpush3.bf16.msra.mxu1 %v7176_v63 }
0x1ae2   :  { %3907 = vmatprep.subr.bf16.mxu1 %v8378_v29  ;;  %3162 = vmatpush1.bf16.msra.mxu0 %v6877_v13 }
0x1ae3   :  { %3163 = vmatprep.subr.bf16.mxu0 %v8488_v26 }
0x1ae5   :  { %3908 = vmatpush3.bf16.msra.mxu1 %v8489_v46 }
0x1ae6   :  { %3909 = vmatprep.subr.bf16.mxu1 %v8378_v29  ;;  %3164 = vmatpush1.bf16.msra.mxu0 %v8490_v18 }
0x1ae7   :  { %3165 = vmatprep.subr.bf16.mxu0 %v8491_v39 }
0x1ae9   :  { %3910 = vmatpush3.bf16.msra.mxu1 %v8492_v61 }
0x1aea   :  { %3911 = vmatprep.subr.bf16.mxu1 %v8378_v29  ;;  %3166 = vmatpush1.bf16.msra.mxu0 %v8493_v23 }
0x1aeb   :  { %3167 = vmatprep.subr.bf16.mxu0 %v8494_v41 }
0x1aed   :  { %3912 = vmatpush3.bf16.msra.mxu1 %v8495_v22 }
0x1aee   :  { %3194 = vmatprep.subr.bf16.mxu1 %v8496_v44  ;;  %3168 = vmatpush1.bf16.msra.mxu0 %v8497_v50  ;;  %v8507_v44 = vld [vmem:[#allocation34_spill] sm:$0xff]  ;;  %v8508_v50 = vld [vmem:[#allocation33_spill] sm:$0xff] }
0x1aef   :  { %3169 = vmatprep.subr.bf16.mxu0 %v8498_v47  ;;  %v8509_v47 = vld [vmem:[#allocation32_spill] sm:$0xff] }
0x1af2   :  { %3170 = vmatpush1.bf16.msra.mxu0 %v8499_v19  ;;  %v8510_v19 = vld [vmem:[#allocation35_spill] sm:$0xff] }
0x1af3   :  { %3171 = vmatprep.subr.bf16.mxu0 %v8500_v48  ;;  %v8511_v48 = vld [vmem:[#allocation2_spill] sm:$0xff] }
0x1af6   :  { %3172 = vmatpush1.bf16.msra.mxu0 %v8501_v51  ;;  %v8512_v51 = vld [vmem:[#allocation3_spill] sm:$0xff] }
0x1af7   :  { %3173 = vmatprep.subr.bf16.mxu0 %v8502_v54  ;;  %v8513_v54 = vld [vmem:[#allocation8_spill] sm:$0xff] }
0x1afa   :  { %3174 = vmatpush1.bf16.msra.mxu0 %v8503_v40 }
0x1afb   :  { %3175 = vmatprep.subr.bf16.mxu0 %v8504_v6  ;;  %v2077_v6 = vcvt.f32.s32 %v2071_v12 }
0x1afe   :  { %3176 = vmatpush1.bf16.msra.mxu0 %v8505_v27  ;;  %v2078_v27 = vshll.u32 %v2077_v6, 16 }
0x1aff   :  { %3177 = vmatprep.subr.bf16.mxu0 %v8506_v28 }
0x1b02   :  { %3178 = vmatpush1.bf16.msra.mxu0 %v8507_v44 }
0x1b03   :  { %3179 = vmatprep.subr.bf16.mxu0 %v8508_v50 }
0x1b06   :  { %3180 = vmatpush1.bf16.msra.mxu0 %v8509_v47 }
0x1b07   :  { %3181 = vmatprep.subr.bf16.mxu0 %v8510_v19 }
0x1b0a   :  { %3182 = vmatpush1.bf16.msra.mxu0 %v8511_v48 }
0x1b0b   :  { %3183 = vmatprep.subr.bf16.mxu0 %v8512_v51 }
0x1b0e   :  { %3184 = vmatpush1.bf16.msra.mxu0 %v8513_v54  ;;  %v8515_v54 = vld [vmem:[#allocation5_spill] sm:$0xff] }
0x1b0f   :  { %3917 = vmatprep.subr.bf16.mxu0 %v8378_v29 }
0x1b5a   :  { %v2075_v40 = vpop.xlane.xlu1 %2074 }
0x1b5b   :  { %v2076_v28 = vcvt.f32.s32 %v2075_v40 }
0x1b5d   :  { %v7344_v22 = vadd.s32 %v2078_v27, %v2076_v28  ;;  %v8516_v27 = vld [vmem:[#allocation25_spill] sm:$0xff] }
0x1b5f   :  { %8514 = vst [vmem:[#allocation4_spill] sm:$0xff] %v7344_v22  ;;  %vm2090_vm15 = vcmp.eq.s32.totalorder %v8427_v49, %v7344_v22 }
0x1b60   :  { %v7352_v48 = vsel %vm2090_vm15, 1.0, %v8378_v29 }
0x1b61   :  { %vm2267_vm2 = vcmp.gt.f32.partialorder %v7352_v48, 0.5 }
0x1b62   :  { %v7356_v51 = vsel %vm2267_vm2, -inf, %v8515_v54 }
0x1b63   :  { %v2269_v12 = vsel %vm2036_vm1, %v7356_v51, -inf }
0x1b64   :  { %2270 = vmax.xlane.f32.xlu1 %v2269_v12 }
0x1ba3   :  { %v2977_v40 = vpop.f32.mrb[60].mxu1  ;;  %v3018_v6 = vpop.f32.mrb[64].mxu0 }
0x1ba4   :  { %v2978_v28 = vadd.f32 %v2977_v40, %v8516_v27  ;;  %v2979_v19 = vpop.f32.mrb[61].mxu1  ;;  %v3020_v47 = vpop.f32.mrb[65].mxu0  ;;  %v3019_v27 = vadd.f32 %v3018_v6, %v6447_v16 }
0x1ba5   :  { %v2981_v50 = vpop.f32.mrb[62].mxu1  ;;  %v3022_v44 = vpop.f32.mrb[66].mxu0  ;;  %v2980_v61 = vadd.f32 %v2979_v19, %v6437_v37  ;;  %v3021_v26 = vadd.f32 %v3020_v47, %v6443_v21 }
0x1ba6   :  { %v3719_v22 = vmul.f32 -1.442695, %v2978_v28  ;;  %v2982_v41 = vpop.f32.mrb[63].mxu1  ;;  %v3023_v23 = vpop.f32.mrb[67].mxu0 }
0x1ba7   :  { %v3720_v54 = vmul.f32 -1.442695, %v2980_v61 }
0x1ba8   :  { %4298 = vpow2.f32 %v3719_v22 }
0x1ba9   :  { %4300 = vpow2.f32 %v3720_v54 }
0x1bb2   :  { %v4299_v39 = vpop.eup %4298 }
0x1bb3   :  { %v3028_v18 = vadd.f32 1.0, %v4299_v39  ;;  %v4301_v12 = vpop.eup %4300 }
0x1bb4   :  { %v3034_v46 = vadd.f32 1.0, %v4301_v12 }
0x1bb5   :  { %4302 = vrcp.f32 %v3028_v18 }
0x1bb6   :  { %4304 = vrcp.f32 %v3034_v46 }
0x1bbf   :  { %v4303_v40 = vpop.eup %4302 }
0x1bc0   :  { %v3037_v50 = vmul.f32 %v4303_v40, %v3021_v26  ;;  %v4305_v23 = vpop.eup %4304 }
0x1bc1   :  { %v3040_v41 = vsub.f32 1.0, %v4305_v23  ;;  %v3042_v61 = vmul.f32 %v4305_v23, %v7230_v55 }
0x1bc2   :  { %v3038_v44 = vadd.f32 %v3037_v50, %v3019_v27 }
0x1bc4   :  { %4306 = vtanh.f32 %v3038_v44 }
0x1bce   :  { %v4307_v19 = vpop.eup %4306 }
0x1bcf   :  { %v3041_v22 = vmul.f32 %v4307_v19, %v3040_v41 }
0x1bd1   :  { %v7365_v28 = vadd.f32 %v3042_v61, %v3041_v22  ;;  %v8525_v22 = vld [vmem:[#allocation6_spill] sm:$0xff] }
0x1bd3   :  { %v3044_v18 = vpack.c.bf16 %v7365_v28, %v7365_v28 }
0x1bd5   :  { %3914 = vmatmul.mubr.bf16.vlgmr.msra.gmra.mrb[64].mxu1 %v3044_v18  ;;  %3185 = vmatprep.mubr.bf16.mxu0 %v3044_v18 }
0x1bd6   :  { %3226 = vmatprep.mubr.bf16.mxu1 %v3044_v18  ;;  %3195 = vmatpush1.bf16.msra.mxu1 %v6685_v33 }
0x1bd7   :  { %3196 = vmatprep.subr.bf16.mxu1 %v6691_v9 }
0x1bda   :  { %3197 = vmatpush1.bf16.msra.mxu1 %v6697_v0 }
0x1bdb   :  { %3198 = vmatprep.subr.bf16.mxu1 %v6703_v11 }
0x1bde   :  { %3199 = vmatpush1.bf16.msra.mxu1 %v6709_v53 }
0x1bdf   :  { %3200 = vmatprep.subr.bf16.mxu1 %v6715_v35  ;;  %v8517_v35 = vld [vmem:[#allocation10_spill] sm:$0xff] }
0x1be2   :  { %3201 = vmatpush1.bf16.msra.mxu1 %v6721_v31  ;;  %v8518_v31 = vld [vmem:[#allocation11_spill] sm:$0xff] }
0x1be3   :  { %3202 = vmatprep.subr.bf16.mxu1 %v6727_v57  ;;  %v8519_v57 = vld [vmem:[#allocation14_spill] sm:$0xff] }
0x1be6   :  { %3203 = vmatpush1.bf16.msra.mxu1 %v6733_v3  ;;  %v8520_v3 = vld [vmem:[#allocation15_spill] sm:$0xff] }
0x1be7   :  { %3204 = vmatprep.subr.bf16.mxu1 %v6739_v34  ;;  %v8521_v34 = vld [vmem:[#allocation18_spill] sm:$0xff] }
0x1bea   :  { %3205 = vmatpush1.bf16.msra.mxu1 %v6745_v2  ;;  %v8522_v2 = vld [vmem:[#allocation26_spill] sm:$0xff] }
0x1beb   :  { %3206 = vmatprep.subr.bf16.mxu1 %v6751_v7  ;;  %v8523_v7 = vld [vmem:[#allocation24_spill] sm:$0xff] }
0x1bee   :  { %3207 = vmatpush1.bf16.msra.mxu1 %v6757_v15  ;;  %v4499_v15 = vld [vmem:[%s7866_s7 + $0x4] ss:$16 sps:$4 sm:$0xff]  }
0x1bef   :  { %3208 = vmatprep.subr.bf16.mxu1 %v6763_v62 }
0x1bf1   :  { %v7383_v33 = vpop.xlane.xlu1 %2270 }
0x1bf2   :  { %vm2272_vm3 = vcmp.eq.f32.partialorder %v7356_v51, %v7383_v33  ;;  %3209 = vmatpush1.bf16.msra.mxu1 %v6769_v24 }
0x1bf3   :  { %v2273_v9 = vsel %vm2272_vm3, %v8427_v49, 2147483647  ;;  %3210 = vmatprep.subr.bf16.mxu1 %v6775_v25 }
0x1bf4   :  { %v2274_v0 = vsel %vm2036_vm1, %v2273_v9, 2147483647 }
0x1bf5   :  { %v2276_v11 = vshra.s32 %v2274_v0, 16  ;;  %v2275_v62 = vand.u32 65535, %v2274_v0 }
0x1bf6   :  { %3211 = vmatpush1.bf16.msra.mxu1 %v6781_v30 }
0x1bf7   :  { %v2278_v53 = vcvt.s32.f32 %v2276_v11  ;;  %3212 = vmatprep.subr.bf16.mxu1 %v6787_v14  ;;  %v2277_v25 = vcvt.s32.f32 %v2275_v62 }
0x1bf9   :  { %2279 = vmin.xlane.f32.xlu1 %v2278_v53 }
0x1bfa   :  { %3213 = vmatpush1.bf16.msra.mxu1 %v6793_v43  ;;  %v8524_v43 = vld [vmem:[#allocation27_spill] sm:$0xff] }
0x1bfb   :  { %3214 = vmatprep.subr.bf16.mxu1 %v6799_v42 }
0x1bfe   :  { %3215 = vmatpush1.bf16.msra.mxu1 %v7051_v20 }
0x1bff   :  { %3216 = vmatprep.subr.bf16.mxu1 %v7057_v52 }
0x1c02   :  { %3217 = vmatpush1.bf16.msra.mxu1 %v7063_v45 }
0x1c03   :  { %3218 = vmatprep.subr.bf16.mxu1 %v7069_v4 }
0x1c06   :  { %3219 = vmatpush1.bf16.msra.mxu1 %v8517_v35 }
0x1c07   :  { %3220 = vmatprep.subr.bf16.mxu1 %v8518_v31 }
0x1c0a   :  { %3221 = vmatpush1.bf16.msra.mxu1 %v8519_v57 }
0x1c0b   :  { %3222 = vmatprep.subr.bf16.mxu1 %v8520_v3 }
0x1c0e   :  { %3223 = vmatpush1.bf16.msra.mxu1 %v8521_v34 }
0x1c0f   :  { %3224 = vmatprep.subr.bf16.mxu1 %v8522_v2 }
0x1c12   :  { %3225 = vmatpush1.bf16.msra.mxu1 %v8523_v7 }
0x1c13   :  { %3363 = vmatprep.subr.bf16.mxu1 %v4499_v15 }
0x1c86   :  { %v2280_v24 = vpop.xlane.xlu1 %2279 }
0x1c87   :  { %vm2281_vm4 = vcmp.eq.f32.partialorder %v2278_v53, %v2280_v24  ;;  %v2286_v27 = vcvt.f32.s32 %v2280_v24 }
0x1c88   :  { %v2282_v30 = vsel %vm2281_vm4, %v2277_v25, inf  ;;  %v8537_v25 = vld [vmem:[#allocation19_spill] sm:$0xff] }
0x1c89   :  { %2283 = vmin.xlane.f32.xlu1 %v2282_v30  ;;  %v2287_v12 = vshll.u32 %v2286_v27, 16  ;;  %v8538_v30 = vld [vmem:[#allocation20_spill] sm:$0xff] }
0x1c8a   :  { %v8550_v27 = vld [vmem:[#allocation8_spill] sm:$0xff] }
0x1ca8   :  { %v3079_v14 = vpop.f32.mrb[64].mxu1 }
0x1ca9   :  { %v7410_v42 = vadd.f32 %v8524_v43, %v3079_v14  ;;  %v3915_v20 = vpop.f32.mrb[65].mxu1  ;;  %v8539_v14 = vld [vmem:[#allocation21_spill] sm:$0xff] }
0x1caa   :  { %v3082_v52 = vpop.f32.mrb[66].mxu1  ;;  %v8540_v20 = vld [vmem:[#allocation22_spill] sm:$0xff] }
0x1cab   :  { %v3916_v45 = vpop.f32.mrb[67].mxu1  ;;  %v3085_v4 = vsel %vm2036_vm1, %v7410_v42, -inf  ;;  %v8541_v52 = vld [vmem:[#allocation23_spill] sm:$0xff] }
0x1cac   :  { %3086 = vmax.xlane.f32.xlu0 %v3085_v4  ;;  %v8542_v45 = vld [vmem:[#allocation28_spill] sm:$0xff]  ;;  %v8543_v4 = vld [vmem:[#allocation29_spill] sm:$0xff] }
0x1d16   :  { %v2284_v6 = vpop.xlane.xlu1 %2283 }
0x1d17   :  { %v2285_v54 = vcvt.f32.s32 %v2284_v6  ;;  %v8549_v6 = vld [vmem:[#allocation3_spill] sm:$0xff] }
0x1d19   :  { %v7417_v40 = vadd.s32 %v2287_v12, %v2285_v54 }
0x1d1b   :  { %vm2299_vm6 = vcmp.eq.s32.totalorder %v8427_v49, %v7417_v40 }
0x1d1c   :  { %v7425_v44 = vsel %vm2299_vm6, 1.0, %v7352_v48 }
0x1d1d   :  { %vm2477_vm7 = vcmp.gt.f32.partialorder %v7425_v44, 0.5 }
0x1d1e   :  { %v7429_v61 = vsel %vm2477_vm7, -inf, %v8525_v22  ;;  %v8551_v22 = vld [vmem:[#allocation25_spill] sm:$0xff] }
0x1d1f   :  { %v2479_v18 = vsel %vm2036_vm1, %v7429_v61, -inf }
0x1d39   :  { %v3087_v55 = vpop.xlane.xlu0 %3086 }
0x1d3a   :  { %vm3088_vm5 = vcmp.eq.f32.partialorder %v7410_v42, %v3087_v55  ;;  %v8544_v55 = vld [vmem:[#allocation34_spill] sm:$0xff] }
0x1d3b   :  { %v3089_v26 = vsel %vm3088_vm5, %v8427_v49, 2147483647 }
0x1d3c   :  { %v3090_v46 = vsel %vm2036_vm1, %v3089_v26, 2147483647  ;;  %v8545_v26 = vld [vmem:[#allocation33_spill] sm:$0xff] }
0x1d3d   :  { %v3092_v39 = vshra.s32 %v3090_v46, 16  ;;  %v3091_v50 = vand.u32 65535, %v3090_v46  ;;  %v8546_v46 = vld [vmem:[#allocation32_spill] sm:$0xff] }
0x1d3f   :  { %v3094_v47 = vcvt.s32.f32 %v3092_v39  ;;  %v3093_v41 = vcvt.s32.f32 %v3091_v50  ;;  %v8547_v39 = vld [vmem:[#allocation35_spill] sm:$0xff] }
0x1d41   :  { %3095 = vmin.xlane.f32.xlu0 %v3094_v47 }
0x1dce   :  { %v3096_v23 = vpop.xlane.xlu0 %3095 }
0x1dcf   :  { %vm3097_vm8 = vcmp.eq.f32.partialorder %v3094_v47, %v3096_v23  ;;  %v3102_v9 = vcvt.f32.s32 %v3096_v23  ;;  %v8548_v47 = vld [vmem:[#allocation2_spill] sm:$0xff] }
0x1dd0   :  { %v3098_v19 = vsel %vm3097_vm8, %v3093_v41, inf }
0x1dd1   :  { %3099 = vmin.xlane.f32.xlu0 %v3098_v19  ;;  %v3103_v11 = vshll.u32 %v3102_v9, 16 }
0x1dd5   :  { %2480 = vmax.xlane.f32.xlu0 %v2479_v18 }
0x1e5e   :  { %v3100_v0 = vpop.xlane.xlu0 %3099 }
0x1e5f   :  { %v3101_v53 = vcvt.f32.s32 %v3100_v0 }
0x1e61   :  { %v3104_v48 = vadd.s32 %v3103_v11, %v3101_v53 }
0x1e62   :  { %v7433_v35 = vpop.xlane.xlu0 %2480 }
0x1e63   :  { %v3105_v31 = vcvt.s32.f32 %v3104_v48  ;;  %vm2482_vm9 = vcmp.eq.f32.partialorder %v7429_v61, %v7433_v35 }
0x1e64   :  { %v2483_v57 = vsel %vm2482_vm9, %v8427_v49, 2147483647 }
0x1e65   :  { %v3149_v3 = vmul.f32 %v7126_v1, %v3105_v31  ;;  %v7440_v34 = vsel %vm2036_vm1, %v2483_v57, 2147483647  ;;  %v4500_v1 = vld [vmem:[%s7866_s7] ss:$16 sps:$4 sm:$0xff]  }
0x1e66   :  { %v2486_v2 = vshra.s32 %v7440_v34, 16  ;;  %v2485_v54 = vand.u32 65535, %v7440_v34 }
0x1e67   :  { %v3150_v7 = vadd.f32 %v7132_v32, %v3149_v3  ;;  %v4501_v32 = vld [vmem:[%s7866_s7 + $0x24] ss:$16 sps:$4 sm:$0xff]  }
0x1e68   :  { %v7444_v15 = vcvt.s32.f32 %v2486_v2  ;;  %v2487_v50 = vcvt.s32.f32 %v2485_v54  ;;  %v4516_v54 = vld [vmem:[%s7866_s7 + $0xec] ss:$16 sps:$4 sm:$0xff]  }
0x1e69   :  { %v3151_v62 = vmax.f32 %v3150_v7, 0.0 }
0x1e6a   :  { %2489 = vmin.xlane.f32.xlu1 %v7444_v15 }
0x1e6b   :  { %v3152_v24 = vpack.c.bf16 %v3151_v62, %v3151_v62 }
0x1e6d   :  { %3186 = vmatmul.mubr.bf16.vlgmr.msra.gmra.mrb[68].mxu0 %v3152_v24  ;;  %3227 = vmatmul.mubr.bf16.vlgmr.msra.gmra.mrb[68].mxu1 %v3152_v24 }
0x1e6e   :  { %3918 = vmatpush3.bf16.msra.mxu0 %v7138_v36  ;;  %3933 = vmatprep.mubr.msk.bf16.mxu0 %vm4549_vm0, %v8378_v29  ;;  %v8530_v36 = vld [vmem:[#allocation38_spill] sm:$0xff] }
0x1e6f   :  { %3919 = vmatprep.subr.bf16.mxu0 %v8378_v29  ;;  %3364 = vmatpush1.bf16.msra.mxu1 %v4500_v1 }
0x1e70   :  { %3365 = vmatprep.subr.bf16.mxu1 %v4501_v32 }
0x1e72   :  { %3920 = vmatpush3.bf16.msra.mxu0 %v7149_v59  ;;  %v8533_v59 = vld [vmem:[#allocation39_spill] sm:$0xff] }
0x1e73   :  { %3921 = vmatprep.subr.bf16.mxu0 %v8378_v29  ;;  %3366 = vmatpush1.bf16.msra.mxu1 %v6835_v56  ;;  %v8526_v56 = vld [vmem:[#allocation30_spill] sm:$0xff] }
0x1e74   :  { %3367 = vmatprep.subr.bf16.mxu1 %v6841_v38  ;;  %v8527_v38 = vld [vmem:[#allocation37_spill] sm:$0xff] }
0x1e76   :  { %3922 = vmatpush3.bf16.msra.mxu0 %v7158_v17  ;;  %v8534_v17 = vld [vmem:[#allocation13_spill] sm:$0xff] }
0x1e77   :  { %3923 = vmatprep.subr.bf16.mxu0 %v8378_v29  ;;  %3368 = vmatpush1.bf16.msra.mxu1 %v6849_v5  ;;  %v8528_v5 = vld [vmem:[#allocation31_spill] sm:$0xff] }
0x1e78   :  { %3369 = vmatprep.subr.bf16.mxu1 %v6855_v10  ;;  %v8529_v10 = vld [vmem:[#allocation7_spill] sm:$0xff] }
0x1e7a   :  { %3924 = vmatpush3.bf16.msra.mxu0 %v7167_v58  ;;  %v8535_v58 = vld [vmem:[#allocation16_spill] sm:$0xff] }
0x1e7b   :  { %3925 = vmatprep.subr.bf16.mxu0 %v8378_v29  ;;  %3370 = vmatpush1.bf16.msra.mxu1 %v6863_v8  ;;  %v8531_v8 = vld [vmem:[#allocation9_spill] sm:$0xff] }
0x1e7c   :  { %3371 = vmatprep.subr.bf16.mxu1 %v6869_v60  ;;  %v8532_v60 = vld [vmem:[#allocation12_spill] sm:$0xff] }
0x1e7e   :  { %3926 = vmatpush3.bf16.msra.mxu0 %v7176_v63  ;;  %v8536_v63 = vld [vmem:[#allocation17_spill] sm:$0xff] }
0x1e7f   :  { %3927 = vmatprep.subr.bf16.mxu0 %v8378_v29  ;;  %3372 = vmatpush1.bf16.msra.mxu1 %v6877_v13  ;;  %v4502_v13 = vld [vmem:[%s7866_s7 + $0xc] ss:$16 sps:$4 sm:$0xff]  }
0x1e80   :  { %3373 = vmatprep.subr.bf16.mxu1 %v8526_v56 }
0x1e82   :  { %3928 = vmatpush3.bf16.msra.mxu0 %v8527_v38 }
0x1e83   :  { %3929 = vmatprep.subr.bf16.mxu0 %v8378_v29  ;;  %3374 = vmatpush1.bf16.msra.mxu1 %v8528_v5 }
0x1e84   :  { %3375 = vmatprep.subr.bf16.mxu1 %v8529_v10 }
0x1e86   :  { %3930 = vmatpush3.bf16.msra.mxu0 %v8530_v36 }
0x1e87   :  { %3931 = vmatprep.subr.bf16.mxu0 %v8378_v29  ;;  %3376 = vmatpush1.bf16.msra.mxu1 %v8531_v8 }
0x1e88   :  { %3377 = vmatprep.subr.bf16.mxu1 %v8532_v60 }
0x1e8a   :  { %3932 = vmatpush3.bf16.msra.mxu0 %v8533_v59 }
0x1e8b   :  { %3404 = vmatprep.subr.bf16.mxu0 %v4502_v13  ;;  %3378 = vmatpush1.bf16.msra.mxu1 %v8534_v17  ;;  %v4503_v17 = vld [vmem:[%s7866_s7 + $0x8] ss:$16 sps:$4 sm:$0xff]  }
0x1e8c   :  { %3379 = vmatprep.subr.bf16.mxu1 %v8535_v58  ;;  %v4504_v58 = vld [vmem:[%s7866_s7 + $0x2c] ss:$16 sps:$4 sm:$0xff]  }
0x1e8f   :  { %3380 = vmatpush1.bf16.msra.mxu1 %v8536_v63  ;;  %v4506_v63 = vld [vmem:[%s7866_s7 + $0x4c] ss:$16 sps:$4 sm:$0xff]  }
0x1e90   :  { %3381 = vmatprep.subr.bf16.mxu1 %v8537_v25  ;;  %v4507_v25 = vld [vmem:[%s7866_s7 + $0x48] ss:$16 sps:$4 sm:$0xff]  }
0x1e93   :  { %3382 = vmatpush1.bf16.msra.mxu1 %v8538_v30  ;;  %v4508_v30 = vld [vmem:[%s7866_s7 + $0x6c] ss:$16 sps:$4 sm:$0xff]  }
0x1e94   :  { %3383 = vmatprep.subr.bf16.mxu1 %v8539_v14  ;;  %v4509_v14 = vld [vmem:[%s7866_s7 + $0x68] ss:$16 sps:$4 sm:$0xff]  }
0x1e97   :  { %3384 = vmatpush1.bf16.msra.mxu1 %v8540_v20  ;;  %v4510_v20 = vld [vmem:[%s7866_s7 + $0x8c] ss:$16 sps:$4 sm:$0xff]  }
0x1e98   :  { %3385 = vmatprep.subr.bf16.mxu1 %v8541_v52  ;;  %v4511_v52 = vld [vmem:[%s7866_s7 + $0x88] ss:$16 sps:$4 sm:$0xff]  }
0x1e9b   :  { %3386 = vmatpush1.bf16.msra.mxu1 %v8542_v45 }
0x1e9c   :  { %3387 = vmatprep.subr.bf16.mxu1 %v8543_v4  ;;  %v4512_v4 = vld [vmem:[%s7866_s7 + $0xac] ss:$16 sps:$4 sm:$0xff]  }
0x1e9f   :  { %3388 = vmatpush1.bf16.msra.mxu1 %v8544_v55 }
0x1ea0   :  { %3389 = vmatprep.subr.bf16.mxu1 %v8545_v26  ;;  %v4513_v26 = vld [vmem:[%s7866_s7 + $0xa8] ss:$16 sps:$4 sm:$0xff]  }
0x1ea3   :  { %3390 = vmatpush1.bf16.msra.mxu1 %v8546_v46 }
0x1ea4   :  { %3391 = vmatprep.subr.bf16.mxu1 %v8547_v39 }
0x1ea7   :  { %3392 = vmatpush1.bf16.msra.mxu1 %v8548_v47  ;;  %v4514_v47 = vld [vmem:[%s7866_s7 + $0xcc] ss:$16 sps:$4 sm:$0xff]  }
0x1ea8   :  { %3393 = vmatprep.subr.bf16.mxu1 %v8549_v6 }
0x1eab   :  { %3394 = vmatpush1.bf16.msra.mxu1 %v8550_v27  ;;  %v4515_v27 = vld [vmem:[%s7866_s7 + $0xc8] ss:$16 sps:$4 sm:$0xff]  }
0x1eac   :  { %3937 = vmatprep.subr.bf16.mxu1 %v8378_v29 }
0x1ef7   :  { %v7504_v12 = vpop.xlane.xlu1 %2489 }
0x1ef8   :  { %vm2491_vm10 = vcmp.eq.f32.partialorder %v7444_v15, %v7504_v12  ;;  %v2496_v45 = vcvt.f32.s32 %v7504_v12 }
0x1ef9   :  { %v2492_v23 = vsel %vm2491_vm10, %v2487_v50, inf  ;;  %v8552_v50 = vld [vmem:[#allocation36_spill] sm:$0xff] }
0x1efa   :  { %2493 = vmin.xlane.f32.xlu0 %v2492_v23  ;;  %v2497_v46 = vshll.u32 %v2496_v45, 16 }
0x1f40   :  { %v3187_v41 = vpop.f32.mrb[68].mxu0  ;;  %v3228_v19 = vpop.f32.mrb[68].mxu1 }
0x1f41   :  { %v3188_v18 = vadd.f32 %v3187_v41, %v8551_v22  ;;  %v3189_v9 = vpop.f32.mrb[69].mxu0  ;;  %v3230_v0 = vpop.f32.mrb[69].mxu1  ;;  %v3229_v32 = vadd.f32 %v3228_v19, %v6447_v16  ;;  %v4517_v41 = vld [vmem:[%s7866_s7 + $0xe8] ss:$16 sps:$4 sm:$0xff]  }
0x1f42   :  { %v3191_v11 = vpop.f32.mrb[70].mxu0  ;;  %v3232_v53 = vpop.f32.mrb[70].mxu1  ;;  %v3190_v3 = vadd.f32 %v3189_v9, %v6437_v37  ;;  %v3231_v24 = vadd.f32 %v3230_v0, %v6443_v21  ;;  %v4520_v9 = vld [vmem:[%s7866_s7 + $0x12c] ss:$16 sps:$4 sm:$0xff]   ;;  %v4521_v0 = vld [vmem:[%s7866_s7 + $0x128] ss:$16 sps:$4 sm:$0xff]  }
0x1f43   :  { %v3721_v48 = vmul.f32 -1.442695, %v3188_v18  ;;  %v3192_v31 = vpop.f32.mrb[71].mxu0  ;;  %v3233_v57 = vpop.f32.mrb[71].mxu1  ;;  %v4518_v18 = vld [vmem:[%s7866_s7 + $0x10c] ss:$16 sps:$4 sm:$0xff]  }
0x1f44   :  { %v3722_v34 = vmul.f32 -1.442695, %v3190_v3  ;;  %v4522_v11 = vld [vmem:[%s7866_s7 + $0x14c] ss:$16 sps:$4 sm:$0xff]   ;;  %v4523_v53 = vld [vmem:[%s7866_s7 + $0x148] ss:$16 sps:$4 sm:$0xff]  }
0x1f45   :  { %4308 = vpow2.f32 %v3721_v48  ;;  %v4524_v48 = vld [vmem:[%s7866_s7 + $0x16c] ss:$16 sps:$4 sm:$0xff]   ;;  %v4525_v31 = vld [vmem:[%s7866_s7 + $0x168] ss:$16 sps:$4 sm:$0xff]  }
0x1f46   :  { %4310 = vpow2.f32 %v3722_v34  ;;  %v4526_v57 = vld [vmem:[%s7866_s7 + $0x18c] ss:$16 sps:$4 sm:$0xff]   ;;  %v4527_v3 = vld [vmem:[%s7866_s7 + $0x188] ss:$16 sps:$4 sm:$0xff]  }
0x1f47   :  { %v4528_v34 = vld [vmem:[%s7866_s7 + $0x1ac] ss:$16 sps:$4 sm:$0xff]  }
0x1f4f   :  { %v4309_v2 = vpop.eup %4308 }
0x1f50   :  { %v3238_v7 = vadd.f32 1.0, %v4309_v2  ;;  %v4311_v15 = vpop.eup %4310  ;;  %v4529_v2 = vld [vmem:[%s7866_s7 + $0x1a8] ss:$16 sps:$4 sm:$0xff]  }
0x1f51   :  { %v3244_v62 = vadd.f32 1.0, %v4311_v15  ;;  %v4531_v15 = vld [vmem:[%s7866_s7 + $0x1c8] ss:$16 sps:$4 sm:$0xff]  }
0x1f52   :  { %4312 = vrcp.f32 %v3238_v7  ;;  %v4530_v7 = vld [vmem:[%s7866_s7 + $0x1cc] ss:$16 sps:$4 sm:$0xff]  }
0x1f53   :  { %4314 = vrcp.f32 %v3244_v62  ;;  %v4532_v62 = vld [vmem:[%s7866_s7 + $0x1ec] ss:$16 sps:$4 sm:$0xff]  }
0x1f5c   :  { %v4313_v1 = vpop.eup %4312 }
0x1f5d   :  { %v3247_v56 = vmul.f32 %v4313_v1, %v3231_v24  ;;  %v4315_v5 = vpop.eup %4314  ;;  %v4533_v24 = vld [vmem:[%s7866_s7 + $0x1e8] ss:$16 sps:$4 sm:$0xff]  }
0x1f5e   :  { %v3250_v10 = vsub.f32 1.0, %v4315_v5  ;;  %v3252_v60 = vmul.f32 %v4315_v5, %v7365_v28  ;;  %v4505_v28 = vld [vmem:[%s7866_s7 + $0x28] ss:$16 sps:$4 sm:$0xff]  }
0x1f5f   :  { %v3248_v38 = vadd.f32 %v3247_v56, %v3229_v32 }
0x1f61   :  { %4316 = vtanh.f32 %v3248_v38 }
0x1f6b   :  { %v4317_v36 = vpop.eup %4316 }
0x1f6c   :  { %v3251_v8 = vmul.f32 %v4317_v36, %v3250_v10 }
0x1f6e   :  { %v7513_v59 = vadd.f32 %v3252_v60, %v3251_v8 }
0x1f70   :  { %v3254_v13 = vpack.c.bf16 %v7513_v59, %v7513_v59 }
0x1f72   :  { %3934 = vmatmul.mubr.bf16.vlgmr.msra.gmra.mrb[72].mxu0 %v3254_v13  ;;  %3395 = vmatprep.mubr.bf16.mxu1 %v3254_v13 }
0x1f73   :  { %3436 = vmatprep.mubr.bf16.mxu0 %v3254_v13  ;;  %3405 = vmatpush1.bf16.msra.mxu0 %v4503_v17 }
0x1f74   :  { %3406 = vmatprep.subr.bf16.mxu0 %v4504_v58 }
0x1f77   :  { %3407 = vmatpush1.bf16.msra.mxu0 %v4505_v28 }
0x1f78   :  { %3408 = vmatprep.subr.bf16.mxu0 %v4506_v63 }
0x1f7b   :  { %3409 = vmatpush1.bf16.msra.mxu0 %v4507_v25 }
0x1f7c   :  { %3410 = vmatprep.subr.bf16.mxu0 %v4508_v30 }
0x1f7f   :  { %3411 = vmatpush1.bf16.msra.mxu0 %v4509_v14 }
0x1f80   :  { %3412 = vmatprep.subr.bf16.mxu0 %v4510_v20 }
0x1f83   :  { %3413 = vmatpush1.bf16.msra.mxu0 %v4511_v52 }
0x1f84   :  { %3414 = vmatprep.subr.bf16.mxu0 %v4512_v4 }
0x1f87   :  { %v2494_v55 = vpop.xlane.xlu0 %2493  ;;  %3415 = vmatpush1.bf16.msra.mxu0 %v4513_v26 }
0x1f88   :  { %v2495_v39 = vcvt.f32.s32 %v2494_v55  ;;  %3416 = vmatprep.subr.bf16.mxu0 %v4514_v47  ;;  %v8553_v47 = vld [vmem:[#allocation40_spill] sm:$0xff] }
0x1f8a   :  { %v7554_v6 = vadd.s32 %v2497_v46, %v2495_v39 }
0x1f8b   :  { %3417 = vmatpush1.bf16.msra.mxu0 %v4515_v27 }
0x1f8c   :  { %vm2509_vm12 = vcmp.eq.s32.totalorder %v8427_v49, %v7554_v6  ;;  %3418 = vmatprep.subr.bf16.mxu0 %v4516_v54 }
0x1f8d   :  { %v7568_v12 = vsel %vm2509_vm12, 1.0, %v7425_v44  ;;  %v4519_v44 = vld [vmem:[%s7866_s7 + $0x108] ss:$16 sps:$4 sm:$0xff]  }
0x1f8e   :  { %vm2687_vm13 = vcmp.gt.f32.partialorder %v7568_v12, 0.5 }
0x1f8f   :  { %v7572_v23 = vsel %vm2687_vm13, -inf, %v8552_v50  ;;  %3419 = vmatpush1.bf16.msra.mxu0 %v4517_v41 }
0x1f90   :  { %v2689_v19 = vsel %vm2036_vm1, %v7572_v23, -inf  ;;  %3420 = vmatprep.subr.bf16.mxu0 %v4518_v18 }
0x1f91   :  { %2690 = vmax.xlane.f32.xlu1 %v2689_v19 }
0x1f93   :  { %3421 = vmatpush1.bf16.msra.mxu0 %v4519_v44 }
0x1f94   :  { %3422 = vmatprep.subr.bf16.mxu0 %v4520_v9 }
0x1f97   :  { %3423 = vmatpush1.bf16.msra.mxu0 %v4521_v0 }
0x1f98   :  { %3424 = vmatprep.subr.bf16.mxu0 %v4522_v11 }
0x1f9b   :  { %3425 = vmatpush1.bf16.msra.mxu0 %v4523_v53 }
0x1f9c   :  { %3426 = vmatprep.subr.bf16.mxu0 %v4524_v48 }
0x1f9f   :  { %3427 = vmatpush1.bf16.msra.mxu0 %v4525_v31 }
0x1fa0   :  { %3428 = vmatprep.subr.bf16.mxu0 %v4526_v57 }
0x1fa3   :  { %3429 = vmatpush1.bf16.msra.mxu0 %v4527_v3 }
0x1fa4   :  { %3430 = vmatprep.subr.bf16.mxu0 %v4528_v34 }
0x1fa7   :  { %3431 = vmatpush1.bf16.msra.mxu0 %v4529_v2  ;;  %v4534_v2 = vld [vmem:[%s7867_s5] ss:$0 sm:$0xff] }
0x1fa8   :  { %3432 = vmatprep.subr.bf16.mxu0 %v4530_v7 }
0x1fab   :  { %3433 = vmatpush1.bf16.msra.mxu0 %v4531_v15  ;;  %v4535_v15 = vld [vmem:[%s7868_s6] ss:$0 sm:$0xff] }
0x1fac   :  { %3434 = vmatprep.subr.bf16.mxu0 %v4532_v62 }
0x1faf   :  { %3435 = vmatpush1.bf16.msra.mxu0 %v4533_v24 }
0x201e   :  { %v7627_v1 = vpop.xlane.xlu1 %2690 }
0x201f   :  { %vm2692_vm14 = vcmp.eq.f32.partialorder %v7572_v23, %v7627_v1 }
0x2020   :  { %v2693_v32 = vsel %vm2692_vm14, %v8427_v49, 2147483647 }
0x2021   :  { %v2694_v56 = vsel %vm2036_vm1, %v2693_v32, 2147483647 }
0x2022   :  { %v2696_v38 = vshra.s32 %v2694_v56, 16  ;;  %v2695_v58 = vand.u32 65535, %v2694_v56  ;;  %v4536_v56 = vld [vmem:[%s7869_s9] sm:$0xff]  }
0x2024   :  { %v2698_v5 = vcvt.s32.f32 %v2696_v38  ;;  %v2697_v63 = vcvt.s32.f32 %v2695_v58  ;;  %v4537_v38 = vld [vmem:[%s7869_s9 + $0x8] sm:$0xff]  }
0x2026   :  { %2699 = vmin.xlane.f32.xlu0 %v2698_v5 }
0x2045   :  { %v3289_v10 = vpop.f32.mrb[72].mxu0 }
0x2046   :  { %v7634_v36 = vadd.f32 %v8524_v43, %v3289_v10  ;;  %v3935_v8 = vpop.f32.mrb[73].mxu0  ;;  %v4539_v10 = vld [vmem:[%s7869_s9 + $0x18] sm:$0xff]  }
0x2047   :  { %v3292_v60 = vpop.f32.mrb[74].mxu0  ;;  %v4540_v8 = vld [vmem:[%s7869_s9 + $0x20] sm:$0xff]  }
0x2048   :  { %v3936_v13 = vpop.f32.mrb[75].mxu0  ;;  %v3295_v17 = vsel %vm2036_vm1, %v7634_v36, -inf  ;;  %v4541_v60 = vld [vmem:[%s7869_s9 + $0x28] sm:$0xff]  }
0x2049   :  { %3296 = vmax.xlane.f32.xlu0 %v3295_v17  ;;  %v4542_v13 = vld [vmem:[%s7869_s9 + $0x30] sm:$0xff]   ;;  %v4543_v17 = vld [vmem:[%s7869_s9 + $0x38] sm:$0xff]  }
0x20b3   :  { %v2700_v28 = vpop.xlane.xlu0 %2699 }
0x20b4   :  { %vm2701_vm2 = vcmp.eq.f32.partialorder %v2698_v5, %v2700_v28  ;;  %v2706_v45 = vcvt.f32.s32 %v2700_v28  ;;  %v4538_v5 = vld [vmem:[%s7869_s9 + $0x10] sm:$0xff]  }
0x20b5   :  { %v2702_v25 = vsel %vm2701_vm2, %v2697_v63, inf }
0x20b6   :  { %2703 = vmin.xlane.f32.xlu1 %v2702_v25  ;;  %v2707_v55 = vshll.u32 %v2706_v45, 16 }
0x20d6   :  { %v3297_v30 = vpop.xlane.xlu0 %3296 }
0x20d7   :  { %vm3298_vm3 = vcmp.eq.f32.partialorder %v7634_v36, %v3297_v30 }
0x20d8   :  { %v3299_v14 = vsel %vm3298_vm3, %v8427_v49, 2147483647 }
0x20d9   :  { %v3300_v43 = vsel %vm2036_vm1, %v3299_v14, 2147483647 }
0x20da   :  { %v3302_v20 = vshra.s32 %v3300_v43, 16  ;;  %v3301_v50 = vand.u32 65535, %v3300_v43 }
0x20dc   :  { %v3304_v52 = vcvt.s32.f32 %v3302_v20  ;;  %v3303_v19 = vcvt.s32.f32 %v3301_v50 }
0x20de   :  { %3305 = vmin.xlane.f32.xlu0 %v3304_v52 }
0x2143   :  { %v2704_v4 = vpop.xlane.xlu1 %2703 }
0x2144   :  { %v2705_v26 = vcvt.f32.s32 %v2704_v4 }
0x2146   :  { %v7641_v46 = vadd.s32 %v2707_v55, %v2705_v26 }
0x2148   :  { %vm2719_vm4 = vcmp.eq.s32.totalorder %v8427_v49, %v7641_v46 }
0x2149   :  { %v7649_v39 = vsel %vm2719_vm4, 1.0, %v7568_v12 }
0x214a   :  { %vm2897_vm5 = vcmp.gt.f32.partialorder %v7649_v39, 0.5 }
0x214b   :  { %v7653_v27 = vsel %vm2897_vm5, -inf, %v8553_v47 }
0x214c   :  { %v2899_v54 = vsel %vm2036_vm1, %v7653_v27, -inf }
0x214d   :  { %2900 = vmax.xlane.f32.xlu1 %v2899_v54 }
0x216b   :  { %v3306_v41 = vpop.xlane.xlu0 %3305 }
0x216c   :  { %vm3307_vm7 = vcmp.eq.f32.partialorder %v3304_v52, %v3306_v41  ;;  %v3312_v53 = vcvt.f32.s32 %v3306_v41 }
0x216d   :  { %v3308_v18 = vsel %vm3307_vm7, %v3303_v19, inf }
0x216e   :  { %3309 = vmin.xlane.f32.xlu0 %v3308_v18  ;;  %v3313_v31 = vshll.u32 %v3312_v53, 16 }
0x21da   :  { %v7657_v44 = vpop.xlane.xlu1 %2900 }
0x21db   :  { %vm2902_vm8 = vcmp.eq.f32.partialorder %v7653_v27, %v7657_v44 }
0x21dc   :  { %v2903_v12 = vsel %vm2902_vm8, %v8427_v49, 2147483647 }
0x21dd   :  { %v2904_v9 = vsel %vm2036_vm1, %v2903_v12, 2147483647 }
0x21de   :  { %v2906_v0 = vshra.s32 %v2904_v9, 16  ;;  %v2905_v58 = vand.u32 65535, %v2904_v9 }
0x21e0   :  { %v2908_v11 = vcvt.s32.f32 %v2906_v0  ;;  %v2907_v63 = vcvt.s32.f32 %v2905_v58 }
0x21e2   :  { %2909 = vmin.xlane.f32.xlu1 %v2908_v11 }
0x21fb   :  { %v3310_v48 = vpop.xlane.xlu0 %3309 }
0x21fc   :  { %v3311_v57 = vcvt.f32.s32 %v3310_v48 }
0x21fe   :  { %v3314_v3 = vadd.s32 %v3313_v31, %v3311_v57 }
0x2200   :  { %v3315_v34 = vcvt.s32.f32 %v3314_v3 }
0x2202   :  { %v3359_v7 = vmul.f32 %v4534_v2, %v3315_v34 }
0x2204   :  { %v3360_v62 = vadd.f32 %v4535_v15, %v3359_v7 }
0x2206   :  { %v3361_v24 = vmax.f32 %v3360_v62, 0.0 }
0x2208   :  { %v3362_v32 = vpack.c.bf16 %v3361_v24, %v3361_v24 }
0x220a   :  { %3396 = vmatmul.mubr.bf16.vlgmr.msra.gmra.mrb[72].mxu1 %v3362_v32  ;;  %3437 = vmatmul.mubr.bf16.vlgmr.msra.gmra.mrb[76].mxu0 %v3362_v32 }
0x220b   :  { %3938 = vmatpush3.bf16.msra.mxu1 %v4536_v56  ;;  %3953 = vmatprep.mubr.msk.bf16.mxu1 %vm4549_vm0, %v8378_v29 }
0x220c   :  { %3939 = vmatprep.subr.bf16.mxu1 %v8378_v29 }
0x220f   :  { %3940 = vmatpush3.bf16.msra.mxu1 %v4537_v38 }
0x2210   :  { %3941 = vmatprep.subr.bf16.mxu1 %v8378_v29 }
0x2213   :  { %3942 = vmatpush3.bf16.msra.mxu1 %v4538_v5 }
0x2214   :  { %3943 = vmatprep.subr.bf16.mxu1 %v8378_v29 }
0x2217   :  { %3944 = vmatpush3.bf16.msra.mxu1 %v4539_v10 }
0x2218   :  { %3945 = vmatprep.subr.bf16.mxu1 %v8378_v29 }
0x221b   :  { %3946 = vmatpush3.bf16.msra.mxu1 %v4540_v8 }
0x221c   :  { %3947 = vmatprep.subr.bf16.mxu1 %v8378_v29 }
0x221f   :  { %3948 = vmatpush3.bf16.msra.mxu1 %v4541_v60 }
0x2220   :  { %3949 = vmatprep.subr.bf16.mxu1 %v8378_v29 }
0x2223   :  { %3950 = vmatpush3.bf16.msra.mxu1 %v4542_v13 }
0x2224   :  { %3951 = vmatprep.subr.bf16.mxu1 %v8378_v29 }
0x2227   :  { %3952 = vmatpush3.bf16.msra.mxu1 %v4543_v17 }
0x226f   :  { %v2910_v28 = vpop.xlane.xlu1 %2909 }
0x2270   :  { %vm2911_vm0 = vcmp.eq.f32.partialorder %v2908_v11, %v2910_v28  ;;  %v2916_v11 = vcvt.f32.s32 %v2910_v28 }
0x2271   :  { %v2912_v25 = vsel %vm2911_vm0, %v2907_v63, inf }
0x2272   :  { %2913 = vmin.xlane.f32.xlu1 %v2912_v25 }
0x22dd   :  { %v3397_v30 = vpop.f32.mrb[72].mxu1  ;;  %v3438_v14 = vpop.f32.mrb[76].mxu0 }
0x22de   :  { %v3398_v43 = vadd.f32 %v3397_v30, %v8551_v22  ;;  %v3399_v20 = vpop.f32.mrb[73].mxu1  ;;  %v3440_v52 = vpop.f32.mrb[77].mxu0  ;;  %v3439_v9 = vadd.f32 %v3438_v14, %v6447_v16 }
0x22df   :  { %v3401_v45 = vpop.f32.mrb[74].mxu1  ;;  %v3442_v4 = vpop.f32.mrb[78].mxu0  ;;  %v3400_v47 = vadd.f32 %v3399_v20, %v6437_v37  ;;  %v3441_v12 = vadd.f32 %v3440_v52, %v6443_v21  ;;  %v2917_v37 = vshll.u32 %v2916_v11, 16 }
0x22e0   :  { %v3723_v29 = vmul.f32 -1.442695, %v3398_v43  ;;  %v3402_v55 = vpop.f32.mrb[75].mxu1  ;;  %v3443_v26 = vpop.f32.mrb[79].mxu0 }
0x22e1   :  { %v3724_v54 = vmul.f32 -1.442695, %v3400_v47 }
0x22e2   :  { %4318 = vpow2.f32 %v3723_v29 }
0x22e3   :  { %4320 = vpow2.f32 %v3724_v54 }
0x22ec   :  { %v4319_v50 = vpop.eup %4318 }
0x22ed   :  { %v3448_v41 = vadd.f32 1.0, %v4319_v50  ;;  %v4321_v19 = vpop.eup %4320 }
0x22ee   :  { %v3454_v18 = vadd.f32 1.0, %v4321_v19  ;;  %v8554_v19 = vld [vmem:[#allocation42_spill] sm:$0xff] }
0x22ef   :  { %4322 = vrcp.f32 %v3448_v41 }
0x22f0   :  { %4324 = vrcp.f32 %v3454_v18  ;;  %v8555_v18 = vld [vmem:[#allocation41_spill] sm:$0xff] }
0x22f9   :  { %v4323_v22 = vpop.eup %4322 }
0x22fa   :  { %v3457_v0 = vmul.f32 %v4323_v22, %v3441_v12  ;;  %v4325_v3 = vpop.eup %4324  ;;  %v2080_v12 = vsub.f32 %v8555_v18, %v8554_v19 }
0x22fb   :  { %v3460_v34 = vsub.f32 1.0, %v4325_v3  ;;  %v3462_v62 = vmul.f32 %v4325_v3, %v7513_v59 }
0x22fc   :  { %v3458_v53 = vadd.f32 %v3457_v0, %v3439_v9  ;;  %v2081_v22 = vmul.f32 1.442695, %v2080_v12  ;;  %v2499_v9 = vsub.f32 %v7429_v61, %v7433_v35 }
0x22fe   :  { %4326 = vtanh.f32 %v3458_v53  ;;  %v2500_v11 = vmul.f32 1.442695, %v2499_v9  ;;  %v2919_v53 = vsub.f32 %v7653_v27, %v7657_v44 }
0x22ff   :  { %v2914_v48 = vpop.xlane.xlu1 %2913  ;;  %4328 = vpow2.f32 %v2081_v22 }
0x2300   :  { %v2915_v31 = vcvt.f32.s32 %v2914_v48  ;;  %4330 = vpow2.f32 %v2500_v11 }
0x2302   :  { %v7706_v57 = vadd.s32 %v2917_v37, %v2915_v31 }
0x2304   :  { %vm2929_vm9 = vcmp.eq.s32.totalorder %v8427_v49, %v7706_v57 }
0x2305   :  { %v3106_v21 = vsel %vm2929_vm9, 1.0, %v7649_v39 }
0x2306   :  { %vm3107_vm10 = vcmp.gt.f32.partialorder %v3106_v21, 0.5 }
0x2307   :  { %v7715_v16 = vsel %vm3107_vm10, -inf, %v7410_v42 }
0x2308   :  { %v4327_v2 = vpop.eup %4326  ;;  %v3109_v7 = vsel %vm2036_vm1, %v7715_v16, -inf }
0x2309   :  { %3110 = vmax.xlane.f32.xlu0 %v3109_v7  ;;  %v3461_v15 = vmul.f32 %v4327_v2, %v3460_v34  ;;  %v4544_v2 = vld [vmem:[%s7871_s10] ss:$0 sm:$0xff] }
0x230b   :  { %v3463_v24 = vadd.f32 %v3462_v62, %v3461_v15 }
0x230d   :  { %v3464_v32 = vpack.c.bf16 %v3463_v24, %v3463_v24 }
0x230f   :  { %3954 = vmatmul.mubr.bf16.vlgmr.msra.gmra.mrb[76].mxu1 %v3464_v32 }
0x2396   :  { %v7720_v56 = vpop.xlane.xlu0 %3110 }
0x2397   :  { %vm3112_vm13 = vcmp.eq.f32.partialorder %v7715_v16, %v7720_v56 }
0x2398   :  { %v3113_v42 = vsel %vm3112_vm13, %v8427_v49, 2147483647  ;;  %vm2517_vm13 = vcmp.eq.s32.totalorder %v8427_v49, 10 }
0x2399   :  { %v3114_v39 = vsel %vm2036_vm1, %v3113_v42, 2147483647  ;;  %v4329_v42 = vpop.eup %4328 }
0x239a   :  { %v3116_v38 = vshra.s32 %v3114_v39, 16  ;;  %v3115_v59 = vand.u32 65535, %v3114_v39  ;;  %v2083_v39 = vsel %vm2036_vm1, %v4329_v42, 0.0  ;;  %v8556_v42 = vld [vmem:[#allocation4_spill] sm:$0xff] }
0x239c   :  { %v3118_v5 = vcvt.s32.f32 %v3116_v38  ;;  %v3117_v58 = vcvt.s32.f32 %v3115_v59  ;;  %v4331_v38 = vpop.eup %4330  ;;  %v2289_v59 = vsub.f32 %v7356_v51, %v7383_v33 }
0x239e   :  { %3119 = vmin.xlane.f32.xlu1 %v3118_v5 }
0x23e2   :  { %v3499_v10 = vpop.f32.mrb[76].mxu1 }
0x23e3   :  { %v3955_v8 = vpop.f32.mrb[77].mxu1  ;;  %v3500_v7 = vadd.f32 %v4544_v2, %v3499_v10 }
0x23e4   :  { %v3502_v60 = vpop.f32.mrb[78].mxu1 }
0x23e5   :  { %v3956_v13 = vpop.f32.mrb[79].mxu1 }
0x242b   :  { %v3120_v17 = vpop.xlane.xlu1 %3119 }
0x242c   :  { %vm3121_vm14 = vcmp.eq.f32.partialorder %v3118_v5, %v3120_v17  ;;  %v3126_v63 = vcvt.f32.s32 %v3120_v17  ;;  %v2502_v5 = vsel %vm2036_vm1, %v4331_v38, 0.0  ;;  %v2290_v17 = vmul.f32 1.442695, %v2289_v59 }
0x242d   :  { %v3122_v28 = vsel %vm3121_vm14, %v3117_v58, inf  ;;  %v2709_v58 = vsub.f32 %v7572_v23, %v7627_v1  ;;  %vm2724_vm14 = vcmp.eq.s32.totalorder %v8427_v49, 3 }
0x242e   :  { %3123 = vmin.xlane.f32.xlu0 %v3122_v28  ;;  %v3127_v30 = vshll.u32 %v3126_v63, 16  ;;  %v3129_v28 = vsub.f32 %v7715_v16, %v7720_v56 }
0x242f   :  { %v2710_v63 = vmul.f32 1.442695, %v2709_v58 }
0x24bb   :  { %v3124_v25 = vpop.xlane.xlu0 %3123 }
0x24bc   :  { %v3125_v14 = vcvt.f32.s32 %v3124_v25 }
0x24be   :  { %v7726_v43 = vadd.s32 %v3127_v30, %v3125_v14  ;;  %v3130_v30 = vmul.f32 1.442695, %v3129_v28 }
0x24c0   :  { %vm3139_vm2 = vcmp.eq.s32.totalorder %v8427_v49, %v7726_v43 }
0x24c1   :  { %v3316_v20 = vsel %vm3139_vm2, 1.0, %v3106_v21  ;;  %v2920_v21 = vmul.f32 1.442695, %v2919_v53 }
0x24c2   :  { %vm3317_vm3 = vcmp.gt.f32.partialorder %v3316_v20, 0.5 }
0x24c3   :  { %v7734_v52 = vsel %vm3317_vm3, -inf, %v7634_v36  ;;  %4332 = vpow2.f32 %v2920_v21  ;;  %vm2937_vm3 = vcmp.eq.s32.totalorder %v8427_v49, 12 }
0x24c4   :  { %v3319_v45 = vsel %vm2036_vm1, %v7734_v52, -inf }
0x24c5   :  { %3320 = vmax.xlane.f32.xlu1 %v3319_v45 }
0x24cd   :  { %v4333_v10 = vpop.eup %4332 }
0x24ce   :  { %v2922_v8 = vsel %vm2036_vm1, %v4333_v10, 0.0 }
0x2552   :  { %v7738_v4 = vpop.xlane.xlu1 %3320 }
0x2553   :  { %vm3322_vm5 = vcmp.eq.f32.partialorder %v7734_v52, %v7738_v4  ;;  %v3339_v34 = vsub.f32 %v7734_v52, %v7738_v4 }
0x2554   :  { %v3323_v29 = vsel %vm3322_vm5, %v8427_v49, 2147483647  ;;  %vm3144_vm5 = vcmp.eq.s32.totalorder %v8427_v49, 5 }
0x2555   :  { %v3324_v55 = vsel %vm2036_vm1, %v3323_v29, 2147483647  ;;  %v3340_v62 = vmul.f32 1.442695, %v3339_v34 }
0x2556   :  { %v3326_v26 = vshra.s32 %v3324_v55, 16  ;;  %v3325_v54 = vand.u32 65535, %v3324_v55 }
0x2557   :  { %4334 = vpow2.f32 %v3340_v62 }
0x2558   :  { %v3328_v47 = vcvt.s32.f32 %v3326_v26  ;;  %v3327_v36 = vcvt.s32.f32 %v3325_v54  ;;  %4336 = vpow2.f32 %v2290_v17 }
0x2559   :  { %4338 = vpow2.f32 %v2710_v63 }
0x255a   :  { %3329 = vmin.xlane.f32.xlu0 %v3328_v47  ;;  %4340 = vpow2.f32 %v3130_v30 }
0x2561   :  { %v4335_v60 = vpop.eup %4334 }
0x2562   :  { %v3342_v13 = vsel %vm2036_vm1, %v4335_v60, 0.0  ;;  %v4337_v54 = vpop.eup %4336 }
0x25e7   :  { %v3330_v50 = vpop.xlane.xlu0 %3329 }
0x25e8   :  { %vm3331_vm7 = vcmp.eq.f32.partialorder %v3328_v47, %v3330_v50  ;;  %v3336_v0 = vcvt.f32.s32 %v3330_v50 }
0x25e9   :  { %v3332_v41 = vsel %vm3331_vm7, %v3327_v36, inf  ;;  %v2292_v36 = vsel %vm2036_vm1, %v4337_v54, 0.0  ;;  %vm3147_vm7 = vcmp.eq.s32.totalorder %v8427_v49, 13 }
0x25ea   :  { %3333 = vmin.xlane.f32.xlu1 %v3332_v41  ;;  %v3337_v37 = vshll.u32 %v3336_v0, 16  ;;  %v4339_v41 = vpop.eup %4338 }
0x25eb   :  { %v4341_v22 = vpop.eup %4340  ;;  %v2712_v9 = vsel %vm2036_vm1, %v4339_v41, 0.0 }
0x2677   :  { %v3334_v48 = vpop.xlane.xlu1 %3333 }
0x2678   :  { %v3335_v31 = vcvt.f32.s32 %v3334_v48 }
0x267a   :  { %v7750_v3 = vadd.s32 %v3337_v37, %v3335_v31  ;;  %v3132_v31 = vsel %vm2036_vm1, %v4341_v22, 0.0 }
0x267c   :  { %vm3349_vm8 = vcmp.eq.s32.totalorder %v8427_v49, %v7750_v3 }
0x267d   :  { %v3505_v15 = vsel %vm3349_vm8, 1.0, %v3316_v20 }
0x267e   :  { %vm3506_vm0 = vcmp.gt.f32.partialorder %v3505_v15, 0.5 }
0x267f   :  { %v7762_v24 = vsel %vm3506_vm0, -inf, %v3500_v7  ;;  %vm3357_vm0 = vcmp.eq.s32.totalorder %v8427_v49, 14 }
0x2680   :  { %v3508_v32 = vsel %vm2036_vm1, %v7762_v24, -inf }
0x2681   :  { %3509 = vmax.xlane.f32.xlu0 %v3508_v32 }
0x2685   :  { %2084 = vadd.xlane.f32.xlu0 %v2083_v39 }
0x2689   :  { %2503 = vadd.xlane.f32.xlu0 %v2502_v5 }
0x268d   :  { %2923 = vadd.xlane.f32.xlu0 %v2922_v8 }
0x2691   :  { %3343 = vadd.xlane.f32.xlu0 %v3342_v13 }
0x270e   :  { %v7776_v25 = vpop.xlane.xlu0 %3509 }
0x270f   :  { %vm3511_vm10 = vcmp.eq.f32.partialorder %v7762_v24, %v7776_v25  ;;  %v3528_v14 = vsub.f32 %v7762_v24, %v7776_v25 }
0x2710   :  { %v3512_v20 = vsel %vm3511_vm10, %v8427_v49, 2147483647  ;;  %vm3543_vm10 = vcmp.eq.s32.totalorder %v8427_v49, 7 }
0x2711   :  { %v3513_v45 = vsel %vm2036_vm1, %v3512_v20, 2147483647  ;;  %v3529_v26 = vmul.f32 1.442695, %v3528_v14 }
0x2712   :  { %v2085_v29 = vpop.xlane.xlu0 %2084  ;;  %v3515_v55 = vshra.s32 %v3513_v45, 16 }
0x2713   :  { %4342 = vlog2.f32 %v2085_v29  ;;  %v2095_v29 = vcvt.s32.f32 %v8556_v42 }
0x2714   :  { %v3517_v47 = vcvt.s32.f32 %v3515_v55 }
0x2716   :  { %3518 = vmin.xlane.f32.xlu1 %v3517_v47  ;;  %v2504_v50 = vpop.xlane.xlu0 %2503 }
0x2717   :  { %4344 = vlog2.f32 %v2504_v50 }
0x2718   :  { %4346 = vpow2.f32 %v3529_v26 }
0x271a   :  { %2293 = vadd.xlane.f32.xlu1 %v2292_v36  ;;  %v2924_v12 = vpop.xlane.xlu0 %2923  ;;  %v2096_v36 = vsel %vm2058_vm11, %v2095_v29, 0.0 }
0x271b   :  { %4348 = vlog2.f32 %v2924_v12 }
0x271d   :  { %v4343_v0 = vpop.eup %4342 }
0x271e   :  { %2713 = vadd.xlane.f32.xlu1 %v2712_v9  ;;  %v3344_v11 = vpop.xlane.xlu0 %3343  ;;  %v2087_v53 = vmul.f32 0.6931472, %v4343_v0 }
0x271f   :  { %4350 = vlog2.f32 %v3344_v11 }
0x2720   :  { %v2088_v37 = vadd.f32 %v2087_v53, %v8554_v19 }
0x2721   :  { %v4345_v48 = vpop.eup %4344 }
0x2722   :  { %v4347_v21 = vpop.eup %4346  ;;  %v2506_v34 = vmul.f32 0.6931472, %v4345_v48  ;;  %3133 = vadd.xlane.f32.xlu1 %v3132_v31  ;;  %v2089_v2 = vsub.f32 %v8555_v18, %v2088_v37 }
0x2723   :  { %v3531_v62 = vsel %vm2036_vm1, %v4347_v21, 0.0 }
0x2724   :  { %v2507_v7 = vadd.f32 %v2506_v34, %v7433_v35  ;;  %v2091_v39 = vsel %vm2090_vm15, %v2089_v2, 0.0 }
0x2725   :  { %v4349_v15 = vpop.eup %4348  ;;  %v2092_v10 = vsel %vm2036_vm1, %v2091_v39, 0.0 }
0x2726   :  { %v2926_v32 = vmul.f32 0.6931472, %v4349_v15  ;;  %3532 = vadd.xlane.f32.xlu1 %v3531_v62  ;;  %v2508_v19 = vsub.f32 %v7429_v61, %v2507_v7 }
0x2728   :  { %v2927_v38 = vadd.f32 %v2926_v32, %v7657_v44  ;;  %v2510_v35 = vsel %vm2509_vm12, %v2508_v19, 0.0  ;;  %vm2097_vm12 = vcmp.eq.s32.totalorder %v8427_v49, 8 }
0x2729   :  { %v4351_v5 = vpop.eup %4350  ;;  %v2511_v13 = vsel %vm2036_vm1, %v2510_v35, 0.0 }
0x272a   :  { %v3346_v8 = vmul.f32 0.6931472, %v4351_v5  ;;  %2093 = vadd.xlane.f32.xlu1 %v2092_v10  ;;  %v2928_v18 = vsub.f32 %v7653_v27, %v2927_v38  ;;  %v2515_v5 = vcvt.s32.f32 %v7554_v6 }
0x272c   :  { %v3347_v60 = vadd.f32 %v3346_v8, %v7738_v4  ;;  %v2930_v61 = vsel %vm2929_vm9, %v2928_v18, 0.0  ;;  %v3514_v4 = vand.u32 65535, %v3513_v45  ;;  %vm2304_vm9 = vcmp.eq.s32.totalorder %v8427_v49, 1 }
0x272d   :  { %v2931_v59 = vsel %vm2036_vm1, %v2930_v61, 0.0  ;;  %v2935_v18 = vcvt.s32.f32 %v7706_v57 }
0x272e   :  { %2512 = vadd.xlane.f32.xlu1 %v2511_v13  ;;  %v3348_v44 = vsub.f32 %v7734_v52, %v3347_v60  ;;  %v3516_v28 = vcvt.s32.f32 %v3514_v4 }
0x2730   :  { %v3350_v17 = vsel %vm3349_vm8, %v3348_v44, 0.0  ;;  %v3145_v44 = vcvt.s32.f32 %v7726_v43  ;;  %vm3354_vm8 = vcmp.eq.s32.totalorder %v8427_v49, 6 }
0x2731   :  { %v3351_v27 = vsel %vm2036_vm1, %v3350_v17, 0.0  ;;  %v3355_v17 = vcvt.s32.f32 %v7750_v3 }
0x2732   :  { %2932 = vadd.xlane.f32.xlu1 %v2931_v59 }
0x2736   :  { %3352 = vadd.xlane.f32.xlu1 %v3351_v27 }
0x27a3   :  { %v3519_v58 = vpop.xlane.xlu1 %3518 }
0x27a4   :  { %vm3520_vm15 = vcmp.eq.f32.partialorder %v3517_v47, %v3519_v58  ;;  %v2305_v47 = vcvt.s32.f32 %v7417_v40 }
0x27a5   :  { %v3521_v63 = vsel %vm3520_vm15, %v3516_v28, inf  ;;  %vm3546_vm15 = vcmp.eq.s32.totalorder %v8427_v49, 15 }
0x27a6   :  { %3522 = vmin.xlane.f32.xlu0 %v3521_v63 }
0x27a7   :  { %v2294_v30 = vpop.xlane.xlu1 %2293 }
0x27a8   :  { %4352 = vlog2.f32 %v2294_v30 }
0x27ab   :  { %v2714_v14 = vpop.xlane.xlu1 %2713 }
0x27ac   :  { %4354 = vlog2.f32 %v2714_v14 }
0x27af   :  { %v3134_v52 = vpop.xlane.xlu1 %3133 }
0x27b0   :  { %4356 = vlog2.f32 %v3134_v52 }
0x27b2   :  { %v4353_v20 = vpop.eup %4352 }
0x27b3   :  { %v2296_v55 = vmul.f32 0.6931472, %v4353_v20  ;;  %v3533_v26 = vpop.xlane.xlu1 %3532 }
0x27b4   :  { %4358 = vlog2.f32 %v3533_v26 }
0x27b5   :  { %v2297_v54 = vadd.f32 %v2296_v55, %v7383_v33 }
0x27b6   :  { %v4355_v45 = vpop.eup %4354 }
0x27b7   :  { %v2716_v50 = vmul.f32 0.6931472, %v4355_v45  ;;  %v2094_v41 = vpop.xlane.xlu1 %2093  ;;  %v2298_v12 = vsub.f32 %v7356_v51, %v2297_v54 }
0x27b8   :  { %v2098_v22 = vsel %vm2097_vm12, %v2094_v41, %v2096_v36 }
0x27b9   :  { %v2717_v9 = vadd.f32 %v2716_v50, %v7627_v1  ;;  %v2300_v33 = vsel %vm2299_vm6, %v2298_v12, 0.0  ;;  %v2306_v0 = vsel %vm2304_vm9, %v2305_v47, %v2098_v22  ;;  %vm2307_vm6 = vcmp.eq.s32.totalorder %v8427_v49, 9 }
0x27ba   :  { %v4357_v11 = vpop.eup %4356  ;;  %v2301_v53 = vsel %vm2036_vm1, %v2300_v33, 0.0 }
0x27bb   :  { %v3136_v48 = vmul.f32 0.6931472, %v4357_v11  ;;  %2302 = vadd.xlane.f32.xlu0 %v2301_v53  ;;  %v2718_v37 = vsub.f32 %v7572_v23, %v2717_v9  ;;  %v2513_v38 = vpop.xlane.xlu1 %2512 }
0x27bd   :  { %v3137_v31 = vadd.f32 %v3136_v48, %v7720_v56  ;;  %v2720_v51 = vsel %vm2719_vm4, %v2718_v37, 0.0  ;;  %v3525_v56 = vcvt.f32.s32 %v3519_v58  ;;  %vm2514_vm4 = vcmp.eq.s32.totalorder %v8427_v49, 2 }
0x27be   :  { %v2721_v1 = vsel %vm2036_vm1, %v2720_v51, 0.0  ;;  %v4359_v23 = vpop.eup %4358 }
0x27bf   :  { %2722 = vadd.xlane.f32.xlu0 %v2721_v1  ;;  %v3138_v40 = vsub.f32 %v7715_v16, %v3137_v31  ;;  %v3535_v2 = vmul.f32 0.6931472, %v4359_v23  ;;  %v3526_v62 = vshll.u32 %v3525_v56, 16  ;;  %v2933_v60 = vpop.xlane.xlu1 %2932 }
0x27c1   :  { %v3140_v21 = vsel %vm3139_vm2, %v3138_v40, 0.0  ;;  %v3536_v7 = vadd.f32 %v3535_v2, %v7776_v25  ;;  %vm2727_vm2 = vcmp.eq.s32.totalorder %v8427_v49, 11 }
0x27c2   :  { %v3141_v34 = vsel %vm2036_vm1, %v3140_v21, 0.0 }
0x27c3   :  { %3142 = vadd.xlane.f32.xlu0 %v3141_v34  ;;  %v3537_v39 = vsub.f32 %v7762_v24, %v3536_v7  ;;  %v2725_v24 = vcvt.s32.f32 %v7641_v46  ;;  %v3353_v58 = vpop.xlane.xlu1 %3352 }
0x2833   :  { %v3523_v15 = vpop.xlane.xlu0 %3522 }
0x2834   :  { %v3524_v32 = vcvt.f32.s32 %v3523_v15 }
0x2836   :  { %v3527_v42 = vadd.s32 %v3526_v62, %v3524_v32 }
0x2838   :  { %vm3538_vm11 = vcmp.eq.s32.totalorder %v8427_v49, %v3527_v42  ;;  %v3544_v28 = vcvt.s32.f32 %v3527_v42 }
0x2839   :  { %v3539_v16 = vsel %vm3538_vm11, %v3537_v39, 0.0 }
0x283a   :  { %v3540_v19 = vsel %vm2036_vm1, %v3539_v16, 0.0  ;;  %vm2934_vm1 = vcmp.eq.s32.totalorder %v8427_v49, 4 }
0x283b   :  { %3541 = vadd.xlane.f32.xlu0 %v3540_v19 }
0x2848   :  { %v2303_v25 = vpop.xlane.xlu0 %2302 }
0x2849   :  { %v2308_v10 = vsel %vm2307_vm6, %v2303_v25, %v2306_v0 }
0x284a   :  { %v2516_v8 = vsel %vm2514_vm4, %v2515_v5, %v2308_v10 }
0x284b   :  { %v2518_v35 = vsel %vm2517_vm13, %v2513_v38, %v2516_v8 }
0x284c   :  { %v2726_v13 = vsel %vm2724_vm14, %v2725_v24, %v2518_v35  ;;  %v2723_v61 = vpop.xlane.xlu0 %2722 }
0x284d   :  { %v2728_v6 = vsel %vm2727_vm2, %v2723_v61, %v2726_v13 }
0x284e   :  { %v2936_v59 = vsel %vm2934_vm1, %v2935_v18, %v2728_v6 }
0x284f   :  { %v2938_v46 = vsel %vm2937_vm3, %v2933_v60, %v2936_v59 }
0x2850   :  { %v3146_v27 = vsel %vm3144_vm5, %v3145_v44, %v2938_v46  ;;  %v3143_v57 = vpop.xlane.xlu0 %3142 }
0x2851   :  { %v3148_v4 = vsel %vm3147_vm7, %v3143_v57, %v3146_v27 }
0x2852   :  { %v3356_v63 = vsel %vm3354_vm8, %v3355_v17, %v3148_v4 }
0x2853   :  { %v3358_v30 = vsel %vm3357_vm0, %v3353_v58, %v3356_v63 }
0x2854   :  { %v3545_v43 = vsel %vm3543_vm10, %v3544_v28, %v3358_v30 }
0x28c8   :  { %v3542_v14 = vpop.xlane.xlu0 %3541 }
0x28c9   :  { %v3547_v52 = vsel %vm3546_vm15, %v3542_v14, %v3545_v43 }
0x28ca   :  { %3548 = vst [vmem:[%s7872_s11] sm:$0xff] %v3547_v52 }

</bundles_post_ra>
